<compile_context>
chip_gen: v7x
topology: tpu7x:2x2x1
jax: 0.10.0
libtpu: 0.0.40
codegen_flags: <defaults>
</compile_context>

<pallas_src>
import functools

import jax
import jax.numpy as jnp
from jax.experimental import pallas as pl
from jax.experimental.pallas import tpu as pltpu

HIDDEN = 768
FFN = 3072


def _ffn_kernel(x_ref, w1_ref, b1_ref, w2_ref, b2_ref, o_ref):
    """Fused FFN: accumulate over FFN (intermediate-dim) chunks into o_ref.

    Grid = (M_tiles, F_chunks).  For sequence tile i and ffn chunk j:
        h  = gelu(x_i @ W1[:, j] + b1[j])      (tanh-approx GELU, EUP path)
        o += h @ W2[j, :]
    On the last chunk, add b2.  Output dtype is fp32, so accumulating directly
    into o_ref is exact (no separate scratch needed).
    """
    j = pl.program_id(1)

    @pl.when(j == 0)
    def _():
        o_ref[...] = jnp.zeros_like(o_ref)

    # bf16 operands, fp32 accumulation on the MXU.
    h = jnp.dot(x_ref[...], w1_ref[...], preferred_element_type=jnp.float32)
    h = h + b1_ref[...]                      # (tm, tf) + (1, tf) broadcast
    # TODO(synk): torch uses exact erf GELU; tanh approx differs by ~1e-3 but
    # keeps the transcendental on the EUP slot instead of a VPU erf polynomial.
    h = jax.nn.gelu(h, approximate=True)
    o_ref[...] += jnp.dot(h.astype(jnp.bfloat16), w2_ref[...],
                          preferred_element_type=jnp.float32)

    @pl.when(j == pl.num_programs(1) - 1)
    def _():
        o_ref[...] = o_ref[...] + b2_ref[...]


def _default_tm(M):
    """Single M tile (weights streamed once) except on v7x (2 TensorCores)."""
    try:
        kind = jax.devices()[0].device_kind.lower()
    except Exception:
        kind = ""
    if "v7" in kind and M % 2 == 0 and (M // 2) % 8 == 0:
        return M // 2
    return M


@functools.partial(jax.jit, static_argnames=("tm", "tf"))
def ffn_forward(x, w1t, b1, w2t, b2, *, tm=None, tf=512):
    """x: (B, S, H). w1t: (H, F), b1: (F,), w2t: (F, H), b2: (H,)."""
    B, S, H = x.shape
    F = w1t.shape[1]
    assert H == HIDDEN and F == FFN
    M = B * S
    if tm is None:
        tm = _default_tm(M)
    assert M % tm == 0 and F % tf == 0

    # bf16 matmul operands; fp32 biases and fp32 output/accumulator.
    x2d = x.reshape(M, H).astype(jnp.bfloat16)
    w1t_bf = w1t.astype(jnp.bfloat16)
    w2t_bf = w2t.astype(jnp.bfloat16)
    b1_2d = b1.reshape(1, F).astype(jnp.float32)
    b2_2d = b2.reshape(1, H).astype(jnp.float32)

    cost = pl.CostEstimate(
        flops=4 * M * H * F,                     # two matmuls of 2*M*H*F each
        transcendentals=M * F,                   # one tanh per FFN activation
        bytes_accessed=(
            M * H * 2                            # x (bf16)
            + (H * F + F * H) * 2                # weights (bf16)
            + (F + H) * 4                        # biases (fp32)
            + M * H * 4                          # out (fp32)
        ),
    )

    out2d = pl.pallas_call(
        _ffn_kernel,
        out_shape=jax.ShapeDtypeStruct((M, H), jnp.float32),
        grid_spec=pltpu.PrefetchScalarGridSpec(
            num_scalar_prefetch=0,
            grid=(M // tm, F // tf),
            in_specs=[
                pl.BlockSpec((tm, H), lambda i, j: (i, 0)),   # x tile (bf16)
                pl.BlockSpec((H, tf), lambda i, j: (0, j)),   # W1^T chunk
                pl.BlockSpec((1, tf), lambda i, j: (0, j)),   # b1 chunk
                pl.BlockSpec((tf, H), lambda i, j: (j, 0)),   # W2^T chunk
                pl.BlockSpec((1, H), lambda i, j: (0, 0)),    # b2
            ],
            out_specs=pl.BlockSpec((tm, H), lambda i, j: (i, 0)),
        ),
        compiler_params=pltpu.CompilerParams(
            dimension_semantics=("parallel", "arbitrary"),
            # Working set (double-buffered bf16 weight chunks + x/out/biases +
            # h temp) is a few MB; 32 MiB gives headroom on every generation
            # (v7x physical VMEM is 64 MiB, scoped default 32 MiB).
            vmem_limit_bytes=32 * 1024 * 1024,
        ),
        cost_estimate=cost,
    )(x2d, w1t_bf, b1_2d, w2t_bf, b2_2d)

    return out2d.reshape(B, S, H).astype(x.dtype)


def init_params(key):
    """Deterministic synthetic params matching nn.Linear shapes.

    PyTorch Linear stores weight as (out_features, in_features); we
    pre-transpose to (in, out) so the kernel does a plain x @ W^T matmul.
    """
    k1, k2, k3, k4 = jax.random.split(key, 4)
    bound1 = 1.0 / (HIDDEN ** 0.5)
    bound2 = 1.0 / (FFN ** 0.5)
    w1 = jax.random.uniform(k1, (FFN, HIDDEN), jnp.float32, -bound1, bound1)
    b1 = jax.random.uniform(k2, (FFN,), jnp.float32, -bound1, bound1)
    w2 = jax.random.uniform(k3, (HIDDEN, FFN), jnp.float32, -bound2, bound2)
    b2 = jax.random.uniform(k4, (HIDDEN,), jnp.float32, -bound2, bound2)
    return w1.T, b1, w2.T, b2  # pre-transposed: (H,F), (F,), (F,H), (H,)


def reference(x, w1t, b1, w2t, b2):
    """fp32 reference matching the torch module (exact-erf GELU)."""
    h = jnp.einsum("bsh,hf->bsf", x, w1t) + b1
    h = jax.nn.gelu(h, approximate=False)
    return jnp.einsum("bsf,fh->bsh", h, w2t) + b2


if __name__ == "__main__":
    key = jax.random.PRNGKey(0)
    kx, kp = jax.random.split(key)

    # Shapes implied by the module's forward: (1, 384, 768)
    x = jax.random.normal(kx, (1, 384, HIDDEN), jnp.float32)
    w1t, b1, w2t, b2 = init_params(kp)

    out = ffn_forward(x, w1t, b1, w2t, b2)
    out = jax.block_until_ready(out)

    ref = reference(x, w1t, b1, w2t, b2)
    assert out.shape == (1, 384, HIDDEN), out.shape
    # bf16 operands + tanh GELU vs fp32 exact-erf reference -> looser tolerance.
    assert jnp.allclose(out, ref, atol=3e-2, rtol=3e-2), float(
        jnp.max(jnp.abs(out - ref))
    )
    print("KERNEL_OK")
</pallas_src>

<mosaic_0001>
module attributes {stable_mosaic.version = 11 : i64} {
  func.func @_ffn_kernel(%arg0: i32, %arg1: i32, %arg2: memref<384x768xbf16, #tpu.memory_space<vmem>>, %arg3: memref<768x512xbf16, #tpu.memory_space<vmem>>, %arg4: memref<1x512xf32, #tpu.memory_space<vmem>>, %arg5: memref<512x768xbf16, #tpu.memory_space<vmem>>, %arg6: memref<1x768xf32, #tpu.memory_space<vmem>>, %arg7: memref<384x768xf32, #tpu.memory_space<vmem>>) attributes {dimension_semantics = [#tpu.dimension_semantics<parallel>, #tpu.dimension_semantics<arbitrary>], iteration_bounds = array<i64: 1, 6>, scalar_prefetch = 0 : i64, scratch_operands = 0 : i64, tpu.core_type = #tpu.core_type<tc>, window_params = [{transform_indices = @transform_0, window_bounds = array<i64: 384, 768>}, {transform_indices = @transform_1, window_bounds = array<i64: 768, 512>}, {transform_indices = @transform_2, window_bounds = array<i64: 1, 512>}, {transform_indices = @transform_3, window_bounds = array<i64: 512, 768>}, {pipeline_mode = #tpu.pipeline_mode<synchronous>, transform_indices = @transform_4, window_bounds = array<i64: 1, 768>}, {transform_indices = @transform_5, window_bounds = array<i64: 384, 768>}]} {
    %c0_i32 = arith.constant 0 : i32
    %0 = arith.cmpi eq, %arg1, %c0_i32 : i32
    %1 = arith.extui %0 : i1 to i32
    %c0_i32_0 = arith.constant 0 : i32
    %2 = arith.cmpi ne, %1, %c0_i32_0 : i32
    scf.if %2 {
      %cst_18 = arith.constant 0.000000e+00 : f32
      %31 = vector.broadcast %cst_18 : f32 to vector<384x768xf32>
      %c0_19 = arith.constant 0 : index
      %c0_20 = arith.constant 0 : index
      %32 = vector.load %arg7[%c0_19, %c0_20] : memref<384x768xf32, #tpu.memory_space<vmem>>, vector<384x768xf32>
      tpu.vector_store %arg7[%c0_19, %c0_20], %31 {strides = array<i32>} : memref<384x768xf32, #tpu.memory_space<vmem>>, vector<384x768xf32>,
    } else {
    }
    %c0 = arith.constant 0 : index
    %c0_1 = arith.constant 0 : index
    %3 = vector.load %arg2[%c0, %c0_1] : memref<384x768xbf16, #tpu.memory_space<vmem>>, vector<384x768xbf16>
    %c0_2 = arith.constant 0 : index
    %c0_3 = arith.constant 0 : index
    %4 = vector.load %arg3[%c0_2, %c0_3] : memref<768x512xbf16, #tpu.memory_space<vmem>>, vector<768x512xbf16>
    %cst = arith.constant dense<0.000000e+00> : vector<384x512xf32>
    %5 = tpu.matmul %3, %4, %cst {dimension_numbers = #tpu.dot_dimension_numbers<[1], [0], [0], [1], [0, 0, 1, 1], [], []>} : vector<384x768xbf16>, vector<768x512xbf16>, vector<384x512xf32> -> vector<384x512xf32>
    %c0_4 = arith.constant 0 : index
    %c0_5 = arith.constant 0 : index
    %6 = vector.load %arg4[%c0_4, %c0_5] : memref<1x512xf32, #tpu.memory_space<vmem>>, vector<1x512xf32>
    %7 = vector.broadcast %6 : vector<1x512xf32> to vector<384x512xf32>
    %8 = arith.addf %5, %7 : vector<384x512xf32>
    %9 = arith.mulf %8, %8 : vector<384x512xf32>
    %10 = arith.mulf %8, %9 : vector<384x512xf32>
    %cst_6 = arith.constant 4.471500e-02 : f32
    %11 = vector.broadcast %cst_6 : f32 to vector<384x512xf32>
    %12 = arith.mulf %11, %10 : vector<384x512xf32>
    %13 = arith.addf %8, %12 : vector<384x512xf32>
    %cst_7 = arith.constant 0.797884583 : f32
    %14 = vector.broadcast %cst_7 : f32 to vector<384x512xf32>
    %15 = arith.mulf %14, %13 : vector<384x512xf32>
    %16 = math.tanh %15 : vector<384x512xf32>
    %cst_8 = arith.constant 1.000000e+00 : f32
    %17 = vector.broadcast %cst_8 : f32 to vector<384x512xf32>
    %18 = arith.addf %17, %16 : vector<384x512xf32>
    %cst_9 = arith.constant 5.000000e-01 : f32
    %19 = vector.broadcast %cst_9 : f32 to vector<384x512xf32>
    %20 = arith.mulf %19, %18 : vector<384x512xf32>
    %21 = arith.mulf %8, %20 : vector<384x512xf32>
    %c0_10 = arith.constant 0 : index
    %c0_11 = arith.constant 0 : index
    %22 = vector.load %arg7[%c0_10, %c0_11] : memref<384x768xf32, #tpu.memory_space<vmem>>, vector<384x768xf32>
    %23 = arith.truncf %21 : vector<384x512xf32> to vector<384x512xbf16>
    %c0_12 = arith.constant 0 : index
    %c0_13 = arith.constant 0 : index
    %24 = vector.load %arg5[%c0_12, %c0_13] : memref<512x768xbf16, #tpu.memory_space<vmem>>, vector<512x768xbf16>
    %cst_14 = arith.constant dense<0.000000e+00> : vector<384x768xf32>
    %25 = tpu.matmul %23, %24, %cst_14 {dimension_numbers = #tpu.dot_dimension_numbers<[1], [0], [0], [1], [0, 0, 1, 1], [], []>} : vector<384x512xbf16>, vector<512x768xbf16>, vector<384x768xf32> -> vector<384x768xf32>
    %26 = arith.addf %22, %25 : vector<384x768xf32>
    %c0_15 = arith.constant 0 : index
    %c0_16 = arith.constant 0 : index
    %27 = vector.load %arg7[%c0_15, %c0_16] : memref<384x768xf32, #tpu.memory_space<vmem>>, vector<384x768xf32>
    tpu.vector_store %arg7[%c0_15, %c0_16], %26 {strides = array<i32>} : memref<384x768xf32, #tpu.memory_space<vmem>>, vector<384x768xf32>,
    %c5_i32 = arith.constant 5 : i32
    %28 = arith.cmpi eq, %arg1, %c5_i32 : i32
    %29 = arith.extui %28 : i1 to i32
    %c0_i32_17 = arith.constant 0 : i32
    %30 = arith.cmpi ne, %29, %c0_i32_17 : i32
    scf.if %30 {
      %c0_18 = arith.constant 0 : index
      %c0_19 = arith.constant 0 : index
      %31 = vector.load %arg7[%c0_18, %c0_19] : memref<384x768xf32, #tpu.memory_space<vmem>>, vector<384x768xf32>
      %c0_20 = arith.constant 0 : index
      %c0_21 = arith.constant 0 : index
      %32 = vector.load %arg6[%c0_20, %c0_21] : memref<1x768xf32, #tpu.memory_space<vmem>>, vector<1x768xf32>
      %33 = vector.broadcast %32 : vector<1x768xf32> to vector<384x768xf32>
      %34 = arith.addf %31, %33 : vector<384x768xf32>
      %c0_22 = arith.constant 0 : index
      %c0_23 = arith.constant 0 : index
      %35 = vector.load %arg7[%c0_22, %c0_23] : memref<384x768xf32, #tpu.memory_space<vmem>>, vector<384x768xf32>
      tpu.vector_store %arg7[%c0_22, %c0_23], %34 {strides = array<i32>} : memref<384x768xf32, #tpu.memory_space<vmem>>, vector<384x768xf32>,
    } else {
    }
    return
  }
  func.func @transform_0(%arg0: i32, %arg1: i32) -> (i32, i32) {
    %c0_i32 = arith.constant 0 : i32
    %c0_i32_0 = arith.constant 0 : i32
    return %arg0, %c0_i32 : i32, i32
  }
  func.func @transform_1(%arg0: i32, %arg1: i32) -> (i32, i32) {
    %c0_i32 = arith.constant 0 : i32
    %c0_i32_0 = arith.constant 0 : i32
    return %c0_i32, %arg1 : i32, i32
  }
  func.func @transform_2(%arg0: i32, %arg1: i32) -> (i32, i32) {
    %c0_i32 = arith.constant 0 : i32
    %c0_i32_0 = arith.constant 0 : i32
    return %c0_i32, %arg1 : i32, i32
  }
  func.func @transform_3(%arg0: i32, %arg1: i32) -> (i32, i32) {
    %c0_i32 = arith.constant 0 : i32
    %c0_i32_0 = arith.constant 0 : i32
    return %arg1, %c0_i32 : i32, i32
  }
  func.func @transform_4(%arg0: i32, %arg1: i32) -> (i32, i32) {
    %c0_i32 = arith.constant 0 : i32
    %c0_i32_0 = arith.constant 0 : i32
    %c0_i32_1 = arith.constant 0 : i32
    return %c0_i32, %c0_i32_0 : i32, i32
  }
  func.func @transform_5(%arg0: i32, %arg1: i32) -> (i32, i32) {
    %c0_i32 = arith.constant 0 : i32
    %c0_i32_0 = arith.constant 0 : i32
    return %arg0, %c0_i32 : i32, i32
  }
}

</mosaic_0001>

<bundles_post_ra>
// kernel: ffn_forward.1
= control target key start
LH: loop header
LB: loop body
LE: loop exit
PB: predicated region body
PF: predicated region fallthrough
CT: control target
= control target key end

     0   :  { %10 = vsyncpa [#allocation4], 0  ;;  %s14030_s18 = smov 0   ;;  %s14032_s19 = smov 0   ;;  %s19790_s0 = inlined_call_operand.vmem [shape: bf16[384,768], index: 0, kind: input, shape index: {}]   ;;  %s19791_s1 = inlined_call_operand.vmem [shape: bf16[768,3072], index: 1, kind: input, shape index: {}]   ;;  %s19792_s2 = inlined_call_operand.vmem [shape: f32[1,3072], index: 2, kind: input, shape index: {}]   ;;  %s19793_s3 = inlined_call_operand.vmem [shape: bf16[3072,768], index: 3, kind: input, shape index: {}]   ;;  %s19794_s4 = inlined_call_operand.vmem [shape: f32[1,768], index: 4, kind: input, shape index: {}]   ;;  %s19795_s5 = inlined_call_operand.hbm [shape: f32[384,768], index: 5, kind: output, shape index: {}]  }
   0x1   :  { %s14034_s20 = smov 0   ;;  %s14036_s21 = smov 0  }
   0x2   :  { %s14038_s22 = smov 0  }
   0x3 LB: > { %s11152_s23 = sadd.s32 4294967295, %s13994_s22   ;;  %s25_s24 = sadd.s32 1, %s13990_s21  ;;  %s13994_s22 = sphi %s14038_s22, %s16_s22   ;;  %s13990_s21 = sphi %s14036_s21, %s20403_s21   ;;  %s13986_s20 = sphi %s14034_s20, %s20402_s20   ;;  %s13982_s19 = sphi %s14032_s19, %s20401_s19   ;;  %s13978_s18 = sphi %s14030_s18, %s20400_s18  }
   0x4   : > { %p26_p0 = scmp.ge.s32.totalorder %s25_s24, 6  ;;  %p68_p1 = scmp.ne.s32.totalorder %s13982_s19, %s13978_s18 }
   0x5   : > { %p69_p2 = scmp.eq.s32.totalorder %s13994_s22, 0  ;;  %s61_s26 = sadd.s32 1, %s13982_s19 }
   0x6   : > { %s20405_s24 = smov (%p26_p0, %s25_s24), 0  ;;  %p11155_p5 = scmp.ge.s32.totalorder %s13994_s22, 6 }
   0x7   : > { %p70_p3 = por %p69_p2, %p68_p1  ;;  %s58_s25 = ssub.s32 %s13990_s21, %s20405_s24 }
   0x8   : > { %p59_p4 = scmp.eq.s32.totalorder %s58_s25, 0  ;;  %206 = sbr.rel (%p11155_p5) target bundleno = 115 (0x73), region = 24 }
   0xa   : > { %s14066_s27 = scalar_select %p59_p4, %s13982_s19, %s61_s26  }
   0xf   : > { %209 = sbr.rel (!%p70_p3) target bundleno = 115 (0x73), region = 28  ;;  %s211_s28 = sand.u32 (%p70_p3), 1, %s13982_s19  }
  0x10   : > { %s11696_s29 = sshll.u32 (%p70_p3), %s13990_s21, 4  ;;  %s12561_s30 = smul.u32 (%p70_p3), 1536, %s211_s28 }
  0x11   : > { %s14074_s8 = scalar_lea.vmem (%p70_p3), %s19791_s1, %s11696_s29 }
  0x12   : > { %v229_v0 = vld [vmem:[%s14074_s8] sm:$0xff] (%p70_p3)  ;;  %v231_v1 = vld [vmem:[%s14074_s8 + $0x8] sm:$0xff] (%p70_p3)  ;;  %s14082_s9 = scalar_lea.vmem (%p70_p3), [#allocation2], %s12561_s30 }
  0x13   : > { %v233_v2 = vld [vmem:[%s14074_s8 + $0x60] sm:$0xff] (%p70_p3)  ;;  %v235_v3 = vld [vmem:[%s14074_s8 + $0x68] sm:$0xff] (%p70_p3)  ;;  %230 = vst [vmem:[%s14082_s9] sm:$0xff] (%p70_p3), %v229_v0  ;;  %232 = vst [vmem:[%s14082_s9 + $0x8] sm:$0xff] (%p70_p3), %v231_v1 }
  0x14   : > { %v237_v4 = vld [vmem:[%s14074_s8 + $0xc0] sm:$0xff] (%p70_p3)  ;;  %v239_v5 = vld [vmem:[%s14074_s8 + $0xc8] sm:$0xff] (%p70_p3)  ;;  %234 = vst [vmem:[%s14082_s9 + $0x10] sm:$0xff] (%p70_p3), %v233_v2  ;;  %236 = vst [vmem:[%s14082_s9 + $0x18] sm:$0xff] (%p70_p3), %v235_v3 }
  0x15   : > { %238 = vst [vmem:[%s14082_s9 + $0x20] sm:$0xff] (%p70_p3), %v237_v4  ;;  %240 = vst [vmem:[%s14082_s9 + $0x28] sm:$0xff] (%p70_p3), %v239_v5  ;;  %v241_v6 = vld [vmem:[%s14074_s8 + $0x120] sm:$0xff] (%p70_p3)  ;;  %v243_v7 = vld [vmem:[%s14074_s8 + $0x128] sm:$0xff] (%p70_p3) }
  0x16   : > { %v245_v8 = vld [vmem:[%s14074_s8 + $0x180] sm:$0xff]  ;;  %242 = vst [vmem:[%s14082_s9 + $0x30] sm:$0xff] %v241_v6  ;;  %244 = vst [vmem:[%s14082_s9 + $0x38] sm:$0xff] %v243_v7  ;;  %v247_v9 = vld [vmem:[%s14074_s8 + $0x188] sm:$0xff] }
  0x17   : > { %246 = vst [vmem:[%s14082_s9 + $0x40] sm:$0xff] %v245_v8  ;;  %v249_v10 = vld [vmem:[%s14074_s8 + $0x1e0] sm:$0xff]  ;;  %v251_v11 = vld [vmem:[%s14074_s8 + $0x1e8] sm:$0xff]  ;;  %248 = vst [vmem:[%s14082_s9 + $0x48] sm:$0xff] %v247_v9 }
  0x18   : > { %250 = vst [vmem:[%s14082_s9 + $0x50] sm:$0xff] %v249_v10  ;;  %252 = vst [vmem:[%s14082_s9 + $0x58] sm:$0xff] %v251_v11  ;;  %v253_v12 = vld [vmem:[%s14074_s8 + $0x240] sm:$0xff]  ;;  %v255_v13 = vld [vmem:[%s14074_s8 + $0x248] sm:$0xff] }
  0x19   : > { %v257_v14 = vld [vmem:[%s14074_s8 + $0x2a0] sm:$0xff]  ;;  %254 = vst [vmem:[%s14082_s9 + $0x60] sm:$0xff] %v253_v12  ;;  %256 = vst [vmem:[%s14082_s9 + $0x68] sm:$0xff] %v255_v13  ;;  %v259_v15 = vld [vmem:[%s14074_s8 + $0x2a8] sm:$0xff] }
  0x1a   : > { %258 = vst [vmem:[%s14082_s9 + $0x70] sm:$0xff] %v257_v14  ;;  %v261_v16 = vld [vmem:[%s14074_s8 + $0x300] sm:$0xff]  ;;  %v263_v17 = vld [vmem:[%s14074_s8 + $0x308] sm:$0xff]  ;;  %260 = vst [vmem:[%s14082_s9 + $0x78] sm:$0xff] %v259_v15 }
  0x1b   : > { %262 = vst [vmem:[%s14082_s9 + $0x80] sm:$0xff] %v261_v16  ;;  %264 = vst [vmem:[%s14082_s9 + $0x88] sm:$0xff] %v263_v17  ;;  %v265_v18 = vld [vmem:[%s14074_s8 + $0x360] sm:$0xff]  ;;  %v267_v19 = vld [vmem:[%s14074_s8 + $0x368] sm:$0xff] }
  0x1c   : > { %v269_v20 = vld [vmem:[%s14074_s8 + $0x3c0] sm:$0xff]  ;;  %266 = vst [vmem:[%s14082_s9 + $0x90] sm:$0xff] %v265_v18  ;;  %268 = vst [vmem:[%s14082_s9 + $0x98] sm:$0xff] %v267_v19  ;;  %v271_v21 = vld [vmem:[%s14074_s8 + $0x3c8] sm:$0xff] }
  0x1d   : > { %270 = vst [vmem:[%s14082_s9 + $0xa0] sm:$0xff] %v269_v20  ;;  %v273_v22 = vld [vmem:[%s14074_s8 + $0x420] sm:$0xff]  ;;  %v275_v23 = vld [vmem:[%s14074_s8 + $0x428] sm:$0xff]  ;;  %272 = vst [vmem:[%s14082_s9 + $0xa8] sm:$0xff] %v271_v21 }
  0x1e   : > { %274 = vst [vmem:[%s14082_s9 + $0xb0] sm:$0xff] %v273_v22  ;;  %276 = vst [vmem:[%s14082_s9 + $0xb8] sm:$0xff] %v275_v23  ;;  %v277_v24 = vld [vmem:[%s14074_s8 + $0x480] sm:$0xff]  ;;  %v279_v25 = vld [vmem:[%s14074_s8 + $0x488] sm:$0xff] }
  0x1f   : > { %v281_v26 = vld [vmem:[%s14074_s8 + $0x4e0] sm:$0xff]  ;;  %278 = vst [vmem:[%s14082_s9 + $0xc0] sm:$0xff] %v277_v24  ;;  %280 = vst [vmem:[%s14082_s9 + $0xc8] sm:$0xff] %v279_v25  ;;  %v283_v27 = vld [vmem:[%s14074_s8 + $0x4e8] sm:$0xff] }
  0x20   : > { %282 = vst [vmem:[%s14082_s9 + $0xd0] sm:$0xff] %v281_v26  ;;  %v285_v28 = vld [vmem:[%s14074_s8 + $0x540] sm:$0xff]  ;;  %v287_v29 = vld [vmem:[%s14074_s8 + $0x548] sm:$0xff]  ;;  %284 = vst [vmem:[%s14082_s9 + $0xd8] sm:$0xff] %v283_v27 }
  0x21   : > { %286 = vst [vmem:[%s14082_s9 + $0xe0] sm:$0xff] %v285_v28  ;;  %288 = vst [vmem:[%s14082_s9 + $0xe8] sm:$0xff] %v287_v29  ;;  %v289_v30 = vld [vmem:[%s14074_s8 + $0x5a0] sm:$0xff]  ;;  %v291_v31 = vld [vmem:[%s14074_s8 + $0x5a8] sm:$0xff] }
  0x22   : > { %v293_v32 = vld [vmem:[%s14074_s8 + $0x600] sm:$0xff]  ;;  %290 = vst [vmem:[%s14082_s9 + $0xf0] sm:$0xff] %v289_v30  ;;  %292 = vst [vmem:[%s14082_s9 + $0xf8] sm:$0xff] %v291_v31  ;;  %v295_v33 = vld [vmem:[%s14074_s8 + $0x608] sm:$0xff] }
  0x23   : > { %294 = vst [vmem:[%s14082_s9 + $0x100] sm:$0xff] %v293_v32  ;;  %v297_v34 = vld [vmem:[%s14074_s8 + $0x660] sm:$0xff]  ;;  %v299_v35 = vld [vmem:[%s14074_s8 + $0x668] sm:$0xff]  ;;  %296 = vst [vmem:[%s14082_s9 + $0x108] sm:$0xff] %v295_v33 }
  0x24   : > { %298 = vst [vmem:[%s14082_s9 + $0x110] sm:$0xff] %v297_v34  ;;  %300 = vst [vmem:[%s14082_s9 + $0x118] sm:$0xff] %v299_v35  ;;  %v301_v36 = vld [vmem:[%s14074_s8 + $0x6c0] sm:$0xff]  ;;  %v303_v37 = vld [vmem:[%s14074_s8 + $0x6c8] sm:$0xff] }
  0x25   : > { %v305_v38 = vld [vmem:[%s14074_s8 + $0x720] sm:$0xff]  ;;  %302 = vst [vmem:[%s14082_s9 + $0x120] sm:$0xff] %v301_v36  ;;  %304 = vst [vmem:[%s14082_s9 + $0x128] sm:$0xff] %v303_v37  ;;  %v307_v39 = vld [vmem:[%s14074_s8 + $0x728] sm:$0xff] }
  0x26   : > { %306 = vst [vmem:[%s14082_s9 + $0x130] sm:$0xff] %v305_v38  ;;  %v309_v40 = vld [vmem:[%s14074_s8 + $0x780] sm:$0xff]  ;;  %v311_v41 = vld [vmem:[%s14074_s8 + $0x788] sm:$0xff]  ;;  %308 = vst [vmem:[%s14082_s9 + $0x138] sm:$0xff] %v307_v39 }
  0x27   : > { %310 = vst [vmem:[%s14082_s9 + $0x140] sm:$0xff] %v309_v40  ;;  %312 = vst [vmem:[%s14082_s9 + $0x148] sm:$0xff] %v311_v41  ;;  %v313_v42 = vld [vmem:[%s14074_s8 + $0x7e0] sm:$0xff]  ;;  %v315_v43 = vld [vmem:[%s14074_s8 + $0x7e8] sm:$0xff] }
  0x28   : > { %v317_v44 = vld [vmem:[%s14074_s8 + $0x840] sm:$0xff]  ;;  %314 = vst [vmem:[%s14082_s9 + $0x150] sm:$0xff] %v313_v42  ;;  %316 = vst [vmem:[%s14082_s9 + $0x158] sm:$0xff] %v315_v43  ;;  %v319_v45 = vld [vmem:[%s14074_s8 + $0x848] sm:$0xff] }
  0x29   : > { %318 = vst [vmem:[%s14082_s9 + $0x160] sm:$0xff] %v317_v44  ;;  %v321_v46 = vld [vmem:[%s14074_s8 + $0x8a0] sm:$0xff]  ;;  %v323_v47 = vld [vmem:[%s14074_s8 + $0x8a8] sm:$0xff]  ;;  %320 = vst [vmem:[%s14082_s9 + $0x168] sm:$0xff] %v319_v45 }
  0x2a   : > { %322 = vst [vmem:[%s14082_s9 + $0x170] sm:$0xff] %v321_v46  ;;  %324 = vst [vmem:[%s14082_s9 + $0x178] sm:$0xff] %v323_v47  ;;  %v325_v48 = vld [vmem:[%s14074_s8 + $0x900] sm:$0xff]  ;;  %v327_v49 = vld [vmem:[%s14074_s8 + $0x908] sm:$0xff] }
  0x2b   : > { %v329_v50 = vld [vmem:[%s14074_s8 + $0x960] sm:$0xff]  ;;  %326 = vst [vmem:[%s14082_s9 + $0x180] sm:$0xff] %v325_v48  ;;  %328 = vst [vmem:[%s14082_s9 + $0x188] sm:$0xff] %v327_v49  ;;  %v331_v51 = vld [vmem:[%s14074_s8 + $0x968] sm:$0xff] }
  0x2c   : > { %330 = vst [vmem:[%s14082_s9 + $0x190] sm:$0xff] %v329_v50  ;;  %v333_v52 = vld [vmem:[%s14074_s8 + $0x9c0] sm:$0xff]  ;;  %v335_v53 = vld [vmem:[%s14074_s8 + $0x9c8] sm:$0xff]  ;;  %332 = vst [vmem:[%s14082_s9 + $0x198] sm:$0xff] %v331_v51 }
  0x2d   : > { %334 = vst [vmem:[%s14082_s9 + $0x1a0] sm:$0xff] %v333_v52  ;;  %336 = vst [vmem:[%s14082_s9 + $0x1a8] sm:$0xff] %v335_v53  ;;  %v337_v54 = vld [vmem:[%s14074_s8 + $0xa20] sm:$0xff]  ;;  %v339_v55 = vld [vmem:[%s14074_s8 + $0xa28] sm:$0xff] }
  0x2e   : > { %v341_v56 = vld [vmem:[%s14074_s8 + $0xa80] sm:$0xff]  ;;  %338 = vst [vmem:[%s14082_s9 + $0x1b0] sm:$0xff] %v337_v54  ;;  %340 = vst [vmem:[%s14082_s9 + $0x1b8] sm:$0xff] %v339_v55  ;;  %v343_v57 = vld [vmem:[%s14074_s8 + $0xa88] sm:$0xff] }
  0x2f   : > { %342 = vst [vmem:[%s14082_s9 + $0x1c0] sm:$0xff] %v341_v56  ;;  %v345_v58 = vld [vmem:[%s14074_s8 + $0xae0] sm:$0xff]  ;;  %v347_v59 = vld [vmem:[%s14074_s8 + $0xae8] sm:$0xff]  ;;  %344 = vst [vmem:[%s14082_s9 + $0x1c8] sm:$0xff] %v343_v57 }
  0x30   : > { %346 = vst [vmem:[%s14082_s9 + $0x1d0] sm:$0xff] %v345_v58  ;;  %348 = vst [vmem:[%s14082_s9 + $0x1d8] sm:$0xff] %v347_v59  ;;  %v349_v60 = vld [vmem:[%s14074_s8 + $0xb40] sm:$0xff]  ;;  %v351_v61 = vld [vmem:[%s14074_s8 + $0xb48] sm:$0xff] }
  0x31   : > { %v353_v62 = vld [vmem:[%s14074_s8 + $0xba0] sm:$0xff]  ;;  %350 = vst [vmem:[%s14082_s9 + $0x1e0] sm:$0xff] %v349_v60  ;;  %352 = vst [vmem:[%s14082_s9 + $0x1e8] sm:$0xff] %v351_v61  ;;  %v355_v63 = vld [vmem:[%s14074_s8 + $0xba8] sm:$0xff] }
  0x32   : > { %354 = vst [vmem:[%s14082_s9 + $0x1f0] sm:$0xff] %v353_v62  ;;  %v357_v0 = vld [vmem:[%s14074_s8 + $0xc00] sm:$0xff]  ;;  %v359_v1 = vld [vmem:[%s14074_s8 + $0xc08] sm:$0xff]  ;;  %356 = vst [vmem:[%s14082_s9 + $0x1f8] sm:$0xff] %v355_v63 }
  0x33   : > { %358 = vst [vmem:[%s14082_s9 + $0x200] sm:$0xff] %v357_v0  ;;  %360 = vst [vmem:[%s14082_s9 + $0x208] sm:$0xff] %v359_v1  ;;  %v361_v2 = vld [vmem:[%s14074_s8 + $0xc60] sm:$0xff]  ;;  %v363_v3 = vld [vmem:[%s14074_s8 + $0xc68] sm:$0xff] }
  0x34   : > { %v365_v4 = vld [vmem:[%s14074_s8 + $0xcc0] sm:$0xff]  ;;  %362 = vst [vmem:[%s14082_s9 + $0x210] sm:$0xff] %v361_v2  ;;  %364 = vst [vmem:[%s14082_s9 + $0x218] sm:$0xff] %v363_v3  ;;  %v367_v5 = vld [vmem:[%s14074_s8 + $0xcc8] sm:$0xff] }
  0x35   : > { %366 = vst [vmem:[%s14082_s9 + $0x220] sm:$0xff] %v365_v4  ;;  %v369_v6 = vld [vmem:[%s14074_s8 + $0xd20] sm:$0xff]  ;;  %v371_v7 = vld [vmem:[%s14074_s8 + $0xd28] sm:$0xff]  ;;  %368 = vst [vmem:[%s14082_s9 + $0x228] sm:$0xff] %v367_v5 }
  0x36   : > { %370 = vst [vmem:[%s14082_s9 + $0x230] sm:$0xff] %v369_v6  ;;  %372 = vst [vmem:[%s14082_s9 + $0x238] sm:$0xff] %v371_v7  ;;  %v373_v8 = vld [vmem:[%s14074_s8 + $0xd80] sm:$0xff]  ;;  %v375_v9 = vld [vmem:[%s14074_s8 + $0xd88] sm:$0xff] }
  0x37   : > { %v377_v10 = vld [vmem:[%s14074_s8 + $0xde0] sm:$0xff]  ;;  %374 = vst [vmem:[%s14082_s9 + $0x240] sm:$0xff] %v373_v8  ;;  %376 = vst [vmem:[%s14082_s9 + $0x248] sm:$0xff] %v375_v9  ;;  %v379_v11 = vld [vmem:[%s14074_s8 + $0xde8] sm:$0xff] }
  0x38   : > { %378 = vst [vmem:[%s14082_s9 + $0x250] sm:$0xff] %v377_v10  ;;  %v381_v12 = vld [vmem:[%s14074_s8 + $0xe40] sm:$0xff]  ;;  %v383_v13 = vld [vmem:[%s14074_s8 + $0xe48] sm:$0xff]  ;;  %380 = vst [vmem:[%s14082_s9 + $0x258] sm:$0xff] %v379_v11 }
  0x39   : > { %382 = vst [vmem:[%s14082_s9 + $0x260] sm:$0xff] %v381_v12  ;;  %384 = vst [vmem:[%s14082_s9 + $0x268] sm:$0xff] %v383_v13  ;;  %v385_v14 = vld [vmem:[%s14074_s8 + $0xea0] sm:$0xff]  ;;  %v387_v15 = vld [vmem:[%s14074_s8 + $0xea8] sm:$0xff] }
  0x3a   : > { %v389_v16 = vld [vmem:[%s14074_s8 + $0xf00] sm:$0xff]  ;;  %386 = vst [vmem:[%s14082_s9 + $0x270] sm:$0xff] %v385_v14  ;;  %388 = vst [vmem:[%s14082_s9 + $0x278] sm:$0xff] %v387_v15  ;;  %v391_v17 = vld [vmem:[%s14074_s8 + $0xf08] sm:$0xff] }
  0x3b   : > { %390 = vst [vmem:[%s14082_s9 + $0x280] sm:$0xff] %v389_v16  ;;  %v393_v18 = vld [vmem:[%s14074_s8 + $0xf60] sm:$0xff]  ;;  %v395_v19 = vld [vmem:[%s14074_s8 + $0xf68] sm:$0xff]  ;;  %392 = vst [vmem:[%s14082_s9 + $0x288] sm:$0xff] %v391_v17 }
  0x3c   : > { %394 = vst [vmem:[%s14082_s9 + $0x290] sm:$0xff] %v393_v18  ;;  %396 = vst [vmem:[%s14082_s9 + $0x298] sm:$0xff] %v395_v19  ;;  %v397_v20 = vld [vmem:[%s14074_s8 + $0xfc0] sm:$0xff]  ;;  %v399_v21 = vld [vmem:[%s14074_s8 + $0xfc8] sm:$0xff] }
  0x3d   : > { %v401_v22 = vld [vmem:[%s14074_s8 + $0x1020] sm:$0xff]  ;;  %398 = vst [vmem:[%s14082_s9 + $0x2a0] sm:$0xff] %v397_v20  ;;  %400 = vst [vmem:[%s14082_s9 + $0x2a8] sm:$0xff] %v399_v21  ;;  %v403_v23 = vld [vmem:[%s14074_s8 + $0x1028] sm:$0xff] }
  0x3e   : > { %402 = vst [vmem:[%s14082_s9 + $0x2b0] sm:$0xff] %v401_v22  ;;  %v405_v24 = vld [vmem:[%s14074_s8 + $0x1080] sm:$0xff]  ;;  %v407_v25 = vld [vmem:[%s14074_s8 + $0x1088] sm:$0xff]  ;;  %404 = vst [vmem:[%s14082_s9 + $0x2b8] sm:$0xff] %v403_v23 }
  0x3f   : > { %406 = vst [vmem:[%s14082_s9 + $0x2c0] sm:$0xff] %v405_v24  ;;  %408 = vst [vmem:[%s14082_s9 + $0x2c8] sm:$0xff] %v407_v25  ;;  %v409_v26 = vld [vmem:[%s14074_s8 + $0x10e0] sm:$0xff]  ;;  %v411_v27 = vld [vmem:[%s14074_s8 + $0x10e8] sm:$0xff] }
  0x40   : > { %v413_v28 = vld [vmem:[%s14074_s8 + $0x1140] sm:$0xff]  ;;  %410 = vst [vmem:[%s14082_s9 + $0x2d0] sm:$0xff] %v409_v26  ;;  %412 = vst [vmem:[%s14082_s9 + $0x2d8] sm:$0xff] %v411_v27  ;;  %v415_v29 = vld [vmem:[%s14074_s8 + $0x1148] sm:$0xff] }
  0x41   : > { %414 = vst [vmem:[%s14082_s9 + $0x2e0] sm:$0xff] %v413_v28  ;;  %v417_v30 = vld [vmem:[%s14074_s8 + $0x11a0] sm:$0xff]  ;;  %v419_v31 = vld [vmem:[%s14074_s8 + $0x11a8] sm:$0xff]  ;;  %416 = vst [vmem:[%s14082_s9 + $0x2e8] sm:$0xff] %v415_v29 }
  0x42   : > { %418 = vst [vmem:[%s14082_s9 + $0x2f0] sm:$0xff] %v417_v30  ;;  %420 = vst [vmem:[%s14082_s9 + $0x2f8] sm:$0xff] %v419_v31  ;;  %v421_v32 = vld [vmem:[%s14074_s8 + $0x1200] sm:$0xff]  ;;  %v423_v33 = vld [vmem:[%s14074_s8 + $0x1208] sm:$0xff] }
  0x43   : > { %v425_v34 = vld [vmem:[%s14074_s8 + $0x1260] sm:$0xff]  ;;  %422 = vst [vmem:[%s14082_s9 + $0x300] sm:$0xff] %v421_v32  ;;  %424 = vst [vmem:[%s14082_s9 + $0x308] sm:$0xff] %v423_v33  ;;  %v427_v35 = vld [vmem:[%s14074_s8 + $0x1268] sm:$0xff] }
  0x44   : > { %426 = vst [vmem:[%s14082_s9 + $0x310] sm:$0xff] %v425_v34  ;;  %v429_v36 = vld [vmem:[%s14074_s8 + $0x12c0] sm:$0xff]  ;;  %v431_v37 = vld [vmem:[%s14074_s8 + $0x12c8] sm:$0xff]  ;;  %428 = vst [vmem:[%s14082_s9 + $0x318] sm:$0xff] %v427_v35 }
  0x45   : > { %430 = vst [vmem:[%s14082_s9 + $0x320] sm:$0xff] %v429_v36  ;;  %432 = vst [vmem:[%s14082_s9 + $0x328] sm:$0xff] %v431_v37  ;;  %v433_v38 = vld [vmem:[%s14074_s8 + $0x1320] sm:$0xff]  ;;  %v435_v39 = vld [vmem:[%s14074_s8 + $0x1328] sm:$0xff] }
  0x46   : > { %v437_v40 = vld [vmem:[%s14074_s8 + $0x1380] sm:$0xff]  ;;  %434 = vst [vmem:[%s14082_s9 + $0x330] sm:$0xff] %v433_v38  ;;  %436 = vst [vmem:[%s14082_s9 + $0x338] sm:$0xff] %v435_v39  ;;  %v439_v41 = vld [vmem:[%s14074_s8 + $0x1388] sm:$0xff] }
  0x47   : > { %438 = vst [vmem:[%s14082_s9 + $0x340] sm:$0xff] %v437_v40  ;;  %v441_v42 = vld [vmem:[%s14074_s8 + $0x13e0] sm:$0xff]  ;;  %v443_v43 = vld [vmem:[%s14074_s8 + $0x13e8] sm:$0xff]  ;;  %440 = vst [vmem:[%s14082_s9 + $0x348] sm:$0xff] %v439_v41 }
  0x48   : > { %442 = vst [vmem:[%s14082_s9 + $0x350] sm:$0xff] %v441_v42  ;;  %444 = vst [vmem:[%s14082_s9 + $0x358] sm:$0xff] %v443_v43  ;;  %v445_v44 = vld [vmem:[%s14074_s8 + $0x1440] sm:$0xff]  ;;  %v447_v45 = vld [vmem:[%s14074_s8 + $0x1448] sm:$0xff] }
  0x49   : > { %v449_v46 = vld [vmem:[%s14074_s8 + $0x14a0] sm:$0xff]  ;;  %446 = vst [vmem:[%s14082_s9 + $0x360] sm:$0xff] %v445_v44  ;;  %448 = vst [vmem:[%s14082_s9 + $0x368] sm:$0xff] %v447_v45  ;;  %v451_v47 = vld [vmem:[%s14074_s8 + $0x14a8] sm:$0xff] }
  0x4a   : > { %450 = vst [vmem:[%s14082_s9 + $0x370] sm:$0xff] %v449_v46  ;;  %v453_v48 = vld [vmem:[%s14074_s8 + $0x1500] sm:$0xff]  ;;  %v455_v49 = vld [vmem:[%s14074_s8 + $0x1508] sm:$0xff]  ;;  %452 = vst [vmem:[%s14082_s9 + $0x378] sm:$0xff] %v451_v47 }
  0x4b   : > { %454 = vst [vmem:[%s14082_s9 + $0x380] sm:$0xff] %v453_v48  ;;  %456 = vst [vmem:[%s14082_s9 + $0x388] sm:$0xff] %v455_v49  ;;  %v457_v50 = vld [vmem:[%s14074_s8 + $0x1560] sm:$0xff]  ;;  %v459_v51 = vld [vmem:[%s14074_s8 + $0x1568] sm:$0xff] }
  0x4c   : > { %v461_v52 = vld [vmem:[%s14074_s8 + $0x15c0] sm:$0xff]  ;;  %458 = vst [vmem:[%s14082_s9 + $0x390] sm:$0xff] %v457_v50  ;;  %460 = vst [vmem:[%s14082_s9 + $0x398] sm:$0xff] %v459_v51  ;;  %v463_v53 = vld [vmem:[%s14074_s8 + $0x15c8] sm:$0xff] }
  0x4d   : > { %462 = vst [vmem:[%s14082_s9 + $0x3a0] sm:$0xff] %v461_v52  ;;  %v465_v54 = vld [vmem:[%s14074_s8 + $0x1620] sm:$0xff]  ;;  %v467_v55 = vld [vmem:[%s14074_s8 + $0x1628] sm:$0xff]  ;;  %464 = vst [vmem:[%s14082_s9 + $0x3a8] sm:$0xff] %v463_v53 }
  0x4e   : > { %466 = vst [vmem:[%s14082_s9 + $0x3b0] sm:$0xff] %v465_v54  ;;  %468 = vst [vmem:[%s14082_s9 + $0x3b8] sm:$0xff] %v467_v55  ;;  %v469_v56 = vld [vmem:[%s14074_s8 + $0x1680] sm:$0xff]  ;;  %v471_v57 = vld [vmem:[%s14074_s8 + $0x1688] sm:$0xff] }
  0x4f   : > { %v473_v58 = vld [vmem:[%s14074_s8 + $0x16e0] sm:$0xff]  ;;  %470 = vst [vmem:[%s14082_s9 + $0x3c0] sm:$0xff] %v469_v56  ;;  %472 = vst [vmem:[%s14082_s9 + $0x3c8] sm:$0xff] %v471_v57  ;;  %v475_v59 = vld [vmem:[%s14074_s8 + $0x16e8] sm:$0xff] }
  0x50   : > { %474 = vst [vmem:[%s14082_s9 + $0x3d0] sm:$0xff] %v473_v58  ;;  %v477_v60 = vld [vmem:[%s14074_s8 + $0x1740] sm:$0xff]  ;;  %v479_v61 = vld [vmem:[%s14074_s8 + $0x1748] sm:$0xff]  ;;  %476 = vst [vmem:[%s14082_s9 + $0x3d8] sm:$0xff] %v475_v59 }
  0x51   : > { %478 = vst [vmem:[%s14082_s9 + $0x3e0] sm:$0xff] %v477_v60  ;;  %480 = vst [vmem:[%s14082_s9 + $0x3e8] sm:$0xff] %v479_v61  ;;  %v481_v62 = vld [vmem:[%s14074_s8 + $0x17a0] sm:$0xff]  ;;  %v483_v63 = vld [vmem:[%s14074_s8 + $0x17a8] sm:$0xff] }
  0x52   : > { %v485_v0 = vld [vmem:[%s14074_s8 + $0x1800] sm:$0xff]  ;;  %482 = vst [vmem:[%s14082_s9 + $0x3f0] sm:$0xff] %v481_v62  ;;  %484 = vst [vmem:[%s14082_s9 + $0x3f8] sm:$0xff] %v483_v63  ;;  %v487_v1 = vld [vmem:[%s14074_s8 + $0x1808] sm:$0xff] }
  0x53   : > { %486 = vst [vmem:[%s14082_s9 + $0x400] sm:$0xff] %v485_v0  ;;  %v489_v2 = vld [vmem:[%s14074_s8 + $0x1860] sm:$0xff]  ;;  %v491_v3 = vld [vmem:[%s14074_s8 + $0x1868] sm:$0xff]  ;;  %488 = vst [vmem:[%s14082_s9 + $0x408] sm:$0xff] %v487_v1 }
  0x54   : > { %490 = vst [vmem:[%s14082_s9 + $0x410] sm:$0xff] %v489_v2  ;;  %492 = vst [vmem:[%s14082_s9 + $0x418] sm:$0xff] %v491_v3  ;;  %v493_v4 = vld [vmem:[%s14074_s8 + $0x18c0] sm:$0xff]  ;;  %v495_v5 = vld [vmem:[%s14074_s8 + $0x18c8] sm:$0xff] }
  0x55   : > { %v497_v6 = vld [vmem:[%s14074_s8 + $0x1920] sm:$0xff]  ;;  %494 = vst [vmem:[%s14082_s9 + $0x420] sm:$0xff] %v493_v4  ;;  %496 = vst [vmem:[%s14082_s9 + $0x428] sm:$0xff] %v495_v5  ;;  %v499_v7 = vld [vmem:[%s14074_s8 + $0x1928] sm:$0xff] }
  0x56   : > { %498 = vst [vmem:[%s14082_s9 + $0x430] sm:$0xff] %v497_v6  ;;  %v501_v8 = vld [vmem:[%s14074_s8 + $0x1980] sm:$0xff]  ;;  %v503_v9 = vld [vmem:[%s14074_s8 + $0x1988] sm:$0xff]  ;;  %500 = vst [vmem:[%s14082_s9 + $0x438] sm:$0xff] %v499_v7 }
  0x57   : > { %502 = vst [vmem:[%s14082_s9 + $0x440] sm:$0xff] %v501_v8  ;;  %504 = vst [vmem:[%s14082_s9 + $0x448] sm:$0xff] %v503_v9  ;;  %v505_v10 = vld [vmem:[%s14074_s8 + $0x19e0] sm:$0xff]  ;;  %v507_v11 = vld [vmem:[%s14074_s8 + $0x19e8] sm:$0xff] }
  0x58   : > { %v509_v12 = vld [vmem:[%s14074_s8 + $0x1a40] sm:$0xff]  ;;  %506 = vst [vmem:[%s14082_s9 + $0x450] sm:$0xff] %v505_v10  ;;  %508 = vst [vmem:[%s14082_s9 + $0x458] sm:$0xff] %v507_v11  ;;  %v511_v13 = vld [vmem:[%s14074_s8 + $0x1a48] sm:$0xff] }
  0x59   : > { %510 = vst [vmem:[%s14082_s9 + $0x460] sm:$0xff] %v509_v12  ;;  %v513_v14 = vld [vmem:[%s14074_s8 + $0x1aa0] sm:$0xff]  ;;  %v515_v15 = vld [vmem:[%s14074_s8 + $0x1aa8] sm:$0xff]  ;;  %512 = vst [vmem:[%s14082_s9 + $0x468] sm:$0xff] %v511_v13 }
  0x5a   : > { %514 = vst [vmem:[%s14082_s9 + $0x470] sm:$0xff] %v513_v14  ;;  %516 = vst [vmem:[%s14082_s9 + $0x478] sm:$0xff] %v515_v15  ;;  %v517_v16 = vld [vmem:[%s14074_s8 + $0x1b00] sm:$0xff]  ;;  %v519_v17 = vld [vmem:[%s14074_s8 + $0x1b08] sm:$0xff] }
  0x5b   : > { %v521_v18 = vld [vmem:[%s14074_s8 + $0x1b60] sm:$0xff]  ;;  %518 = vst [vmem:[%s14082_s9 + $0x480] sm:$0xff] %v517_v16  ;;  %520 = vst [vmem:[%s14082_s9 + $0x488] sm:$0xff] %v519_v17  ;;  %v523_v19 = vld [vmem:[%s14074_s8 + $0x1b68] sm:$0xff] }
  0x5c   : > { %522 = vst [vmem:[%s14082_s9 + $0x490] sm:$0xff] %v521_v18  ;;  %v525_v20 = vld [vmem:[%s14074_s8 + $0x1bc0] sm:$0xff]  ;;  %v527_v21 = vld [vmem:[%s14074_s8 + $0x1bc8] sm:$0xff]  ;;  %524 = vst [vmem:[%s14082_s9 + $0x498] sm:$0xff] %v523_v19 }
  0x5d   : > { %526 = vst [vmem:[%s14082_s9 + $0x4a0] sm:$0xff] %v525_v20  ;;  %528 = vst [vmem:[%s14082_s9 + $0x4a8] sm:$0xff] %v527_v21  ;;  %v529_v22 = vld [vmem:[%s14074_s8 + $0x1c20] sm:$0xff]  ;;  %v531_v23 = vld [vmem:[%s14074_s8 + $0x1c28] sm:$0xff] }
  0x5e   : > { %v533_v24 = vld [vmem:[%s14074_s8 + $0x1c80] sm:$0xff]  ;;  %530 = vst [vmem:[%s14082_s9 + $0x4b0] sm:$0xff] %v529_v22  ;;  %532 = vst [vmem:[%s14082_s9 + $0x4b8] sm:$0xff] %v531_v23  ;;  %v535_v25 = vld [vmem:[%s14074_s8 + $0x1c88] sm:$0xff] }
  0x5f   : > { %534 = vst [vmem:[%s14082_s9 + $0x4c0] sm:$0xff] %v533_v24  ;;  %v537_v26 = vld [vmem:[%s14074_s8 + $0x1ce0] sm:$0xff]  ;;  %v539_v27 = vld [vmem:[%s14074_s8 + $0x1ce8] sm:$0xff]  ;;  %536 = vst [vmem:[%s14082_s9 + $0x4c8] sm:$0xff] %v535_v25 }
  0x60   : > { %538 = vst [vmem:[%s14082_s9 + $0x4d0] sm:$0xff] %v537_v26  ;;  %540 = vst [vmem:[%s14082_s9 + $0x4d8] sm:$0xff] %v539_v27  ;;  %v541_v28 = vld [vmem:[%s14074_s8 + $0x1d40] sm:$0xff]  ;;  %v543_v29 = vld [vmem:[%s14074_s8 + $0x1d48] sm:$0xff] }
  0x61   : > { %v545_v30 = vld [vmem:[%s14074_s8 + $0x1da0] sm:$0xff]  ;;  %542 = vst [vmem:[%s14082_s9 + $0x4e0] sm:$0xff] %v541_v28  ;;  %544 = vst [vmem:[%s14082_s9 + $0x4e8] sm:$0xff] %v543_v29  ;;  %v547_v31 = vld [vmem:[%s14074_s8 + $0x1da8] sm:$0xff] }
  0x62   : > { %546 = vst [vmem:[%s14082_s9 + $0x4f0] sm:$0xff] %v545_v30  ;;  %v549_v32 = vld [vmem:[%s14074_s8 + $0x1e00] sm:$0xff]  ;;  %v551_v33 = vld [vmem:[%s14074_s8 + $0x1e08] sm:$0xff]  ;;  %548 = vst [vmem:[%s14082_s9 + $0x4f8] sm:$0xff] %v547_v31 }
  0x63   : > { %550 = vst [vmem:[%s14082_s9 + $0x500] sm:$0xff] %v549_v32  ;;  %552 = vst [vmem:[%s14082_s9 + $0x508] sm:$0xff] %v551_v33  ;;  %v553_v34 = vld [vmem:[%s14074_s8 + $0x1e60] sm:$0xff]  ;;  %v555_v35 = vld [vmem:[%s14074_s8 + $0x1e68] sm:$0xff] }
  0x64   : > { %v557_v36 = vld [vmem:[%s14074_s8 + $0x1ec0] sm:$0xff]  ;;  %554 = vst [vmem:[%s14082_s9 + $0x510] sm:$0xff] %v553_v34  ;;  %556 = vst [vmem:[%s14082_s9 + $0x518] sm:$0xff] %v555_v35  ;;  %v559_v37 = vld [vmem:[%s14074_s8 + $0x1ec8] sm:$0xff] }
  0x65   : > { %558 = vst [vmem:[%s14082_s9 + $0x520] sm:$0xff] %v557_v36  ;;  %v561_v38 = vld [vmem:[%s14074_s8 + $0x1f20] sm:$0xff]  ;;  %v563_v39 = vld [vmem:[%s14074_s8 + $0x1f28] sm:$0xff]  ;;  %560 = vst [vmem:[%s14082_s9 + $0x528] sm:$0xff] %v559_v37 }
  0x66   : > { %562 = vst [vmem:[%s14082_s9 + $0x530] sm:$0xff] %v561_v38  ;;  %564 = vst [vmem:[%s14082_s9 + $0x538] sm:$0xff] %v563_v39  ;;  %v565_v40 = vld [vmem:[%s14074_s8 + $0x1f80] sm:$0xff]  ;;  %v567_v41 = vld [vmem:[%s14074_s8 + $0x1f88] sm:$0xff] }
  0x67   : > { %v569_v42 = vld [vmem:[%s14074_s8 + $0x1fe0] sm:$0xff]  ;;  %566 = vst [vmem:[%s14082_s9 + $0x540] sm:$0xff] %v565_v40  ;;  %568 = vst [vmem:[%s14082_s9 + $0x548] sm:$0xff] %v567_v41  ;;  %v571_v43 = vld [vmem:[%s14074_s8 + $0x1fe8] sm:$0xff] }
  0x68   : > { %570 = vst [vmem:[%s14082_s9 + $0x550] sm:$0xff] %v569_v42  ;;  %v573_v44 = vld [vmem:[%s14074_s8 + $0x2040] sm:$0xff]  ;;  %v575_v45 = vld [vmem:[%s14074_s8 + $0x2048] sm:$0xff]  ;;  %572 = vst [vmem:[%s14082_s9 + $0x558] sm:$0xff] %v571_v43 }
  0x69   : > { %574 = vst [vmem:[%s14082_s9 + $0x560] sm:$0xff] %v573_v44  ;;  %576 = vst [vmem:[%s14082_s9 + $0x568] sm:$0xff] %v575_v45  ;;  %v577_v46 = vld [vmem:[%s14074_s8 + $0x20a0] sm:$0xff]  ;;  %v579_v47 = vld [vmem:[%s14074_s8 + $0x20a8] sm:$0xff] }
  0x6a   : > { %v581_v48 = vld [vmem:[%s14074_s8 + $0x2100] sm:$0xff]  ;;  %578 = vst [vmem:[%s14082_s9 + $0x570] sm:$0xff] %v577_v46  ;;  %580 = vst [vmem:[%s14082_s9 + $0x578] sm:$0xff] %v579_v47  ;;  %v583_v49 = vld [vmem:[%s14074_s8 + $0x2108] sm:$0xff] }
  0x6b   : > { %582 = vst [vmem:[%s14082_s9 + $0x580] sm:$0xff] %v581_v48  ;;  %v585_v50 = vld [vmem:[%s14074_s8 + $0x2160] sm:$0xff]  ;;  %v587_v51 = vld [vmem:[%s14074_s8 + $0x2168] sm:$0xff]  ;;  %584 = vst [vmem:[%s14082_s9 + $0x588] sm:$0xff] %v583_v49 }
  0x6c   : > { %586 = vst [vmem:[%s14082_s9 + $0x590] sm:$0xff] %v585_v50  ;;  %588 = vst [vmem:[%s14082_s9 + $0x598] sm:$0xff] %v587_v51  ;;  %v589_v52 = vld [vmem:[%s14074_s8 + $0x21c0] sm:$0xff]  ;;  %v591_v53 = vld [vmem:[%s14074_s8 + $0x21c8] sm:$0xff] }
  0x6d   : > { %v593_v54 = vld [vmem:[%s14074_s8 + $0x2220] sm:$0xff]  ;;  %590 = vst [vmem:[%s14082_s9 + $0x5a0] sm:$0xff] %v589_v52  ;;  %592 = vst [vmem:[%s14082_s9 + $0x5a8] sm:$0xff] %v591_v53  ;;  %v595_v55 = vld [vmem:[%s14074_s8 + $0x2228] sm:$0xff] }
  0x6e   : > { %594 = vst [vmem:[%s14082_s9 + $0x5b0] sm:$0xff] %v593_v54  ;;  %v597_v56 = vld [vmem:[%s14074_s8 + $0x2280] sm:$0xff]  ;;  %v599_v57 = vld [vmem:[%s14074_s8 + $0x2288] sm:$0xff]  ;;  %596 = vst [vmem:[%s14082_s9 + $0x5b8] sm:$0xff] %v595_v55 }
  0x6f   : > { %598 = vst [vmem:[%s14082_s9 + $0x5c0] sm:$0xff] %v597_v56  ;;  %600 = vst [vmem:[%s14082_s9 + $0x5c8] sm:$0xff] %v599_v57  ;;  %v601_v58 = vld [vmem:[%s14074_s8 + $0x22e0] sm:$0xff]  ;;  %v603_v59 = vld [vmem:[%s14074_s8 + $0x22e8] sm:$0xff] }
  0x70   : > { %v605_v60 = vld [vmem:[%s14074_s8 + $0x2340] sm:$0xff]  ;;  %602 = vst [vmem:[%s14082_s9 + $0x5d0] sm:$0xff] %v601_v58  ;;  %604 = vst [vmem:[%s14082_s9 + $0x5d8] sm:$0xff] %v603_v59  ;;  %v607_v61 = vld [vmem:[%s14074_s8 + $0x2348] sm:$0xff] }
  0x71   : > { %606 = vst [vmem:[%s14082_s9 + $0x5e0] sm:$0xff] %v605_v60  ;;  %v609_v62 = vld [vmem:[%s14074_s8 + $0x23a0] sm:$0xff]  ;;  %v611_v63 = vld [vmem:[%s14074_s8 + $0x23a8] sm:$0xff]  ;;  %608 = vst [vmem:[%s14082_s9 + $0x5e8] sm:$0xff] %v607_v61 }
  0x72   : > { %610 = vst [vmem:[%s14082_s9 + $0x5f0] sm:$0xff] %v609_v62  ;;  %612 = vst [vmem:[%s14082_s9 + $0x5f8] sm:$0xff] %v611_v63 }
  0x73 PF: > { %p11158_p6 = scmp.ge.s32.totalorder %s13994_s22, 1  ;;  %p635_p7 = scmp.lt.s32.totalorder %s13994_s22, 7 }
  0x75   : > { %p636_p8 = pnand %p11158_p6, %p635_p7 }
  0x77   : > { %639 = sbr.rel (%p636_p8) target bundleno = 2169 (0x879), region = 59 }
  0x7e   : > { %s642_s10 = sand.u32 1, %s13978_s18   ;;  %s11159_s11 = sshll.u32 %s13986_s20, 2 }
  0x7f   : > { %s12562_s12 = smul.u32 1536, %s642_s10  ;;  %p689_p9 = scmp.lt.s32.totalorder %s11159_s11, 23 }
  0x80   : > { %s11160_s13 = sshll.u32 %s13986_s20, 6  ;;  %p11162_p11 = scmp.ne.s32.totalorder %s13986_s20, 0 }
  0x81   : > { %p694_p10 = scmp.lt.s32.totalorder %s11160_s13, 383  ;;  %s20407_s11 = smov (!%p689_p9, %s11159_s11), 23  ;;  %v13996_v0 = vmov (!%p11162_p11), 0.0  }
  0x82   : > { %s14470_s16 = scalar_lea.vmem %s19792_s2, %s20407_s11  ;;  %s14477_s29 = scalar_lea.vmem [#allocation2], %s12562_s12  ;;  %705 = vst [vmem:[#allocation3] sm:$0xff] (!%p11162_p11), %v13996_v0  ;;  %706 = vst [vmem:[#allocation3 + $0x8] sm:$0xff] (!%p11162_p11), %v13996_v0 }
  0x83   : > { %s20409_s13 = smov (!%p694_p10, %s11160_s13), 383  ;;  %704 = sbr.rel (%p11162_p11) target bundleno = 275 (0x113), region = 67 }
  0x84   : > { %s12563_s17 = smul.u32 24, %s20409_s13  ;;  %707 = vst [vmem:[#allocation3 + $0x10] sm:$0xff] (!%p11162_p11), %v13996_v0  ;;  %708 = vst [vmem:[#allocation3 + $0x18] sm:$0xff] (!%p11162_p11), %v13996_v0 }
  0x85   : > { %709 = vst [vmem:[#allocation3 + $0x20] sm:$0xff] (!%p11162_p11), %v13996_v0  ;;  %710 = vst [vmem:[#allocation3 + $0x28] sm:$0xff] (!%p11162_p11), %v13996_v0 }
  0x86   : > { %s14475_s28 = scalar_lea.vmem %s19793_s3, %s12563_s17  ;;  %711 = vst [vmem:[#allocation3 + $0x30] sm:$0xff] (!%p11162_p11), %v13996_v0  ;;  %712 = vst [vmem:[#allocation3 + $0x38] sm:$0xff] (!%p11162_p11), %v13996_v0 }
  0x87   : > { %713 = vst [vmem:[#allocation3 + $0x40] sm:$0xff] (!%p11162_p11), %v13996_v0  ;;  %714 = vst [vmem:[#allocation3 + $0x48] sm:$0xff] (!%p11162_p11), %v13996_v0 }
  0x88   : > { %715 = vst [vmem:[#allocation3 + $0x50] sm:$0xff] (!%p11162_p11), %v13996_v0  ;;  %716 = vst [vmem:[#allocation3 + $0x58] sm:$0xff] (!%p11162_p11), %v13996_v0 }
  0x89   : > { %717 = vst [vmem:[#allocation3 + $0x60] sm:$0xff] (!%p11162_p11), %v13996_v0  ;;  %718 = vst [vmem:[#allocation3 + $0x68] sm:$0xff] (!%p11162_p11), %v13996_v0 }
  0x8a   : > { %719 = vst [vmem:[#allocation3 + $0x70] sm:$0xff] %v13996_v0  ;;  %720 = vst [vmem:[#allocation3 + $0x78] sm:$0xff] %v13996_v0 }
  0x8b   : > { %721 = vst [vmem:[#allocation3 + $0x80] sm:$0xff] %v13996_v0  ;;  %722 = vst [vmem:[#allocation3 + $0x88] sm:$0xff] %v13996_v0 }
  0x8c   : > { %723 = vst [vmem:[#allocation3 + $0x90] sm:$0xff] %v13996_v0  ;;  %724 = vst [vmem:[#allocation3 + $0x98] sm:$0xff] %v13996_v0 }
  0x8d   : > { %725 = vst [vmem:[#allocation3 + $0xa0] sm:$0xff] %v13996_v0  ;;  %726 = vst [vmem:[#allocation3 + $0xa8] sm:$0xff] %v13996_v0 }
  0x8e   : > { %727 = vst [vmem:[#allocation3 + $0xb0] sm:$0xff] %v13996_v0  ;;  %728 = vst [vmem:[#allocation3 + $0xb8] sm:$0xff] %v13996_v0 }
  0x8f   : > { %729 = vst [vmem:[#allocation3 + $0xc0] sm:$0xff] %v13996_v0  ;;  %730 = vst [vmem:[#allocation3 + $0xc8] sm:$0xff] %v13996_v0 }
  0x90   : > { %731 = vst [vmem:[#allocation3 + $0xd0] sm:$0xff] %v13996_v0  ;;  %732 = vst [vmem:[#allocation3 + $0xd8] sm:$0xff] %v13996_v0 }
  0x91   : > { %733 = vst [vmem:[#allocation3 + $0xe0] sm:$0xff] %v13996_v0  ;;  %734 = vst [vmem:[#allocation3 + $0xe8] sm:$0xff] %v13996_v0 }
  0x92   : > { %735 = vst [vmem:[#allocation3 + $0xf0] sm:$0xff] %v13996_v0  ;;  %736 = vst [vmem:[#allocation3 + $0xf8] sm:$0xff] %v13996_v0 }
  0x93   : > { %737 = vst [vmem:[#allocation3 + $0x100] sm:$0xff] %v13996_v0  ;;  %738 = vst [vmem:[#allocation3 + $0x108] sm:$0xff] %v13996_v0 }
  0x94   : > { %739 = vst [vmem:[#allocation3 + $0x110] sm:$0xff] %v13996_v0  ;;  %740 = vst [vmem:[#allocation3 + $0x118] sm:$0xff] %v13996_v0 }
  0x95   : > { %741 = vst [vmem:[#allocation3 + $0x120] sm:$0xff] %v13996_v0  ;;  %742 = vst [vmem:[#allocation3 + $0x128] sm:$0xff] %v13996_v0 }
  0x96   : > { %743 = vst [vmem:[#allocation3 + $0x130] sm:$0xff] %v13996_v0  ;;  %744 = vst [vmem:[#allocation3 + $0x138] sm:$0xff] %v13996_v0 }
  0x97   : > { %745 = vst [vmem:[#allocation3 + $0x140] sm:$0xff] %v13996_v0  ;;  %746 = vst [vmem:[#allocation3 + $0x148] sm:$0xff] %v13996_v0 }
  0x98   : > { %747 = vst [vmem:[#allocation3 + $0x150] sm:$0xff] %v13996_v0  ;;  %748 = vst [vmem:[#allocation3 + $0x158] sm:$0xff] %v13996_v0 }
  0x99   : > { %749 = vst [vmem:[#allocation3 + $0x160] sm:$0xff] %v13996_v0  ;;  %750 = vst [vmem:[#allocation3 + $0x168] sm:$0xff] %v13996_v0 }
  0x9a   : > { %751 = vst [vmem:[#allocation3 + $0x170] sm:$0xff] %v13996_v0  ;;  %752 = vst [vmem:[#allocation3 + $0x178] sm:$0xff] %v13996_v0 }
  0x9b   : > { %753 = vst [vmem:[#allocation3 + $0x180] sm:$0xff] %v13996_v0  ;;  %754 = vst [vmem:[#allocation3 + $0x188] sm:$0xff] %v13996_v0 }
  0x9c   : > { %755 = vst [vmem:[#allocation3 + $0x190] sm:$0xff] %v13996_v0  ;;  %756 = vst [vmem:[#allocation3 + $0x198] sm:$0xff] %v13996_v0 }
  0x9d   : > { %757 = vst [vmem:[#allocation3 + $0x1a0] sm:$0xff] %v13996_v0  ;;  %758 = vst [vmem:[#allocation3 + $0x1a8] sm:$0xff] %v13996_v0 }
  0x9e   : > { %759 = vst [vmem:[#allocation3 + $0x1b0] sm:$0xff] %v13996_v0  ;;  %760 = vst [vmem:[#allocation3 + $0x1b8] sm:$0xff] %v13996_v0 }
  0x9f   : > { %761 = vst [vmem:[#allocation3 + $0x1c0] sm:$0xff] %v13996_v0  ;;  %762 = vst [vmem:[#allocation3 + $0x1c8] sm:$0xff] %v13996_v0 }
  0xa0   : > { %763 = vst [vmem:[#allocation3 + $0x1d0] sm:$0xff] %v13996_v0  ;;  %764 = vst [vmem:[#allocation3 + $0x1d8] sm:$0xff] %v13996_v0 }
  0xa1   : > { %765 = vst [vmem:[#allocation3 + $0x1e0] sm:$0xff] %v13996_v0  ;;  %766 = vst [vmem:[#allocation3 + $0x1e8] sm:$0xff] %v13996_v0 }
  0xa2   : > { %767 = vst [vmem:[#allocation3 + $0x1f0] sm:$0xff] %v13996_v0  ;;  %768 = vst [vmem:[#allocation3 + $0x1f8] sm:$0xff] %v13996_v0 }
  0xa3   : > { %769 = vst [vmem:[#allocation3 + $0x200] sm:$0xff] %v13996_v0  ;;  %770 = vst [vmem:[#allocation3 + $0x208] sm:$0xff] %v13996_v0 }
  0xa4   : > { %771 = vst [vmem:[#allocation3 + $0x210] sm:$0xff] %v13996_v0  ;;  %772 = vst [vmem:[#allocation3 + $0x218] sm:$0xff] %v13996_v0 }
  0xa5   : > { %773 = vst [vmem:[#allocation3 + $0x220] sm:$0xff] %v13996_v0  ;;  %774 = vst [vmem:[#allocation3 + $0x228] sm:$0xff] %v13996_v0 }
  0xa6   : > { %775 = vst [vmem:[#allocation3 + $0x230] sm:$0xff] %v13996_v0  ;;  %776 = vst [vmem:[#allocation3 + $0x238] sm:$0xff] %v13996_v0 }
  0xa7   : > { %777 = vst [vmem:[#allocation3 + $0x240] sm:$0xff] %v13996_v0  ;;  %778 = vst [vmem:[#allocation3 + $0x248] sm:$0xff] %v13996_v0 }
  0xa8   : > { %779 = vst [vmem:[#allocation3 + $0x250] sm:$0xff] %v13996_v0  ;;  %780 = vst [vmem:[#allocation3 + $0x258] sm:$0xff] %v13996_v0 }
  0xa9   : > { %781 = vst [vmem:[#allocation3 + $0x260] sm:$0xff] %v13996_v0  ;;  %782 = vst [vmem:[#allocation3 + $0x268] sm:$0xff] %v13996_v0 }
  0xaa   : > { %783 = vst [vmem:[#allocation3 + $0x270] sm:$0xff] %v13996_v0  ;;  %784 = vst [vmem:[#allocation3 + $0x278] sm:$0xff] %v13996_v0 }
  0xab   : > { %785 = vst [vmem:[#allocation3 + $0x280] sm:$0xff] %v13996_v0  ;;  %786 = vst [vmem:[#allocation3 + $0x288] sm:$0xff] %v13996_v0 }
  0xac   : > { %787 = vst [vmem:[#allocation3 + $0x290] sm:$0xff] %v13996_v0  ;;  %788 = vst [vmem:[#allocation3 + $0x298] sm:$0xff] %v13996_v0 }
  0xad   : > { %789 = vst [vmem:[#allocation3 + $0x2a0] sm:$0xff] %v13996_v0  ;;  %790 = vst [vmem:[#allocation3 + $0x2a8] sm:$0xff] %v13996_v0 }
  0xae   : > { %791 = vst [vmem:[#allocation3 + $0x2b0] sm:$0xff] %v13996_v0  ;;  %792 = vst [vmem:[#allocation3 + $0x2b8] sm:$0xff] %v13996_v0 }
  0xaf   : > { %793 = vst [vmem:[#allocation3 + $0x2c0] sm:$0xff] %v13996_v0  ;;  %794 = vst [vmem:[#allocation3 + $0x2c8] sm:$0xff] %v13996_v0 }
  0xb0   : > { %795 = vst [vmem:[#allocation3 + $0x2d0] sm:$0xff] %v13996_v0  ;;  %796 = vst [vmem:[#allocation3 + $0x2d8] sm:$0xff] %v13996_v0 }
  0xb1   : > { %797 = vst [vmem:[#allocation3 + $0x2e0] sm:$0xff] %v13996_v0  ;;  %798 = vst [vmem:[#allocation3 + $0x2e8] sm:$0xff] %v13996_v0 }
  0xb2   : > { %799 = vst [vmem:[#allocation3 + $0x2f0] sm:$0xff] %v13996_v0  ;;  %800 = vst [vmem:[#allocation3 + $0x2f8] sm:$0xff] %v13996_v0 }
  0xb3   : > { %801 = vst [vmem:[#allocation3 + $0x300] sm:$0xff] %v13996_v0  ;;  %802 = vst [vmem:[#allocation3 + $0x308] sm:$0xff] %v13996_v0 }
  0xb4   : > { %803 = vst [vmem:[#allocation3 + $0x310] sm:$0xff] %v13996_v0  ;;  %804 = vst [vmem:[#allocation3 + $0x318] sm:$0xff] %v13996_v0 }
  0xb5   : > { %805 = vst [vmem:[#allocation3 + $0x320] sm:$0xff] %v13996_v0  ;;  %806 = vst [vmem:[#allocation3 + $0x328] sm:$0xff] %v13996_v0 }
  0xb6   : > { %807 = vst [vmem:[#allocation3 + $0x330] sm:$0xff] %v13996_v0  ;;  %808 = vst [vmem:[#allocation3 + $0x338] sm:$0xff] %v13996_v0 }
  0xb7   : > { %809 = vst [vmem:[#allocation3 + $0x340] sm:$0xff] %v13996_v0  ;;  %810 = vst [vmem:[#allocation3 + $0x348] sm:$0xff] %v13996_v0 }
  0xb8   : > { %811 = vst [vmem:[#allocation3 + $0x350] sm:$0xff] %v13996_v0  ;;  %812 = vst [vmem:[#allocation3 + $0x358] sm:$0xff] %v13996_v0 }
  0xb9   : > { %813 = vst [vmem:[#allocation3 + $0x360] sm:$0xff] %v13996_v0  ;;  %814 = vst [vmem:[#allocation3 + $0x368] sm:$0xff] %v13996_v0 }
  0xba   : > { %815 = vst [vmem:[#allocation3 + $0x370] sm:$0xff] %v13996_v0  ;;  %816 = vst [vmem:[#allocation3 + $0x378] sm:$0xff] %v13996_v0 }
  0xbb   : > { %817 = vst [vmem:[#allocation3 + $0x380] sm:$0xff] %v13996_v0  ;;  %818 = vst [vmem:[#allocation3 + $0x388] sm:$0xff] %v13996_v0 }
  0xbc   : > { %819 = vst [vmem:[#allocation3 + $0x390] sm:$0xff] %v13996_v0  ;;  %820 = vst [vmem:[#allocation3 + $0x398] sm:$0xff] %v13996_v0 }
  0xbd   : > { %821 = vst [vmem:[#allocation3 + $0x3a0] sm:$0xff] %v13996_v0  ;;  %822 = vst [vmem:[#allocation3 + $0x3a8] sm:$0xff] %v13996_v0 }
  0xbe   : > { %823 = vst [vmem:[#allocation3 + $0x3b0] sm:$0xff] %v13996_v0  ;;  %824 = vst [vmem:[#allocation3 + $0x3b8] sm:$0xff] %v13996_v0 }
  0xbf   : > { %825 = vst [vmem:[#allocation3 + $0x3c0] sm:$0xff] %v13996_v0  ;;  %826 = vst [vmem:[#allocation3 + $0x3c8] sm:$0xff] %v13996_v0 }
  0xc0   : > { %827 = vst [vmem:[#allocation3 + $0x3d0] sm:$0xff] %v13996_v0  ;;  %828 = vst [vmem:[#allocation3 + $0x3d8] sm:$0xff] %v13996_v0 }
  0xc1   : > { %829 = vst [vmem:[#allocation3 + $0x3e0] sm:$0xff] %v13996_v0  ;;  %830 = vst [vmem:[#allocation3 + $0x3e8] sm:$0xff] %v13996_v0 }
  0xc2   : > { %831 = vst [vmem:[#allocation3 + $0x3f0] sm:$0xff] %v13996_v0  ;;  %832 = vst [vmem:[#allocation3 + $0x3f8] sm:$0xff] %v13996_v0 }
  0xc3   : > { %833 = vst [vmem:[#allocation3 + $0x400] sm:$0xff] %v13996_v0  ;;  %834 = vst [vmem:[#allocation3 + $0x408] sm:$0xff] %v13996_v0 }
  0xc4   : > { %835 = vst [vmem:[#allocation3 + $0x410] sm:$0xff] %v13996_v0  ;;  %836 = vst [vmem:[#allocation3 + $0x418] sm:$0xff] %v13996_v0 }
  0xc5   : > { %837 = vst [vmem:[#allocation3 + $0x420] sm:$0xff] %v13996_v0  ;;  %838 = vst [vmem:[#allocation3 + $0x428] sm:$0xff] %v13996_v0 }
  0xc6   : > { %839 = vst [vmem:[#allocation3 + $0x430] sm:$0xff] %v13996_v0  ;;  %840 = vst [vmem:[#allocation3 + $0x438] sm:$0xff] %v13996_v0 }
  0xc7   : > { %841 = vst [vmem:[#allocation3 + $0x440] sm:$0xff] %v13996_v0  ;;  %842 = vst [vmem:[#allocation3 + $0x448] sm:$0xff] %v13996_v0 }
  0xc8   : > { %843 = vst [vmem:[#allocation3 + $0x450] sm:$0xff] %v13996_v0  ;;  %844 = vst [vmem:[#allocation3 + $0x458] sm:$0xff] %v13996_v0 }
  0xc9   : > { %845 = vst [vmem:[#allocation3 + $0x460] sm:$0xff] %v13996_v0  ;;  %846 = vst [vmem:[#allocation3 + $0x468] sm:$0xff] %v13996_v0 }
  0xca   : > { %847 = vst [vmem:[#allocation3 + $0x470] sm:$0xff] %v13996_v0  ;;  %848 = vst [vmem:[#allocation3 + $0x478] sm:$0xff] %v13996_v0 }
  0xcb   : > { %849 = vst [vmem:[#allocation3 + $0x480] sm:$0xff] %v13996_v0  ;;  %850 = vst [vmem:[#allocation3 + $0x488] sm:$0xff] %v13996_v0 }
  0xcc   : > { %851 = vst [vmem:[#allocation3 + $0x490] sm:$0xff] %v13996_v0  ;;  %852 = vst [vmem:[#allocation3 + $0x498] sm:$0xff] %v13996_v0 }
  0xcd   : > { %853 = vst [vmem:[#allocation3 + $0x4a0] sm:$0xff] %v13996_v0  ;;  %854 = vst [vmem:[#allocation3 + $0x4a8] sm:$0xff] %v13996_v0 }
  0xce   : > { %855 = vst [vmem:[#allocation3 + $0x4b0] sm:$0xff] %v13996_v0  ;;  %856 = vst [vmem:[#allocation3 + $0x4b8] sm:$0xff] %v13996_v0 }
  0xcf   : > { %857 = vst [vmem:[#allocation3 + $0x4c0] sm:$0xff] %v13996_v0  ;;  %858 = vst [vmem:[#allocation3 + $0x4c8] sm:$0xff] %v13996_v0 }
  0xd0   : > { %859 = vst [vmem:[#allocation3 + $0x4d0] sm:$0xff] %v13996_v0  ;;  %860 = vst [vmem:[#allocation3 + $0x4d8] sm:$0xff] %v13996_v0 }
  0xd1   : > { %861 = vst [vmem:[#allocation3 + $0x4e0] sm:$0xff] %v13996_v0  ;;  %862 = vst [vmem:[#allocation3 + $0x4e8] sm:$0xff] %v13996_v0 }
  0xd2   : > { %863 = vst [vmem:[#allocation3 + $0x4f0] sm:$0xff] %v13996_v0  ;;  %864 = vst [vmem:[#allocation3 + $0x4f8] sm:$0xff] %v13996_v0 }
  0xd3   : > { %865 = vst [vmem:[#allocation3 + $0x500] sm:$0xff] %v13996_v0  ;;  %866 = vst [vmem:[#allocation3 + $0x508] sm:$0xff] %v13996_v0 }
  0xd4   : > { %867 = vst [vmem:[#allocation3 + $0x510] sm:$0xff] %v13996_v0  ;;  %868 = vst [vmem:[#allocation3 + $0x518] sm:$0xff] %v13996_v0 }
  0xd5   : > { %869 = vst [vmem:[#allocation3 + $0x520] sm:$0xff] %v13996_v0  ;;  %870 = vst [vmem:[#allocation3 + $0x528] sm:$0xff] %v13996_v0 }
  0xd6   : > { %871 = vst [vmem:[#allocation3 + $0x530] sm:$0xff] %v13996_v0  ;;  %872 = vst [vmem:[#allocation3 + $0x538] sm:$0xff] %v13996_v0 }
  0xd7   : > { %873 = vst [vmem:[#allocation3 + $0x540] sm:$0xff] %v13996_v0  ;;  %874 = vst [vmem:[#allocation3 + $0x548] sm:$0xff] %v13996_v0 }
  0xd8   : > { %875 = vst [vmem:[#allocation3 + $0x550] sm:$0xff] %v13996_v0  ;;  %876 = vst [vmem:[#allocation3 + $0x558] sm:$0xff] %v13996_v0 }
  0xd9   : > { %877 = vst [vmem:[#allocation3 + $0x560] sm:$0xff] %v13996_v0  ;;  %878 = vst [vmem:[#allocation3 + $0x568] sm:$0xff] %v13996_v0 }
  0xda   : > { %879 = vst [vmem:[#allocation3 + $0x570] sm:$0xff] %v13996_v0  ;;  %880 = vst [vmem:[#allocation3 + $0x578] sm:$0xff] %v13996_v0 }
  0xdb   : > { %881 = vst [vmem:[#allocation3 + $0x580] sm:$0xff] %v13996_v0  ;;  %882 = vst [vmem:[#allocation3 + $0x588] sm:$0xff] %v13996_v0 }
  0xdc   : > { %883 = vst [vmem:[#allocation3 + $0x590] sm:$0xff] %v13996_v0  ;;  %884 = vst [vmem:[#allocation3 + $0x598] sm:$0xff] %v13996_v0 }
  0xdd   : > { %885 = vst [vmem:[#allocation3 + $0x5a0] sm:$0xff] %v13996_v0  ;;  %886 = vst [vmem:[#allocation3 + $0x5a8] sm:$0xff] %v13996_v0 }
  0xde   : > { %887 = vst [vmem:[#allocation3 + $0x5b0] sm:$0xff] %v13996_v0  ;;  %888 = vst [vmem:[#allocation3 + $0x5b8] sm:$0xff] %v13996_v0 }
  0xdf   : > { %889 = vst [vmem:[#allocation3 + $0x5c0] sm:$0xff] %v13996_v0  ;;  %890 = vst [vmem:[#allocation3 + $0x5c8] sm:$0xff] %v13996_v0 }
  0xe0   : > { %891 = vst [vmem:[#allocation3 + $0x5d0] sm:$0xff] %v13996_v0  ;;  %892 = vst [vmem:[#allocation3 + $0x5d8] sm:$0xff] %v13996_v0 }
  0xe1   : > { %893 = vst [vmem:[#allocation3 + $0x5e0] sm:$0xff] %v13996_v0  ;;  %894 = vst [vmem:[#allocation3 + $0x5e8] sm:$0xff] %v13996_v0 }
  0xe2   : > { %895 = vst [vmem:[#allocation3 + $0x5f0] sm:$0xff] %v13996_v0  ;;  %896 = vst [vmem:[#allocation3 + $0x5f8] sm:$0xff] %v13996_v0 }
  0xe3   : > { %897 = vst [vmem:[#allocation3 + $0x600] sm:$0xff] %v13996_v0  ;;  %898 = vst [vmem:[#allocation3 + $0x608] sm:$0xff] %v13996_v0 }
  0xe4   : > { %899 = vst [vmem:[#allocation3 + $0x610] sm:$0xff] %v13996_v0  ;;  %900 = vst [vmem:[#allocation3 + $0x618] sm:$0xff] %v13996_v0 }
  0xe5   : > { %901 = vst [vmem:[#allocation3 + $0x620] sm:$0xff] %v13996_v0  ;;  %902 = vst [vmem:[#allocation3 + $0x628] sm:$0xff] %v13996_v0 }
  0xe6   : > { %903 = vst [vmem:[#allocation3 + $0x630] sm:$0xff] %v13996_v0  ;;  %904 = vst [vmem:[#allocation3 + $0x638] sm:$0xff] %v13996_v0 }
  0xe7   : > { %905 = vst [vmem:[#allocation3 + $0x640] sm:$0xff] %v13996_v0  ;;  %906 = vst [vmem:[#allocation3 + $0x648] sm:$0xff] %v13996_v0 }
  0xe8   : > { %907 = vst [vmem:[#allocation3 + $0x650] sm:$0xff] %v13996_v0  ;;  %908 = vst [vmem:[#allocation3 + $0x658] sm:$0xff] %v13996_v0 }
  0xe9   : > { %909 = vst [vmem:[#allocation3 + $0x660] sm:$0xff] %v13996_v0  ;;  %910 = vst [vmem:[#allocation3 + $0x668] sm:$0xff] %v13996_v0 }
  0xea   : > { %911 = vst [vmem:[#allocation3 + $0x670] sm:$0xff] %v13996_v0  ;;  %912 = vst [vmem:[#allocation3 + $0x678] sm:$0xff] %v13996_v0 }
  0xeb   : > { %913 = vst [vmem:[#allocation3 + $0x680] sm:$0xff] %v13996_v0  ;;  %914 = vst [vmem:[#allocation3 + $0x688] sm:$0xff] %v13996_v0 }
  0xec   : > { %915 = vst [vmem:[#allocation3 + $0x690] sm:$0xff] %v13996_v0  ;;  %916 = vst [vmem:[#allocation3 + $0x698] sm:$0xff] %v13996_v0 }
  0xed   : > { %917 = vst [vmem:[#allocation3 + $0x6a0] sm:$0xff] %v13996_v0  ;;  %918 = vst [vmem:[#allocation3 + $0x6a8] sm:$0xff] %v13996_v0 }
  0xee   : > { %919 = vst [vmem:[#allocation3 + $0x6b0] sm:$0xff] %v13996_v0  ;;  %920 = vst [vmem:[#allocation3 + $0x6b8] sm:$0xff] %v13996_v0 }
  0xef   : > { %921 = vst [vmem:[#allocation3 + $0x6c0] sm:$0xff] %v13996_v0  ;;  %922 = vst [vmem:[#allocation3 + $0x6c8] sm:$0xff] %v13996_v0 }
  0xf0   : > { %923 = vst [vmem:[#allocation3 + $0x6d0] sm:$0xff] %v13996_v0  ;;  %924 = vst [vmem:[#allocation3 + $0x6d8] sm:$0xff] %v13996_v0 }
  0xf1   : > { %925 = vst [vmem:[#allocation3 + $0x6e0] sm:$0xff] %v13996_v0  ;;  %926 = vst [vmem:[#allocation3 + $0x6e8] sm:$0xff] %v13996_v0 }
  0xf2   : > { %927 = vst [vmem:[#allocation3 + $0x6f0] sm:$0xff] %v13996_v0  ;;  %928 = vst [vmem:[#allocation3 + $0x6f8] sm:$0xff] %v13996_v0 }
  0xf3   : > { %929 = vst [vmem:[#allocation3 + $0x700] sm:$0xff] %v13996_v0  ;;  %930 = vst [vmem:[#allocation3 + $0x708] sm:$0xff] %v13996_v0 }
  0xf4   : > { %931 = vst [vmem:[#allocation3 + $0x710] sm:$0xff] %v13996_v0  ;;  %932 = vst [vmem:[#allocation3 + $0x718] sm:$0xff] %v13996_v0 }
  0xf5   : > { %933 = vst [vmem:[#allocation3 + $0x720] sm:$0xff] %v13996_v0  ;;  %934 = vst [vmem:[#allocation3 + $0x728] sm:$0xff] %v13996_v0 }
  0xf6   : > { %935 = vst [vmem:[#allocation3 + $0x730] sm:$0xff] %v13996_v0  ;;  %936 = vst [vmem:[#allocation3 + $0x738] sm:$0xff] %v13996_v0 }
  0xf7   : > { %937 = vst [vmem:[#allocation3 + $0x740] sm:$0xff] %v13996_v0  ;;  %938 = vst [vmem:[#allocation3 + $0x748] sm:$0xff] %v13996_v0 }
  0xf8   : > { %939 = vst [vmem:[#allocation3 + $0x750] sm:$0xff] %v13996_v0  ;;  %940 = vst [vmem:[#allocation3 + $0x758] sm:$0xff] %v13996_v0 }
  0xf9   : > { %941 = vst [vmem:[#allocation3 + $0x760] sm:$0xff] %v13996_v0  ;;  %942 = vst [vmem:[#allocation3 + $0x768] sm:$0xff] %v13996_v0 }
  0xfa   : > { %943 = vst [vmem:[#allocation3 + $0x770] sm:$0xff] %v13996_v0  ;;  %944 = vst [vmem:[#allocation3 + $0x778] sm:$0xff] %v13996_v0 }
  0xfb   : > { %945 = vst [vmem:[#allocation3 + $0x780] sm:$0xff] %v13996_v0  ;;  %946 = vst [vmem:[#allocation3 + $0x788] sm:$0xff] %v13996_v0 }
  0xfc   : > { %947 = vst [vmem:[#allocation3 + $0x790] sm:$0xff] %v13996_v0  ;;  %948 = vst [vmem:[#allocation3 + $0x798] sm:$0xff] %v13996_v0 }
  0xfd   : > { %949 = vst [vmem:[#allocation3 + $0x7a0] sm:$0xff] %v13996_v0  ;;  %950 = vst [vmem:[#allocation3 + $0x7a8] sm:$0xff] %v13996_v0 }
  0xfe   : > { %951 = vst [vmem:[#allocation3 + $0x7b0] sm:$0xff] %v13996_v0  ;;  %952 = vst [vmem:[#allocation3 + $0x7b8] sm:$0xff] %v13996_v0 }
  0xff   : > { %953 = vst [vmem:[#allocation3 + $0x7c0] sm:$0xff] %v13996_v0  ;;  %954 = vst [vmem:[#allocation3 + $0x7c8] sm:$0xff] %v13996_v0 }
 0x100   : > { %955 = vst [vmem:[#allocation3 + $0x7d0] sm:$0xff] %v13996_v0  ;;  %956 = vst [vmem:[#allocation3 + $0x7d8] sm:$0xff] %v13996_v0 }
 0x101   : > { %957 = vst [vmem:[#allocation3 + $0x7e0] sm:$0xff] %v13996_v0  ;;  %958 = vst [vmem:[#allocation3 + $0x7e8] sm:$0xff] %v13996_v0 }
 0x102   : > { %959 = vst [vmem:[#allocation3 + $0x7f0] sm:$0xff] %v13996_v0  ;;  %960 = vst [vmem:[#allocation3 + $0x7f8] sm:$0xff] %v13996_v0 }
 0x103   : > { %961 = vst [vmem:[#allocation3 + $0x800] sm:$0xff] %v13996_v0  ;;  %962 = vst [vmem:[#allocation3 + $0x808] sm:$0xff] %v13996_v0 }
 0x104   : > { %963 = vst [vmem:[#allocation3 + $0x810] sm:$0xff] %v13996_v0  ;;  %964 = vst [vmem:[#allocation3 + $0x818] sm:$0xff] %v13996_v0 }
 0x105   : > { %965 = vst [vmem:[#allocation3 + $0x820] sm:$0xff] %v13996_v0  ;;  %966 = vst [vmem:[#allocation3 + $0x828] sm:$0xff] %v13996_v0 }
 0x106   : > { %967 = vst [vmem:[#allocation3 + $0x830] sm:$0xff] %v13996_v0  ;;  %968 = vst [vmem:[#allocation3 + $0x838] sm:$0xff] %v13996_v0 }
 0x107   : > { %969 = vst [vmem:[#allocation3 + $0x840] sm:$0xff] %v13996_v0  ;;  %970 = vst [vmem:[#allocation3 + $0x848] sm:$0xff] %v13996_v0 }
 0x108   : > { %971 = vst [vmem:[#allocation3 + $0x850] sm:$0xff] %v13996_v0  ;;  %972 = vst [vmem:[#allocation3 + $0x858] sm:$0xff] %v13996_v0 }
 0x109   : > { %973 = vst [vmem:[#allocation3 + $0x860] sm:$0xff] %v13996_v0  ;;  %974 = vst [vmem:[#allocation3 + $0x868] sm:$0xff] %v13996_v0 }
 0x10a   : > { %975 = vst [vmem:[#allocation3 + $0x870] sm:$0xff] %v13996_v0  ;;  %976 = vst [vmem:[#allocation3 + $0x878] sm:$0xff] %v13996_v0 }
 0x10b   : > { %977 = vst [vmem:[#allocation3 + $0x880] sm:$0xff] %v13996_v0  ;;  %978 = vst [vmem:[#allocation3 + $0x888] sm:$0xff] %v13996_v0 }
 0x10c   : > { %979 = vst [vmem:[#allocation3 + $0x890] sm:$0xff] %v13996_v0  ;;  %980 = vst [vmem:[#allocation3 + $0x898] sm:$0xff] %v13996_v0 }
 0x10d   : > { %981 = vst [vmem:[#allocation3 + $0x8a0] sm:$0xff] %v13996_v0  ;;  %982 = vst [vmem:[#allocation3 + $0x8a8] sm:$0xff] %v13996_v0 }
 0x10e   : > { %983 = vst [vmem:[#allocation3 + $0x8b0] sm:$0xff] %v13996_v0  ;;  %984 = vst [vmem:[#allocation3 + $0x8b8] sm:$0xff] %v13996_v0 }
 0x10f   : > { %985 = vst [vmem:[#allocation3 + $0x8c0] sm:$0xff] %v13996_v0  ;;  %986 = vst [vmem:[#allocation3 + $0x8c8] sm:$0xff] %v13996_v0 }
 0x110   : > { %987 = vst [vmem:[#allocation3 + $0x8d0] sm:$0xff] %v13996_v0  ;;  %988 = vst [vmem:[#allocation3 + $0x8d8] sm:$0xff] %v13996_v0 }
 0x111   : > { %989 = vst [vmem:[#allocation3 + $0x8e0] sm:$0xff] %v13996_v0  ;;  %990 = vst [vmem:[#allocation3 + $0x8e8] sm:$0xff] %v13996_v0 }
 0x112   : > { %991 = vst [vmem:[#allocation3 + $0x8f0] sm:$0xff] %v13996_v0  ;;  %992 = vst [vmem:[#allocation3 + $0x8f8] sm:$0xff] %v13996_v0 }
 0x113 PF: > { %v12614_v1 = vld [vmem:[%s14477_s29 + $0x4] ss:$16 sps:$4 sm:$0xff]   ;;  %v12618_v3 = vld [vmem:[%s14477_s29] ss:$16 sps:$4 sm:$0xff]   ;;  %p11691_p12 = scmp.ne.s32.totalorder %s13986_s20, 5 }
 0x114   : > { %v12616_v2 = vld [vmem:[%s14477_s29 + $0x204] ss:$16 sps:$4 sm:$0xff]   ;;  %3031 = vmatprep.subr.bf16.mxu1 %v12614_v1  ;;  %v12619_v4 = vld [vmem:[%s14477_s29 + $0x200] ss:$16 sps:$4 sm:$0xff]  }
 0x115   : > { %3304 = vmatprep.subr.bf16.mxu0 %v12616_v2  ;;  %v12620_v5 = vld [vmem:[%s14477_s29 + $0x24] ss:$16 sps:$4 sm:$0xff]   ;;  %3032 = vmatpush1.bf16.msra.mxu1 %v12618_v3  ;;  %v12624_v7 = vld [vmem:[%s14477_s29 + $0x20] ss:$16 sps:$4 sm:$0xff]   ;;  %v12718_v3 = vld [vmem:[%s14477_s29 + $0xc] ss:$16 sps:$4 sm:$0xff]  }
 0x116   : > { %3305 = vmatpush1.bf16.msra.mxu0 %v12619_v4  ;;  %v12622_v6 = vld [vmem:[%s14477_s29 + $0x224] ss:$16 sps:$4 sm:$0xff]   ;;  %3033 = vmatprep.subr.bf16.mxu1 %v12620_v5  ;;  %v12625_v8 = vld [vmem:[%s14477_s29 + $0x220] ss:$16 sps:$4 sm:$0xff]  }
 0x117   : > { %3306 = vmatprep.subr.bf16.mxu0 %v12622_v6  ;;  %v12626_v9 = vld [vmem:[%s14477_s29 + $0x44] ss:$16 sps:$4 sm:$0xff]   ;;  %v12630_v11 = vld [vmem:[%s14477_s29 + $0x40] ss:$16 sps:$4 sm:$0xff]   ;;  %v12716_v6 = vld [vmem:[%s14477_s29 + $0x8] ss:$16 sps:$4 sm:$0xff]  }
 0x118   : > { %v12628_v10 = vld [vmem:[%s14477_s29 + $0x244] ss:$16 sps:$4 sm:$0xff]   ;;  %v12631_v12 = vld [vmem:[%s14477_s29 + $0x240] ss:$16 sps:$4 sm:$0xff]  }
 0x119   : > { %3034 = vmatpush1.bf16.msra.mxu1 %v12624_v7  ;;  %v12632_v13 = vld [vmem:[%s14477_s29 + $0x64] ss:$16 sps:$4 sm:$0xff]   ;;  %v12636_v15 = vld [vmem:[%s14477_s29 + $0x60] ss:$16 sps:$4 sm:$0xff]  }
 0x11a   : > { %3307 = vmatpush1.bf16.msra.mxu0 %v12625_v8  ;;  %3035 = vmatprep.subr.bf16.mxu1 %v12626_v9  ;;  %v12634_v14 = vld [vmem:[%s14477_s29 + $0x264] ss:$16 sps:$4 sm:$0xff]   ;;  %v12637_v16 = vld [vmem:[%s14477_s29 + $0x260] ss:$16 sps:$4 sm:$0xff]   ;;  %v12727_v9 = vld [vmem:[%s14477_s29 + $0x2c] ss:$16 sps:$4 sm:$0xff]  }
 0x11b   : > { %3308 = vmatprep.subr.bf16.mxu0 %v12628_v10  ;;  %v12638_v17 = vld [vmem:[%s14477_s29 + $0x84] ss:$16 sps:$4 sm:$0xff]   ;;  %v12642_v19 = vld [vmem:[%s14477_s29 + $0x80] ss:$16 sps:$4 sm:$0xff]   ;;  %v12725_v10 = vld [vmem:[%s14477_s29 + $0x28] ss:$16 sps:$4 sm:$0xff]  }
 0x11c   : > { %v12640_v18 = vld [vmem:[%s14477_s29 + $0x284] ss:$16 sps:$4 sm:$0xff]   ;;  %v12643_v20 = vld [vmem:[%s14477_s29 + $0x280] ss:$16 sps:$4 sm:$0xff]  }
 0x11d   : > { %3036 = vmatpush1.bf16.msra.mxu1 %v12630_v11  ;;  %v12644_v21 = vld [vmem:[%s14477_s29 + $0xa4] ss:$16 sps:$4 sm:$0xff]   ;;  %v12648_v23 = vld [vmem:[%s14477_s29 + $0xa0] ss:$16 sps:$4 sm:$0xff]   ;;  %v12742_v11 = vld [vmem:[%s14477_s29 + $0x4c] ss:$16 sps:$4 sm:$0xff]  }
 0x11e   : > { %3309 = vmatpush1.bf16.msra.mxu0 %v12631_v12  ;;  %3037 = vmatprep.subr.bf16.mxu1 %v12632_v13  ;;  %v12646_v22 = vld [vmem:[%s14477_s29 + $0x2a4] ss:$16 sps:$4 sm:$0xff]   ;;  %v12649_v24 = vld [vmem:[%s14477_s29 + $0x2a0] ss:$16 sps:$4 sm:$0xff]  }
 0x11f   : > { %3310 = vmatprep.subr.bf16.mxu0 %v12634_v14  ;;  %v12650_v25 = vld [vmem:[%s14477_s29 + $0xc4] ss:$16 sps:$4 sm:$0xff]   ;;  %v12654_v27 = vld [vmem:[%s14477_s29 + $0xc0] ss:$16 sps:$4 sm:$0xff]  }
 0x120   : > { %v12652_v26 = vld [vmem:[%s14477_s29 + $0x2c4] ss:$16 sps:$4 sm:$0xff]   ;;  %v12655_v28 = vld [vmem:[%s14477_s29 + $0x2c0] ss:$16 sps:$4 sm:$0xff]  }
 0x121   : > { %3038 = vmatpush1.bf16.msra.mxu1 %v12636_v15  ;;  %v12656_v29 = vld [vmem:[%s14477_s29 + $0xe4] ss:$16 sps:$4 sm:$0xff]   ;;  %v12660_v31 = vld [vmem:[%s14477_s29 + $0xe0] ss:$16 sps:$4 sm:$0xff]  }
 0x122   : > { %3311 = vmatpush1.bf16.msra.mxu0 %v12637_v16  ;;  %3039 = vmatprep.subr.bf16.mxu1 %v12638_v17  ;;  %v12658_v30 = vld [vmem:[%s14477_s29 + $0x2e4] ss:$16 sps:$4 sm:$0xff]   ;;  %v12661_v32 = vld [vmem:[%s14477_s29 + $0x2e0] ss:$16 sps:$4 sm:$0xff]   ;;  %v12740_v16 = vld [vmem:[%s14477_s29 + $0x48] ss:$16 sps:$4 sm:$0xff]  }
 0x123   : > { %3312 = vmatprep.subr.bf16.mxu0 %v12640_v18  ;;  %v12662_v33 = vld [vmem:[%s14477_s29 + $0x104] ss:$16 sps:$4 sm:$0xff]   ;;  %v12666_v35 = vld [vmem:[%s14477_s29 + $0x100] ss:$16 sps:$4 sm:$0xff]   ;;  %v12751_v17 = vld [vmem:[%s14477_s29 + $0x6c] ss:$16 sps:$4 sm:$0xff]  }
 0x124   : > { %v12664_v34 = vld [vmem:[%s14477_s29 + $0x304] ss:$16 sps:$4 sm:$0xff]   ;;  %v12667_v36 = vld [vmem:[%s14477_s29 + $0x300] ss:$16 sps:$4 sm:$0xff]   ;;  %v12749_v18 = vld [vmem:[%s14477_s29 + $0x68] ss:$16 sps:$4 sm:$0xff]  }
 0x125   : > { %3040 = vmatpush1.bf16.msra.mxu1 %v12642_v19  ;;  %v12668_v37 = vld [vmem:[%s14477_s29 + $0x124] ss:$16 sps:$4 sm:$0xff]   ;;  %v12672_v39 = vld [vmem:[%s14477_s29 + $0x120] ss:$16 sps:$4 sm:$0xff]  }
 0x126   : > { %3313 = vmatpush1.bf16.msra.mxu0 %v12643_v20  ;;  %3041 = vmatprep.subr.bf16.mxu1 %v12644_v21  ;;  %v12670_v38 = vld [vmem:[%s14477_s29 + $0x324] ss:$16 sps:$4 sm:$0xff]   ;;  %v12673_v40 = vld [vmem:[%s14477_s29 + $0x320] ss:$16 sps:$4 sm:$0xff]   ;;  %v12766_v20 = vld [vmem:[%s14477_s29 + $0x8c] ss:$16 sps:$4 sm:$0xff]  }
 0x127   : > { %3314 = vmatprep.subr.bf16.mxu0 %v12646_v22  ;;  %v12674_v41 = vld [vmem:[%s14477_s29 + $0x144] ss:$16 sps:$4 sm:$0xff]   ;;  %v12678_v43 = vld [vmem:[%s14477_s29 + $0x140] ss:$16 sps:$4 sm:$0xff]  }
 0x128   : > { %v12676_v42 = vld [vmem:[%s14477_s29 + $0x344] ss:$16 sps:$4 sm:$0xff]   ;;  %v12679_v44 = vld [vmem:[%s14477_s29 + $0x340] ss:$16 sps:$4 sm:$0xff]  }
 0x129   : > { %3042 = vmatpush1.bf16.msra.mxu1 %v12648_v23  ;;  %v12680_v45 = vld [vmem:[%s14477_s29 + $0x164] ss:$16 sps:$4 sm:$0xff]   ;;  %v12684_v47 = vld [vmem:[%s14477_s29 + $0x160] ss:$16 sps:$4 sm:$0xff]  }
 0x12a   : > { %3315 = vmatpush1.bf16.msra.mxu0 %v12649_v24  ;;  %3043 = vmatprep.subr.bf16.mxu1 %v12650_v25  ;;  %v12682_v46 = vld [vmem:[%s14477_s29 + $0x364] ss:$16 sps:$4 sm:$0xff]   ;;  %v12685_v48 = vld [vmem:[%s14477_s29 + $0x360] ss:$16 sps:$4 sm:$0xff]   ;;  %v12764_v24 = vld [vmem:[%s14477_s29 + $0x88] ss:$16 sps:$4 sm:$0xff]  }
 0x12b   : > { %3316 = vmatprep.subr.bf16.mxu0 %v12652_v26  ;;  %v12686_v49 = vld [vmem:[%s14477_s29 + $0x184] ss:$16 sps:$4 sm:$0xff]   ;;  %v12690_v53 = vld [vmem:[%s14477_s29 + $0x180] ss:$16 sps:$4 sm:$0xff]   ;;  %v12775_v25 = vld [vmem:[%s14477_s29 + $0xac] ss:$16 sps:$4 sm:$0xff]  }
 0x12c   : > { %v12712_v50 = vld [vmem:[%s19790_s0 + $0x4] ss:$24 sps:$4 sm:$0xff]   ;;  %v12691_v54 = vld [vmem:[%s14477_s29 + $0x380] ss:$16 sps:$4 sm:$0xff]   ;;  %v12719_v7 = vld [vmem:[%s19790_s0 + $0x34] ss:$24 sps:$4 sm:$0xff]  }
 0x12d   : > { %3044 = vmatpush1.bf16.msra.mxu1 %v12654_v27  ;;  %v12688_v51 = vld [vmem:[%s14477_s29 + $0x384] ss:$16 sps:$4 sm:$0xff]   ;;  %3063 = vmatprep.mubr.bf16.mxu1 %v12712_v50  ;;  %v12696_v57 = vld [vmem:[%s14477_s29 + $0x1a0] ss:$16 sps:$4 sm:$0xff]   ;;  %v12773_v26 = vld [vmem:[%s14477_s29 + $0xa8] ss:$16 sps:$4 sm:$0xff]  }
 0x12e   : > { %3317 = vmatpush1.bf16.msra.mxu0 %v12655_v28  ;;  %3045 = vmatprep.subr.bf16.mxu1 %v12656_v29  ;;  %v12715_v52 = vld [vmem:[%s19790_s0 + $0xc] ss:$24 sps:$4 sm:$0xff]   ;;  %v12697_v58 = vld [vmem:[%s14477_s29 + $0x3a0] ss:$16 sps:$4 sm:$0xff]   ;;  %v12721_v8 = vld [vmem:[%s19790_s0 + $0x3c] ss:$24 sps:$4 sm:$0xff]  }
 0x12f   : > { %3318 = vmatprep.subr.bf16.mxu0 %v12658_v30  ;;  %3336 = vmatprep.mubr.bf16.mxu0 %v12715_v52  ;;  %v12692_v55 = vld [vmem:[%s14477_s29 + $0x1a4] ss:$16 sps:$4 sm:$0xff]   ;;  %v12702_v61 = vld [vmem:[%s14477_s29 + $0x1c0] ss:$16 sps:$4 sm:$0xff]   ;;  %v12790_v27 = vld [vmem:[%s14477_s29 + $0xcc] ss:$16 sps:$4 sm:$0xff]  }
 0x130   : > { %v12694_v56 = vld [vmem:[%s14477_s29 + $0x3a4] ss:$16 sps:$4 sm:$0xff]   ;;  %v12703_v62 = vld [vmem:[%s14477_s29 + $0x3c0] ss:$16 sps:$4 sm:$0xff]   ;;  %v12836_v50 = vld [vmem:[%s14477_s29 + $0x148] ss:$16 sps:$4 sm:$0xff]  }
 0x131   : > { %3046 = vmatpush1.bf16.msra.mxu1 %v12660_v31  ;;  %v12698_v59 = vld [vmem:[%s14477_s29 + $0x1c4] ss:$16 sps:$4 sm:$0xff]   ;;  %v12708_v1 = vld [vmem:[%s14477_s29 + $0x1e0] ss:$16 sps:$4 sm:$0xff]  }
 0x132   : > { %3319 = vmatpush1.bf16.msra.mxu0 %v12661_v32  ;;  %3047 = vmatprep.subr.bf16.mxu1 %v12662_v33  ;;  %v12700_v60 = vld [vmem:[%s14477_s29 + $0x3c4] ss:$16 sps:$4 sm:$0xff]   ;;  %v12709_v2 = vld [vmem:[%s14477_s29 + $0x3e0] ss:$16 sps:$4 sm:$0xff]   ;;  %v12788_v32 = vld [vmem:[%s14477_s29 + $0xc8] ss:$16 sps:$4 sm:$0xff]  }
 0x133   : > { %3320 = vmatprep.subr.bf16.mxu0 %v12664_v34  ;;  %v12704_v63 = vld [vmem:[%s14477_s29 + $0x1e4] ss:$16 sps:$4 sm:$0xff]   ;;  %v12710_v4 = vld [vmem:[%s19790_s0] ss:$24 sps:$4 sm:$0xff]   ;;  %v12723_v12 = vld [vmem:[%s19790_s0 + $0x30] ss:$24 sps:$4 sm:$0xff]  }
 0x134   : > { %v12706_v0 = vld [vmem:[%s14477_s29 + $0x3e4] ss:$16 sps:$4 sm:$0xff]   ;;  %v12713_v5 = vld [vmem:[%s19790_s0 + $0x8] ss:$24 sps:$4 sm:$0xff]   ;;  %v12724_v13 = vld [vmem:[%s19790_s0 + $0x38] ss:$24 sps:$4 sm:$0xff]  }
 0x135   : > { %3048 = vmatpush1.bf16.msra.mxu1 %v12666_v35  ;;  %v12728_v14 = vld [vmem:[%s19790_s0 + $0x64] ss:$24 sps:$4 sm:$0xff]   ;;  %v12732_v19 = vld [vmem:[%s19790_s0 + $0x60] ss:$24 sps:$4 sm:$0xff]   ;;  %v12734_v22 = vld [vmem:[%s19790_s0 + $0x94] ss:$24 sps:$4 sm:$0xff]  }
 0x136   : > { %3321 = vmatpush1.bf16.msra.mxu0 %v12667_v36  ;;  %3049 = vmatprep.subr.bf16.mxu1 %v12668_v37  ;;  %v12730_v15 = vld [vmem:[%s19790_s0 + $0x6c] ss:$24 sps:$4 sm:$0xff]   ;;  %v12733_v21 = vld [vmem:[%s19790_s0 + $0x68] ss:$24 sps:$4 sm:$0xff]   ;;  %v12736_v23 = vld [vmem:[%s19790_s0 + $0x9c] ss:$24 sps:$4 sm:$0xff]  }
 0x137   : > { %3322 = vmatprep.subr.bf16.mxu0 %v12670_v38  ;;  %v12738_v28 = vld [vmem:[%s19790_s0 + $0x90] ss:$24 sps:$4 sm:$0xff]   ;;  %v12743_v30 = vld [vmem:[%s19790_s0 + $0xc4] ss:$24 sps:$4 sm:$0xff]   ;;  %v12747_v36 = vld [vmem:[%s19790_s0 + $0xc0] ss:$24 sps:$4 sm:$0xff]  }
 0x138   : > { %v12739_v29 = vld [vmem:[%s19790_s0 + $0x98] ss:$24 sps:$4 sm:$0xff]   ;;  %v12745_v31 = vld [vmem:[%s19790_s0 + $0xcc] ss:$24 sps:$4 sm:$0xff]   ;;  %v12748_v37 = vld [vmem:[%s19790_s0 + $0xc8] ss:$24 sps:$4 sm:$0xff]  }
 0x139   : > { %3050 = vmatpush1.bf16.msra.mxu1 %v12672_v39  ;;  %v12799_v33 = vld [vmem:[%s14477_s29 + $0xec] ss:$16 sps:$4 sm:$0xff]   ;;  %v12797_v34 = vld [vmem:[%s14477_s29 + $0xe8] ss:$16 sps:$4 sm:$0xff]   ;;  %v12848_v52 = vld [vmem:[%s14477_s29 + $0x420] ss:$16 sps:$4 sm:$0xff]  }
 0x13a   : > { %3323 = vmatpush1.bf16.msra.mxu0 %v12673_v40  ;;  %3051 = vmatprep.subr.bf16.mxu1 %v12674_v41  ;;  %v12814_v35 = vld [vmem:[%s14477_s29 + $0x10c] ss:$16 sps:$4 sm:$0xff]   ;;  %v12812_v40 = vld [vmem:[%s14477_s29 + $0x108] ss:$16 sps:$4 sm:$0xff]  }
 0x13b   : > { %3324 = vmatprep.subr.bf16.mxu0 %v12676_v42  ;;  %v12752_v38 = vld [vmem:[%s19790_s0 + $0xf4] ss:$24 sps:$4 sm:$0xff]   ;;  %v12756_v42 = vld [vmem:[%s19790_s0 + $0xf0] ss:$24 sps:$4 sm:$0xff]  }
 0x13c   : > { %v12754_v39 = vld [vmem:[%s19790_s0 + $0xfc] ss:$24 sps:$4 sm:$0xff]  }
 0x13d   : > { %3052 = vmatpush1.bf16.msra.mxu1 %v12678_v43  ;;  %v12823_v41 = vld [vmem:[%s14477_s29 + $0x12c] ss:$16 sps:$4 sm:$0xff]   ;;  %v12757_v43 = vld [vmem:[%s19790_s0 + $0xf8] ss:$24 sps:$4 sm:$0xff]  }
 0x13e   : > { %3325 = vmatpush1.bf16.msra.mxu0 %v12679_v44  ;;  %3053 = vmatprep.subr.bf16.mxu1 %v12680_v45  ;;  %v12821_v44 = vld [vmem:[%s14477_s29 + $0x128] ss:$16 sps:$4 sm:$0xff]   ;;  %v12758_v45 = vld [vmem:[%s19790_s0 + $0x124] ss:$24 sps:$4 sm:$0xff]  }
 0x13f   : > { %3326 = vmatprep.subr.bf16.mxu0 %v12682_v46  ;;  %v12760_v46 = vld [vmem:[%s19790_s0 + $0x12c] ss:$24 sps:$4 sm:$0xff]  }
 0x141   : > { %3054 = vmatpush1.bf16.msra.mxu1 %v12684_v47  ;;  %v12838_v47 = vld [vmem:[%s14477_s29 + $0x14c] ss:$16 sps:$4 sm:$0xff]  }
 0x142   : > { %3327 = vmatpush1.bf16.msra.mxu0 %v12685_v48  ;;  %3055 = vmatprep.subr.bf16.mxu1 %v12686_v49  ;;  %v12845_v48 = vld [vmem:[%s14477_s29 + $0x400] ss:$16 sps:$4 sm:$0xff]   ;;  %v12847_v49 = vld [vmem:[%s14477_s29 + $0x404] ss:$16 sps:$4 sm:$0xff]  }
 0x143   : > { %3328 = vmatprep.subr.bf16.mxu0 %v12688_v51  ;;  %v12850_v51 = vld [vmem:[%s14477_s29 + $0x424] ss:$16 sps:$4 sm:$0xff]  }
 0x145   : > { %3056 = vmatpush1.bf16.msra.mxu1 %v12690_v53  ;;  %v12853_v53 = vld [vmem:[%s14477_s29 + $0x16c] ss:$16 sps:$4 sm:$0xff]  }
 0x146   : > { %3329 = vmatpush1.bf16.msra.mxu0 %v12691_v54  ;;  %3057 = vmatprep.subr.bf16.mxu1 %v12692_v55  ;;  %v12762_v54 = vld [vmem:[%s19790_s0 + $0x120] ss:$24 sps:$4 sm:$0xff]  }
 0x147   : > { %3330 = vmatprep.subr.bf16.mxu0 %v12694_v56  ;;  %v12851_v55 = vld [vmem:[%s14477_s29 + $0x168] ss:$16 sps:$4 sm:$0xff]   ;;  %v12860_v56 = vld [vmem:[%s14477_s29 + $0x440] ss:$16 sps:$4 sm:$0xff]  }
 0x149   : > { %3058 = vmatpush1.bf16.msra.mxu1 %v12696_v57  ;;  %v12862_v57 = vld [vmem:[%s14477_s29 + $0x444] ss:$16 sps:$4 sm:$0xff]  }
 0x14a   : > { %3331 = vmatpush1.bf16.msra.mxu0 %v12697_v58  ;;  %3059 = vmatprep.subr.bf16.mxu1 %v12698_v59  ;;  %v12763_v58 = vld [vmem:[%s19790_s0 + $0x128] ss:$24 sps:$4 sm:$0xff]   ;;  %v12767_v59 = vld [vmem:[%s19790_s0 + $0x154] ss:$24 sps:$4 sm:$0xff]  }
 0x14b   : > { %3332 = vmatprep.subr.bf16.mxu0 %v12700_v60  ;;  %v12769_v60 = vld [vmem:[%s19790_s0 + $0x15c] ss:$24 sps:$4 sm:$0xff]  }
 0x14d   : > { %3060 = vmatpush1.bf16.msra.mxu1 %v12702_v61  ;;  %v12865_v61 = vld [vmem:[%s14477_s29 + $0x464] ss:$16 sps:$4 sm:$0xff]  }
 0x14e   : > { %3333 = vmatpush1.bf16.msra.mxu0 %v12703_v62  ;;  %3061 = vmatprep.subr.bf16.mxu1 %v12704_v63  ;;  %v12863_v62 = vld [vmem:[%s14477_s29 + $0x460] ss:$16 sps:$4 sm:$0xff]   ;;  %v12874_v63 = vld [vmem:[%s14477_s29 + $0x484] ss:$16 sps:$4 sm:$0xff]  }
 0x14f   : > { %3334 = vmatprep.subr.bf16.mxu0 %v12706_v0  ;;  %v12875_v0 = vld [vmem:[%s14477_s29 + $0x188] ss:$16 sps:$4 sm:$0xff]  }
 0x151   : > { %3062 = vmatpush1.bf16.msra.mxu1 %v12708_v1  ;;  %v12877_v1 = vld [vmem:[%s14477_s29 + $0x18c] ss:$16 sps:$4 sm:$0xff]  }
 0x152   : > { %3335 = vmatpush1.bf16.msra.mxu0 %v12709_v2  ;;  %3850 = vmatprep.subr.bf16.mxu1 %v12718_v3  ;;  %v12771_v2 = vld [vmem:[%s19790_s0 + $0x150] ss:$24 sps:$4 sm:$0xff]  }
 0x153   : > { %3577 = vmatprep.subr.bf16.mxu0 %v12847_v49  ;;  %v12872_v3 = vld [vmem:[%s14477_s29 + $0x480] ss:$16 sps:$4 sm:$0xff]  }
 0x154   : > { %3064 = vmatmul.mubr.bf16.vlgmr.msra.gmra.mrb[0].mxu1 %v12710_v4  ;;  %v12772_v4 = vld [vmem:[%s19790_s0 + $0x158] ss:$24 sps:$4 sm:$0xff]  }
 0x155   : > { %3337 = vmatmul.mubr.bf16.vlgmr.msra.gmra.mrb[0].mxu0 %v12713_v5  ;;  %3851 = vmatpush1.bf16.msra.mxu1 %v12716_v6  ;;  %v12776_v5 = vld [vmem:[%s19790_s0 + $0x184] ss:$24 sps:$4 sm:$0xff]   ;;  %v12810_v49 = vld [vmem:[%s19790_s0 + $0x240] ss:$24 sps:$4 sm:$0xff]  }
 0x156   : > { %3073 = vmatprep.mubr.bf16.mxu1 %v12719_v7  ;;  %3346 = vmatprep.mubr.bf16.mxu0 %v12721_v8  ;;  %v12778_v6 = vld [vmem:[%s19790_s0 + $0x18c] ss:$24 sps:$4 sm:$0xff]   ;;  %v12878_v8 = vld [vmem:[%s14477_s29 + $0x4a0] ss:$16 sps:$4 sm:$0xff]  }
 0x157   : > { %3852 = vmatprep.subr.bf16.mxu1 %v12727_v9  ;;  %3578 = vmatpush1.bf16.msra.mxu0 %v12845_v48  ;;  %v12880_v7 = vld [vmem:[%s14477_s29 + $0x4a4] ss:$16 sps:$4 sm:$0xff]  }
 0x158   : > { %3579 = vmatprep.subr.bf16.mxu0 %v12850_v51  ;;  %v12889_v9 = vld [vmem:[%s14477_s29 + $0x4c4] ss:$16 sps:$4 sm:$0xff]  }
 0x159   : > { %3853 = vmatpush1.bf16.msra.mxu1 %v12725_v10  ;;  %v12893_v10 = vld [vmem:[%s14477_s29 + $0x1a8] ss:$16 sps:$4 sm:$0xff]   ;;  %v12946_v48 = vld [vmem:[%s14477_s29 + $0x5c4] ss:$16 sps:$4 sm:$0xff]  }
 0x15a   : > { %3854 = vmatprep.subr.bf16.mxu1 %v12742_v11  ;;  %v12895_v11 = vld [vmem:[%s14477_s29 + $0x1ac] ss:$16 sps:$4 sm:$0xff]  }
 0x15b   : > { %3580 = vmatpush1.bf16.msra.mxu0 %v12848_v52  ;;  %v12815_v51 = vld [vmem:[%s19790_s0 + $0x274] ss:$24 sps:$4 sm:$0xff]  }
 0x15c   : > { %3074 = vmatmul.mubr.bf16.gmra.mrb[4].mxu1 %v12723_v12  ;;  %3581 = vmatprep.subr.bf16.mxu0 %v12862_v57  ;;  %v12887_v12 = vld [vmem:[%s14477_s29 + $0x4c0] ss:$16 sps:$4 sm:$0xff]   ;;  %v12817_v52 = vld [vmem:[%s19790_s0 + $0x27c] ss:$24 sps:$4 sm:$0xff]  }
 0x15d   : > { %3347 = vmatmul.mubr.bf16.gmra.mrb[4].mxu0 %v12724_v13  ;;  %3083 = vmatprep.mubr.bf16.mxu1 %v12728_v14  ;;  %v12780_v13 = vld [vmem:[%s19790_s0 + $0x180] ss:$24 sps:$4 sm:$0xff]  }
 0x15e   : > { %3356 = vmatprep.mubr.bf16.mxu0 %v12730_v15  ;;  %3855 = vmatpush1.bf16.msra.mxu1 %v12740_v16  ;;  %v12781_v14 = vld [vmem:[%s19790_s0 + $0x188] ss:$24 sps:$4 sm:$0xff]   ;;  %v12782_v15 = vld [vmem:[%s19790_s0 + $0x1b4] ss:$24 sps:$4 sm:$0xff]   ;;  %v12820_v57 = vld [vmem:[%s19790_s0 + $0x278] ss:$24 sps:$4 sm:$0xff]  }
 0x15f   : > { %3856 = vmatprep.subr.bf16.mxu1 %v12751_v17  ;;  %3582 = vmatpush1.bf16.msra.mxu0 %v12860_v56  ;;  %v12784_v16 = vld [vmem:[%s19790_s0 + $0x1bc] ss:$24 sps:$4 sm:$0xff]   ;;  %v12819_v56 = vld [vmem:[%s19790_s0 + $0x270] ss:$24 sps:$4 sm:$0xff]  }
 0x160   : > { %3583 = vmatprep.subr.bf16.mxu0 %v12865_v61  ;;  %v12892_v17 = vld [vmem:[%s14477_s29 + $0x4e4] ss:$16 sps:$4 sm:$0xff]   ;;  %v12829_v61 = vld [vmem:[%s19790_s0 + $0x2a8] ss:$24 sps:$4 sm:$0xff]  }
 0x162   : > { %3857 = vmatpush1.bf16.msra.mxu1 %v12749_v18  ;;  %v12890_v18 = vld [vmem:[%s14477_s29 + $0x4e0] ss:$16 sps:$4 sm:$0xff]  }
 0x163   : > { %3858 = vmatprep.subr.bf16.mxu1 %v12766_v20  ;;  %3584 = vmatpush1.bf16.msra.mxu0 %v12863_v62  ;;  %v12786_v20 = vld [vmem:[%s19790_s0 + $0x1b0] ss:$24 sps:$4 sm:$0xff]   ;;  %v12830_v62 = vld [vmem:[%s19790_s0 + $0x2d4] ss:$24 sps:$4 sm:$0xff]  }
 0x164   : > { %3084 = vmatmul.mubr.bf16.gmra.mrb[8].mxu1 %v12732_v19  ;;  %3585 = vmatprep.subr.bf16.mxu0 %v12874_v63  ;;  %v12904_v19 = vld [vmem:[%s14477_s29 + $0x504] ss:$16 sps:$4 sm:$0xff]  }
 0x165   : > { %3357 = vmatmul.mubr.bf16.gmra.mrb[8].mxu0 %v12733_v21  ;;  %3093 = vmatprep.mubr.bf16.mxu1 %v12734_v22  ;;  %v12787_v21 = vld [vmem:[%s19790_s0 + $0x1b8] ss:$24 sps:$4 sm:$0xff]   ;;  %v12791_v22 = vld [vmem:[%s19790_s0 + $0x1e4] ss:$24 sps:$4 sm:$0xff]  }
 0x166   : > { %3366 = vmatprep.mubr.bf16.mxu0 %v12736_v23  ;;  %3859 = vmatpush1.bf16.msra.mxu1 %v12764_v24  ;;  %v12902_v23 = vld [vmem:[%s14477_s29 + $0x500] ss:$16 sps:$4 sm:$0xff]   ;;  %v12917_v24 = vld [vmem:[%s14477_s29 + $0x1c8] ss:$16 sps:$4 sm:$0xff]   ;;  %v12832_v63 = vld [vmem:[%s19790_s0 + $0x2dc] ss:$24 sps:$4 sm:$0xff]  }
 0x167   : > { %3860 = vmatprep.subr.bf16.mxu1 %v12775_v25  ;;  %3586 = vmatpush1.bf16.msra.mxu0 %v12872_v3  ;;  %v12919_v25 = vld [vmem:[%s14477_s29 + $0x1cc] ss:$16 sps:$4 sm:$0xff]  }
 0x168   : > { %3587 = vmatprep.subr.bf16.mxu0 %v12880_v7  ;;  %v12841_v3 = vld [vmem:[%s19790_s0 + $0x30c] ss:$24 sps:$4 sm:$0xff]   ;;  %v12856_v7 = vld [vmem:[%s19790_s0 + $0x33c] ss:$24 sps:$4 sm:$0xff]  }
 0x16a   : > { %3861 = vmatpush1.bf16.msra.mxu1 %v12773_v26  ;;  %v12793_v26 = vld [vmem:[%s19790_s0 + $0x1ec] ss:$24 sps:$4 sm:$0xff]  }
 0x16b   : > { %3862 = vmatprep.subr.bf16.mxu1 %v12790_v27  ;;  %3588 = vmatpush1.bf16.msra.mxu0 %v12878_v8  ;;  %v12907_v27 = vld [vmem:[%s14477_s29 + $0x524] ss:$16 sps:$4 sm:$0xff]   ;;  %v12858_v8 = vld [vmem:[%s19790_s0 + $0x330] ss:$24 sps:$4 sm:$0xff]  }
 0x16c   : > { %3094 = vmatmul.mubr.bf16.gmra.mrb[12].mxu1 %v12738_v28  ;;  %3589 = vmatprep.subr.bf16.mxu0 %v12889_v9  ;;  %v12905_v28 = vld [vmem:[%s14477_s29 + $0x520] ss:$16 sps:$4 sm:$0xff]  }
 0x16d   : > { %3367 = vmatmul.mubr.bf16.gmra.mrb[12].mxu0 %v12739_v29  ;;  %3103 = vmatprep.mubr.bf16.mxu1 %v12743_v30  ;;  %v12916_v29 = vld [vmem:[%s14477_s29 + $0x544] ss:$16 sps:$4 sm:$0xff]   ;;  %v12795_v30 = vld [vmem:[%s19790_s0 + $0x1e0] ss:$24 sps:$4 sm:$0xff]  }
 0x16e   : > { %3376 = vmatprep.mubr.bf16.mxu0 %v12745_v31  ;;  %3863 = vmatpush1.bf16.msra.mxu1 %v12788_v32  ;;  %v12796_v31 = vld [vmem:[%s19790_s0 + $0x1e8] ss:$24 sps:$4 sm:$0xff]   ;;  %v12800_v32 = vld [vmem:[%s19790_s0 + $0x214] ss:$24 sps:$4 sm:$0xff]   ;;  %v12859_v9 = vld [vmem:[%s19790_s0 + $0x338] ss:$24 sps:$4 sm:$0xff]  }
 0x16f   : > { %3864 = vmatprep.subr.bf16.mxu1 %v12799_v33  ;;  %3590 = vmatpush1.bf16.msra.mxu0 %v12887_v12  ;;  %v12914_v33 = vld [vmem:[%s14477_s29 + $0x540] ss:$16 sps:$4 sm:$0xff]  }
 0x170   : > { %3591 = vmatprep.subr.bf16.mxu0 %v12892_v17  ;;  %v12870_v12 = vld [vmem:[%s19790_s0 + $0x360] ss:$24 sps:$4 sm:$0xff]  }
 0x171   : > { %v12886_v17 = vld [vmem:[%s19790_s0 + $0x398] ss:$24 sps:$4 sm:$0xff]  }
 0x172   : > { %3865 = vmatpush1.bf16.msra.mxu1 %v12797_v34  ;;  %v12935_v34 = vld [vmem:[%s14477_s29 + $0x1e8] ss:$16 sps:$4 sm:$0xff]  }
 0x173   : > { %3866 = vmatprep.subr.bf16.mxu1 %v12814_v35  ;;  %3592 = vmatpush1.bf16.msra.mxu0 %v12890_v18  ;;  %v12937_v35 = vld [vmem:[%s14477_s29 + $0x1ec] ss:$16 sps:$4 sm:$0xff]  }
 0x174   : > { %3104 = vmatmul.mubr.bf16.gmra.mrb[16].mxu1 %v12747_v36  ;;  %3593 = vmatprep.subr.bf16.mxu0 %v12904_v19  ;;  %v12802_v36 = vld [vmem:[%s19790_s0 + $0x21c] ss:$24 sps:$4 sm:$0xff]   ;;  %v12898_v19 = vld [vmem:[%s19790_s0 + $0x3cc] ss:$24 sps:$4 sm:$0xff]  }
 0x175   : > { %3377 = vmatmul.mubr.bf16.gmra.mrb[16].mxu0 %v12748_v37  ;;  %3113 = vmatprep.mubr.bf16.mxu1 %v12752_v38  ;;  %v12922_v37 = vld [vmem:[%s14477_s29 + $0x564] ss:$16 sps:$4 sm:$0xff]   ;;  %v12920_v38 = vld [vmem:[%s14477_s29 + $0x560] ss:$16 sps:$4 sm:$0xff]  }
 0x176   : > { %3386 = vmatprep.mubr.bf16.mxu0 %v12754_v39  ;;  %3867 = vmatpush1.bf16.msra.mxu1 %v12812_v40  ;;  %v12931_v39 = vld [vmem:[%s14477_s29 + $0x584] ss:$16 sps:$4 sm:$0xff]   ;;  %v12804_v40 = vld [vmem:[%s19790_s0 + $0x210] ss:$24 sps:$4 sm:$0xff]  }
 0x177   : > { %3868 = vmatprep.subr.bf16.mxu1 %v12823_v41  ;;  %3594 = vmatpush1.bf16.msra.mxu0 %v12902_v23  ;;  %v12805_v41 = vld [vmem:[%s19790_s0 + $0x218] ss:$24 sps:$4 sm:$0xff]   ;;  %v15142_v18 = vld [vmem:[%s19790_s0 + $0x3c4] ss:$24 sps:$4 sm:$0xff]  }
 0x178   : > { %3595 = vmatprep.subr.bf16.mxu0 %v12907_v27  ;;  %v12910_v23 = vld [vmem:[%s19790_s0 + $0x3fc] ss:$24 sps:$4 sm:$0xff]   ;;  %v12925_v27 = vld [vmem:[%s19790_s0 + $0x42c] ss:$24 sps:$4 sm:$0xff]  }
 0x17a   : > { %3869 = vmatpush1.bf16.msra.mxu1 %v12821_v44  ;;  %v12955_v44 = vld [vmem:[%s14477_s29 + $0x20c] ss:$16 sps:$4 sm:$0xff]  }
 0x17b   : > { %3870 = vmatprep.subr.bf16.mxu1 %v12838_v47  ;;  %3596 = vmatpush1.bf16.msra.mxu0 %v12905_v28  ;;  %v12932_v47 = vld [vmem:[%s14477_s29 + $0x5a0] ss:$16 sps:$4 sm:$0xff]  }
 0x17c   : > { %3114 = vmatmul.mubr.bf16.gmra.mrb[20].mxu1 %v12756_v42  ;;  %3597 = vmatprep.subr.bf16.mxu0 %v12916_v29  ;;  %v12929_v42 = vld [vmem:[%s14477_s29 + $0x580] ss:$16 sps:$4 sm:$0xff]  }
 0x17d   : > { %3387 = vmatmul.mubr.bf16.gmra.mrb[20].mxu0 %v12757_v43  ;;  %3123 = vmatprep.mubr.bf16.mxu1 %v12758_v45  ;;  %v12806_v43 = vld [vmem:[%s19790_s0 + $0x244] ss:$24 sps:$4 sm:$0xff]   ;;  %v15188_v28 = vld [vmem:[%s19790_s0 + $0x420] ss:$24 sps:$4 sm:$0xff]  }
 0x17e   : > { %3396 = vmatprep.mubr.bf16.mxu0 %v12760_v46  ;;  %3871 = vmatpush1.bf16.msra.mxu1 %v12836_v50  ;;  %v12808_v45 = vld [vmem:[%s19790_s0 + $0x24c] ss:$24 sps:$4 sm:$0xff]   ;;  %v12811_v50 = vld [vmem:[%s19790_s0 + $0x248] ss:$24 sps:$4 sm:$0xff]  }
 0x17f   : > { %3872 = vmatprep.subr.bf16.mxu1 %v12853_v53  ;;  %3598 = vmatpush1.bf16.msra.mxu0 %v12914_v33  ;;  %v12934_v46 = vld [vmem:[%s14477_s29 + $0x5a4] ss:$16 sps:$4 sm:$0xff]   ;;  %v12944_v53 = vld [vmem:[%s14477_s29 + $0x5c0] ss:$16 sps:$4 sm:$0xff]  }
 0x180   : > { %3599 = vmatprep.subr.bf16.mxu0 %v12922_v37  ;;  %v12928_v29 = vld [vmem:[%s19790_s0 + $0x428] ss:$24 sps:$4 sm:$0xff]   ;;  %v12943_v33 = vld [vmem:[%s19790_s0 + $0x458] ss:$24 sps:$4 sm:$0xff]  }
 0x181   : > { %v12953_v37 = vld [vmem:[%s14477_s29 + $0x208] ss:$16 sps:$4 sm:$0xff]  }
 0x182   : > { %3873 = vmatpush1.bf16.msra.mxu1 %v12851_v55  ;;  %v12949_v55 = vld [vmem:[%s14477_s29 + $0x5e4] ss:$16 sps:$4 sm:$0xff]  }
 0x183   : > { %3874 = vmatprep.subr.bf16.mxu1 %v12877_v1  ;;  %3600 = vmatpush1.bf16.msra.mxu0 %v12920_v38  ;;  %v12835_v1 = vld [vmem:[%s19790_s0 + $0x2d8] ss:$24 sps:$4 sm:$0xff]   ;;  %v12956_v38 = vld [vmem:[%s19790_s0 + $0x44] ss:$24 sps:$4 sm:$0xff]  }
 0x184   : > { %3124 = vmatmul.mubr.bf16.gmra.mrb[24].mxu1 %v12762_v54  ;;  %3601 = vmatprep.subr.bf16.mxu0 %v12931_v39  ;;  %v12947_v54 = vld [vmem:[%s14477_s29 + $0x5e0] ss:$16 sps:$4 sm:$0xff]   ;;  %v12961_v39 = vld [vmem:[%s14477_s29 + $0x22c] ss:$16 sps:$4 sm:$0xff]  }
 0x185   : > { %3397 = vmatmul.mubr.bf16.gmra.mrb[24].mxu0 %v12763_v58  ;;  %3133 = vmatprep.mubr.bf16.mxu1 %v12767_v59  ;;  %v12824_v58 = vld [vmem:[%s19790_s0 + $0x2a4] ss:$24 sps:$4 sm:$0xff]  }
 0x186   : > { %3406 = vmatprep.mubr.bf16.mxu0 %v12769_v60  ;;  %3875 = vmatpush1.bf16.msra.mxu1 %v12875_v0  ;;  %v12826_v59 = vld [vmem:[%s19790_s0 + $0x2ac] ss:$24 sps:$4 sm:$0xff]   ;;  %v12828_v60 = vld [vmem:[%s19790_s0 + $0x2a0] ss:$24 sps:$4 sm:$0xff]   ;;  %v12834_v0 = vld [vmem:[%s19790_s0 + $0x2d0] ss:$24 sps:$4 sm:$0xff]  }
 0x187   : > { %3876 = vmatprep.subr.bf16.mxu1 %v12895_v11  ;;  %3602 = vmatpush1.bf16.msra.mxu0 %v12929_v42  ;;  %v12868_v11 = vld [vmem:[%s19790_s0 + $0x36c] ss:$24 sps:$4 sm:$0xff]  }
 0x188   : > { %3603 = vmatprep.subr.bf16.mxu0 %v12934_v46  ;;  %v12970_v42 = vld [vmem:[%s14477_s29 + $0x24c] ss:$16 sps:$4 sm:$0xff]   ;;  %v12968_v46 = vld [vmem:[%s14477_s29 + $0x248] ss:$16 sps:$4 sm:$0xff]  }
 0x18a   : > { %3877 = vmatpush1.bf16.msra.mxu1 %v12893_v10  ;;  %v12866_v10 = vld [vmem:[%s19790_s0 + $0x364] ss:$24 sps:$4 sm:$0xff]  }
 0x18b   : > { %3878 = vmatprep.subr.bf16.mxu1 %v12919_v25  ;;  %3604 = vmatpush1.bf16.msra.mxu0 %v12932_v47  ;;  %v12913_v25 = vld [vmem:[%s19790_s0 + $0x3f8] ss:$24 sps:$4 sm:$0xff]   ;;  %v12976_v47 = vld [vmem:[%s14477_s29 + $0x26c] ss:$16 sps:$4 sm:$0xff]  }
 0x18c   : > { %3134 = vmatmul.mubr.bf16.gmra.mrb[28].mxu1 %v12771_v2  ;;  %3605 = vmatprep.subr.bf16.mxu0 %v12946_v48  ;;  %v12839_v2 = vld [vmem:[%s19790_s0 + $0x304] ss:$24 sps:$4 sm:$0xff]   ;;  %v13793_v48 = vld [vmem:[%s19790_s0 + $0x30] ss:$24 sps:$4 sm:$0xff]  }
 0x18d   : > { %3407 = vmatmul.mubr.bf16.gmra.mrb[28].mxu0 %v12772_v4  ;;  %3143 = vmatprep.mubr.bf16.mxu1 %v12776_v5  ;;  %v12843_v4 = vld [vmem:[%s19790_s0 + $0x300] ss:$24 sps:$4 sm:$0xff]  }
 0x18e   : > { %3416 = vmatprep.mubr.bf16.mxu0 %v12778_v6  ;;  %3879 = vmatpush1.bf16.msra.mxu1 %v12917_v24  ;;  %v12844_v5 = vld [vmem:[%s19790_s0 + $0x308] ss:$24 sps:$4 sm:$0xff]   ;;  %v12854_v6 = vld [vmem:[%s19790_s0 + $0x334] ss:$24 sps:$4 sm:$0xff]  }
 0x18f   : > { %3880 = vmatprep.subr.bf16.mxu1 %v12937_v35  ;;  %3606 = vmatpush1.bf16.msra.mxu0 %v12944_v53  ;;  %v15170_v24 = vld [vmem:[%s19790_s0 + $0x3f0] ss:$24 sps:$4 sm:$0xff]   ;;  %v13790_v35 = vld [vmem:[%s19790_s0 + $0x4] ss:$24 sps:$4 sm:$0xff]  }
 0x190   : > { %3607 = vmatprep.subr.bf16.mxu0 %v12949_v55  ;;  %v12965_v53 = vld [vmem:[%s19790_s0 + $0xa4] ss:$24 sps:$4 sm:$0xff]  }
 0x191   : > { %v12991_v55 = vld [vmem:[%s14477_s29 + $0x2ac] ss:$16 sps:$4 sm:$0xff]  }
 0x192   : > { %3881 = vmatpush1.bf16.msra.mxu1 %v12935_v34  ;;  %v12952_v34 = vld [vmem:[%s19790_s0 + $0x14] ss:$24 sps:$4 sm:$0xff]  }
 0x193   : > { %4123 = vmatprep.subr.bf16.mxu1 %v12955_v44  ;;  %3608 = vmatpush1.bf16.msra.mxu0 %v12947_v54  ;;  %v12958_v44 = vld [vmem:[%s19790_s0 + $0x40] ss:$24 sps:$4 sm:$0xff]  }
 0x194   : > { %3144 = vmatmul.mubr.bf16.gmra.mrb[32].mxu1 %v12780_v13  ;;  %v12871_v13 = vld [vmem:[%s19790_s0 + $0x368] ss:$24 sps:$4 sm:$0xff]  }
 0x195   : > { %3417 = vmatmul.mubr.bf16.gmra.mrb[32].mxu0 %v12781_v14  ;;  %3153 = vmatprep.mubr.bf16.mxu1 %v12782_v15  ;;  %v12881_v14 = vld [vmem:[%s19790_s0 + $0x394] ss:$24 sps:$4 sm:$0xff]   ;;  %v12983_v54 = vld [vmem:[%s14477_s29 + $0x288] ss:$16 sps:$4 sm:$0xff]  }
 0x196   : > { %3426 = vmatprep.mubr.bf16.mxu0 %v12784_v16  ;;  %v12883_v15 = vld [vmem:[%s19790_s0 + $0x39c] ss:$24 sps:$4 sm:$0xff]   ;;  %v15134_v16 = vld [vmem:[%s19790_s0 + $0x390] ss:$24 sps:$4 sm:$0xff]  }
 0x19c   : > { %3154 = vmatmul.mubr.bf16.gmra.mrb[36].mxu1 %v12786_v20  ;;  %v15152_v20 = vld [vmem:[%s19790_s0 + $0x3c0] ss:$24 sps:$4 sm:$0xff]  }
 0x19d   : > { %3427 = vmatmul.mubr.bf16.gmra.mrb[36].mxu0 %v12787_v21  ;;  %3163 = vmatprep.mubr.bf16.mxu1 %v12791_v22  ;;  %v12901_v21 = vld [vmem:[%s19790_s0 + $0x3c8] ss:$24 sps:$4 sm:$0xff]   ;;  %v15160_v22 = vld [vmem:[%s19790_s0 + $0x3f4] ss:$24 sps:$4 sm:$0xff]  }
 0x19e   : > { %3436 = vmatprep.mubr.bf16.mxu0 %v12793_v26  ;;  %v15178_v26 = vld [vmem:[%s19790_s0 + $0x424] ss:$24 sps:$4 sm:$0xff]  }
 0x1a4   : > { %3164 = vmatmul.mubr.bf16.gmra.mrb[40].mxu1 %v12795_v30  ;;  %v15196_v30 = vld [vmem:[%s19790_s0 + $0x454] ss:$24 sps:$4 sm:$0xff]  }
 0x1a5   : > { %3437 = vmatmul.mubr.bf16.gmra.mrb[40].mxu0 %v12796_v31  ;;  %3173 = vmatprep.mubr.bf16.mxu1 %v12800_v32  ;;  %v12940_v31 = vld [vmem:[%s19790_s0 + $0x45c] ss:$24 sps:$4 sm:$0xff]   ;;  %v15206_v32 = vld [vmem:[%s19790_s0 + $0x450] ss:$24 sps:$4 sm:$0xff]  }
 0x1a6   : > { %3446 = vmatprep.mubr.bf16.mxu0 %v12802_v36  ;;  %v12950_v36 = vld [vmem:[%s19790_s0 + $0x10] ss:$24 sps:$4 sm:$0xff]  }
 0x1ac   : > { %3174 = vmatmul.mubr.bf16.gmra.mrb[44].mxu1 %v12804_v40  ;;  %v12959_v40 = vld [vmem:[%s14477_s29 + $0x228] ss:$16 sps:$4 sm:$0xff]  }
 0x1ad   : > { %3447 = vmatmul.mubr.bf16.gmra.mrb[44].mxu0 %v12805_v41  ;;  %3183 = vmatprep.mubr.bf16.mxu1 %v12806_v43  ;;  %v13791_v41 = vld [vmem:[%s19790_s0] ss:$24 sps:$4 sm:$0xff]   ;;  %v13792_v43 = vld [vmem:[%s19790_s0 + $0x34] ss:$24 sps:$4 sm:$0xff]  }
 0x1ae   : > { %3456 = vmatprep.mubr.bf16.mxu0 %v12808_v45  ;;  %v12962_v45 = vld [vmem:[%s19790_s0 + $0x74] ss:$24 sps:$4 sm:$0xff]  }
 0x1b4   : > { %3184 = vmatmul.mubr.bf16.gmra.mrb[48].mxu1 %v12810_v49  ;;  %v12974_v49 = vld [vmem:[%s14477_s29 + $0x268] ss:$16 sps:$4 sm:$0xff]  }
 0x1b5   : > { %3457 = vmatmul.mubr.bf16.gmra.mrb[48].mxu0 %v12811_v50  ;;  %3193 = vmatprep.mubr.bf16.mxu1 %v12815_v51  ;;  %v13794_v50 = vld [vmem:[%s19790_s0 + $0x64] ss:$24 sps:$4 sm:$0xff]  }
 0x1b6   : > { %3466 = vmatprep.mubr.bf16.mxu0 %v12817_v52  ;;  %v12985_v51 = vld [vmem:[%s14477_s29 + $0x28c] ss:$16 sps:$4 sm:$0xff]   ;;  %v12964_v52 = vld [vmem:[%s19790_s0 + $0x70] ss:$24 sps:$4 sm:$0xff]  }
 0x1bc   : > { %3194 = vmatmul.mubr.bf16.gmra.mrb[52].mxu1 %v12819_v56  ;;  %v13795_v56 = vld [vmem:[%s19790_s0 + $0x60] ss:$24 sps:$4 sm:$0xff]  }
 0x1bd   : > { %3467 = vmatmul.mubr.bf16.gmra.mrb[52].mxu0 %v12820_v57  ;;  %3203 = vmatprep.mubr.bf16.mxu1 %v12824_v58  ;;  %v13796_v57 = vld [vmem:[%s19790_s0 + $0x94] ss:$24 sps:$4 sm:$0xff]   ;;  %v12989_v58 = vld [vmem:[%s14477_s29 + $0x2a8] ss:$16 sps:$4 sm:$0xff]  }
 0x1be   : > { %3476 = vmatprep.mubr.bf16.mxu0 %v12826_v59 }
 0x1c4   : > { %3204 = vmatmul.mubr.bf16.gmra.mrb[56].mxu1 %v12828_v60  ;;  %v13000_v60 = vld [vmem:[%s14477_s29 + $0x2cc] ss:$16 sps:$4 sm:$0xff]  }
 0x1c5   : > { %3477 = vmatmul.mubr.bf16.gmra.mrb[56].mxu0 %v12829_v61  ;;  %3213 = vmatprep.mubr.bf16.mxu1 %v12830_v62  ;;  %v12967_v62 = vld [vmem:[%s19790_s0 + $0xa0] ss:$24 sps:$4 sm:$0xff]  }
 0x1c6   : > { %3486 = vmatprep.mubr.bf16.mxu0 %v12832_v63 }
 0x1cc   : > { %3214 = vmatmul.mubr.bf16.gmra.mrb[60].mxu1 %v12834_v0  ;;  %v12971_v0 = vld [vmem:[%s19790_s0 + $0xd4] ss:$24 sps:$4 sm:$0xff]  }
 0x1cd   : > { %3487 = vmatmul.mubr.bf16.gmra.mrb[60].mxu0 %v12835_v1  ;;  %3223 = vmatprep.mubr.bf16.mxu1 %v12839_v2  ;;  %v12998_v2 = vld [vmem:[%s14477_s29 + $0x2c8] ss:$16 sps:$4 sm:$0xff]  }
 0x1ce   : > { %3496 = vmatprep.mubr.bf16.mxu0 %v12841_v3  ;;  %v13006_v3 = vld [vmem:[%s14477_s29 + $0x2ec] ss:$16 sps:$4 sm:$0xff]  }
 0x1d4   : > { %3224 = vmatmul.mubr.bf16.gmra.mrb[64].mxu1 %v12843_v4  ;;  %v13797_v4 = vld [vmem:[%s19790_s0 + $0x90] ss:$24 sps:$4 sm:$0xff]  }
 0x1d5   : > { %3497 = vmatmul.mubr.bf16.gmra.mrb[64].mxu0 %v12844_v5  ;;  %3233 = vmatprep.mubr.bf16.mxu1 %v12854_v6  ;;  %v13798_v5 = vld [vmem:[%s19790_s0 + $0xc4] ss:$24 sps:$4 sm:$0xff]   ;;  %v13004_v6 = vld [vmem:[%s14477_s29 + $0x2e8] ss:$16 sps:$4 sm:$0xff]  }
 0x1d6   : > { %3506 = vmatprep.mubr.bf16.mxu0 %v12856_v7 }
 0x1dc   : > { %3234 = vmatmul.mubr.bf16.gmra.mrb[68].mxu1 %v12858_v8  ;;  %v13015_v8 = vld [vmem:[%s14477_s29 + $0x30c] ss:$16 sps:$4 sm:$0xff]  }
 0x1dd   : > { %3507 = vmatmul.mubr.bf16.gmra.mrb[68].mxu0 %v12859_v9  ;;  %3243 = vmatprep.mubr.bf16.mxu1 %v12866_v10  ;;  %v12973_v10 = vld [vmem:[%s19790_s0 + $0xd0] ss:$24 sps:$4 sm:$0xff]  }
 0x1de   : > { %3516 = vmatprep.mubr.bf16.mxu0 %v12868_v11 }
 0x1e4   : > { %3244 = vmatmul.mubr.bf16.gmra.mrb[72].mxu1 %v12870_v12  ;;  %v12977_v12 = vld [vmem:[%s19790_s0 + $0x104] ss:$24 sps:$4 sm:$0xff]  }
 0x1e5   : > { %3517 = vmatmul.mubr.bf16.gmra.mrb[72].mxu0 %v12871_v13  ;;  %3253 = vmatprep.mubr.bf16.mxu1 %v12881_v14  ;;  %v13013_v14 = vld [vmem:[%s14477_s29 + $0x308] ss:$16 sps:$4 sm:$0xff]  }
 0x1e6   : > { %3526 = vmatprep.mubr.bf16.mxu0 %v12883_v15  ;;  %v13021_v15 = vld [vmem:[%s14477_s29 + $0x32c] ss:$16 sps:$4 sm:$0xff]  }
 0x1ec   : > { %3254 = vmatmul.mubr.bf16.gmra.mrb[76].mxu1 %v15134_v16 }
 0x1ed   : > { %3527 = vmatmul.mubr.bf16.gmra.mrb[76].mxu0 %v12886_v17  ;;  %3263 = vmatprep.mubr.bf16.mxu1 %v15142_v18  ;;  %v13799_v17 = vld [vmem:[%s19790_s0 + $0xc0] ss:$24 sps:$4 sm:$0xff]  }
 0x1ee   : > { %3536 = vmatprep.mubr.bf16.mxu0 %v12898_v19  ;;  %v13800_v19 = vld [vmem:[%s19790_s0 + $0xf4] ss:$24 sps:$4 sm:$0xff]  }
 0x1f4   : > { %3264 = vmatmul.mubr.bf16.gmra.mrb[80].mxu1 %v15152_v20 }
 0x1f5   : > { %3537 = vmatmul.mubr.bf16.gmra.mrb[80].mxu0 %v12901_v21  ;;  %3273 = vmatprep.mubr.bf16.mxu1 %v15160_v22  ;;  %v13019_v21 = vld [vmem:[%s14477_s29 + $0x328] ss:$16 sps:$4 sm:$0xff]  }
 0x1f6   : > { %3546 = vmatprep.mubr.bf16.mxu0 %v12910_v23 }
 0x1fc   : > { %3274 = vmatmul.mubr.bf16.gmra.mrb[84].mxu1 %v15170_v24 }
 0x1fd   : > { %3547 = vmatmul.mubr.bf16.gmra.mrb[84].mxu0 %v12913_v25  ;;  %3283 = vmatprep.mubr.bf16.mxu1 %v15178_v26  ;;  %v13030_v25 = vld [vmem:[%s14477_s29 + $0x34c] ss:$16 sps:$4 sm:$0xff]  }
 0x1fe   : > { %3556 = vmatprep.mubr.bf16.mxu0 %v12925_v27 }
 0x204   : > { %3284 = vmatmul.mubr.bf16.gmra.mrb[88].mxu1 %v15188_v28 }
 0x205   : > { %3557 = vmatmul.mubr.bf16.gmra.mrb[88].mxu0 %v12928_v29  ;;  %3293 = vmatprep.mubr.bf16.mxu1 %v15196_v30  ;;  %v12979_v29 = vld [vmem:[%s19790_s0 + $0x100] ss:$24 sps:$4 sm:$0xff]  }
 0x206   : > { %3566 = vmatprep.mubr.bf16.mxu0 %v12940_v31 }
 0x20c   : > { %3294 = vmatmul.mubr.bf16.gmra.mrb[92].mxu1 %v15206_v32 }
 0x20d   : > { %3567 = vmatmul.mubr.bf16.gmra.mrb[92].mxu0 %v12943_v33  ;;  %3882 = vmatprep.mubr.bf16.mxu1 %v13790_v35  ;;  %v12980_v33 = vld [vmem:[%s19790_s0 + $0x134] ss:$24 sps:$4 sm:$0xff]   ;;  %v13028_v35 = vld [vmem:[%s14477_s29 + $0x348] ss:$16 sps:$4 sm:$0xff]  }
 0x20e   : > { %3609 = vmatprep.mubr.bf16.mxu0 %v12952_v34 }
 0x214   : > { %3883 = vmatmul.mubr.bf16.vlgmr.msra.gmra.mrb[96].mxu1 %v13791_v41  ;;  %v13045_v41 = vld [vmem:[%s14477_s29 + $0x38c] ss:$16 sps:$4 sm:$0xff]  }
 0x215   : > { %3610 = vmatmul.mubr.bf16.vlgmr.msra.gmra.mrb[0].mxu0 %v12950_v36  ;;  %4124 = vmatpush1.bf16.msra.mxu1 %v12953_v37  ;;  %v13036_v36 = vld [vmem:[%s14477_s29 + $0x36c] ss:$16 sps:$4 sm:$0xff]   ;;  %v13801_v37 = vld [vmem:[%s19790_s0 + $0xf0] ss:$24 sps:$4 sm:$0xff]  }
 0x216   : > { %3619 = vmatprep.mubr.bf16.mxu0 %v12956_v38  ;;  %3892 = vmatprep.mubr.bf16.mxu1 %v13792_v43  ;;  %v13802_v38 = vld [vmem:[%s19790_s0 + $0x124] ss:$24 sps:$4 sm:$0xff]   ;;  %v12982_v43 = vld [vmem:[%s19790_s0 + $0x130] ss:$24 sps:$4 sm:$0xff]  }
 0x217   : > { %4125 = vmatprep.subr.bf16.mxu1 %v12961_v39  ;;  %v13034_v39 = vld [vmem:[%s14477_s29 + $0x368] ss:$16 sps:$4 sm:$0xff]  }
 0x219   : > { %4126 = vmatpush1.bf16.msra.mxu1 %v12959_v40 }
 0x21a   : > { %4127 = vmatprep.subr.bf16.mxu1 %v12970_v42 }
 0x21c   : > { %3893 = vmatmul.mubr.bf16.gmra.mrb[100].mxu1 %v13793_v48  ;;  %v13051_v48 = vld [vmem:[%s14477_s29 + $0x3ac] ss:$16 sps:$4 sm:$0xff]  }
 0x21d   : > { %3620 = vmatmul.mubr.bf16.gmra.mrb[4].mxu0 %v12958_v44  ;;  %3902 = vmatprep.mubr.bf16.mxu1 %v13794_v50  ;;  %v13804_v50 = vld [vmem:[%s19790_s0 + $0x154] ss:$24 sps:$4 sm:$0xff]  }
 0x21e   : > { %3629 = vmatprep.mubr.bf16.mxu0 %v12962_v45  ;;  %4128 = vmatpush1.bf16.msra.mxu1 %v12968_v46  ;;  %v12986_v45 = vld [vmem:[%s19790_s0 + $0x164] ss:$24 sps:$4 sm:$0xff]  }
 0x21f   : > { %4129 = vmatprep.subr.bf16.mxu1 %v12976_v47  ;;  %v13043_v47 = vld [vmem:[%s14477_s29 + $0x388] ss:$16 sps:$4 sm:$0xff]  }
 0x222   : > { %4130 = vmatpush1.bf16.msra.mxu1 %v12974_v49  ;;  %v13803_v49 = vld [vmem:[%s19790_s0 + $0x120] ss:$24 sps:$4 sm:$0xff]  }
 0x223   : > { %4131 = vmatprep.subr.bf16.mxu1 %v12985_v51  ;;  %v13049_v51 = vld [vmem:[%s14477_s29 + $0x3a8] ss:$16 sps:$4 sm:$0xff]  }
 0x224   : > { %3903 = vmatmul.mubr.bf16.gmra.mrb[104].mxu1 %v13795_v56 }
 0x225   : > { %3630 = vmatmul.mubr.bf16.gmra.mrb[8].mxu0 %v12964_v52  ;;  %3912 = vmatprep.mubr.bf16.mxu1 %v13796_v57  ;;  %v12992_v57 = vld [vmem:[%s19790_s0 + $0x194] ss:$24 sps:$4 sm:$0xff]  }
 0x226   : > { %3639 = vmatprep.mubr.bf16.mxu0 %v12965_v53  ;;  %4132 = vmatpush1.bf16.msra.mxu1 %v12983_v54  ;;  %v13060_v53 = vld [vmem:[%s14477_s29 + $0x3cc] ss:$16 sps:$4 sm:$0xff]  }
 0x227   : > { %v15265_v59 = vpop.f32.mrb[0].mxu1  ;;  %4133 = vmatprep.subr.bf16.mxu1 %v12991_v55  ;;  %v12988_v55 = vld [vmem:[%s19790_s0 + $0x160] ss:$24 sps:$4 sm:$0xff]  }
 0x228   : > { %v15268_v61 = vpop.f32.mrb[1].mxu1 }
 0x229   : > { %v15273_v63 = vpop.f32.mrb[2].mxu1 }
 0x22a   : > { %v15278_v1 = vpop.f32.mrb[3].mxu1  ;;  %4134 = vmatpush1.bf16.msra.mxu1 %v12989_v58 }
 0x22b   : > { %4135 = vmatprep.subr.bf16.mxu1 %v13000_v60  ;;  %v13058_v60 = vld [vmem:[%s14477_s29 + $0x3c8] ss:$16 sps:$4 sm:$0xff]  }
 0x22c   : > { %3913 = vmatmul.mubr.bf16.gmra.mrb[108].mxu1 %v13797_v4  ;;  %v13806_v4 = vld [vmem:[%s19790_s0 + $0x184] ss:$24 sps:$4 sm:$0xff]  }
 0x22d   : > { %3640 = vmatmul.mubr.bf16.gmra.mrb[12].mxu0 %v12967_v62  ;;  %3922 = vmatprep.mubr.bf16.mxu1 %v13798_v5  ;;  %v13066_v62 = vld [vmem:[%s14477_s29 + $0x3ec] ss:$16 sps:$4 sm:$0xff]  }
 0x22e   : > { %3649 = vmatprep.mubr.bf16.mxu0 %v12971_v0  ;;  %4136 = vmatpush1.bf16.msra.mxu1 %v12998_v2  ;;  %v13069_v0 = vld [vmem:[%s14475_s28] ss:$24 sps:$4 sm:$0xff]   ;;  %v13071_v2 = vld [vmem:[%s14475_s28 + $0x4] ss:$24 sps:$4 sm:$0xff]   ;;  %v13075_v5 = vld [vmem:[%s14475_s28 + $0x34] ss:$24 sps:$4 sm:$0xff]  }
 0x22f   : > { %v15289_v7 = vpop.f32.mrb[4].mxu1  ;;  %4137 = vmatprep.subr.bf16.mxu1 %v13006_v3  ;;  %v13805_v3 = vld [vmem:[%s19790_s0 + $0x150] ss:$24 sps:$4 sm:$0xff]   ;;  %7933 = vmatprep.subr.bf16.mxu0 %v13071_v2  ;;  %v13007_v2 = vld [vmem:[%s19790_s0 + $0x224] ss:$24 sps:$4 sm:$0xff]  }
 0x230   : > { %v15292_v9 = vpop.f32.mrb[5].mxu1  ;;  %7934 = vmatpush1.bf16.msra.mxu0 %v13069_v0 }
 0x231   : > { %v15297_v11 = vpop.f32.mrb[6].mxu1  ;;  %7935 = vmatprep.subr.bf16.mxu0 %v13075_v5  ;;  %v13094_v5 = vld [vmem:[%s14475_s28 + $0x120] ss:$24 sps:$4 sm:$0xff]  }
 0x232   : > { %v15302_v13 = vpop.f32.mrb[7].mxu1  ;;  %4138 = vmatpush1.bf16.msra.mxu1 %v13004_v6  ;;  %v13064_v6 = vld [vmem:[%s14477_s29 + $0x3e8] ss:$16 sps:$4 sm:$0xff]  }
 0x233   : > { %4139 = vmatprep.subr.bf16.mxu1 %v13015_v8 }
 0x234   : > { %3923 = vmatmul.mubr.bf16.gmra.mrb[112].mxu1 %v13799_v17  ;;  %v12995_v17 = vld [vmem:[%s19790_s0 + $0x1c4] ss:$24 sps:$4 sm:$0xff]  }
 0x235   : > { %3650 = vmatmul.mubr.bf16.gmra.mrb[16].mxu0 %v12973_v10  ;;  %3932 = vmatprep.mubr.bf16.mxu1 %v13800_v19  ;;  %v13073_v10 = vld [vmem:[%s14475_s28 + $0x30] ss:$24 sps:$4 sm:$0xff]  }
 0x236   : > { %3659 = vmatprep.mubr.bf16.mxu0 %v12977_v12  ;;  %4140 = vmatpush1.bf16.msra.mxu1 %v13013_v14  ;;  %v12994_v14 = vld [vmem:[%s19790_s0 + $0x190] ss:$24 sps:$4 sm:$0xff]  }
 0x237   : > { %v15313_v23 = vpop.f32.mrb[8].mxu1  ;;  %4141 = vmatprep.subr.bf16.mxu1 %v13021_v15  ;;  %7936 = vmatpush1.bf16.msra.mxu0 %v13073_v10  ;;  %v13812_v10 = vld [vmem:[%s19790_s0 + $0x214] ss:$24 sps:$4 sm:$0xff]  }
 0x238   : > { %v15316_v27 = vpop.f32.mrb[9].mxu1 }
 0x239   : > { %v15321_v31 = vpop.f32.mrb[10].mxu1 }
 0x23a   : > { %v15326_v34 = vpop.f32.mrb[11].mxu1  ;;  %4142 = vmatpush1.bf16.msra.mxu1 %v13019_v21  ;;  %v13078_v21 = vld [vmem:[%s14475_s28 + $0x64] ss:$24 sps:$4 sm:$0xff]  }
 0x23b   : > { %4143 = vmatprep.subr.bf16.mxu1 %v13030_v25  ;;  %v13076_v25 = vld [vmem:[%s14475_s28 + $0x60] ss:$24 sps:$4 sm:$0xff]   ;;  %7937 = vmatprep.subr.bf16.mxu0 %v13078_v21  ;;  %v13097_v21 = vld [vmem:[%s14475_s28 + $0x150] ss:$24 sps:$4 sm:$0xff]  }
 0x23c   : > { %3933 = vmatmul.mubr.bf16.gmra.mrb[116].mxu1 %v13801_v37  ;;  %7938 = vmatpush1.bf16.msra.mxu0 %v13076_v25 }
 0x23d   : > { %3660 = vmatmul.mubr.bf16.gmra.mrb[20].mxu0 %v12979_v29  ;;  %3942 = vmatprep.mubr.bf16.mxu1 %v13802_v38  ;;  %v13807_v29 = vld [vmem:[%s19790_s0 + $0x180] ss:$24 sps:$4 sm:$0xff]   ;;  %v13082_v38 = vld [vmem:[%s14475_s28 + $0x90] ss:$24 sps:$4 sm:$0xff]  }
 0x23e   : > { %3669 = vmatprep.mubr.bf16.mxu0 %v12980_v33  ;;  %4144 = vmatpush1.bf16.msra.mxu1 %v13028_v35  ;;  %v13081_v33 = vld [vmem:[%s14477_s29 + $0x40c] ss:$16 sps:$4 sm:$0xff]  }
 0x23f   : > { %v15337_v40 = vpop.f32.mrb[12].mxu1  ;;  %4145 = vmatprep.subr.bf16.mxu1 %v13036_v36  ;;  %v13808_v35 = vld [vmem:[%s19790_s0 + $0x1b4] ss:$24 sps:$4 sm:$0xff]  }
 0x240   : > { %v15340_v42 = vpop.f32.mrb[13].mxu1  ;;  %v13084_v36 = vld [vmem:[%s14475_s28 + $0x94] ss:$24 sps:$4 sm:$0xff]  }
 0x241   : > { %v15345_v44 = vpop.f32.mrb[14].mxu1  ;;  %7939 = vmatprep.subr.bf16.mxu0 %v13084_v36 }
 0x242   : > { %v15350_v46 = vpop.f32.mrb[15].mxu1  ;;  %4146 = vmatpush1.bf16.msra.mxu1 %v13034_v39  ;;  %7940 = vmatpush1.bf16.msra.mxu0 %v13082_v38  ;;  %v13102_v38 = vld [vmem:[%s14475_s28 + $0x184] ss:$24 sps:$4 sm:$0xff]  }
 0x243   : > { %4147 = vmatprep.subr.bf16.mxu1 %v13045_v41  ;;  %v12997_v41 = vld [vmem:[%s19790_s0 + $0x1c0] ss:$24 sps:$4 sm:$0xff]  }
 0x244   : > { %3943 = vmatmul.mubr.bf16.gmra.mrb[120].mxu1 %v13803_v49  ;;  %v13085_v49 = vld [vmem:[%s14475_s28 + $0xc0] ss:$24 sps:$4 sm:$0xff]  }
 0x245   : > { %3670 = vmatmul.mubr.bf16.gmra.mrb[24].mxu0 %v12982_v43  ;;  %3952 = vmatprep.mubr.bf16.mxu1 %v13804_v50  ;;  %v13809_v50 = vld [vmem:[%s19790_s0 + $0x1b0] ss:$24 sps:$4 sm:$0xff]  }
 0x246   : > { %3679 = vmatprep.mubr.bf16.mxu0 %v12986_v45  ;;  %4148 = vmatpush1.bf16.msra.mxu1 %v13043_v47  ;;  %v13001_v45 = vld [vmem:[%s19790_s0 + $0x1f4] ss:$24 sps:$4 sm:$0xff]  }
 0x247   : > { %v15361_v52 = vpop.f32.mrb[16].mxu1  ;;  %4149 = vmatprep.subr.bf16.mxu1 %v13051_v48  ;;  %v13087_v48 = vld [vmem:[%s14475_s28 + $0xc4] ss:$24 sps:$4 sm:$0xff]  }
 0x248   : > { %v15364_v54 = vpop.f32.mrb[17].mxu1  ;;  %7941 = vmatprep.subr.bf16.mxu0 %v13087_v48  ;;  %v13814_v48 = vld [vmem:[%s19790_s0 + $0x244] ss:$24 sps:$4 sm:$0xff]  }
 0x249   : > { %v15369_v56 = vpop.f32.mrb[18].mxu1  ;;  %7942 = vmatpush1.bf16.msra.mxu0 %v13085_v49  ;;  %v13108_v49 = vld [vmem:[%s14475_s28 + $0x1b4] ss:$24 sps:$4 sm:$0xff]  }
 0x24a   : > { %v15374_v58 = vpop.f32.mrb[19].mxu1  ;;  %4150 = vmatpush1.bf16.msra.mxu1 %v13049_v51  ;;  %v13810_v51 = vld [vmem:[%s19790_s0 + $0x1e4] ss:$24 sps:$4 sm:$0xff]  }
 0x24b   : > { %4151 = vmatprep.subr.bf16.mxu1 %v13060_v53  ;;  %v13090_v53 = vld [vmem:[%s14475_s28 + $0xf4] ss:$24 sps:$4 sm:$0xff]  }
 0x24c   : > { %3953 = vmatmul.mubr.bf16.gmra.mrb[124].mxu1 %v13805_v3  ;;  %7943 = vmatprep.subr.bf16.mxu0 %v13090_v53 }
 0x24d   : > { %3680 = vmatmul.mubr.bf16.gmra.mrb[28].mxu0 %v12988_v55  ;;  %3962 = vmatprep.mubr.bf16.mxu1 %v13806_v4  ;;  %v13096_v4 = vld [vmem:[%s14475_s28 + $0x124] ss:$24 sps:$4 sm:$0xff]  }
 0x24e   : > { %3689 = vmatprep.mubr.bf16.mxu0 %v12992_v57  ;;  %4152 = vmatpush1.bf16.msra.mxu1 %v13058_v60  ;;  %v13088_v57 = vld [vmem:[%s14475_s28 + $0xf0] ss:$24 sps:$4 sm:$0xff]  }
 0x24f   : > { %v15388_v8 = vpop.f32.mrb[20].mxu1  ;;  %4153 = vmatprep.subr.bf16.mxu1 %v13066_v62  ;;  %v13003_v62 = vld [vmem:[%s19790_s0 + $0x1f0] ss:$24 sps:$4 sm:$0xff]   ;;  %7944 = vmatpush1.bf16.msra.mxu0 %v13088_v57 }
 0x250   : > { %v15391_v12 = vpop.f32.mrb[21].mxu1  ;;  %7945 = vmatprep.subr.bf16.mxu0 %v13096_v4  ;;  %v13012_v57 = vld [vmem:[%s19790_s0 + $0x250] ss:$24 sps:$4 sm:$0xff]  }
 0x251   : > { %v15396_v15 = vpop.f32.mrb[22].mxu1 }
 0x252   : > { %v15401_v19 = vpop.f32.mrb[23].mxu1  ;;  %4154 = vmatpush1.bf16.msra.mxu1 %v13064_v6  ;;  %v13811_v6 = vld [vmem:[%s19790_s0 + $0x1e0] ss:$24 sps:$4 sm:$0xff]  }
 0x253   : > { %4396 = vmatprep.subr.bf16.mxu1 %v13081_v33  ;;  %7946 = vmatpush1.bf16.msra.mxu0 %v13094_v5  ;;  %v13111_v5 = vld [vmem:[%s14475_s28 + $0x1e4] ss:$24 sps:$4 sm:$0xff]  }
 0x254   : > { %3963 = vmatmul.mubr.bf16.gmra.mrb[128].mxu1 %v13807_v29  ;;  %v13009_v29 = vld [vmem:[%s19790_s0 + $0x220] ss:$24 sps:$4 sm:$0xff]  }
 0x255   : > { %3690 = vmatmul.mubr.bf16.gmra.mrb[32].mxu0 %v12994_v14  ;;  %3972 = vmatprep.mubr.bf16.mxu1 %v13808_v35  ;;  %v13099_v14 = vld [vmem:[%s14475_s28 + $0x154] ss:$24 sps:$4 sm:$0xff]  }
 0x256   : > { %3699 = vmatprep.mubr.bf16.mxu0 %v12995_v17  ;;  %7947 = vmatprep.subr.bf16.mxu0 %v13099_v14  ;;  %v13010_v35 = vld [vmem:[%s19790_s0 + $0x254] ss:$24 sps:$4 sm:$0xff]  }
 0x257   : > { %v15413_v37 = vpop.f32.mrb[24].mxu1  ;;  %7948 = vmatpush1.bf16.msra.mxu0 %v13097_v21  ;;  %v13816_v14 = vld [vmem:[%s19790_s0 + $0x274] ss:$24 sps:$4 sm:$0xff]  }
 0x258   : > { %v15416_v39 = vpop.f32.mrb[25].mxu1  ;;  %7949 = vmatprep.subr.bf16.mxu0 %v13102_v38  ;;  %v13114_v21 = vld [vmem:[%s14475_s28 + $0x214] ss:$24 sps:$4 sm:$0xff]  }
 0x259   : > { %v15421_v43 = vpop.f32.mrb[26].mxu1 }
 0x25a   : > { %v15426_v47 = vpop.f32.mrb[27].mxu1 }
 0x25c   : > { %3973 = vmatmul.mubr.bf16.gmra.mrb[132].mxu1 %v13809_v50 }
 0x25d   : > { %3700 = vmatmul.mubr.bf16.gmra.mrb[36].mxu0 %v12997_v41  ;;  %3982 = vmatprep.mubr.bf16.mxu1 %v13810_v51  ;;  %v13100_v41 = vld [vmem:[%s14475_s28 + $0x180] ss:$24 sps:$4 sm:$0xff]   ;;  %v13106_v51 = vld [vmem:[%s14475_s28 + $0x1b0] ss:$24 sps:$4 sm:$0xff]  }
 0x25e   : > { %3709 = vmatprep.mubr.bf16.mxu0 %v13001_v45  ;;  %v13813_v45 = vld [vmem:[%s19790_s0 + $0x210] ss:$24 sps:$4 sm:$0xff]   ;;  %7950 = vmatpush1.bf16.msra.mxu0 %v13100_v41  ;;  %v13018_v41 = vld [vmem:[%s19790_s0 + $0x280] ss:$24 sps:$4 sm:$0xff]  }
 0x25f   : > { %v15437_v55 = vpop.f32.mrb[28].mxu1  ;;  %7951 = vmatprep.subr.bf16.mxu0 %v13108_v49 }
 0x260   : > { %v15440_v60 = vpop.f32.mrb[29].mxu1 }
 0x261   : > { %v15445_v0 = vpop.f32.mrb[30].mxu1 }
 0x262   : > { %v15450_v3 = vpop.f32.mrb[31].mxu1  ;;  %7952 = vmatpush1.bf16.msra.mxu0 %v13106_v51  ;;  %v13120_v51 = vld [vmem:[%s14475_s28 + $0x244] ss:$24 sps:$4 sm:$0xff]  }
 0x263   : > { %7953 = vmatprep.subr.bf16.mxu0 %v13111_v5  ;;  %v13818_v5 = vld [vmem:[%s19790_s0 + $0x2a4] ss:$24 sps:$4 sm:$0xff]  }
 0x264   : > { %3983 = vmatmul.mubr.bf16.gmra.mrb[136].mxu1 %v13811_v6  ;;  %v13109_v6 = vld [vmem:[%s14475_s28 + $0x1e0] ss:$24 sps:$4 sm:$0xff]  }
 0x265   : > { %3710 = vmatmul.mubr.bf16.gmra.mrb[40].mxu0 %v13003_v62  ;;  %3992 = vmatprep.mubr.bf16.mxu1 %v13812_v10  ;;  %v13815_v10 = vld [vmem:[%s19790_s0 + $0x240] ss:$24 sps:$4 sm:$0xff]  }
 0x266   : > { %3719 = vmatprep.mubr.bf16.mxu0 %v13007_v2  ;;  %v13016_v2 = vld [vmem:[%s19790_s0 + $0x284] ss:$24 sps:$4 sm:$0xff]   ;;  %7954 = vmatpush1.bf16.msra.mxu0 %v13109_v6  ;;  %v13123_v6 = vld [vmem:[%s14475_s28 + $0x274] ss:$24 sps:$4 sm:$0xff]  }
 0x267   : > { %v15461_v17 = vpop.f32.mrb[32].mxu1  ;;  %7955 = vmatprep.subr.bf16.mxu0 %v13114_v21 }
 0x268   : > { %v15464_v25 = vpop.f32.mrb[33].mxu1 }
 0x269   : > { %v15469_v33 = vpop.f32.mrb[34].mxu1 }
 0x26a   : > { %v15474_v36 = vpop.f32.mrb[35].mxu1 }
 0x26c   : > { %3993 = vmatmul.mubr.bf16.gmra.mrb[140].mxu1 %v13813_v45 }
 0x26d   : > { %3720 = vmatmul.mubr.bf16.gmra.mrb[44].mxu0 %v13009_v29  ;;  %4002 = vmatprep.mubr.bf16.mxu1 %v13814_v48  ;;  %v13022_v48 = vld [vmem:[%s19790_s0 + $0x2b4] ss:$24 sps:$4 sm:$0xff]  }
 0x26e   : > { %3729 = vmatprep.mubr.bf16.mxu0 %v13010_v35  ;;  %v13112_v35 = vld [vmem:[%s14475_s28 + $0x210] ss:$24 sps:$4 sm:$0xff]  }
 0x26f   : > { %v15485_v50 = vpop.f32.mrb[36].mxu1  ;;  %7956 = vmatpush1.bf16.msra.mxu0 %v13112_v35  ;;  %v13024_v35 = vld [vmem:[%s19790_s0 + $0x2b0] ss:$24 sps:$4 sm:$0xff]  }
 0x270   : > { %v15488_v53 = vpop.f32.mrb[37].mxu1  ;;  %7957 = vmatprep.subr.bf16.mxu0 %v13120_v51 }
 0x271   : > { %v15493_v62 = vpop.f32.mrb[38].mxu1 }
 0x272   : > { %v15498_v4 = vpop.f32.mrb[39].mxu1 }
 0x274   : > { %4003 = vmatmul.mubr.bf16.gmra.mrb[144].mxu1 %v13815_v10 }
 0x275   : > { %3730 = vmatmul.mubr.bf16.gmra.mrb[48].mxu0 %v13012_v57  ;;  %4012 = vmatprep.mubr.bf16.mxu1 %v13816_v14  ;;  %v13118_v57 = vld [vmem:[%s14475_s28 + $0x240] ss:$24 sps:$4 sm:$0xff]   ;;  %v13121_v14 = vld [vmem:[%s14475_s28 + $0x270] ss:$24 sps:$4 sm:$0xff]  }
 0x276   : > { %3739 = vmatprep.mubr.bf16.mxu0 %v13016_v2  ;;  %v13817_v2 = vld [vmem:[%s19790_s0 + $0x270] ss:$24 sps:$4 sm:$0xff]   ;;  %7958 = vmatpush1.bf16.msra.mxu0 %v13118_v57  ;;  %v13124_v57 = vld [vmem:[%s14475_s28 + $0x2a0] ss:$24 sps:$4 sm:$0xff]  }
 0x277   : > { %v15509_v29 = vpop.f32.mrb[40].mxu1  ;;  %7959 = vmatprep.subr.bf16.mxu0 %v13123_v6  ;;  %v13820_v6 = vld [vmem:[%s19790_s0 + $0x2d4] ss:$24 sps:$4 sm:$0xff]  }
 0x278   : > { %v15512_v38 = vpop.f32.mrb[41].mxu1 }
 0x279   : > { %v15517_v45 = vpop.f32.mrb[42].mxu1 }
 0x27a   : > { %v15522_v49 = vpop.f32.mrb[43].mxu1  ;;  %7960 = vmatpush1.bf16.msra.mxu0 %v13121_v14 }
 0x27c   : > { %4013 = vmatmul.mubr.bf16.gmra.mrb[148].mxu1 %v13817_v2  ;;  %v13126_v2 = vld [vmem:[%s14475_s28 + $0x2a4] ss:$24 sps:$4 sm:$0xff]  }
 0x27d   : > { %3740 = vmatmul.mubr.bf16.gmra.mrb[52].mxu0 %v13018_v41  ;;  %4022 = vmatprep.mubr.bf16.mxu1 %v13818_v5  ;;  %v13819_v5 = vld [vmem:[%s19790_s0 + $0x2a0] ss:$24 sps:$4 sm:$0xff]  }
 0x27e   : > { %3749 = vmatprep.mubr.bf16.mxu0 %v13022_v48  ;;  %v13025_v48 = vld [vmem:[%s19790_s0 + $0x2e4] ss:$24 sps:$4 sm:$0xff]   ;;  %7961 = vmatprep.subr.bf16.mxu0 %v13126_v2  ;;  %v13821_v2 = vld [vmem:[%s19790_s0 + $0x2d0] ss:$24 sps:$4 sm:$0xff]  }
 0x27f   : > { %v15533_v10 = vpop.f32.mrb[44].mxu1  ;;  %7962 = vmatpush1.bf16.msra.mxu0 %v13124_v57 }
 0x280   : > { %v15536_v21 = vpop.f32.mrb[45].mxu1 }
 0x281   : > { %19961 = vst [vmem:[#allocation6_spill] sm:$0xff] %v15536_v21  ;;  %v15541_v41 = vpop.f32.mrb[46].mxu1 }
 0x282   : > { %19962 = vst [vmem:[#allocation7_spill] sm:$0xff] %v15541_v41  ;;  %v15546_v51 = vpop.f32.mrb[47].mxu1  ;;  %v13132_v41 = vld [vmem:[%s14475_s28 + $0x2d4] ss:$24 sps:$4 sm:$0xff]  }
 0x283   : > { %19963 = vst [vmem:[#allocation8_spill] sm:$0xff] %v15546_v51  ;;  %v13130_v51 = vld [vmem:[%s14475_s28 + $0x2d0] ss:$24 sps:$4 sm:$0xff]   ;;  %7963 = vmatprep.subr.bf16.mxu0 %v13132_v41  ;;  %v13822_v41 = vld [vmem:[%s19790_s0 + $0x304] ss:$24 sps:$4 sm:$0xff]  }
 0x284   : > { %4023 = vmatmul.mubr.bf16.gmra.mrb[152].mxu1 %v13819_v5  ;;  %7964 = vmatpush1.bf16.msra.mxu0 %v13130_v51  ;;  %v13033_v51 = vld [vmem:[%s19790_s0 + $0x310] ss:$24 sps:$4 sm:$0xff]  }
 0x285   : > { %3750 = vmatmul.mubr.bf16.gmra.mrb[56].mxu0 %v13024_v35  ;;  %4032 = vmatprep.mubr.bf16.mxu1 %v13820_v6  ;;  %v13027_v35 = vld [vmem:[%s19790_s0 + $0x2e0] ss:$24 sps:$4 sm:$0xff]  }
 0x286   : > { %3759 = vmatprep.mubr.bf16.mxu0 %v13025_v48  ;;  %v13031_v48 = vld [vmem:[%s19790_s0 + $0x314] ss:$24 sps:$4 sm:$0xff]  }
 0x287   : > { %v15557_v21 = vpop.f32.mrb[48].mxu1 }
 0x288   : > { %v15560_v14 = vpop.f32.mrb[49].mxu1 }
 0x289   : > { %v15565_v5 = vpop.f32.mrb[50].mxu1 }
 0x28a   : > { %19964 = vst [vmem:[#allocation9_spill] sm:$0xff] %v15565_v5  ;;  %v15570_v6 = vpop.f32.mrb[51].mxu1 }
 0x28c   : > { %4033 = vmatmul.mubr.bf16.gmra.mrb[156].mxu1 %v13821_v2  ;;  %v13037_v2 = vld [vmem:[%s19790_s0 + $0x344] ss:$24 sps:$4 sm:$0xff]  }
 0x28d   : > { %3760 = vmatmul.mubr.bf16.gmra.mrb[60].mxu0 %v13027_v35  ;;  %4042 = vmatprep.mubr.bf16.mxu1 %v13822_v41  ;;  %v13823_v41 = vld [vmem:[%s19790_s0 + $0x300] ss:$24 sps:$4 sm:$0xff]  }
 0x28e   : > { %3769 = vmatprep.mubr.bf16.mxu0 %v13031_v48 }
 0x28f   : > { %v15578_v57 = vpop.f32.mrb[52].mxu1 }
 0x290   : > { %19965 = vst [vmem:[#allocation10_spill] sm:$0xff] %v15578_v57  ;;  %v15580_v5 = vpop.f32.mrb[53].mxu1 }
 0x291   : > { %19966 = vst [vmem:[#allocation11_spill] sm:$0xff] %v15580_v5  ;;  %v15585_v35 = vpop.f32.mrb[54].mxu1  ;;  %v13824_v5 = vld [vmem:[%s19790_s0 + $0x334] ss:$24 sps:$4 sm:$0xff]  }
 0x292   : > { %19967 = vst [vmem:[#allocation12_spill] sm:$0xff] %v15585_v35  ;;  %v15590_v48 = vpop.f32.mrb[55].mxu1 }
 0x293   : > { %19968 = vst [vmem:[#allocation13_spill] sm:$0xff] %v15590_v48  ;;  %v13039_v48 = vld [vmem:[%s19790_s0 + $0x340] ss:$24 sps:$4 sm:$0xff]  }
 0x294   : > { %4043 = vmatmul.mubr.bf16.gmra.mrb[160].mxu1 %v13823_v41  ;;  %v13040_v41 = vld [vmem:[%s19790_s0 + $0x374] ss:$24 sps:$4 sm:$0xff]  }
 0x295   : > { %3770 = vmatmul.mubr.bf16.gmra.mrb[64].mxu0 %v13033_v51  ;;  %4052 = vmatprep.mubr.bf16.mxu1 %v13824_v5  ;;  %v13825_v5 = vld [vmem:[%s19790_s0 + $0x330] ss:$24 sps:$4 sm:$0xff]  }
 0x296   : > { %3779 = vmatprep.mubr.bf16.mxu0 %v13037_v2 }
 0x297   : > { %v15598_v57 = vpop.f32.mrb[56].mxu1 }
 0x298   : > { %19969 = vst [vmem:[#allocation14_spill] sm:$0xff] %v15598_v57  ;;  %v15600_v35 = vpop.f32.mrb[57].mxu1 }
 0x299   : > { %19970 = vst [vmem:[#allocation15_spill] sm:$0xff] %v15600_v35  ;;  %v15605_v51 = vpop.f32.mrb[58].mxu1  ;;  %v13826_v35 = vld [vmem:[%s19790_s0 + $0x364] ss:$24 sps:$4 sm:$0xff]  }
 0x29a   : > { %19971 = vst [vmem:[#allocation16_spill] sm:$0xff] %v15605_v51  ;;  %v15610_v2 = vpop.f32.mrb[59].mxu1 }
 0x29b   : > { %19972 = vst [vmem:[#allocation17_spill] sm:$0xff] %v15610_v2  ;;  %v13042_v2 = vld [vmem:[%s19790_s0 + $0x370] ss:$24 sps:$4 sm:$0xff]  }
 0x29c   : > { %4053 = vmatmul.mubr.bf16.gmra.mrb[164].mxu1 %v13825_v5  ;;  %v13046_v5 = vld [vmem:[%s19790_s0 + $0x3a4] ss:$24 sps:$4 sm:$0xff]  }
 0x29d   : > { %3780 = vmatmul.mubr.bf16.gmra.mrb[68].mxu0 %v13039_v48  ;;  %4062 = vmatprep.mubr.bf16.mxu1 %v13826_v35  ;;  %v13827_v35 = vld [vmem:[%s19790_s0 + $0x360] ss:$24 sps:$4 sm:$0xff]  }
 0x29e   : > { %3789 = vmatprep.mubr.bf16.mxu0 %v13040_v41 }
 0x29f   : > { %v15618_v57 = vpop.f32.mrb[60].mxu1 }
 0x2a0   : > { %19973 = vst [vmem:[#allocation18_spill] sm:$0xff] %v15618_v57  ;;  %v15620_v51 = vpop.f32.mrb[61].mxu1 }
 0x2a1   : > { %19974 = vst [vmem:[#allocation19_spill] sm:$0xff] %v15620_v51  ;;  %v15625_v48 = vpop.f32.mrb[62].mxu1  ;;  %v13828_v51 = vld [vmem:[%s19790_s0 + $0x394] ss:$24 sps:$4 sm:$0xff]  }
 0x2a2   : > { %19975 = vst [vmem:[#allocation20_spill] sm:$0xff] %v15625_v48  ;;  %v15630_v41 = vpop.f32.mrb[63].mxu1 }
 0x2a3   : > { %19976 = vst [vmem:[#allocation21_spill] sm:$0xff] %v15630_v41  ;;  %v13048_v41 = vld [vmem:[%s19790_s0 + $0x3a0] ss:$24 sps:$4 sm:$0xff]  }
 0x2a4   : > { %4063 = vmatmul.mubr.bf16.gmra.mrb[168].mxu1 %v13827_v35  ;;  %v13052_v35 = vld [vmem:[%s19790_s0 + $0x3d4] ss:$24 sps:$4 sm:$0xff]  }
 0x2a5   : > { %3790 = vmatmul.mubr.bf16.gmra.mrb[72].mxu0 %v13042_v2  ;;  %4072 = vmatprep.mubr.bf16.mxu1 %v13828_v51 }
 0x2a6   : > { %3799 = vmatprep.mubr.bf16.mxu0 %v13046_v5 }
 0x2a7   : > { %v15638_v57 = vpop.f32.mrb[64].mxu1 }
 0x2a8   : > { %19977 = vst [vmem:[#allocation22_spill] sm:$0xff] %v15638_v57  ;;  %v15640_v48 = vpop.f32.mrb[65].mxu1 }
 0x2a9   : > { %19978 = vst [vmem:[#allocation23_spill] sm:$0xff] %v15640_v48  ;;  %v15645_v2 = vpop.f32.mrb[66].mxu1 }
 0x2aa   : > { %19979 = vst [vmem:[#allocation24_spill] sm:$0xff] %v15645_v2  ;;  %v15650_v5 = vpop.f32.mrb[67].mxu1  ;;  %v13054_v2 = vld [vmem:[%s19790_s0 + $0x3d0] ss:$24 sps:$4 sm:$0xff]  }
 0x2ab   : > { %19980 = vst [vmem:[#allocation25_spill] sm:$0xff] %v15650_v5  ;;  %v13055_v5 = vld [vmem:[%s19790_s0 + $0x404] ss:$24 sps:$4 sm:$0xff]  }
 0x2ac   : > { %4073 = vmatmul.mubr.bf16.gmra.mrb[172].mxu1 %v15134_v16 }
 0x2ad   : > { %3800 = vmatmul.mubr.bf16.gmra.mrb[76].mxu0 %v13048_v41  ;;  %4082 = vmatprep.mubr.bf16.mxu1 %v15142_v18 }
 0x2ae   : > { %3809 = vmatprep.mubr.bf16.mxu0 %v13052_v35  ;;  %v13057_v35 = vld [vmem:[%s19790_s0 + $0x400] ss:$24 sps:$4 sm:$0xff]  }
 0x2af   : > { %v15654_v51 = vpop.f32.mrb[68].mxu1 }
 0x2b0   : > { %v15656_v48 = vpop.f32.mrb[69].mxu1 }
 0x2b1   : > { %v15661_v57 = vpop.f32.mrb[70].mxu1 }
 0x2b2   : > { %19981 = vst [vmem:[#allocation26_spill] sm:$0xff] %v15661_v57  ;;  %v15666_v41 = vpop.f32.mrb[71].mxu1 }
 0x2b3   : > { %19982 = vst [vmem:[#allocation27_spill] sm:$0xff] %v15666_v41  ;;  %v13061_v41 = vld [vmem:[%s19790_s0 + $0x434] ss:$24 sps:$4 sm:$0xff]  }
 0x2b4   : > { %4083 = vmatmul.mubr.bf16.gmra.mrb[176].mxu1 %v15152_v20 }
 0x2b5   : > { %3810 = vmatmul.mubr.bf16.gmra.mrb[80].mxu0 %v13054_v2  ;;  %4092 = vmatprep.mubr.bf16.mxu1 %v15160_v22 }
 0x2b6   : > { %3819 = vmatprep.mubr.bf16.mxu0 %v13055_v5  ;;  %v13063_v5 = vld [vmem:[%s19790_s0 + $0x430] ss:$24 sps:$4 sm:$0xff]  }
 0x2b7   : > { %v15670_v16 = vpop.f32.mrb[72].mxu1 }
 0x2b8   : > { %v15672_v18 = vpop.f32.mrb[73].mxu1 }
 0x2b9   : > { %v15677_v57 = vpop.f32.mrb[74].mxu1 }
 0x2ba   : > { %19983 = vst [vmem:[#allocation28_spill] sm:$0xff] %v15677_v57  ;;  %v15682_v2 = vpop.f32.mrb[75].mxu1 }
 0x2bb   : > { %19984 = vst [vmem:[#allocation29_spill] sm:$0xff] %v15682_v2  ;;  %v13067_v2 = vld [vmem:[%s19790_s0 + $0x464] ss:$24 sps:$4 sm:$0xff]  }
 0x2bc   : > { %4093 = vmatmul.mubr.bf16.gmra.mrb[180].mxu1 %v15170_v24  ;;  %v1331_v24 = vlaneseq }
 0x2bd   : > { %3820 = vmatmul.mubr.bf16.gmra.mrb[84].mxu0 %v13057_v35  ;;  %4102 = vmatprep.mubr.bf16.mxu1 %v15178_v26 }
 0x2be   : > { %3829 = vmatprep.mubr.bf16.mxu0 %v13061_v41 }
 0x2bf   : > { %v15686_v20 = vpop.f32.mrb[76].mxu1 }
 0x2c0   : > { %19985 = vst [vmem:[#allocation30_spill] sm:$0xff] %v15686_v20  ;;  %v15688_v22 = vpop.f32.mrb[77].mxu1 }
 0x2c1   : > { %19986 = vst [vmem:[#allocation31_spill] sm:$0xff] %v15688_v22  ;;  %v15693_v57 = vpop.f32.mrb[78].mxu1  ;;  %v15709_v22 = vshrl.u32 %v1331_v24, 7 }
 0x2c2   : > { %19987 = vst [vmem:[#allocation32_spill] sm:$0xff] %v15693_v57  ;;  %v15698_v35 = vpop.f32.mrb[79].mxu1  ;;  %v13072_v57 = vld [vmem:[%s19790_s0 + $0x460] ss:$24 sps:$4 sm:$0xff]  }
 0x2c3   : > { %19988 = vst [vmem:[#allocation33_spill] sm:$0xff] %v15698_v35  ;;  %19991 = vst [vmem:[#allocation36_spill] sm:$0xff] %v15709_v22 }
 0x2c4   : > { %4103 = vmatmul.mubr.bf16.gmra.mrb[184].mxu1 %v15188_v28 }
 0x2c5   : > { %3830 = vmatmul.mubr.bf16.gmra.mrb[88].mxu0 %v13063_v5  ;;  %4112 = vmatprep.mubr.bf16.mxu1 %v15196_v30  ;;  %v19796_v30 = vsub.s32 0, %v15709_v22  ;;  %v13829_v5 = vld [vmem:[%s19790_s0 + $0xc] ss:$24 sps:$4 sm:$0xff]  }
 0x2c6   : > { %3839 = vmatprep.mubr.bf16.mxu0 %v13067_v2  ;;  %v19797_v2 = vsub.s32 1, %v15709_v22  ;;  %v13091_v22 = vld [vmem:[%s14477_s29 + $0x428] ss:$16 sps:$4 sm:$0xff]  }
 0x2c7   : > { %v15702_v26 = vpop.f32.mrb[80].mxu1 }
 0x2c8   : > { %19989 = vst [vmem:[#allocation34_spill] sm:$0xff] %v15702_v26  ;;  %v15704_v41 = vpop.f32.mrb[81].mxu1  ;;  %v13079_v26 = vld [vmem:[%s14477_s29 + $0x408] ss:$16 sps:$4 sm:$0xff]  }
 0x2c9   : > { %19990 = vst [vmem:[#allocation35_spill] sm:$0xff] %v15704_v41  ;;  %v15711_v35 = vpop.f32.mrb[82].mxu1  ;;  %v1329_v41 = vld [vmem:[%s14470_s16] sm:$0xf] }
 0x2ca   : > { %19992 = vst [vmem:[#allocation37_spill] sm:$0xff] %v15711_v35  ;;  %v15713_v28 = vpop.f32.mrb[83].mxu1 }
 0x2cb   : > { %19993 = vst [vmem:[#allocation38_spill] sm:$0xff] %v15713_v28 }
 0x2cc   : > { %4113 = vmatmul.mubr.bf16.gmra.mrb[188].mxu1 %v15206_v32  ;;  %v15732_v32 = vrot.slane %v1329_v41, %v19797_v2  ;;  %v13831_v2 = vld [vmem:[%s19790_s0 + $0x3c] ss:$24 sps:$4 sm:$0xff]  }
 0x2cd   : > { %3840 = vmatmul.mubr.bf16.gmra.mrb[92].mxu0 %v13072_v57  ;;  %4155 = vmatprep.mubr.bf16.mxu1 %v13829_v5  ;;  %v15728_v57 = vrot.slane %v1329_v41, %v19796_v30  ;;  %v13093_v5 = vld [vmem:[%s14477_s29 + $0x42c] ss:$16 sps:$4 sm:$0xff]  }
 0x2ce   : > { %v15749_v41 = vadd.f32 %v15268_v61, %v15732_v32  ;;  %v15769_v61 = vadd.f32 %v15292_v9, %v15732_v32 }
 0x2cf   : > { %v15722_v24 = vpop.f32.mrb[84].mxu1  ;;  %v15745_v30 = vadd.f32 %v15265_v59, %v15728_v57  ;;  %v15765_v59 = vadd.f32 %v15289_v7, %v15728_v57  ;;  %v15786_v7 = vadd.f32 %v15316_v27, %v15732_v32 }
 0x2d0   : > { %19994 = vst [vmem:[#allocation39_spill] sm:$0xff] %v15722_v24  ;;  %v15724_v35 = vpop.f32.mrb[85].mxu1  ;;  %v13830_v24 = vld [vmem:[%s19790_s0 + $0x8] ss:$24 sps:$4 sm:$0xff]  }
 0x2d1   : > { %v15734_v28 = vpop.f32.mrb[86].mxu1  ;;  %19996 = vst [vmem:[#allocation41_spill] sm:$0xff] %v15786_v7  ;;  %v15810_v7 = vadd.f32 %v15345_v44, %v15728_v57  ;;  %v15829_v44 = vadd.f32 %v15369_v56, %v15728_v57  ;;  %v15848_v56 = vadd.f32 %v15396_v15, %v15728_v57  ;;  %v15868_v15 = vadd.f32 %v15426_v47, %v15732_v32 }
 0x2d2   : > { %v15737_v20 = vpop.f32.mrb[87].mxu1  ;;  %v15887_v47 = vadd.f32 %v15450_v3, %v15732_v32  ;;  %v15907_v3 = vadd.f32 %v15474_v36, %v15732_v32  ;;  %v15928_v36 = vadd.f32 %v15509_v29, %v15728_v57 }
 0x2d3   : > { %19995 = vst [vmem:[#allocation40_spill] sm:$0xff] %v15737_v20  ;;  %v15757_v20 = vadd.f32 %v15273_v63, %v15728_v57  ;;  %v15778_v63 = vadd.f32 %v15302_v13, %v15732_v32  ;;  %v15800_v13 = vadd.f32 %v15337_v40, %v15728_v57  ;;  %v15822_v40 = vadd.f32 %v15364_v54, %v15732_v32 }
 0x2d4   : > { %4156 = vmatmul.mubr.bf16.vlgmr.msra.gmra.mrb[96].mxu1 %v13830_v24  ;;  %v15761_v24 = vadd.f32 %v15278_v1, %v15732_v32  ;;  %v15782_v1 = vadd.f32 %v15313_v23, %v15728_v57  ;;  %v15804_v23 = vadd.f32 %v15340_v42, %v15732_v32  ;;  %v15841_v54 = vadd.f32 %v15391_v12, %v15732_v32 }
 0x2d5   : > { %4397 = vmatpush1.bf16.msra.mxu1 %v13079_v26  ;;  %4165 = vmatprep.mubr.bf16.mxu1 %v13831_v2  ;;  %v13105_v26 = vld [vmem:[%s14477_s29 + $0x44c] ss:$16 sps:$4 sm:$0xff]   ;;  %v15774_v2 = vadd.f32 %v15297_v11, %v15728_v57  ;;  %v15796_v11 = vadd.f32 %v15326_v34, %v15732_v32  ;;  %v15818_v34 = vadd.f32 %v15361_v52, %v15728_v57 }
 0x2d6   : > { %4398 = vmatprep.subr.bf16.mxu1 %v13093_v5  ;;  %v15792_v5 = vadd.f32 %v15321_v31, %v15728_v57  ;;  %19997 = vst [vmem:[#allocation42_spill] sm:$0xff] %v15804_v23  ;;  %v15814_v31 = vadd.f32 %v15350_v46, %v15732_v32  ;;  %19998 = vst [vmem:[#allocation43_spill] sm:$0xff] %v15822_v40  ;;  %v13103_v23 = vld [vmem:[%s14477_s29 + $0x448] ss:$16 sps:$4 sm:$0xff]   ;;  %v15833_v46 = vadd.f32 %v15374_v58, %v15732_v32 }
 0x2d7   : > { %v15788_v9 = vpop.f32.mrb[88].mxu1  ;;  %v15837_v52 = vadd.f32 %v15388_v8, %v15728_v57  ;;  %v15852_v58 = vadd.f32 %v15401_v19, %v15732_v32  ;;  %v15856_v8 = vadd.f32 %v15413_v37, %v15728_v57  ;;  %v15860_v12 = vadd.f32 %v15416_v39, %v15732_v32  ;;  %v13832_v39 = vld [vmem:[%s19790_s0 + $0x38] ss:$24 sps:$4 sm:$0xff]   ;;  %20001 = vst [vmem:[#allocation46_spill] sm:$0xff] %v15928_v36  ;;  %v20006_v36 = vld [vmem:[#allocation6_spill] sm:$0xff] }
 0x2d8   : > { %v15806_v27 = vpop.f32.mrb[89].mxu1  ;;  %v15872_v19 = vadd.f32 %v15437_v55, %v15728_v57  ;;  %v15876_v37 = vadd.f32 %v15440_v60, %v15732_v32  ;;  %v15891_v55 = vadd.f32 %v15461_v17, %v15728_v57  ;;  %v13833_v60 = vld [vmem:[%s19790_s0 + $0x6c] ss:$24 sps:$4 sm:$0xff]   ;;  %v15911_v17 = vadd.f32 %v15485_v50, %v15728_v57 }
 0x2d9   : > { %v15824_v42 = vpop.f32.mrb[90].mxu1  ;;  %4399 = vmatpush1.bf16.msra.mxu1 %v13091_v22  ;;  %v13117_v22 = vld [vmem:[%s14477_s29 + $0x46c] ss:$16 sps:$4 sm:$0xff]  }
 0x2da   : > { %v15843_v40 = vpop.f32.mrb[91].mxu1  ;;  %4400 = vmatprep.subr.bf16.mxu1 %v13105_v26  ;;  %v15864_v26 = vadd.f32 %v15421_v43, %v15728_v57  ;;  %19999 = vst [vmem:[#allocation44_spill] sm:$0xff] %v15876_v37  ;;  %v15883_v43 = vadd.f32 %v15445_v0, %v15728_v57  ;;  %v13115_v37 = vld [vmem:[%s14477_s29 + $0x468] ss:$16 sps:$4 sm:$0xff]   ;;  %v15903_v0 = vadd.f32 %v15469_v33, %v15728_v57 }
 0x2db   : > { %v15924_v33 = vadd.f32 %v15498_v4, %v15732_v32  ;;  %v15946_v4 = vadd.f32 %v15533_v10, %v15728_v57 }
 0x2dc   : > { %4166 = vmatmul.mubr.bf16.gmra.mrb[100].mxu1 %v13832_v39  ;;  %v15899_v39 = vadd.f32 %v15464_v25, %v15732_v32  ;;  %v15920_v25 = vadd.f32 %v15493_v62, %v15728_v57  ;;  %v15942_v62 = vadd.f32 %v15522_v49, %v15732_v32  ;;  %v15964_v49 = vadd.f32 %v15557_v21, %v15728_v57 }
 0x2dd   : > { %4175 = vmatprep.mubr.bf16.mxu1 %v13833_v60  ;;  %4401 = vmatpush1.bf16.msra.mxu1 %v13103_v23  ;;  %v13129_v60 = vld [vmem:[%s14477_s29 + $0x48c] ss:$16 sps:$4 sm:$0xff]   ;;  %v15916_v23 = vadd.f32 %v15488_v53, %v15732_v32  ;;  %20000 = vst [vmem:[#allocation45_spill] sm:$0xff] %v15924_v33  ;;  %v15938_v53 = vadd.f32 %v15517_v45, %v15728_v57  ;;  %20005 = vst [vmem:[#allocation50_spill] sm:$0xff] %v15946_v4  ;;  %v20010_v45 = vld [vmem:[#allocation8_spill] sm:$0xff] }
 0x2de   : > { %4402 = vmatprep.subr.bf16.mxu1 %v13117_v22  ;;  %v15934_v22 = vadd.f32 %v15512_v38, %v15732_v32  ;;  %20004 = vst [vmem:[#allocation49_spill] sm:$0xff] %v15942_v62  ;;  %v15952_v33 = vadd.f32 %v20006_v36, %v15732_v32  ;;  %v20008_v38 = vld [vmem:[#allocation7_spill] sm:$0xff]  ;;  %20012 = vst [vmem:[#allocation51_spill] sm:$0xff] %v15964_v49  ;;  %v15971_v36 = vadd.f32 %v15560_v14, %v15732_v32  ;;  %v20030_v62 = vld [vmem:[#allocation17_spill] sm:$0xff] }
 0x2df   : > { %v15930_v50 = vpop.f32.mrb[92].mxu1  ;;  %20003 = vst [vmem:[#allocation48_spill] sm:$0xff] %v15938_v53  ;;  %v15960_v53 = vadd.f32 %v20010_v45, %v15732_v32  ;;  %v13127_v4 = vld [vmem:[%s14477_s29 + $0x488] ss:$16 sps:$4 sm:$0xff]   ;;  %v15979_v45 = vadd.f32 %v15570_v6, %v15732_v32 }
 0x2e0   : > { %20002 = vst [vmem:[#allocation47_spill] sm:$0xff] %v15934_v22  ;;  %v15948_v29 = vpop.f32.mrb[93].mxu1  ;;  %20007 = vst [vmem:[#allocation6_spill] sm:$0xff] %v15952_v33  ;;  %v15956_v22 = vadd.f32 %v20008_v38, %v15728_v57  ;;  %v20014_v33 = vld [vmem:[#allocation9_spill] sm:$0xff] }
 0x2e1   : > { %20011 = vst [vmem:[#allocation8_spill] sm:$0xff] %v15960_v53  ;;  %v15966_v10 = vpop.f32.mrb[94].mxu1  ;;  %4403 = vmatpush1.bf16.msra.mxu1 %v13115_v37  ;;  %20013 = vst [vmem:[#allocation52_spill] sm:$0xff] %v15971_v36  ;;  %v15975_v38 = vadd.f32 %v20014_v33, %v15728_v57  ;;  %v20017_v53 = vld [vmem:[#allocation10_spill] sm:$0xff]  ;;  %v13135_v37 = vld [vmem:[%s14477_s29 + $0x4ac] ss:$16 sps:$4 sm:$0xff]  }
 0x2e2   : > { %20009 = vst [vmem:[#allocation7_spill] sm:$0xff] %v15956_v22  ;;  %20016 = vst [vmem:[#allocation53_spill] sm:$0xff] %v15979_v45  ;;  %v15983_v21 = vadd.f32 %v20017_v53, %v15728_v57  ;;  %v15985_v49 = vpop.f32.mrb[95].mxu1  ;;  %4404 = vmatprep.subr.bf16.mxu1 %v13129_v60  ;;  %v20019_v22 = vld [vmem:[#allocation11_spill] sm:$0xff]  ;;  %v20021_v36 = vld [vmem:[#allocation12_spill] sm:$0xff] }
 0x2e3   : > { %20015 = vst [vmem:[#allocation9_spill] sm:$0xff] %v15975_v38  ;;  %v15990_v14 = vadd.f32 %v20019_v22, %v15732_v32  ;;  %v15994_v33 = vadd.f32 %v20021_v36, %v15728_v57  ;;  %v20023_v6 = vld [vmem:[#allocation13_spill] sm:$0xff]  ;;  %v20024_v53 = vld [vmem:[#allocation14_spill] sm:$0xff]  ;;  %v20026_v60 = vld [vmem:[#allocation15_spill] sm:$0xff]  ;;  %v16014_v36 = vadd.f32 %v20030_v62, %v15732_v32 }
 0x2e4   : > { %20018 = vst [vmem:[#allocation10_spill] sm:$0xff] %v15983_v21  ;;  %v15998_v45 = vadd.f32 %v20023_v6, %v15732_v32  ;;  %v16002_v21 = vadd.f32 %v20024_v53, %v15728_v57  ;;  %v16006_v38 = vadd.f32 %v20026_v60, %v15732_v32  ;;  %v20028_v22 = vld [vmem:[#allocation16_spill] sm:$0xff]  ;;  %v13834_v53 = vld [vmem:[%s19790_s0 + $0x68] ss:$24 sps:$4 sm:$0xff]   ;;  %v20038_v62 = vld [vmem:[#allocation21_spill] sm:$0xff] }
 0x2e5   : > { %20020 = vst [vmem:[#allocation11_spill] sm:$0xff] %v15990_v14  ;;  %20022 = vst [vmem:[#allocation12_spill] sm:$0xff] %v15994_v33  ;;  %v16010_v14 = vadd.f32 %v20028_v22, %v15728_v57  ;;  %v20032_v33 = vld [vmem:[#allocation18_spill] sm:$0xff]  ;;  %4176 = vmatmul.mubr.bf16.gmra.mrb[104].mxu1 %v13834_v53  ;;  %v20034_v60 = vld [vmem:[#allocation19_spill] sm:$0xff] }
 0x2e6   : > { %20025 = vst [vmem:[#allocation13_spill] sm:$0xff] %v16002_v21  ;;  %20027 = vst [vmem:[#allocation14_spill] sm:$0xff] %v16006_v38  ;;  %v16018_v6 = vadd.f32 %v20032_v33, %v15728_v57  ;;  %v16025_v38 = vadd.f32 %v20034_v60, %v15732_v32  ;;  %v20036_v22 = vld [vmem:[#allocation20_spill] sm:$0xff]  ;;  %4405 = vmatpush1.bf16.msra.mxu1 %v13127_v4  ;;  %v20040_v53 = vld [vmem:[#allocation22_spill] sm:$0xff]  ;;  %v16058_v4 = vadd.f32 %v15654_v51, %v15728_v57 }
 0x2e7   : > { %20029 = vst [vmem:[#allocation15_spill] sm:$0xff] %v16010_v14  ;;  %20031 = vst [vmem:[#allocation16_spill] sm:$0xff] %v16014_v36  ;;  %v16029_v14 = vadd.f32 %v20036_v22, %v15728_v57  ;;  %v16033_v36 = vadd.f32 %v20038_v62, %v15732_v32  ;;  %v13835_v33 = vld [vmem:[%s19790_s0 + $0x9c] ss:$24 sps:$4 sm:$0xff]   ;;  %v16041_v21 = vadd.f32 %v20040_v53, %v15728_v57  ;;  %v20042_v60 = vld [vmem:[#allocation23_spill] sm:$0xff]  ;;  %4406 = vmatprep.subr.bf16.mxu1 %v13135_v37 }
 0x2e8   : > { %20033 = vst [vmem:[#allocation17_spill] sm:$0xff] %v16018_v6  ;;  %20035 = vst [vmem:[#allocation18_spill] sm:$0xff] %v16025_v38  ;;  %4185 = vmatprep.mubr.bf16.mxu1 %v13835_v33  ;;  %v13133_v6 = vld [vmem:[%s14477_s29 + $0x4a8] ss:$16 sps:$4 sm:$0xff]   ;;  %v16045_v38 = vadd.f32 %v20042_v60, %v15732_v32  ;;  %v20044_v22 = vld [vmem:[#allocation24_spill] sm:$0xff]  ;;  %v16062_v53 = vadd.f32 %v15656_v48, %v15732_v32  ;;  %v16074_v37 = vadd.f32 %v15670_v16, %v15728_v57 }
 0x2e9   : > { %20037 = vst [vmem:[#allocation19_spill] sm:$0xff] %v16029_v14  ;;  %20039 = vst [vmem:[#allocation20_spill] sm:$0xff] %v16033_v36  ;;  %v16049_v14 = vadd.f32 %v20044_v22, %v15728_v57  ;;  %v20046_v62 = vld [vmem:[#allocation25_spill] sm:$0xff]  ;;  %v20050_v60 = vld [vmem:[#allocation26_spill] sm:$0xff]  ;;  %v16078_v51 = vadd.f32 %v15672_v18, %v15732_v32 }
 0x2ea   : > { %20041 = vst [vmem:[#allocation21_spill] sm:$0xff] %v16041_v21  ;;  %20043 = vst [vmem:[#allocation22_spill] sm:$0xff] %v16045_v38  ;;  %v16053_v36 = vadd.f32 %v20046_v62, %v15732_v32  ;;  %v13138_v33 = vld [vmem:[%s14477_s29 + $0x4cc] ss:$16 sps:$4 sm:$0xff]   ;;  %v16066_v38 = vadd.f32 %v20050_v60, %v15728_v57  ;;  %v3611_v62 = vpop.f32.mrb[0].mxu0  ;;  %v20056_v48 = vld [vmem:[#allocation28_spill] sm:$0xff]  ;;  %4407 = vmatpush1.bf16.msra.mxu1 %v13133_v6 }
 0x2eb   : > { %20045 = vst [vmem:[#allocation23_spill] sm:$0xff] %v16049_v14  ;;  %20048 = vst [vmem:[#allocation25_spill] sm:$0xff] %v16058_v4  ;;  %v20052_v22 = vld [vmem:[#allocation27_spill] sm:$0xff]  ;;  %v16085_v60 = vadd.f32 %v3611_v62, %v15745_v30  ;;  %v20060_v16 = vld [vmem:[#allocation30_spill] sm:$0xff]  ;;  %4408 = vmatprep.subr.bf16.mxu1 %v13138_v33 }
 0x2ec   : > { %20047 = vst [vmem:[#allocation24_spill] sm:$0xff] %v16053_v36  ;;  %20049 = vst [vmem:[#allocation54_spill] sm:$0xff] %v16062_v53  ;;  %v16070_v14 = vadd.f32 %v20052_v22, %v15732_v32  ;;  %v16082_v53 = vadd.f32 %v20056_v48, %v15728_v57  ;;  %v20058_v22 = vld [vmem:[#allocation29_spill] sm:$0xff]  ;;  %v20062_v18 = vld [vmem:[#allocation31_spill] sm:$0xff] }
 0x2ed   : > { %20051 = vst [vmem:[#allocation26_spill] sm:$0xff] %v16066_v38  ;;  %20054 = vst [vmem:[#allocation55_spill] sm:$0xff] %v16074_v37  ;;  %v3613_v38 = vpop.f32.mrb[1].mxu0  ;;  %v16093_v37 = vadd.f32 %v20060_v16, %v15728_v57  ;;  %v13136_v30 = vld [vmem:[%s14477_s29 + $0x4c8] ss:$16 sps:$4 sm:$0xff]   ;;  %v20064_v62 = vld [vmem:[#allocation32_spill] sm:$0xff]  ;;  %v4669_v16 = vmul.f32 %v16085_v60, %v16085_v60 }
 0x2ee   : > { %20053 = vst [vmem:[#allocation27_spill] sm:$0xff] %v16070_v14  ;;  %20055 = vst [vmem:[#allocation56_spill] sm:$0xff] %v16078_v51  ;;  %v16089_v14 = vadd.f32 %v20058_v22, %v15732_v32  ;;  %v16097_v51 = vadd.f32 %v20062_v18, %v15732_v32  ;;  %v16100_v48 = vadd.f32 %v3613_v38, %v15749_v41  ;;  %v20066_v22 = vld [vmem:[#allocation33_spill] sm:$0xff]  ;;  %v20068_v38 = vld [vmem:[#allocation34_spill] sm:$0xff]  ;;  %4409 = vmatpush1.bf16.msra.mxu1 %v13136_v30 }
 0x2ef   : > { %20057 = vst [vmem:[#allocation28_spill] sm:$0xff] %v16082_v53  ;;  %20061 = vst [vmem:[#allocation30_spill] sm:$0xff] %v16093_v37  ;;  %v3615_v53 = vpop.f32.mrb[2].mxu0  ;;  %v16105_v4 = vadd.f32 %v20064_v62, %v15728_v57  ;;  %v13141_v41 = vld [vmem:[%s14477_s29 + $0x4ec] ss:$16 sps:$4 sm:$0xff]   ;;  %v16119_v6 = vadd.f32 %v20068_v38, %v15728_v57  ;;  %v20074_v33 = vld [vmem:[#allocation38_spill] sm:$0xff]  ;;  %v4861_v38 = vmul.f32 %v16085_v60, %v4669_v16 }
 0x2f0   : > { %20059 = vst [vmem:[#allocation29_spill] sm:$0xff] %v16089_v14  ;;  %20063 = vst [vmem:[#allocation31_spill] sm:$0xff] %v16097_v51  ;;  %v16109_v14 = vadd.f32 %v20066_v22, %v15732_v32  ;;  %v16114_v18 = vadd.f32 %v3615_v53, %v15757_v20  ;;  %v3617_v51 = vpop.f32.mrb[3].mxu0  ;;  %v20070_v62 = vld [vmem:[#allocation35_spill] sm:$0xff]  ;;  %v4670_v22 = vmul.f32 %v16100_v48, %v16100_v48  ;;  %v20072_v20 = vld [vmem:[#allocation37_spill] sm:$0xff]  ;;  %4410 = vmatprep.subr.bf16.mxu1 %v13141_v41 }
 0x2f1   : > { %20065 = vst [vmem:[#allocation32_spill] sm:$0xff] %v16105_v4  ;;  %20069 = vst [vmem:[#allocation34_spill] sm:$0xff] %v16119_v6  ;;  %v16123_v4 = vadd.f32 %v20070_v62, %v15732_v32  ;;  %v16132_v53 = vadd.f32 %v20072_v20, %v15728_v57  ;;  %v16136_v37 = vadd.f32 %v20074_v33, %v15732_v32  ;;  %v13837_v16 = vld [vmem:[%s19790_s0 + $0xcc] ss:$24 sps:$4 sm:$0xff]   ;;  %v20080_v6 = vld [vmem:[#allocation40_spill] sm:$0xff] }
 0x2f2   : > { %20067 = vst [vmem:[#allocation33_spill] sm:$0xff] %v16109_v14  ;;  %v16128_v14 = vadd.f32 %v3617_v51, %v15761_v24  ;;  %v4673_v62 = vmul.f32 %v16114_v18, %v16114_v18  ;;  %v20076_v24 = vld [vmem:[#allocation39_spill] sm:$0xff]  ;;  %v4862_v20 = vmul.f32 %v16100_v48, %v4670_v22  ;;  %v16167_v36 = vadd.f32 %v20080_v6, %v15732_v32 }
 0x2f3   : > { %20071 = vst [vmem:[#allocation35_spill] sm:$0xff] %v16123_v4  ;;  %20073 = vst [vmem:[#allocation37_spill] sm:$0xff] %v16132_v53  ;;  %v13836_v4 = vld [vmem:[%s19790_s0 + $0x98] ss:$24 sps:$4 sm:$0xff]   ;;  %v16146_v51 = vadd.f32 %v20076_v24, %v15728_v57  ;;  %v16157_v53 = vadd.f32 %v15724_v35, %v15732_v32  ;;  %v5053_v24 = vmul.f32 0.044715, %v4861_v38  ;;  %v16171_v30 = vadd.f32 %v15788_v9, %v15728_v57 }
 0x2f4   : > { %20075 = vst [vmem:[#allocation38_spill] sm:$0xff] %v16136_v37  ;;  %4186 = vmatmul.mubr.bf16.gmra.mrb[108].mxu1 %v13836_v4  ;;  %v4674_v33 = vmul.f32 %v16128_v14, %v16128_v14  ;;  %v13139_v37 = vld [vmem:[%s14477_s29 + $0x4e8] ss:$16 sps:$4 sm:$0xff]   ;;  %v16161_v4 = vadd.f32 %v15734_v28, %v15728_v57  ;;  %v4865_v22 = vmul.f32 %v16114_v18, %v4673_v62  ;;  %20081 = vst [vmem:[#allocation40_spill] sm:$0xff] %v16167_v36 }
 0x2f5   : > { %20077 = vst [vmem:[#allocation39_spill] sm:$0xff] %v16146_v51  ;;  %4195 = vmatprep.mubr.bf16.mxu1 %v13837_v16  ;;  %20078 = vst [vmem:[#allocation57_spill] sm:$0xff] %v16157_v53  ;;  %v13144_v51 = vld [vmem:[%s14477_s29 + $0x50c] ss:$16 sps:$4 sm:$0xff]   ;;  %v3621_v16 = vpop.f32.mrb[4].mxu0  ;;  %v16176_v28 = vadd.f32 %v15806_v27, %v15732_v32  ;;  %v5245_v41 = vadd.f32 %v16085_v60, %v5053_v24  ;;  %v16184_v9 = vadd.f32 %v15824_v42, %v15728_v57 }
 0x2f6   : > { %20079 = vst [vmem:[#allocation58_spill] sm:$0xff] %v16161_v4  ;;  %20082 = vst [vmem:[#allocation59_spill] sm:$0xff] %v16171_v30  ;;  %v4866_v35 = vmul.f32 %v16128_v14, %v4674_v33  ;;  %v5054_v53 = vmul.f32 0.044715, %v4862_v20  ;;  %v5057_v38 = vmul.f32 0.044715, %v4865_v22  ;;  %v16180_v6 = vadd.f32 %v3621_v16, %v15765_v59  ;;  %4411 = vmatpush1.bf16.msra.mxu1 %v13139_v37 }
 0x2f7   : > { %20083 = vst [vmem:[#allocation60_spill] sm:$0xff] %v16176_v28  ;;  %v3623_v62 = vpop.f32.mrb[5].mxu0  ;;  %20084 = vst [vmem:[#allocation61_spill] sm:$0xff] %v16184_v9  ;;  %v13142_v28 = vld [vmem:[%s14477_s29 + $0x508] ss:$16 sps:$4 sm:$0xff]   ;;  %4412 = vmatprep.subr.bf16.mxu1 %v13144_v51 }
 0x2f8   : > { %v16187_v33 = vadd.f32 %v3623_v62, %v15769_v61  ;;  %v3625_v20 = vpop.f32.mrb[6].mxu0  ;;  %v5058_v30 = vmul.f32 0.044715, %v4866_v35  ;;  %v5246_v27 = vadd.f32 %v16100_v48, %v5054_v53  ;;  %v5437_v24 = vmul.f32 0.7978846, %v5245_v41  ;;  %v20094_v36 = vld [vmem:[#allocation43_spill] sm:$0xff] }
 0x2f9   : > { %v5249_v22 = vadd.f32 %v16114_v18, %v5057_v38  ;;  %v4677_v59 = vmul.f32 %v16180_v6, %v16180_v6  ;;  %v16195_v16 = vadd.f32 %v3625_v20, %v15774_v2  ;;  %v3627_v42 = vpop.f32.mrb[7].mxu0  ;;  %v13147_v9 = vld [vmem:[%s14477_s29 + $0x52c] ss:$16 sps:$4 sm:$0xff]   ;;  %v13838_v51 = vld [vmem:[%s19790_s0 + $0xc8] ss:$24 sps:$4 sm:$0xff]  }
 0x2fa   : > { %v4678_v61 = vmul.f32 %v16187_v33, %v16187_v33  ;;  %v16201_v35 = vadd.f32 %v3627_v42, %v15778_v63  ;;  %v5250_v37 = vadd.f32 %v16128_v14, %v5058_v30  ;;  %v5438_v53 = vmul.f32 0.7978846, %v5246_v27  ;;  %v13839_v30 = vld [vmem:[%s19790_s0 + $0xfc] ss:$24 sps:$4 sm:$0xff]   ;;  %4413 = vmatpush1.bf16.msra.mxu1 %v13142_v28  ;;  %v13145_v27 = vld [vmem:[%s14477_s29 + $0x528] ss:$16 sps:$4 sm:$0xff]  }
 0x2fb   : > { %13406 = vtanh.f32 %v5437_v24  ;;  %v5441_v41 = vmul.f32 0.7978846, %v5249_v22  ;;  %v4869_v38 = vmul.f32 %v16180_v6, %v4677_v59  ;;  %v4681_v2 = vmul.f32 %v16195_v16, %v16195_v16  ;;  %4414 = vmatprep.subr.bf16.mxu1 %v13147_v9  ;;  %v13150_v42 = vld [vmem:[%s14477_s29 + $0x54c] ss:$16 sps:$4 sm:$0xff]  }
 0x2fc   : > { %4196 = vmatmul.mubr.bf16.gmra.mrb[112].mxu1 %v13838_v51  ;;  %v4870_v63 = vmul.f32 %v16187_v33, %v4678_v61  ;;  %v4682_v62 = vmul.f32 %v16201_v35, %v16201_v35  ;;  %v5442_v20 = vmul.f32 0.7978846, %v5250_v37  ;;  %13408 = vtanh.f32 %v5438_v53  ;;  %v3631_v53 = vpop.f32.mrb[8].mxu0  ;;  %v20089_v51 = vld [vmem:[#allocation41_spill] sm:$0xff] }
 0x2fd   : > { %4205 = vmatprep.mubr.bf16.mxu1 %v13839_v30  ;;  %v16219_v24 = vadd.f32 %v15843_v40, %v15732_v32  ;;  %13410 = vtanh.f32 %v5441_v41  ;;  %v4873_v22 = vmul.f32 %v16195_v16, %v4681_v2  ;;  %v5061_v59 = vmul.f32 0.044715, %v4869_v38  ;;  %v3633_v38 = vpop.f32.mrb[9].mxu0 }
 0x2fe   : > { %v16225_v61 = vadd.f32 %v15930_v50, %v15728_v57  ;;  %v4874_v37 = vmul.f32 %v16201_v35, %v4682_v62  ;;  %13412 = vtanh.f32 %v5442_v20  ;;  %v5062_v28 = vmul.f32 0.044715, %v4870_v63  ;;  %v3635_v30 = vpop.f32.mrb[10].mxu0  ;;  %4415 = vmatpush1.bf16.msra.mxu1 %v13145_v27 }
 0x2ff   : > { %20085 = vst [vmem:[#allocation62_spill] sm:$0xff] %v16219_v24  ;;  %v16230_v40 = vadd.f32 %v15948_v29, %v15732_v32  ;;  %v16233_v41 = vadd.f32 %v3631_v53, %v15782_v1  ;;  %v5065_v9 = vmul.f32 0.044715, %v4873_v22  ;;  %v5253_v2 = vadd.f32 %v16180_v6, %v5061_v59  ;;  %v13148_v29 = vld [vmem:[%s14477_s29 + $0x548] ss:$16 sps:$4 sm:$0xff]   ;;  %v3637_v59 = vpop.f32.mrb[11].mxu0  ;;  %4416 = vmatprep.subr.bf16.mxu1 %v13150_v42 }
 0x300   : > { %20086 = vst [vmem:[#allocation63_spill] sm:$0xff] %v16225_v61  ;;  %v16238_v50 = vadd.f32 %v15966_v10, %v15728_v57  ;;  %v16241_v62 = vadd.f32 %v3633_v38, %v20089_v51  ;;  %v5066_v63 = vmul.f32 0.044715, %v4874_v37  ;;  %v5254_v20 = vadd.f32 %v16187_v33, %v5062_v28  ;;  %v13841_v51 = vld [vmem:[%s19790_s0 + $0x12c] ss:$24 sps:$4 sm:$0xff]  }
 0x301   : > { %20087 = vst [vmem:[#allocation64_spill] sm:$0xff] %v16230_v40  ;;  %v4685_v1 = vmul.f32 %v16233_v41, %v16233_v41  ;;  %v16248_v22 = vadd.f32 %v3635_v30, %v15792_v5  ;;  %v5257_v53 = vadd.f32 %v16195_v16, %v5065_v9  ;;  %v5445_v57 = vmul.f32 0.7978846, %v5253_v2  ;;  %v13840_v9 = vld [vmem:[%s19790_s0 + $0xf8] ss:$24 sps:$4 sm:$0xff]   ;;  %v3641_v40 = vpop.f32.mrb[12].mxu0 }
 0x302   : > { %20088 = vst [vmem:[#allocation65_spill] sm:$0xff] %v16238_v50  ;;  %v4686_v10 = vmul.f32 %v16241_v62, %v16241_v62  ;;  %v16254_v37 = vadd.f32 %v3637_v59, %v15796_v11  ;;  %v5258_v27 = vadd.f32 %v16201_v35, %v5066_v63  ;;  %v5446_v28 = vmul.f32 0.7978846, %v5254_v20  ;;  %4417 = vmatpush1.bf16.msra.mxu1 %v13148_v29 }
 0x303   : > { %v4877_v38 = vmul.f32 %v16233_v41, %v4685_v1  ;;  %v4689_v5 = vmul.f32 %v16248_v22, %v16248_v22  ;;  %v5449_v42 = vmul.f32 0.7978846, %v5257_v53  ;;  %13414 = vtanh.f32 %v5445_v57  ;;  %v13151_v53 = vld [vmem:[%s14477_s29 + $0x568] ss:$16 sps:$4 sm:$0xff]   ;;  %v13153_v57 = vld [vmem:[%s14477_s29 + $0x56c] ss:$16 sps:$4 sm:$0xff]  }
 0x304   : > { %4206 = vmatmul.mubr.bf16.gmra.mrb[116].mxu1 %v13840_v9  ;;  %v4878_v11 = vmul.f32 %v16241_v62, %v4686_v10  ;;  %v4690_v2 = vmul.f32 %v16254_v37, %v16254_v37  ;;  %v5450_v30 = vmul.f32 0.7978846, %v5258_v27  ;;  %13416 = vtanh.f32 %v5446_v28  ;;  %4418 = vmatprep.subr.bf16.mxu1 %v13153_v57 }
 0x305   : > { %4215 = vmatprep.mubr.bf16.mxu1 %v13841_v51  ;;  %v13407_v63 = vpop.eup %13406  ;;  %v16271_v20 = vadd.f32 %v15985_v49, %v15732_v32  ;;  %v4881_v1 = vmul.f32 %v16248_v22, %v4689_v5  ;;  %13418 = vtanh.f32 %v5449_v42  ;;  %v5069_v59 = vmul.f32 0.044715, %v4877_v38  ;;  %v3643_v51 = vpop.f32.mrb[13].mxu0 }
 0x306   : > { %v13409_v10 = vpop.eup %13408  ;;  %v5821_v9 = vadd.f32 1.0, %v13407_v63  ;;  %v4882_v50 = vmul.f32 %v16254_v37, %v4690_v2  ;;  %13420 = vtanh.f32 %v5450_v30  ;;  %v5070_v27 = vmul.f32 0.044715, %v4878_v11  ;;  %v20091_v63 = vld [vmem:[#allocation42_spill] sm:$0xff]  ;;  %v3645_v2 = vpop.f32.mrb[14].mxu0  ;;  %4419 = vmatpush1.bf16.msra.mxu1 %v13151_v53 }
 0x307   : > { %20090 = vst [vmem:[#allocation41_spill] sm:$0xff] %v16271_v20  ;;  %v13411_v28 = vpop.eup %13410  ;;  %v16278_v29 = vadd.f32 %v3641_v40, %v15800_v13  ;;  %v5822_v32 = vadd.f32 1.0, %v13409_v10  ;;  %v5073_v49 = vmul.f32 0.044715, %v4881_v1  ;;  %v16281_v5 = vadd.f32 %v16233_v41, %v5069_v59  ;;  %v3647_v11 = vpop.f32.mrb[15].mxu0 }
 0x308   : > { %v13413_v38 = vpop.eup %13412  ;;  %v6013_v42 = vmul.f32 0.5, %v5821_v9  ;;  %v5825_v20 = vadd.f32 1.0, %v13411_v28  ;;  %v16284_v61 = vadd.f32 %v3643_v51, %v20091_v63  ;;  %v5074_v30 = vmul.f32 0.044715, %v4882_v50 }
 0x309   : > { %v4693_v13 = vmul.f32 %v16278_v29, %v16278_v29  ;;  %v16289_v40 = vadd.f32 %v3645_v2, %v15810_v7  ;;  %v5826_v1 = vadd.f32 1.0, %v13413_v38  ;;  %v6014_v59 = vmul.f32 0.5, %v5822_v32  ;;  %v13842_v7 = vld [vmem:[%s19790_s0 + $0x128] ss:$24 sps:$4 sm:$0xff]   ;;  %v13843_v38 = vld [vmem:[%s19790_s0 + $0x15c] ss:$24 sps:$4 sm:$0xff]  }
 0x30a   : > { %v6205_v57 = vmul.f32 %v16085_v60, %v6013_v42  ;;  %v6017_v10 = vmul.f32 0.5, %v5825_v20  ;;  %v4694_v9 = vmul.f32 %v16284_v61, %v16284_v61  ;;  %v16295_v28 = vadd.f32 %v3647_v11, %v15814_v31 }
 0x30b   : > { %v16298_v50 = vmul.f32 %v16278_v29, %v4693_v13  ;;  %v4697_v53 = vmul.f32 %v16289_v40, %v16289_v40  ;;  %v6018_v51 = vmul.f32 0.5, %v5826_v1  ;;  %v6206_v60 = vmul.f32 %v16100_v48, %v6014_v59  ;;  %v3651_v59 = vpop.f32.mrb[16].mxu0 }
 0x30c   : > { %4216 = vmatmul.mubr.bf16.gmra.mrb[120].mxu1 %v13842_v7  ;;  %v6209_v20 = vmul.f32 %v16114_v18, %v6017_v10  ;;  %v4886_v32 = vmul.f32 %v16284_v61, %v4694_v9  ;;  %v4698_v31 = vmul.f32 %v16295_v28, %v16295_v28  ;;  %v5262_v42 = vadd.f32 %v16241_v62, %v5070_v27 }
 0x30d   : > { %4225 = vmatprep.mubr.bf16.mxu1 %v13843_v38  ;;  %v13415_v63 = vpop.eup %13414  ;;  %v16315_v2 = vmul.f32 %v16289_v40, %v4697_v53  ;;  %v6210_v48 = vmul.f32 %v16128_v14, %v6018_v51  ;;  %v5266_v18 = vadd.f32 %v16254_v37, %v5074_v30  ;;  %v5265_v13 = vadd.f32 %v16248_v22, %v5073_v49  ;;  %v3653_v53 = vpop.f32.mrb[17].mxu0 }
 0x30e   : > { %v13417_v11 = vpop.eup %13416  ;;  %v4890_v1 = vmul.f32 %v16295_v28, %v4698_v31  ;;  %v16321_v10 = vpack.c.bf16 %v6209_v20, %v6205_v57  ;;  %v5829_v9 = vadd.f32 1.0, %v13415_v63  ;;  %v5454_v7 = vmul.f32 0.7978846, %v5262_v42  ;;  %v3655_v4 = vpop.f32.mrb[18].mxu0 }
 0x30f   : > { %v13419_v38 = vpop.eup %13418  ;;  %v16324_v27 = vadd.f32 %v3651_v59, %v15818_v34  ;;  %v16326_v24 = vpack.c.bf16 %v6210_v48, %v6206_v60  ;;  %v5830_v14 = vadd.f32 1.0, %v13417_v11  ;;  %v5458_v51 = vmul.f32 0.7978846, %v5266_v18  ;;  %v3657_v34 = vpop.f32.mrb[19].mxu0 }
 0x310   : > { %20092 = vst [vmem:[#allocation42_spill] sm:$0xff] %v16321_v10  ;;  %v13421_v30 = vpop.eup %13420  ;;  %v16329_v49 = vadd.f32 %v3653_v53, %v20094_v36  ;;  %v5833_v31 = vadd.f32 1.0, %v13419_v38  ;;  %v6021_v21 = vmul.f32 0.5, %v5829_v9  ;;  %13422 = vtanh.f32 %v5454_v7 }
 0x311   : > { %20093 = vst [vmem:[#allocation66_spill] sm:$0xff] %v16326_v24  ;;  %v4701_v57 = vmul.f32 %v16324_v27, %v16324_v27  ;;  %v16334_v20 = vadd.f32 %v3655_v4, %v15829_v44  ;;  %7965 = vmatprep.mubr.bf16.mxu0 %v16326_v24  ;;  %v5834_v60 = vadd.f32 1.0, %v13421_v30  ;;  %v6022_v42 = vmul.f32 0.5, %v5830_v14  ;;  %v13844_v4 = vld [vmem:[%s19790_s0 + $0x158] ss:$24 sps:$4 sm:$0xff]  }
 0x312   : > { %v4702_v63 = vmul.f32 %v16329_v49, %v16329_v49  ;;  %v16340_v36 = vadd.f32 %v3657_v34, %v15833_v46  ;;  %7966 = vmatmul.mubr.bf16.vlgmr.msra.gmra.mrb[96].mxu0 %v16321_v10  ;;  %v6025_v48 = vmul.f32 0.5, %v5833_v31  ;;  %v6213_v18 = vmul.f32 %v16180_v6, %v6021_v21  ;;  %v13845_v6 = vld [vmem:[%s19790_s0 + $0x18c] ss:$24 sps:$4 sm:$0xff]   ;;  %v13154_v30 = vld [vmem:[%s14477_s29 + $0x588] ss:$16 sps:$4 sm:$0xff]  }
 0x313   : > { %v16345_v11 = vmul.f32 %v16324_v27, %v4701_v57  ;;  %v4705_v44 = vmul.f32 %v16334_v20, %v16334_v20  ;;  %v6026_v59 = vmul.f32 0.5, %v5834_v60  ;;  %v6214_v46 = vmul.f32 %v16187_v33, %v6022_v42  ;;  %v3661_v57 = vpop.f32.mrb[20].mxu0 }
 0x314   : > { %4226 = vmatmul.mubr.bf16.gmra.mrb[124].mxu1 %v13844_v4  ;;  %v4894_v9 = vmul.f32 %v16329_v49, %v4702_v63  ;;  %v4706_v21 = vmul.f32 %v16340_v36, %v16340_v36  ;;  %v6217_v7 = vmul.f32 %v16195_v16, %v6025_v48  ;;  %13424 = vtanh.f32 %v5458_v51  ;;  %v3663_v51 = vpop.f32.mrb[21].mxu0  ;;  %v13156_v48 = vld [vmem:[%s14477_s29 + $0x58c] ss:$16 sps:$4 sm:$0xff]  }
 0x315   : > { %4235 = vmatprep.mubr.bf16.mxu1 %v13845_v6  ;;  %v16361_v38 = vmul.f32 %v16334_v20, %v4705_v44  ;;  %v6218_v53 = vmul.f32 %v16201_v35, %v6026_v59  ;;  %v5453_v33 = vmul.f32 0.7978846, %v16281_v5  ;;  %v5457_v14 = vmul.f32 0.7978846, %v5265_v13  ;;  %v3665_v13 = vpop.f32.mrb[22].mxu0  ;;  %4420 = vmatprep.subr.bf16.mxu1 %v13156_v48 }
 0x316   : > { %v4898_v31 = vmul.f32 %v16340_v36, %v4706_v21  ;;  %v16367_v34 = vpack.c.bf16 %v6217_v7, %v6213_v18  ;;  %v5078_v60 = vmul.f32 0.044715, %v4886_v32  ;;  %v5082_v42 = vmul.f32 0.044715, %v4890_v1  ;;  %v3667_v44 = vpop.f32.mrb[23].mxu0  ;;  %4421 = vmatpush1.bf16.msra.mxu1 %v13154_v30 }
 0x317   : > { %v16370_v16 = vadd.f32 %v3661_v57, %v15837_v52  ;;  %v16372_v63 = vpack.c.bf16 %v6218_v53, %v6214_v46  ;;  %13426 = vtanh.f32 %v5453_v33  ;;  %v5077_v35 = vmul.f32 0.044715, %v16298_v50  ;;  %v13846_v7 = vld [vmem:[%s19790_s0 + $0x188] ss:$24 sps:$4 sm:$0xff]   ;;  %v13847_v30 = vld [vmem:[%s19790_s0 + $0x1bc] ss:$24 sps:$4 sm:$0xff]  }
 0x318   : > { %20095 = vst [vmem:[#allocation43_spill] sm:$0xff] %v16367_v34  ;;  %v16377_v5 = vadd.f32 %v3663_v51, %v15841_v54  ;;  %13428 = vtanh.f32 %v5457_v14  ;;  %v5270_v18 = vadd.f32 %v16284_v61, %v5078_v60  ;;  %v5274_v32 = vadd.f32 %v16295_v28, %v5082_v42 }
 0x319   : > { %20096 = vst [vmem:[#allocation67_spill] sm:$0xff] %v16372_v63  ;;  %v4709_v52 = vmul.f32 %v16370_v16, %v16370_v16  ;;  %v16384_v1 = vadd.f32 %v3665_v13, %v15848_v56  ;;  %7975 = vmatprep.mubr.bf16.mxu0 %v16372_v63  ;;  %v5081_v50 = vmul.f32 0.044715, %v16315_v2  ;;  %v5269_v54 = vadd.f32 %v16278_v29, %v5077_v35  ;;  %v3671_v13 = vpop.f32.mrb[24].mxu0 }
 0x31a   : > { %v13423_v4 = vpop.eup %13422  ;;  %v4710_v59 = vmul.f32 %v16377_v5, %v16377_v5  ;;  %v16392_v46 = vadd.f32 %v3667_v44, %v15852_v58  ;;  %7976 = vmatmul.mubr.bf16.gmra.mrb[100].mxu0 %v16367_v34  ;;  %v5462_v21 = vmul.f32 0.7978846, %v5270_v18  ;;  %v5466_v56 = vmul.f32 0.7978846, %v5274_v32  ;;  %v3673_v44 = vpop.f32.mrb[25].mxu0 }
 0x31b   : > { %v16396_v6 = vmul.f32 %v16370_v16, %v4709_v52  ;;  %v4713_v2 = vmul.f32 %v16384_v1, %v16384_v1  ;;  %v5838_v53 = vadd.f32 1.0, %v13423_v4  ;;  %v5273_v58 = vadd.f32 %v16289_v40, %v5081_v50 }
 0x31c   : > { %4236 = vmatmul.mubr.bf16.gmra.mrb[128].mxu1 %v13846_v7  ;;  %v16405_v33 = vmul.f32 %v16377_v5, %v4710_v59  ;;  %v4714_v14 = vmul.f32 %v16392_v46, %v16392_v46  ;;  %13430 = vtanh.f32 %v5462_v21  ;;  %v5461_v57 = vmul.f32 0.7978846, %v5269_v54  ;;  %v3675_v59 = vpop.f32.mrb[26].mxu0 }
 0x31d   : > { %4245 = vmatprep.mubr.bf16.mxu1 %v13847_v30  ;;  %v16413_v60 = vmul.f32 %v16384_v1, %v4713_v2  ;;  %v6030_v42 = vmul.f32 0.5, %v5838_v53  ;;  %13432 = vtanh.f32 %v5466_v56  ;;  %v5465_v51 = vmul.f32 0.7978846, %v5273_v58  ;;  %v3677_v7 = vpop.f32.mrb[27].mxu0 }
 0x31e   : > { %v13425_v35 = vpop.eup %13424  ;;  %v16416_v48 = vmul.f32 %v16392_v46, %v4714_v14  ;;  %13434 = vtanh.f32 %v5461_v57  ;;  %v5086_v18 = vmul.f32 0.044715, %v4894_v9  ;;  %v5090_v32 = vmul.f32 0.044715, %v4898_v31 }
 0x31f   : > { %v16419_v52 = vadd.f32 %v3671_v13, %v15856_v8  ;;  %v5842_v50 = vadd.f32 1.0, %v13425_v35  ;;  %v6222_v54 = vmul.f32 %v16241_v62, %v6030_v42  ;;  %13436 = vtanh.f32 %v5465_v51  ;;  %v13848_v51 = vld [vmem:[%s19790_s0 + $0x1b8] ss:$24 sps:$4 sm:$0xff]  }
 0x320   : > { %v16423_v4 = vadd.f32 %v3673_v44, %v15860_v12  ;;  %v5278_v21 = vadd.f32 %v16329_v49, %v5086_v18  ;;  %v5282_v56 = vadd.f32 %v16340_v36, %v5090_v32  ;;  %v5085_v2 = vmul.f32 0.044715, %v16345_v11  ;;  %v13849_v18 = vld [vmem:[%s19790_s0 + $0x1ec] ss:$24 sps:$4 sm:$0xff]  }
 0x321   : > { %v13427_v9 = vpop.eup %13426  ;;  %v4717_v8 = vmul.f32 %v16419_v52, %v16419_v52  ;;  %v16431_v31 = vadd.f32 %v3675_v59, %v15864_v26  ;;  %v6034_v62 = vmul.f32 0.5, %v5842_v50  ;;  %v5089_v53 = vmul.f32 0.044715, %v16361_v38 }
 0x322   : > { %v13429_v12 = vpop.eup %13428  ;;  %v4718_v58 = vmul.f32 %v16423_v4, %v16423_v4  ;;  %v16437_v14 = vadd.f32 %v3677_v7, %v15868_v15  ;;  %v5837_v11 = vadd.f32 1.0, %v13427_v9  ;;  %v5470_v30 = vmul.f32 0.7978846, %v5278_v21  ;;  %v13159_v21 = vld [vmem:[%s14477_s29 + $0x5ac] ss:$16 sps:$4 sm:$0xff]  }
 0x323   : > { %v16440_v57 = vmul.f32 %v16419_v52, %v4717_v8  ;;  %v4721_v26 = vmul.f32 %v16431_v31, %v16431_v31  ;;  %v6226_v42 = vmul.f32 %v16254_v37, %v6034_v62  ;;  %v5841_v38 = vadd.f32 1.0, %v13429_v12  ;;  %v13157_v37 = vld [vmem:[%s14477_s29 + $0x5a8] ss:$16 sps:$4 sm:$0xff]   ;;  %v3681_v62 = vpop.f32.mrb[28].mxu0  ;;  %4422 = vmatprep.subr.bf16.mxu1 %v13159_v21 }
 0x324   : > { %4246 = vmatmul.mubr.bf16.gmra.mrb[132].mxu1 %v13848_v51  ;;  %v16449_v15 = vmul.f32 %v16423_v4, %v4718_v58  ;;  %v4722_v35 = vmul.f32 %v16437_v14, %v16437_v14  ;;  %v6029_v13 = vmul.f32 0.5, %v5837_v11  ;;  %v5474_v32 = vmul.f32 0.7978846, %v5282_v56  ;;  %v3683_v11 = vpop.f32.mrb[29].mxu0 }
 0x325   : > { %4255 = vmatprep.mubr.bf16.mxu1 %v13849_v18  ;;  %v16458_v44 = vmul.f32 %v16431_v31, %v4721_v26  ;;  %v16460_v50 = vpack.c.bf16 %v6226_v42, %v6222_v54  ;;  %v6033_v59 = vmul.f32 0.5, %v5841_v38  ;;  %13438 = vtanh.f32 %v5470_v30  ;;  %v20098_v38 = vld [vmem:[#allocation44_spill] sm:$0xff]  ;;  %v3685_v51 = vpop.f32.mrb[30].mxu0  ;;  %4423 = vmatpush1.bf16.msra.mxu1 %v13157_v37 }
 0x326   : > { %v13431_v9 = vpop.eup %13430  ;;  %v16464_v8 = vmul.f32 %v16437_v14, %v4722_v35  ;;  %v6221_v7 = vmul.f32 %v16233_v41, %v6029_v13  ;;  %13440 = vtanh.f32 %v5474_v32  ;;  %v5277_v12 = vadd.f32 %v16324_v27, %v5085_v2 }
 0x327   : > { %20097 = vst [vmem:[#allocation68_spill] sm:$0xff] %v16460_v50  ;;  %v13433_v56 = vpop.eup %13432  ;;  %7985 = vmatprep.mubr.bf16.mxu0 %v16460_v50  ;;  %v6225_v58 = vmul.f32 %v16248_v22, %v6033_v59  ;;  %v16471_v54 = vadd.f32 %v3681_v62, %v15872_v19  ;;  %v5846_v30 = vadd.f32 1.0, %v13431_v9  ;;  %v5281_v26 = vadd.f32 %v16334_v20, %v5089_v53  ;;  %v3687_v53 = vpop.f32.mrb[31].mxu0 }
 0x328   : > { %v13435_v42 = vpop.eup %13434  ;;  %v16475_v41 = vadd.f32 %v3683_v11, %v20098_v38  ;;  %v5850_v35 = vadd.f32 1.0, %v13433_v56  ;;  %v5469_v2 = vmul.f32 0.7978846, %v5277_v12  ;;  %v5094_v13 = vmul.f32 0.044715, %v16405_v33 }
 0x329   : > { %v13437_v18 = vpop.eup %13436  ;;  %v16478_v22 = vpack.c.bf16 %v6225_v58, %v6221_v7  ;;  %v4725_v19 = vmul.f32 %v16471_v54, %v16471_v54  ;;  %v16483_v32 = vadd.f32 %v3685_v51, %v15883_v43  ;;  %v6038_v59 = vmul.f32 0.5, %v5846_v30  ;;  %v13850_v56 = vld [vmem:[%s19790_s0 + $0x1e8] ss:$24 sps:$4 sm:$0xff]  }
 0x32a   : > { %v4726_v21 = vmul.f32 %v16475_v41, %v16475_v41  ;;  %v16488_v9 = vadd.f32 %v3687_v53, %v15887_v47  ;;  %v6042_v62 = vmul.f32 0.5, %v5850_v35  ;;  %v5845_v33 = vadd.f32 1.0, %v13435_v42  ;;  %v13851_v42 = vld [vmem:[%s19790_s0 + $0x21c] ss:$24 sps:$4 sm:$0xff]  }
 0x32b   : > { %20099 = vst [vmem:[#allocation44_spill] sm:$0xff] %v16478_v22  ;;  %7986 = vmatmul.mubr.bf16.gmra.mrb[104].mxu0 %v16478_v22  ;;  %v16492_v37 = vmul.f32 %v16471_v54, %v4725_v19  ;;  %v4729_v7 = vmul.f32 %v16483_v32, %v16483_v32  ;;  %v6230_v43 = vmul.f32 %v16284_v61, %v6038_v59  ;;  %v5849_v12 = vadd.f32 1.0, %v13437_v18 }
 0x32c   : > { %4256 = vmatmul.mubr.bf16.gmra.mrb[136].mxu1 %v13850_v56  ;;  %v16501_v47 = vmul.f32 %v16475_v41, %v4726_v21  ;;  %v4730_v58 = vmul.f32 %v16488_v9, %v16488_v9  ;;  %v6234_v11 = vmul.f32 %v16295_v28, %v6042_v62  ;;  %v6037_v30 = vmul.f32 0.5, %v5845_v33  ;;  %v3691_v28 = vpop.f32.mrb[32].mxu0 }
 0x32d   : > { %4265 = vmatprep.mubr.bf16.mxu1 %v13851_v42  ;;  %v16510_v61 = vmul.f32 %v16483_v32, %v4729_v7  ;;  %v6041_v38 = vmul.f32 0.5, %v5849_v12  ;;  %v5473_v51 = vmul.f32 0.7978846, %v5281_v26  ;;  %13442 = vtanh.f32 %v5469_v2  ;;  %v3693_v33 = vpop.f32.mrb[33].mxu0 }
 0x32e   : > { %v16513_v35 = vmul.f32 %v16488_v9, %v4730_v58  ;;  %v16515_v18 = vpack.c.bf16 %v6234_v11, %v6230_v43  ;;  %v6229_v19 = vmul.f32 %v16278_v29, %v6037_v30  ;;  %v5098_v53 = vmul.f32 0.044715, %v16416_v48  ;;  %v3695_v7 = vpop.f32.mrb[34].mxu0  ;;  %v13160_v11 = vld [vmem:[%s14477_s29 + $0x5c8] ss:$16 sps:$4 sm:$0xff]  }
 0x32f   : > { %v13439_v59 = vpop.eup %13438  ;;  %v6233_v21 = vmul.f32 %v16289_v40, %v6041_v38  ;;  %v16521_v62 = vadd.f32 %v3691_v28, %v15891_v55  ;;  %13444 = vtanh.f32 %v5473_v51  ;;  %v5286_v26 = vadd.f32 %v16377_v5, %v5094_v13  ;;  %v3697_v13 = vpop.f32.mrb[35].mxu0  ;;  %v13162_v30 = vld [vmem:[%s14477_s29 + $0x5cc] ss:$16 sps:$4 sm:$0xff]   ;;  %v13852_v28 = vld [vmem:[%s19790_s0 + $0x218] ss:$24 sps:$4 sm:$0xff]  }
 0x330   : > { %20100 = vst [vmem:[#allocation69_spill] sm:$0xff] %v16515_v18  ;;  %v13441_v2 = vpop.eup %13440  ;;  %7995 = vmatprep.mubr.bf16.mxu0 %v16515_v18  ;;  %v16526_v29 = vadd.f32 %v3693_v33, %v15899_v39  ;;  %v5854_v48 = vadd.f32 1.0, %v13439_v59  ;;  %v5290_v43 = vadd.f32 %v16392_v46, %v5098_v53  ;;  %v5093_v40 = vmul.f32 0.044715, %v16396_v6  ;;  %v13853_v33 = vld [vmem:[%s19790_s0 + $0x24c] ss:$24 sps:$4 sm:$0xff]   ;;  %4424 = vmatprep.subr.bf16.mxu1 %v13162_v30 }
 0x331   : > { %v16530_v55 = vpack.c.bf16 %v6233_v21, %v6229_v19  ;;  %v4733_v12 = vmul.f32 %v16521_v62, %v16521_v62  ;;  %v16535_v56 = vadd.f32 %v3695_v7, %v15903_v0  ;;  %v5858_v58 = vadd.f32 1.0, %v13441_v2  ;;  %4425 = vmatpush1.bf16.msra.mxu1 %v13160_v11 }
 0x332   : > { %v4734_v39 = vmul.f32 %v16526_v29, %v16526_v29  ;;  %v16542_v42 = vadd.f32 %v3697_v13, %v15907_v3  ;;  %v6046_v38 = vmul.f32 0.5, %v5854_v48  ;;  %v5478_v6 = vmul.f32 0.7978846, %v5286_v26 }
 0x333   : > { %20101 = vst [vmem:[#allocation70_spill] sm:$0xff] %v16530_v55  ;;  %7996 = vmatmul.mubr.bf16.gmra.mrb[108].mxu0 %v16530_v55  ;;  %v4925_v51 = vmul.f32 %v16521_v62, %v4733_v12  ;;  %v4737_v0 = vmul.f32 %v16535_v56, %v16535_v56  ;;  %v6050_v19 = vmul.f32 0.5, %v5858_v58  ;;  %v5482_v53 = vmul.f32 0.7978846, %v5290_v43  ;;  %v3701_v12 = vpop.f32.mrb[36].mxu0 }
 0x334   : > { %4266 = vmatmul.mubr.bf16.gmra.mrb[140].mxu1 %v13852_v28  ;;  %v4926_v59 = vmul.f32 %v16526_v29, %v4734_v39  ;;  %v4738_v3 = vmul.f32 %v16542_v42, %v16542_v42  ;;  %v6238_v21 = vmul.f32 %v16329_v49, %v6046_v38  ;;  %13446 = vtanh.f32 %v5478_v6 }
 0x335   : > { %4275 = vmatprep.mubr.bf16.mxu1 %v13853_v33  ;;  %v5117_v26 = vmul.f32 0.044715, %v4925_v51  ;;  %v4929_v2 = vmul.f32 %v16535_v56, %v4737_v0  ;;  %v6242_v7 = vmul.f32 %v16340_v36, %v6050_v19  ;;  %13448 = vtanh.f32 %v5482_v53  ;;  %v3703_v36 = vpop.f32.mrb[37].mxu0 }
 0x336   : > { %v5118_v48 = vmul.f32 0.044715, %v4926_v59  ;;  %v4930_v43 = vmul.f32 %v16542_v42, %v4738_v3  ;;  %v5097_v49 = vmul.f32 0.044715, %v16413_v60  ;;  %v5285_v13 = vadd.f32 %v16370_v16, %v5093_v40  ;;  %v3705_v60 = vpop.f32.mrb[38].mxu0 }
 0x337   : > { %v13443_v58 = vpop.eup %13442  ;;  %v5309_v39 = vadd.f32 %v16521_v62, %v5117_v26  ;;  %v5121_v38 = vmul.f32 0.044715, %v4929_v2  ;;  %v16564_v30 = vpack.c.bf16 %v6242_v7, %v6238_v21  ;;  %v16567_v6 = vadd.f32 %v3701_v12, %v15911_v17  ;;  %v3707_v3 = vpop.f32.mrb[39].mxu0 }
 0x338   : > { %v5310_v11 = vadd.f32 %v16526_v29, %v5118_v48  ;;  %v5122_v51 = vmul.f32 0.044715, %v4930_v43  ;;  %v5853_v0 = vadd.f32 1.0, %v13443_v58  ;;  %v16571_v19 = vadd.f32 %v3703_v36, %v15916_v23  ;;  %v13854_v43 = vld [vmem:[%s19790_s0 + $0x248] ss:$24 sps:$4 sm:$0xff]  }
 0x339   : > { %20102 = vst [vmem:[#allocation71_spill] sm:$0xff] %v16564_v30  ;;  %v13445_v28 = vpop.eup %13444  ;;  %v5501_v40 = vmul.f32 0.7978846, %v5309_v39  ;;  %v5313_v53 = vadd.f32 %v16535_v56, %v5121_v38  ;;  %8005 = vmatprep.mubr.bf16.mxu0 %v16564_v30  ;;  %v4741_v59 = vmul.f32 %v16567_v6, %v16567_v6  ;;  %v16578_v17 = vadd.f32 %v3705_v60, %v15920_v25  ;;  %v13855_v39 = vld [vmem:[%s19790_s0 + $0x27c] ss:$24 sps:$4 sm:$0xff]  }
 0x33a   : > { %v5502_v21 = vmul.f32 0.7978846, %v5310_v11  ;;  %v5314_v33 = vadd.f32 %v16542_v42, %v5122_v51  ;;  %v5857_v26 = vadd.f32 1.0, %v13445_v28  ;;  %v6045_v23 = vmul.f32 0.5, %v5853_v0  ;;  %v20103_v60 = vld [vmem:[#allocation45_spill] sm:$0xff] }
 0x33b   : > { %13450 = vtanh.f32 %v5501_v40  ;;  %v5505_v2 = vmul.f32 0.7978846, %v5313_v53  ;;  %v4933_v7 = vmul.f32 %v16567_v6, %v4741_v59  ;;  %v4742_v48 = vmul.f32 %v16571_v19, %v16571_v19  ;;  %v3711_v40 = vpop.f32.mrb[40].mxu0 }
 0x33c   : > { %4276 = vmatmul.mubr.bf16.gmra.mrb[144].mxu1 %v13854_v43  ;;  %13452 = vtanh.f32 %v5502_v21  ;;  %v5506_v25 = vmul.f32 0.7978846, %v5314_v33  ;;  %v6049_v12 = vmul.f32 0.5, %v5857_v26  ;;  %v6237_v58 = vmul.f32 %v16324_v27, %v6045_v23  ;;  %v3713_v23 = vpop.f32.mrb[41].mxu0 }
 0x33d   : > { %4285 = vmatprep.mubr.bf16.mxu1 %v13855_v39  ;;  %13454 = vtanh.f32 %v5505_v2  ;;  %v5125_v38 = vmul.f32 0.044715, %v4933_v7  ;;  %v4934_v36 = vmul.f32 %v16571_v19, %v4742_v48  ;;  %v4745_v11 = vmul.f32 %v16578_v17, %v16578_v17 }
 0x33e   : > { %v13447_v51 = vpop.eup %13446  ;;  %13456 = vtanh.f32 %v5506_v25  ;;  %v6241_v0 = vmul.f32 %v16334_v20, %v6049_v12  ;;  %v16596_v28 = vadd.f32 %v3707_v3, %v20103_v60  ;;  %v5289_v27 = vadd.f32 %v16384_v1, %v5097_v49  ;;  %v3715_v3 = vpop.f32.mrb[42].mxu0 }
 0x33f   : > { %v13449_v53 = vpop.eup %13448  ;;  %v5317_v59 = vadd.f32 %v16567_v6, %v5125_v38  ;;  %v5126_v21 = vmul.f32 0.044715, %v4934_v36  ;;  %v4937_v33 = vmul.f32 %v16578_v17, %v4745_v11  ;;  %v5862_v26 = vadd.f32 1.0, %v13447_v51  ;;  %v3717_v39 = vpop.f32.mrb[43].mxu0 }
 0x340   : > { %v16601_v2 = vpack.c.bf16 %v6241_v0, %v6237_v58  ;;  %v4746_v7 = vmul.f32 %v16596_v28, %v16596_v28  ;;  %v5866_v20 = vadd.f32 1.0, %v13449_v53  ;;  %v5477_v48 = vmul.f32 0.7978846, %v5285_v13  ;;  %v13856_v0 = vld [vmem:[%s19790_s0 + $0x278] ss:$24 sps:$4 sm:$0xff]  }
 0x341   : > { %v5509_v43 = vmul.f32 0.7978846, %v5317_v59  ;;  %v5318_v49 = vadd.f32 %v16571_v19, %v5126_v21  ;;  %v5129_v25 = vmul.f32 0.044715, %v4937_v33  ;;  %v6054_v12 = vmul.f32 0.5, %v5862_v26  ;;  %v20105_v59 = vld [vmem:[#allocation46_spill] sm:$0xff] }
 0x342   : > { %20104 = vst [vmem:[#allocation45_spill] sm:$0xff] %v16601_v2  ;;  %8006 = vmatmul.mubr.bf16.gmra.mrb[112].mxu0 %v16601_v2  ;;  %v4938_v38 = vmul.f32 %v16596_v28, %v4746_v7  ;;  %v6058_v36 = vmul.f32 0.5, %v5866_v20  ;;  %v5481_v58 = vmul.f32 0.7978846, %v5289_v27  ;;  %13458 = vtanh.f32 %v5477_v48  ;;  %v13857_v27 = vld [vmem:[%s19790_s0 + $0x2ac] ss:$24 sps:$4 sm:$0xff]  }
 0x343   : > { %13460 = vtanh.f32 %v5509_v43  ;;  %v5510_v11 = vmul.f32 0.7978846, %v5318_v49  ;;  %v5321_v13 = vadd.f32 %v16578_v17, %v5129_v25  ;;  %v6246_v51 = vmul.f32 %v16377_v5, %v6054_v12  ;;  %v13163_v33 = vld [vmem:[%s14477_s29 + $0x5e8] ss:$16 sps:$4 sm:$0xff]   ;;  %v13165_v26 = vld [vmem:[%s14477_s29 + $0x5ec] ss:$16 sps:$4 sm:$0xff]  }
 0x344   : > { %4286 = vmatmul.mubr.bf16.gmra.mrb[148].mxu1 %v13856_v0  ;;  %v5130_v60 = vmul.f32 0.044715, %v4938_v38  ;;  %v6250_v53 = vmul.f32 %v16392_v46, %v6058_v36  ;;  %13462 = vtanh.f32 %v5481_v58  ;;  %v16615_v21 = vadd.f32 %v3711_v40, %v20105_v59  ;;  %v20106_v20 = vld [vmem:[#allocation47_spill] sm:$0xff]  ;;  %v20107_v43 = vld [vmem:[#allocation48_spill] sm:$0xff]  ;;  %v20109_v38 = vld [vmem:[#allocation49_spill] sm:$0xff]  ;;  %v3721_v58 = vpop.f32.mrb[44].mxu0  ;;  %4426 = vmatprep.subr.bf16.mxu1 %v13165_v26 }
 0x345   : > { %4295 = vmatprep.mubr.bf16.mxu1 %v13857_v27  ;;  %v16622_v5 = vpop.eup %13450  ;;  %13464 = vtanh.f32 %v5510_v11  ;;  %v5513_v7 = vmul.f32 0.7978846, %v5321_v13  ;;  %v16625_v48 = vadd.f32 %v3713_v23, %v20106_v20  ;;  %v16628_v46 = vadd.f32 %v3715_v3, %v20107_v43  ;;  %4427 = vmatpush1.bf16.msra.mxu1 %v13163_v33 }
 0x346   : > { %v16630_v49 = vpop.eup %13452  ;;  %v5322_v40 = vadd.f32 %v16596_v28, %v5130_v60  ;;  %v16633_v25 = vpack.c.bf16 %v6250_v53, %v6246_v51  ;;  %v4749_v12 = vmul.f32 %v16615_v21, %v16615_v21  ;;  %v16638_v36 = vadd.f32 %v3717_v39, %v20109_v38  ;;  %v3723_v51 = vpop.f32.mrb[45].mxu0 }
 0x347   : > { %v16640_v11 = vpop.eup %13454  ;;  %13466 = vtanh.f32 %v5513_v7  ;;  %v4750_v23 = vmul.f32 %v16625_v48, %v16625_v48  ;;  %v4753_v3 = vmul.f32 %v16628_v46, %v16628_v46  ;;  %v5102_v13 = vmul.f32 0.044715, %v16449_v15  ;;  %v3725_v27 = vpop.f32.mrb[46].mxu0 }
 0x348   : > { %20108 = vst [vmem:[#allocation46_spill] sm:$0xff] %v16633_v25  ;;  %v16647_v0 = vpop.eup %13456  ;;  %v5514_v60 = vmul.f32 0.7978846, %v5322_v40  ;;  %8015 = vmatprep.mubr.bf16.mxu0 %v16633_v25  ;;  %v4941_v39 = vmul.f32 %v16615_v21, %v4749_v12  ;;  %v4754_v53 = vmul.f32 %v16638_v36, %v16638_v36  ;;  %v5106_v59 = vmul.f32 0.044715, %v16464_v8  ;;  %v3727_v20 = vpop.f32.mrb[47].mxu0 }
 0x349   : > { %v4942_v26 = vmul.f32 %v16625_v48, %v4750_v23  ;;  %v4945_v7 = vmul.f32 %v16628_v46, %v4753_v3  ;;  %v5294_v15 = vadd.f32 %v16423_v4, %v5102_v13  ;;  %v5101_v33 = vmul.f32 0.044715, %v16440_v57  ;;  %v13858_v23 = vld [vmem:[%s19790_s0 + $0x2a8] ss:$24 sps:$4 sm:$0xff]  }
 0x34a   : > { %13468 = vtanh.f32 %v5514_v60  ;;  %v5133_v43 = vmul.f32 0.044715, %v4941_v39  ;;  %v4946_v40 = vmul.f32 %v16638_v36, %v4754_v53  ;;  %v5298_v12 = vadd.f32 %v16437_v14, %v5106_v59  ;;  %v13859_v53 = vld [vmem:[%s19790_s0 + $0x2dc] ss:$24 sps:$4 sm:$0xff]  }
 0x34b   : > { %v5134_v38 = vmul.f32 0.044715, %v4942_v26  ;;  %v5137_v25 = vmul.f32 0.044715, %v4945_v7  ;;  %v5486_v2 = vmul.f32 0.7978846, %v5294_v15  ;;  %v5293_v8 = vadd.f32 %v16419_v52, %v5101_v33 }
 0x34c   : > { %4296 = vmatmul.mubr.bf16.gmra.mrb[152].mxu1 %v13858_v23  ;;  %v13459_v3 = vpop.eup %13458  ;;  %v5325_v57 = vadd.f32 %v16615_v21, %v5133_v43  ;;  %v5138_v13 = vmul.f32 0.044715, %v4946_v40  ;;  %v5490_v60 = vmul.f32 0.7978846, %v5298_v12  ;;  %v5105_v39 = vmul.f32 0.044715, %v16458_v44 }
 0x34d   : > { %4305 = vmatprep.mubr.bf16.mxu1 %v13859_v53  ;;  %v16669_v59 = vpop.eup %13460  ;;  %v5861_v26 = vadd.f32 1.0, %v13459_v3  ;;  %v5326_v7 = vadd.f32 %v16625_v48, %v5134_v38  ;;  %v5329_v15 = vadd.f32 %v16628_v46, %v5137_v25  ;;  %13470 = vtanh.f32 %v5486_v2  ;;  %v3731_v40 = vpop.f32.mrb[48].mxu0 }
 0x34e   : > { %v13463_v33 = vpop.eup %13462  ;;  %v5517_v23 = vmul.f32 0.7978846, %v5325_v57  ;;  %v5330_v43 = vadd.f32 %v16638_v36, %v5138_v13  ;;  %13472 = vtanh.f32 %v5490_v60  ;;  %v5297_v44 = vadd.f32 %v16431_v31, %v5105_v39  ;;  %v20110_v13 = vld [vmem:[#allocation50_spill] sm:$0xff]  ;;  %v16683_v39 = vpop.f32.mrb[49].mxu0 }
 0x34f   : > { %v16675_v12 = vpop.eup %13464  ;;  %v5865_v30 = vadd.f32 1.0, %v13463_v33  ;;  %v6053_v53 = vmul.f32 0.5, %v5861_v26  ;;  %v5518_v55 = vmul.f32 0.7978846, %v5326_v7  ;;  %v5521_v18 = vmul.f32 0.7978846, %v5329_v15 }
 0x350   : > { %13474 = vtanh.f32 %v5517_v23  ;;  %v5522_v3 = vmul.f32 0.7978846, %v5330_v43  ;;  %v5485_v38 = vmul.f32 0.7978846, %v5293_v8  ;;  %v5489_v22 = vmul.f32 0.7978846, %v5297_v44 }
 0x351   : > { %v16677_v25 = vpop.eup %13466  ;;  %v6057_v2 = vmul.f32 0.5, %v5865_v30  ;;  %v6245_v57 = vmul.f32 %v16370_v16, %v6053_v53  ;;  %13476 = vtanh.f32 %v5518_v55  ;;  %v16681_v60 = vadd.f32 %v3721_v58, %v20110_v13  ;;  %v20111_v33 = vld [vmem:[#allocation6_spill] sm:$0xff]  ;;  %v20112_v7 = vld [vmem:[#allocation7_spill] sm:$0xff]  ;;  %v20114_v8 = vld [vmem:[#allocation8_spill] sm:$0xff]  ;;  %v16694_v43 = vpop.f32.mrb[50].mxu0 }
 0x352   : > { %13478 = vtanh.f32 %v5521_v18  ;;  %v16686_v26 = vadd.f32 %v3723_v51, %v20111_v33  ;;  %v16689_v15 = vadd.f32 %v3725_v27, %v20112_v7  ;;  %v16692_v23 = vadd.f32 %v3727_v20, %v20114_v8  ;;  %v16700_v18 = vpop.f32.mrb[51].mxu0  ;;  %v13860_v58 = vld [vmem:[%s19790_s0 + $0x2d8] ss:$24 sps:$4 sm:$0xff]  }
 0x353   : > { %v6249_v16 = vmul.f32 %v16384_v1, %v6057_v2  ;;  %13480 = vtanh.f32 %v5522_v3  ;;  %v4757_v55 = vmul.f32 %v16681_v60, %v16681_v60  ;;  %v5110_v30 = vmul.f32 0.044715, %v16501_v47  ;;  %v13861_v47 = vld [vmem:[%s19790_s0 + $0x30c] ss:$24 sps:$4 sm:$0xff]   ;;  %v16724_v7 = vpop.f32.mrb[52].mxu0 }
 0x354   : > { %20113 = vst [vmem:[#allocation47_spill] sm:$0xff] %v16689_v15  ;;  %4306 = vmatmul.mubr.bf16.gmra.mrb[156].mxu1 %v13860_v58  ;;  %v16705_v51 = vpop.eup %13468  ;;  %13482 = vtanh.f32 %v5485_v38  ;;  %v4758_v27 = vmul.f32 %v16686_v26, %v16686_v26  ;;  %v4761_v1 = vmul.f32 %v16689_v15, %v16689_v15  ;;  %v4762_v20 = vmul.f32 %v16692_v23, %v16692_v23 }
 0x355   : > { %4315 = vmatprep.mubr.bf16.mxu1 %v13861_v47  ;;  %v16716_v44 = vpack.c.bf16 %v6249_v16, %v6245_v57  ;;  %13484 = vtanh.f32 %v5489_v22  ;;  %v4949_v53 = vmul.f32 %v16681_v60, %v4757_v55  ;;  %v5114_v3 = vmul.f32 0.044715, %v16513_v35  ;;  %v20116_v47 = vld [vmem:[#allocation51_spill] sm:$0xff] }
 0x356   : > { %v4950_v38 = vmul.f32 %v16686_v26, %v4758_v27  ;;  %v4953_v2 = vmul.f32 %v16689_v15, %v4761_v1  ;;  %v4954_v13 = vmul.f32 %v16692_v23, %v4762_v20  ;;  %v5302_v33 = vadd.f32 %v16475_v41, %v5110_v30  ;;  %v16733_v30 = vpop.f32.mrb[53].mxu0 }
 0x357   : > { %20115 = vst [vmem:[#allocation48_spill] sm:$0xff] %v16716_v44  ;;  %v13471_v8 = vpop.eup %13470  ;;  %8016 = vmatmul.mubr.bf16.gmra.mrb[116].mxu0 %v16716_v44  ;;  %v5141_v57 = vmul.f32 0.044715, %v4949_v53  ;;  %v5306_v22 = vadd.f32 %v16488_v9, %v5114_v3  ;;  %v5109_v16 = vmul.f32 0.044715, %v16492_v37  ;;  %v16731_v20 = vadd.f32 %v3731_v40, %v20116_v47  ;;  %v16736_v63 = vpop.f32.mrb[54].mxu0 }
 0x358   : > { %v5113_v35 = vmul.f32 0.044715, %v16510_v61  ;;  %v13473_v55 = vpop.eup %13472  ;;  %v5870_v58 = vadd.f32 1.0, %v13471_v8  ;;  %v5142_v27 = vmul.f32 0.044715, %v4950_v38  ;;  %v16742_v8 = vpop.f32.mrb[55].mxu0 }
 0x359   : > { %v5145_v1 = vmul.f32 0.044715, %v4953_v2  ;;  %20117 = vst [vmem:[#allocation49_spill] sm:$0xff] %v16731_v20  ;;  %v5874_v50 = vadd.f32 1.0, %v13473_v55  ;;  %v5333_v34 = vadd.f32 %v16681_v60, %v5141_v57  ;;  %v5146_v44 = vmul.f32 0.044715, %v4954_v13 }
 0x35a   : > { %v5494_v53 = vmul.f32 0.7978846, %v5302_v33  ;;  %v16738_v3 = vpop.eup %13474  ;;  %v6062_v37 = vmul.f32 0.5, %v5870_v58  ;;  %v5334_v61 = vadd.f32 %v16686_v26, %v5142_v27  ;;  %v5498_v2 = vmul.f32 0.7978846, %v5306_v22 }
 0x35b   : > { %v5337_v38 = vadd.f32 %v16689_v15, %v5145_v1  ;;  %v16744_v40 = vpop.eup %13476  ;;  %v6066_v47 = vmul.f32 0.5, %v5874_v50  ;;  %v5525_v55 = vmul.f32 0.7978846, %v5333_v34  ;;  %v5338_v57 = vadd.f32 %v16692_v23, %v5146_v44  ;;  %v13862_v13 = vld [vmem:[%s19790_s0 + $0x308] ss:$24 sps:$4 sm:$0xff]  }
 0x35c   : > { %13486 = vtanh.f32 %v5494_v53  ;;  %4316 = vmatmul.mubr.bf16.gmra.mrb[160].mxu1 %v13862_v13  ;;  %v16750_v33 = vpop.eup %13478  ;;  %v6254_v58 = vmul.f32 %v16423_v4, %v6062_v37  ;;  %v5526_v27 = vmul.f32 0.7978846, %v5334_v61  ;;  %v13863_v50 = vld [vmem:[%s19790_s0 + $0x33c] ss:$24 sps:$4 sm:$0xff]   ;;  %v5301_v53 = vadd.f32 %v16471_v54, %v5109_v16 }
 0x35d   : > { %v5529_v22 = vmul.f32 0.7978846, %v5337_v38  ;;  %13488 = vtanh.f32 %v5498_v2  ;;  %4325 = vmatprep.mubr.bf16.mxu1 %v13863_v50  ;;  %v16756_v34 = vpop.eup %13480  ;;  %v6258_v44 = vmul.f32 %v16437_v14, %v6066_v47  ;;  %v5530_v1 = vmul.f32 0.7978846, %v5338_v57  ;;  %v20118_v61 = vld [vmem:[#allocation52_spill] sm:$0xff]  ;;  %v16767_v2 = vpop.f32.mrb[56].mxu0 }
 0x35e   : > { %13490 = vtanh.f32 %v5525_v55  ;;  %v13483_v13 = vpop.eup %13482  ;;  %v5305_v4 = vadd.f32 %v16483_v32, %v5113_v35  ;;  %v4765_v37 = vmul.f32 %v16731_v20, %v16731_v20  ;;  %v16765_v38 = vadd.f32 %v16683_v39, %v20118_v61  ;;  %v16771_v16 = vpop.f32.mrb[57].mxu0 }
 0x35f   : > { %13492 = vtanh.f32 %v5526_v27  ;;  %v13485_v50 = vpop.eup %13484  ;;  %v16769_v10 = vpack.c.bf16 %v6258_v44, %v6254_v58  ;;  %v5869_v14 = vadd.f32 1.0, %v13483_v13  ;;  %v5493_v47 = vmul.f32 0.7978846, %v5301_v53  ;;  %v16774_v27 = vpop.f32.mrb[58].mxu0  ;;  %v20121_v44 = vld [vmem:[#allocation9_spill] sm:$0xff] }
 0x360   : > { %20119 = vst [vmem:[#allocation50_spill] sm:$0xff] %v16765_v38  ;;  %13494 = vtanh.f32 %v5529_v22  ;;  %v5873_v55 = vadd.f32 1.0, %v13485_v50  ;;  %v5497_v35 = vmul.f32 0.7978846, %v5305_v4  ;;  %v4957_v57 = vmul.f32 %v16731_v20, %v4765_v37  ;;  %v16783_v53 = vpop.f32.mrb[59].mxu0  ;;  %v20122_v4 = vld [vmem:[#allocation53_spill] sm:$0xff] }
 0x361   : > { %20120 = vst [vmem:[#allocation6_spill] sm:$0xff] %v16769_v10  ;;  %13496 = vtanh.f32 %v5530_v1  ;;  %8025 = vmatprep.mubr.bf16.mxu0 %v16769_v10  ;;  %v6061_v39 = vmul.f32 0.5, %v5869_v14  ;;  %v4766_v58 = vmul.f32 %v16765_v38, %v16765_v38  ;;  %v16781_v22 = vadd.f32 %v16694_v43, %v20121_v44  ;;  %v13864_v43 = vld [vmem:[%s19790_s0 + $0x338] ss:$24 sps:$4 sm:$0xff]  }
 0x362   : > { %13498 = vtanh.f32 %v5493_v47  ;;  %v6065_v13 = vmul.f32 0.5, %v5873_v55  ;;  %v5149_v1 = vmul.f32 0.044715, %v4957_v57  ;;  %v16787_v37 = vadd.f32 %v16700_v18, %v20122_v4  ;;  %v13865_v57 = vld [vmem:[%s19790_s0 + $0x36c] ss:$24 sps:$4 sm:$0xff]  }
 0x363   : > { %13500 = vtanh.f32 %v5497_v35  ;;  %v6253_v61 = vmul.f32 %v16419_v52, %v6061_v39  ;;  %v4958_v50 = vmul.f32 %v16765_v38, %v4766_v58  ;;  %v4769_v14 = vmul.f32 %v16781_v22, %v16781_v22 }
 0x364   : > { %v5886_v47 = vadd.f32 1.0, %v16630_v49  ;;  %4326 = vmatmul.mubr.bf16.gmra.mrb[164].mxu1 %v13864_v43  ;;  %v6257_v55 = vmul.f32 %v16431_v31, %v6065_v13  ;;  %v5341_v35 = vadd.f32 %v16731_v20, %v5149_v1  ;;  %v4770_v18 = vmul.f32 %v16787_v37, %v16787_v37 }
 0x365   : > { %v5890_v52 = vadd.f32 1.0, %v16647_v0  ;;  %4335 = vmatprep.mubr.bf16.mxu1 %v13865_v57  ;;  %v5150_v39 = vmul.f32 0.044715, %v4958_v50  ;;  %v4961_v58 = vmul.f32 %v16781_v22, %v4769_v14  ;;  %v5885_v4 = vadd.f32 1.0, %v16622_v5  ;;  %v16810_v0 = vpop.f32.mrb[60].mxu0 }
 0x366   : > { %v13487_v49 = vpop.eup %13486  ;;  %v6078_v44 = vmul.f32 0.5, %v5886_v47  ;;  %v16807_v13 = vpack.c.bf16 %v6257_v55, %v6253_v61  ;;  %v5533_v43 = vmul.f32 0.7978846, %v5341_v35  ;;  %v4962_v10 = vmul.f32 %v16787_v37, %v4770_v18  ;;  %v16815_v14 = vpop.f32.mrb[61].mxu0 }
 0x367   : > { %v13489_v31 = vpop.eup %13488  ;;  %v5878_v1 = vadd.f32 1.0, %v13487_v49  ;;  %v5342_v57 = vadd.f32 %v16765_v38, %v5150_v39  ;;  %v5153_v50 = vmul.f32 0.044715, %v4961_v58  ;;  %v6082_v15 = vmul.f32 0.5, %v5890_v52  ;;  %v16821_v35 = vpop.f32.mrb[62].mxu0 }
 0x368   : > { %20123 = vst [vmem:[#allocation7_spill] sm:$0xff] %v16807_v13  ;;  %v16812_v24 = vpop.eup %13490  ;;  %v5882_v20 = vadd.f32 1.0, %v13489_v31  ;;  %8026 = vmatmul.mubr.bf16.gmra.mrb[120].mxu0 %v16807_v13  ;;  %13502 = vtanh.f32 %v5533_v43  ;;  %v5154_v61 = vmul.f32 0.044715, %v4962_v10  ;;  %v6270_v55 = vmul.f32 %v16526_v29, %v6078_v44  ;;  %v16827_v58 = vpop.f32.mrb[63].mxu0 }
 0x369   : > { %v16817_v47 = vpop.eup %13492  ;;  %v6070_v5 = vmul.f32 0.5, %v5878_v1  ;;  %v5534_v31 = vmul.f32 0.7978846, %v5342_v57  ;;  %v5345_v39 = vadd.f32 %v16781_v22, %v5153_v50  ;;  %v6274_v52 = vmul.f32 %v16542_v42, %v6082_v15  ;;  %v13866_v42 = vld [vmem:[%s19790_s0 + $0x368] ss:$24 sps:$4 sm:$0xff]  }
 0x36a   : > { %v16823_v18 = vpop.eup %13494  ;;  %v6074_v49 = vmul.f32 0.5, %v5882_v20  ;;  %v5346_v10 = vadd.f32 %v16787_v37, %v5154_v61  ;;  %v5889_v29 = vadd.f32 1.0, %v16640_v11  ;;  %v6077_v44 = vmul.f32 0.5, %v5885_v4  ;;  %v13867_v11 = vld [vmem:[%s19790_s0 + $0x39c] ss:$24 sps:$4 sm:$0xff]  }
 0x36b   : > { %v16829_v38 = vpop.eup %13496  ;;  %v6262_v1 = vmul.f32 %v16475_v41, %v6070_v5  ;;  %13504 = vtanh.f32 %v5534_v31  ;;  %v5537_v20 = vmul.f32 0.7978846, %v5345_v39  ;;  %v16835_v57 = vpack.c.bf16 %v6274_v52, %v6270_v55  ;;  %v20126_v55 = vld [vmem:[#allocation10_spill] sm:$0xff]  ;;  %v20127_v52 = vld [vmem:[#allocation11_spill] sm:$0xff] }
 0x36c   : > { %v13499_v43 = vpop.eup %13498  ;;  %v6266_v13 = vmul.f32 %v16488_v9, %v6074_v49  ;;  %4336 = vmatmul.mubr.bf16.gmra.mrb[168].mxu1 %v13866_v42  ;;  %v5538_v41 = vmul.f32 0.7978846, %v5346_v10  ;;  %v6081_v5 = vmul.f32 0.5, %v5889_v29  ;;  %v6269_v61 = vmul.f32 %v16521_v62, %v6077_v44  ;;  %v16855_v10 = vpop.f32.mrb[64].mxu0  ;;  %v20128_v29 = vld [vmem:[#allocation12_spill] sm:$0xff] }
 0x36d   : > { %20124 = vst [vmem:[#allocation8_spill] sm:$0xff] %v16835_v57  ;;  %v13501_v15 = vpop.eup %13500  ;;  %v5877_v50 = vadd.f32 1.0, %v13499_v43  ;;  %4345 = vmatprep.mubr.bf16.mxu1 %v13867_v11  ;;  %13506 = vtanh.f32 %v5537_v20  ;;  %v16848_v49 = vadd.f32 %v16724_v7, %v20126_v55  ;;  %v16853_v62 = vadd.f32 %v16733_v30, %v20127_v52 }
 0x36e   : > { %v16844_v9 = vpack.c.bf16 %v6266_v13, %v6262_v1  ;;  %v5881_v4 = vadd.f32 1.0, %v13501_v15  ;;  %13508 = vtanh.f32 %v5538_v41  ;;  %v6273_v39 = vmul.f32 %v16535_v56, %v6081_v5  ;;  %v16868_v56 = vpop.f32.mrb[65].mxu0 }
 0x36f   : > { %v6069_v31 = vmul.f32 0.5, %v5877_v50  ;;  %v4773_v1 = vmul.f32 %v16848_v49, %v16848_v49  ;;  %v16862_v7 = vadd.f32 %v16736_v63, %v20128_v29  ;;  %v16866_v44 = vadd.f32 %v16742_v8, %v15998_v45  ;;  %v16876_v15 = vpop.f32.mrb[66].mxu0 }
 0x370   : > { %20125 = vst [vmem:[#allocation51_spill] sm:$0xff] %v16844_v9  ;;  %8035 = vmatprep.mubr.bf16.mxu0 %v16844_v9  ;;  %v6073_v13 = vmul.f32 0.5, %v5881_v4  ;;  %v16871_v43 = vpack.c.bf16 %v6273_v39, %v6269_v61  ;;  %v4774_v20 = vmul.f32 %v16853_v62, %v16853_v62  ;;  %v5894_v42 = vadd.f32 1.0, %v16675_v12  ;;  %v13868_v39 = vld [vmem:[%s19790_s0 + $0x398] ss:$24 sps:$4 sm:$0xff]  }
 0x371   : > { %v6261_v30 = vmul.f32 %v16471_v54, %v6069_v31  ;;  %v4965_v50 = vmul.f32 %v16848_v49, %v4773_v1  ;;  %v4777_v45 = vmul.f32 %v16862_v7, %v16862_v7  ;;  %v4778_v8 = vmul.f32 %v16866_v44, %v16866_v44  ;;  %v16884_v54 = vpop.f32.mrb[67].mxu0 }
 0x372   : > { %20129 = vst [vmem:[#allocation52_spill] sm:$0xff] %v16871_v43  ;;  %v6265_v63 = vmul.f32 %v16483_v32, %v6073_v13  ;;  %v16886_v41 = vpop.eup %13502  ;;  %v4966_v5 = vmul.f32 %v16853_v62, %v4774_v20  ;;  %v5898_v12 = vadd.f32 1.0, %v16705_v51  ;;  %v6086_v61 = vmul.f32 0.5, %v5894_v42 }
 0x373   : > { %v5893_v11 = vadd.f32 1.0, %v16669_v59  ;;  %v5157_v4 = vmul.f32 0.044715, %v4965_v50  ;;  %v4969_v55 = vmul.f32 %v16862_v7, %v4777_v45  ;;  %v4970_v31 = vmul.f32 %v16866_v44, %v4778_v8  ;;  %v13869_v59 = vld [vmem:[%s19790_s0 + $0x3cc] ss:$24 sps:$4 sm:$0xff]   ;;  %v20131_v45 = vld [vmem:[#allocation13_spill] sm:$0xff] }
 0x374   : > { %v16891_v32 = vpack.c.bf16 %v6265_v63, %v6261_v30  ;;  %4346 = vmatmul.mubr.bf16.gmra.mrb[172].mxu1 %v13868_v39  ;;  %v5158_v52 = vmul.f32 0.044715, %v4966_v5  ;;  %v6090_v13 = vmul.f32 0.5, %v5898_v12  ;;  %v6278_v1 = vmul.f32 %v16571_v19, %v6086_v61  ;;  %v16914_v5 = vpop.f32.mrb[68].mxu0 }
 0x375   : > { %v5897_v51 = vadd.f32 1.0, %v16677_v25  ;;  %4355 = vmatprep.mubr.bf16.mxu1 %v13869_v59  ;;  %v16903_v29 = vpop.eup %13504  ;;  %v5349_v30 = vadd.f32 %v16848_v49, %v5157_v4  ;;  %v5161_v20 = vmul.f32 0.044715, %v4969_v55  ;;  %v5162_v42 = vmul.f32 0.044715, %v4970_v31  ;;  %v16921_v31 = vpop.f32.mrb[69].mxu0 }
 0x376   : > { %20130 = vst [vmem:[#allocation9_spill] sm:$0xff] %v16891_v32  ;;  %8036 = vmatmul.mubr.bf16.gmra.mrb[124].mxu0 %v16891_v32  ;;  %v6085_v63 = vmul.f32 0.5, %v5893_v11  ;;  %v5350_v19 = vadd.f32 %v16853_v62, %v5158_v52  ;;  %v6282_v25 = vmul.f32 %v16596_v28, %v6090_v13  ;;  %v16912_v8 = vadd.f32 %v16767_v2, %v20131_v45 }
 0x377   : > { %8045 = vmatprep.mubr.bf16.mxu0 %v16835_v57  ;;  %v6089_v50 = vmul.f32 0.5, %v5897_v51  ;;  %v16916_v12 = vpop.eup %13506  ;;  %v5541_v61 = vmul.f32 0.7978846, %v5349_v30  ;;  %v5353_v4 = vadd.f32 %v16862_v7, %v5161_v20  ;;  %v5354_v11 = vadd.f32 %v16866_v44, %v5162_v42  ;;  %v16930_v51 = vpop.f32.mrb[70].mxu0  ;;  %v20133_v20 = vld [vmem:[#allocation14_spill] sm:$0xff] }
 0x378   : > { %v6277_v55 = vmul.f32 %v16567_v6, %v6085_v63  ;;  %v16923_v39 = vpop.eup %13508  ;;  %v5542_v28 = vmul.f32 0.7978846, %v5350_v19  ;;  %v16925_v52 = vpack.c.bf16 %v6282_v25, %v6278_v1  ;;  %v4781_v13 = vmul.f32 %v16912_v8, %v16912_v8  ;;  %v16936_v42 = vpop.f32.mrb[71].mxu0 }
 0x379   : > { %v6281_v2 = vmul.f32 %v16578_v17, %v6089_v50  ;;  %13510 = vtanh.f32 %v5541_v61  ;;  %v5545_v59 = vmul.f32 0.7978846, %v5353_v4  ;;  %v5546_v30 = vmul.f32 0.7978846, %v5354_v11  ;;  %v20135_v17 = vld [vmem:[#allocation15_spill] sm:$0xff]  ;;  %v20136_v50 = vld [vmem:[#allocation16_spill] sm:$0xff] }
 0x37a   : > { %20132 = vst [vmem:[#allocation53_spill] sm:$0xff] %v16925_v52  ;;  %v16934_v6 = vadd.f32 %v16771_v16, %v20133_v20  ;;  %13512 = vtanh.f32 %v5542_v28  ;;  %v4973_v1 = vmul.f32 %v16912_v8, %v4781_v13  ;;  %v16943_v19 = vadd.f32 %v16774_v27, %v20135_v17  ;;  %v13870_v61 = vld [vmem:[%s19790_s0 + $0x3c8] ss:$24 sps:$4 sm:$0xff]   ;;  %v16970_v20 = vpop.f32.mrb[72].mxu0 }
 0x37b   : > { %v16938_v63 = vpack.c.bf16 %v6281_v2, %v6277_v55  ;;  %13514 = vtanh.f32 %v5545_v59  ;;  %v16949_v45 = vadd.f32 %v16783_v53, %v20136_v50  ;;  %v5902_v16 = vadd.f32 1.0, %v16744_v40  ;;  %v13871_v55 = vld [vmem:[%s19790_s0 + $0x3fc] ss:$24 sps:$4 sm:$0xff]  }
 0x37c   : > { %v4782_v25 = vmul.f32 %v16934_v6, %v16934_v6  ;;  %4356 = vmatmul.mubr.bf16.gmra.mrb[176].mxu1 %v13870_v61  ;;  %13516 = vtanh.f32 %v5546_v30  ;;  %v5165_v4 = vmul.f32 0.044715, %v4973_v1  ;;  %v4785_v27 = vmul.f32 %v16943_v19, %v16943_v19 }
 0x37d   : > { %20134 = vst [vmem:[#allocation10_spill] sm:$0xff] %v16938_v63  ;;  %v5906_v11 = vadd.f32 1.0, %v16756_v34  ;;  %4365 = vmatprep.mubr.bf16.mxu1 %v13871_v55  ;;  %v4786_v53 = vmul.f32 %v16949_v45, %v16949_v45  ;;  %v6094_v28 = vmul.f32 0.5, %v5902_v16  ;;  %v5901_v2 = vadd.f32 1.0, %v16738_v3  ;;  %v16974_v16 = vpop.f32.mrb[73].mxu0 }
 0x37e   : > { %8046 = vmatmul.mubr.bf16.gmra.mrb[128].mxu0 %v16871_v43  ;;  %v4974_v40 = vmul.f32 %v16934_v6, %v4782_v25  ;;  %v5357_v13 = vadd.f32 %v16912_v8, %v5165_v4  ;;  %v4977_v34 = vmul.f32 %v16943_v19, %v4785_v27  ;;  %v5905_v30 = vadd.f32 1.0, %v16750_v33  ;;  %v13169_v43 = vld [vmem:[%s14475_s28 + $0x330] ss:$24 sps:$4 sm:$0xff]  }
 0x37f   : > { %8055 = vmatprep.mubr.bf16.mxu0 %v16925_v52  ;;  %v6098_v59 = vmul.f32 0.5, %v5906_v11  ;;  %v4978_v17 = vmul.f32 %v16949_v45, %v4786_v53  ;;  %v6286_v25 = vmul.f32 %v16625_v48, %v6094_v28  ;;  %v6093_v50 = vmul.f32 0.5, %v5901_v2  ;;  %v16977_v52 = vpop.f32.mrb[74].mxu0 }
 0x380   : > { %v5166_v1 = vmul.f32 0.044715, %v4974_v40  ;;  %v5549_v3 = vmul.f32 0.7978846, %v5357_v13  ;;  %v5169_v61 = vmul.f32 0.044715, %v4977_v34 }
 0x381   : > { %v6290_v55 = vmul.f32 %v16638_v36, %v6098_v59  ;;  %v6097_v4 = vmul.f32 0.5, %v5905_v30  ;;  %v5170_v33 = vmul.f32 0.044715, %v4978_v17  ;;  %v6285_v11 = vmul.f32 %v16615_v21, %v6093_v50  ;;  %v20137_v40 = vld [vmem:[#allocation17_spill] sm:$0xff]  ;;  %v16985_v48 = vpop.f32.mrb[75].mxu0  ;;  %v20139_v30 = vld [vmem:[#allocation18_spill] sm:$0xff] }
 0x382   : > { %v5358_v27 = vadd.f32 %v16934_v6, %v5166_v1  ;;  %v16983_v53 = vadd.f32 %v16810_v0, %v20137_v40  ;;  %13518 = vtanh.f32 %v5549_v3  ;;  %v5361_v28 = vadd.f32 %v16943_v19, %v5169_v61  ;;  %v13872_v1 = vld [vmem:[%s19790_s0 + $0x3f8] ss:$24 sps:$4 sm:$0xff]   ;;  %v20141_v50 = vld [vmem:[#allocation19_spill] sm:$0xff] }
 0x383   : > { %v16988_v2 = vpack.c.bf16 %v6290_v55, %v6286_v25  ;;  %v6289_v36 = vmul.f32 %v16628_v46, %v6097_v4  ;;  %v16991_v13 = vpop.eup %13510  ;;  %v5362_v59 = vadd.f32 %v16949_v45, %v5170_v33  ;;  %v16998_v0 = vadd.f32 %v16815_v14, %v20139_v30  ;;  %v20142_v61 = vld [vmem:[#allocation20_spill] sm:$0xff]  ;;  %v13873_v55 = vld [vmem:[%s19790_s0 + $0x42c] ss:$24 sps:$4 sm:$0xff]  }
 0x384   : > { %v5550_v34 = vmul.f32 0.7978846, %v5358_v27  ;;  %v4789_v21 = vmul.f32 %v16983_v53, %v16983_v53  ;;  %4366 = vmatmul.mubr.bf16.gmra.mrb[180].mxu1 %v13872_v1  ;;  %v17003_v46 = vpop.eup %13512  ;;  %v5553_v17 = vmul.f32 0.7978846, %v5361_v28  ;;  %v17009_v3 = vadd.f32 %v16821_v35, %v20141_v50 }
 0x385   : > { %20138 = vst [vmem:[#allocation11_spill] sm:$0xff] %v16988_v2  ;;  %v17005_v25 = vpack.c.bf16 %v6289_v36, %v6285_v11  ;;  %v17013_v14 = vadd.f32 %v16827_v58, %v20142_v61  ;;  %4375 = vmatprep.mubr.bf16.mxu1 %v13873_v55  ;;  %v17018_v4 = vpop.eup %13514  ;;  %v5554_v27 = vmul.f32 0.7978846, %v5362_v59  ;;  %v4790_v35 = vmul.f32 %v16998_v0, %v16998_v0  ;;  %v13166_v11 = vld [vmem:[%s14475_s28 + $0x300] ss:$24 sps:$4 sm:$0xff]   ;;  %v17034_v59 = vpop.f32.mrb[76].mxu0 }
 0x386   : > { %8056 = vmatmul.mubr.bf16.gmra.mrb[132].mxu0 %v16938_v63  ;;  %13520 = vtanh.f32 %v5550_v34  ;;  %v4981_v33 = vmul.f32 %v16983_v53, %v4789_v21  ;;  %v13168_v58 = vld [vmem:[%s14475_s28 + $0x304] ss:$24 sps:$4 sm:$0xff]   ;;  %v17026_v40 = vpop.eup %13516  ;;  %v4793_v28 = vmul.f32 %v17009_v3, %v17009_v3  ;;  %v5910_v34 = vadd.f32 1.0, %v16817_v47  ;;  %v13171_v21 = vld [vmem:[%s14475_s28 + $0x334] ss:$24 sps:$4 sm:$0xff]   ;;  %v17039_v50 = vpop.f32.mrb[77].mxu0 }
 0x387   : > { %20140 = vst [vmem:[#allocation12_spill] sm:$0xff] %v17005_v25  ;;  %13522 = vtanh.f32 %v5553_v17  ;;  %8065 = vmatprep.mubr.bf16.mxu0 %v16988_v2  ;;  %v4794_v36 = vmul.f32 %v17013_v14, %v17013_v14  ;;  %v4982_v1 = vmul.f32 %v16998_v0, %v4790_v35  ;;  %v5914_v17 = vadd.f32 1.0, %v16829_v38  ;;  %8206 = vmatprep.subr.bf16.mxu0 %v13168_v58  ;;  %v17044_v47 = vpop.f32.mrb[78].mxu0 }
 0x388   : > { %13524 = vtanh.f32 %v5554_v27  ;;  %v5173_v30 = vmul.f32 0.044715, %v4981_v33  ;;  %v4985_v61 = vmul.f32 %v17009_v3, %v4793_v28  ;;  %v6102_v2 = vmul.f32 0.5, %v5910_v34  ;;  %8207 = vmatpush1.bf16.msra.mxu0 %v13166_v11  ;;  %v17049_v57 = vpop.f32.mrb[79].mxu0 }
 0x389   : > { %v4986_v55 = vmul.f32 %v17013_v14, %v4794_v36  ;;  %v5909_v63 = vadd.f32 1.0, %v16812_v24  ;;  %v5174_v33 = vmul.f32 0.044715, %v4982_v1  ;;  %v6106_v35 = vmul.f32 0.5, %v5914_v17  ;;  %8208 = vmatprep.subr.bf16.mxu0 %v13171_v21 }
 0x38a   : > { %v5365_v27 = vadd.f32 %v16983_v53, %v5173_v30  ;;  %v5913_v38 = vadd.f32 1.0, %v16823_v18  ;;  %v5177_v58 = vmul.f32 0.044715, %v4985_v61  ;;  %v6294_v36 = vmul.f32 %v16686_v26, %v6102_v2  ;;  %v13874_v30 = vld [vmem:[%s19790_s0 + $0x428] ss:$24 sps:$4 sm:$0xff]   ;;  %v20143_v2 = vld [vmem:[#allocation21_spill] sm:$0xff] }
 0x38b   : > { %v5178_v28 = vmul.f32 0.044715, %v4986_v55  ;;  %v6101_v34 = vmul.f32 0.5, %v5909_v63  ;;  %v5366_v32 = vadd.f32 %v16998_v0, %v5174_v33  ;;  %v6298_v11 = vmul.f32 %v16692_v23, %v6106_v35  ;;  %v13174_v18 = vld [vmem:[%s14475_s28 + $0x364] ss:$24 sps:$4 sm:$0xff]  }
 0x38c   : > { %v5557_v24 = vmul.f32 0.7978846, %v5365_v27  ;;  %v6105_v9 = vmul.f32 0.5, %v5913_v38  ;;  %4376 = vmatmul.mubr.bf16.gmra.mrb[184].mxu1 %v13874_v30  ;;  %v17058_v1 = vpop.eup %13518  ;;  %v5369_v21 = vadd.f32 %v17009_v3, %v5177_v58  ;;  %v17065_v17 = vadd.f32 %v16855_v10, %v20143_v2  ;;  %v13875_v23 = vld [vmem:[%s19790_s0 + $0x45c] ss:$24 sps:$4 sm:$0xff]   ;;  %v20146_v27 = vld [vmem:[#allocation47_spill] sm:$0xff]  ;;  %8209 = vmatpush1.bf16.msra.mxu0 %v13169_v43 }
 0x38d   : > { %v5370_v26 = vadd.f32 %v17013_v14, %v5178_v28  ;;  %v6293_v63 = vmul.f32 %v16681_v60, %v6101_v34  ;;  %4385 = vmatprep.mubr.bf16.mxu1 %v13875_v23  ;;  %v5558_v61 = vmul.f32 0.7978846, %v5366_v32  ;;  %v17071_v55 = vpack.c.bf16 %v6298_v11, %v6294_v36  ;;  %v13172_v35 = vld [vmem:[%s14475_s28 + $0x360] ss:$24 sps:$4 sm:$0xff]   ;;  %v17081_v34 = vpop.f32.mrb[80].mxu0  ;;  %v20149_v32 = vld [vmem:[#allocation23_spill] sm:$0xff]  ;;  %8210 = vmatprep.subr.bf16.mxu0 %v13174_v18 }
 0x38e   : > { %20144 = vst [vmem:[#allocation13_spill] sm:$0xff] %v17065_v17  ;;  %8066 = vmatmul.mubr.bf16.gmra.mrb[136].mxu0 %v17005_v25  ;;  %13526 = vtanh.f32 %v5557_v24  ;;  %v6297_v33 = vmul.f32 %v20146_v27, %v6105_v9  ;;  %v5561_v60 = vmul.f32 0.7978846, %v5369_v21  ;;  %v4797_v10 = vmul.f32 %v17065_v17, %v17065_v17  ;;  %v20147_v58 = vld [vmem:[#allocation22_spill] sm:$0xff]  ;;  %v20150_v11 = vld [vmem:[#allocation24_spill] sm:$0xff] }
 0x38f   : > { %20145 = vst [vmem:[#allocation14_spill] sm:$0xff] %v17071_v55  ;;  %v5562_v38 = vmul.f32 0.7978846, %v5370_v26  ;;  %v17079_v28 = vadd.f32 %v16868_v56, %v20147_v58  ;;  %13528 = vtanh.f32 %v5558_v61  ;;  %8075 = vmatprep.mubr.bf16.mxu0 %v17071_v55  ;;  %v17090_v36 = vadd.f32 %v16876_v15, %v20149_v32  ;;  %v17096_v56 = vpop.f32.mrb[81].mxu0  ;;  %v13177_v21 = vld [vmem:[%s14475_s28 + $0x394] ss:$24 sps:$4 sm:$0xff]  }
 0x390   : > { %v17083_v24 = vpop.eup %13520  ;;  %v17086_v9 = vpack.c.bf16 %v6297_v33, %v6293_v63  ;;  %v17094_v30 = vadd.f32 %v16884_v54, %v20150_v11  ;;  %13530 = vtanh.f32 %v5561_v60  ;;  %v4989_v26 = vmul.f32 %v17065_v17, %v4797_v10  ;;  %v17105_v2 = vpop.f32.mrb[82].mxu0  ;;  %8211 = vmatpush1.bf16.msra.mxu0 %v13172_v35  ;;  %v13175_v58 = vld [vmem:[%s14475_s28 + $0x390] ss:$24 sps:$4 sm:$0xff]  }
 0x391   : > { %v17099_v43 = vpop.eup %13522  ;;  %v4798_v63 = vmul.f32 %v17079_v28, %v17079_v28  ;;  %v5918_v15 = vadd.f32 1.0, %v16903_v29  ;;  %13532 = vtanh.f32 %v5562_v38  ;;  %v4801_v54 = vmul.f32 %v17090_v36, %v17090_v36  ;;  %v17114_v27 = vpop.f32.mrb[83].mxu0  ;;  %8212 = vmatprep.subr.bf16.mxu0 %v13177_v21 }
 0x392   : > { %20148 = vst [vmem:[#allocation15_spill] sm:$0xff] %v17086_v9  ;;  %v17107_v23 = vpop.eup %13524  ;;  %v4802_v18 = vmul.f32 %v17094_v30, %v17094_v30  ;;  %v5922_v61 = vadd.f32 1.0, %v16923_v39  ;;  %v5181_v33 = vmul.f32 0.044715, %v4989_v26  ;;  %v5917_v10 = vadd.f32 1.0, %v16886_v41  ;;  %v20151_v41 = vld [vmem:[#allocation50_spill] sm:$0xff] }
 0x393   : > { %v4990_v60 = vmul.f32 %v17079_v28, %v4798_v63  ;;  %v6110_v29 = vmul.f32 0.5, %v5918_v15  ;;  %v4993_v38 = vmul.f32 %v17090_v36, %v4801_v54  ;;  %v5921_v55 = vadd.f32 1.0, %v16916_v12  ;;  %v13876_v39 = vld [vmem:[%s19790_s0 + $0x458] ss:$24 sps:$4 sm:$0xff]   ;;  %v13180_v26 = vld [vmem:[%s14475_s28 + $0x3c4] ss:$24 sps:$4 sm:$0xff]  }
 0x394   : > { %v4994_v32 = vmul.f32 %v17094_v30, %v4802_v18  ;;  %v6114_v11 = vmul.f32 0.5, %v5922_v61  ;;  %4386 = vmatmul.mubr.bf16.gmra.mrb[188].mxu1 %v13876_v39  ;;  %v5373_v63 = vadd.f32 %v17065_v17, %v5181_v33  ;;  %v6109_v25 = vmul.f32 0.5, %v5917_v10  ;;  %v13877_v54 = vld [vmem:[%s19790_s0 + $0x14] ss:$24 sps:$4 sm:$0xff]   ;;  %8213 = vmatpush1.bf16.msra.mxu0 %v13175_v58 }
 0x395   : > { %v5182_v15 = vmul.f32 0.044715, %v4990_v60  ;;  %v6302_v35 = vmul.f32 %v20151_v41, %v6110_v29  ;;  %4428 = vmatprep.mubr.bf16.mxu1 %v13877_v54  ;;  %v5185_v12 = vmul.f32 0.044715, %v4993_v38  ;;  %v6113_v21 = vmul.f32 0.5, %v5921_v55  ;;  %v20152_v60 = vld [vmem:[#allocation49_spill] sm:$0xff]  ;;  %8214 = vmatprep.subr.bf16.mxu0 %v13180_v26 }
 0x396   : > { %8076 = vmatmul.mubr.bf16.gmra.mrb[140].mxu0 %v17086_v9  ;;  %v5186_v18 = vmul.f32 0.044715, %v4994_v32  ;;  %v6306_v61 = vmul.f32 %v16787_v37, %v6114_v11  ;;  %v5565_v39 = vmul.f32 0.7978846, %v5373_v63  ;;  %v6301_v17 = vmul.f32 %v20152_v60, %v6109_v25  ;;  %v20153_v29 = vld [vmem:[#allocation25_spill] sm:$0xff]  ;;  %v17139_v41 = vpop.f32.mrb[84].mxu0 }
 0x397   : > { %v5374_v33 = vadd.f32 %v17079_v28, %v5182_v15  ;;  %v17137_v10 = vadd.f32 %v16914_v5, %v20153_v29  ;;  %v13178_v54 = vld [vmem:[%s14475_s28 + $0x3c0] ss:$24 sps:$4 sm:$0xff]   ;;  %v5377_v38 = vadd.f32 %v17090_v36, %v5185_v12  ;;  %v6305_v32 = vmul.f32 %v16781_v22, %v6113_v21  ;;  %v17149_v11 = vpop.f32.mrb[85].mxu0  ;;  %v13183_v25 = vld [vmem:[%s14475_s28 + $0x3f4] ss:$24 sps:$4 sm:$0xff]  }
 0x398   : > { %v17142_v9 = vpop.eup %13526  ;;  %v5378_v37 = vadd.f32 %v17094_v30, %v5186_v18  ;;  %v17146_v55 = vpack.c.bf16 %v6306_v61, %v6302_v35  ;;  %20156 = vst [vmem:[#allocation18_spill] sm:$0xff] %v17149_v11  ;;  %13534 = vtanh.f32 %v5565_v39  ;;  %v20157_v63 = vld [vmem:[#allocation54_spill] sm:$0xff]  ;;  %v17158_v12 = vpop.f32.mrb[86].mxu0  ;;  %v20162_v29 = vld [vmem:[#allocation27_spill] sm:$0xff]  ;;  %8215 = vmatpush1.bf16.msra.mxu0 %v13178_v54 }
 0x399   : > { %20154 = vst [vmem:[#allocation16_spill] sm:$0xff] %v17137_v10  ;;  %v5566_v5 = vmul.f32 0.7978846, %v5374_v33  ;;  %v4805_v58 = vmul.f32 %v17137_v10, %v17137_v10  ;;  %v17156_v15 = vadd.f32 %v16921_v31, %v20157_v63  ;;  %20158 = vst [vmem:[#allocation19_spill] sm:$0xff] %v17158_v12  ;;  %v17160_v35 = vpop.eup %13528  ;;  %v5569_v18 = vmul.f32 0.7978846, %v5377_v38  ;;  %8216 = vmatprep.subr.bf16.mxu0 %v13183_v25 }
 0x39a   : > { %20155 = vst [vmem:[#allocation17_spill] sm:$0xff] %v17146_v55  ;;  %v5570_v22 = vmul.f32 0.7978846, %v5378_v37  ;;  %8085 = vmatprep.mubr.bf16.mxu0 %v17146_v55  ;;  %v17163_v26 = vpack.c.bf16 %v6305_v32, %v6301_v17  ;;  %v20160_v61 = vld [vmem:[#allocation26_spill] sm:$0xff]  ;;  %v17169_v39 = vpop.f32.mrb[87].mxu0  ;;  %v17171_v33 = vpop.eup %13530  ;;  %v17178_v38 = vadd.f32 %v16936_v42, %v20162_v29  ;;  %v5926_v32 = vadd.f32 1.0, %v17003_v46 }
 0x39b   : > { %v17167_v21 = vadd.f32 %v16930_v51, %v20160_v61  ;;  %20161 = vst [vmem:[#allocation21_spill] sm:$0xff] %v17169_v39  ;;  %13536 = vtanh.f32 %v5566_v5  ;;  %v4997_v31 = vmul.f32 %v17137_v10, %v4805_v58  ;;  %v4806_v60 = vmul.f32 %v17156_v15, %v17156_v15  ;;  %v13181_v17 = vld [vmem:[%s14475_s28 + $0x3f0] ss:$24 sps:$4 sm:$0xff]   ;;  %v17181_v51 = vpop.eup %13532  ;;  %v13186_v42 = vld [vmem:[%s14475_s28 + $0x424] ss:$24 sps:$4 sm:$0xff]   ;;  %v17206_v12 = vpop.f32.mrb[88].mxu0 }
 0x39c   : > { %20159 = vst [vmem:[#allocation20_spill] sm:$0xff] %v17163_v26  ;;  %13538 = vtanh.f32 %v5569_v18  ;;  %v5930_v5 = vadd.f32 1.0, %v17026_v40  ;;  %v13878_v58 = vld [vmem:[%s19790_s0 + $0x10] ss:$24 sps:$4 sm:$0xff]   ;;  %v4810_v18 = vmul.f32 %v17178_v38, %v17178_v38  ;;  %v13879_v46 = vld [vmem:[%s19790_s0 + $0x44] ss:$24 sps:$4 sm:$0xff]   ;;  %8217 = vmatpush1.bf16.msra.mxu0 %v13181_v17 }
 0x39d   : > { %v4809_v37 = vmul.f32 %v17167_v21, %v17167_v21  ;;  %4429 = vmatmul.mubr.bf16.vlgmr.msra.gmra.mrb[96].mxu1 %v13878_v58  ;;  %13540 = vtanh.f32 %v5570_v22  ;;  %v5189_v54 = vmul.f32 0.044715, %v4997_v31  ;;  %v4998_v63 = vmul.f32 %v17156_v15, %v4806_v60  ;;  %v13187_v40 = vld [vmem:[%s14475_s28 + $0x8] ss:$24 sps:$4 sm:$0xff]   ;;  %v13189_v61 = vld [vmem:[%s14475_s28 + $0xc] ss:$24 sps:$4 sm:$0xff]   ;;  %8218 = vmatprep.subr.bf16.mxu0 %v13186_v42 }
 0x39e   : > { %4438 = vmatprep.mubr.bf16.mxu1 %v13879_v46  ;;  %8086 = vmatmul.mubr.bf16.gmra.mrb[144].mxu0 %v17163_v26  ;;  %v6118_v29 = vmul.f32 0.5, %v5926_v32  ;;  %v6122_v22 = vmul.f32 0.5, %v5930_v5  ;;  %v5925_v31 = vadd.f32 1.0, %v16991_v13  ;;  %v13184_v60 = vld [vmem:[%s14475_s28 + $0x420] ss:$24 sps:$4 sm:$0xff]   ;;  %v5002_v39 = vmul.f32 %v17178_v38, %v4810_v18  ;;  %20163 = vst [vmem:[#allocation47_spill] sm:$0xff] %v17206_v12 }
 0x39f   : > { %v5001_v25 = vmul.f32 %v17167_v21, %v4809_v37  ;;  %v5381_v58 = vadd.f32 %v17137_v10, %v5189_v54  ;;  %v5190_v55 = vmul.f32 0.044715, %v4998_v63  ;;  %v5929_v46 = vadd.f32 1.0, %v17018_v4  ;;  %8479 = vmatprep.subr.bf16.mxu1 %v13189_v61  ;;  %v13192_v26 = vld [vmem:[%s14475_s28 + $0x3c] ss:$24 sps:$4 sm:$0xff]   ;;  %v17211_v5 = vpop.f32.mrb[89].mxu0 }
 0x3a0   : > { %v6310_v37 = vmul.f32 %v16853_v62, %v6118_v29  ;;  %v6314_v32 = vmul.f32 %v16866_v44, %v6122_v22  ;;  %v6117_v13 = vmul.f32 0.5, %v5925_v31  ;;  %8480 = vmatpush1.bf16.msra.mxu1 %v13187_v40  ;;  %v13190_v54 = vld [vmem:[%s14475_s28 + $0x38] ss:$24 sps:$4 sm:$0xff]   ;;  %v5194_v4 = vmul.f32 0.044715, %v5002_v39  ;;  %v17215_v12 = vpop.f32.mrb[90].mxu0  ;;  %8219 = vmatpush1.bf16.msra.mxu0 %v13184_v60 }
 0x3a1   : > { %v5193_v11 = vmul.f32 0.044715, %v5001_v25  ;;  %v5573_v63 = vmul.f32 0.7978846, %v5381_v58  ;;  %v5382_v18 = vadd.f32 %v17156_v15, %v5190_v55  ;;  %v6121_v10 = vmul.f32 0.5, %v5929_v46  ;;  %8481 = vmatprep.subr.bf16.mxu1 %v13192_v26  ;;  %v20165_v44 = vld [vmem:[#allocation55_spill] sm:$0xff] }
 0x3a2   : > { %v17218_v61 = vpack.c.bf16 %v6314_v32, %v6310_v37  ;;  %v6309_v62 = vmul.f32 %v16848_v49, %v6117_v13  ;;  %v17223_v25 = vadd.f32 %v16970_v20, %v20165_v44  ;;  %v17225_v42 = vpop.f32.mrb[91].mxu0  ;;  %v17227_v40 = vpop.eup %13534  ;;  %v5386_v39 = vadd.f32 %v17178_v38, %v5194_v4  ;;  %v20166_v20 = vld [vmem:[#allocation56_spill] sm:$0xff]  ;;  %v20169_v46 = vld [vmem:[#allocation29_spill] sm:$0xff]  ;;  %v13193_v37 = vld [vmem:[%s14475_s28 + $0x68] ss:$24 sps:$4 sm:$0xff]  }
 0x3a3   : > { %v5385_v17 = vadd.f32 %v17167_v21, %v5193_v11  ;;  %13542 = vtanh.f32 %v5573_v63  ;;  %v5574_v55 = vmul.f32 0.7978846, %v5382_v18  ;;  %v6313_v26 = vmul.f32 %v16862_v7, %v6121_v10  ;;  %v20167_v22 = vld [vmem:[#allocation28_spill] sm:$0xff]  ;;  %v13880_v7 = vld [vmem:[%s19790_s0 + $0x40] ss:$24 sps:$4 sm:$0xff]  }
 0x3a4   : > { %20164 = vst [vmem:[#allocation22_spill] sm:$0xff] %v17218_v61  ;;  %8095 = vmatprep.mubr.bf16.mxu0 %v17218_v61  ;;  %v4813_v49 = vmul.f32 %v17223_v25, %v17223_v25  ;;  %v17236_v29 = vadd.f32 %v16974_v16, %v20166_v20  ;;  %v17240_v31 = vadd.f32 %v16977_v52, %v20167_v22  ;;  %v5578_v60 = vmul.f32 0.7978846, %v5386_v39  ;;  %v13881_v52 = vld [vmem:[%s19790_s0 + $0x74] ss:$24 sps:$4 sm:$0xff]   ;;  %v17274_v39 = vpop.f32.mrb[92].mxu0 }
 0x3a5   : > { %v5577_v11 = vmul.f32 0.7978846, %v5385_v17  ;;  %4439 = vmatmul.mubr.bf16.gmra.mrb[100].mxu1 %v13880_v7  ;;  %v17245_v10 = vpop.eup %13536  ;;  %13544 = vtanh.f32 %v5574_v55  ;;  %v17247_v58 = vpack.c.bf16 %v6313_v26, %v6309_v62  ;;  %v17251_v16 = vadd.f32 %v16985_v48, %v20169_v46  ;;  %v13195_v32 = vld [vmem:[%s14475_s28 + $0x6c] ss:$24 sps:$4 sm:$0xff]   ;;  %v13196_v4 = vld [vmem:[%s14475_s28 + $0x450] ss:$24 sps:$4 sm:$0xff]  }
 0x3a6   : > { %4448 = vmatprep.mubr.bf16.mxu1 %v13881_v52  ;;  %8482 = vmatpush1.bf16.msra.mxu1 %v13190_v54  ;;  %v17258_v13 = vpop.eup %13538  ;;  %v5005_v63 = vmul.f32 %v17223_v25, %v4813_v49  ;;  %v4814_v18 = vmul.f32 %v17236_v29, %v17236_v29  ;;  %v4817_v48 = vmul.f32 %v17240_v31, %v17240_v31  ;;  %v13198_v17 = vld [vmem:[%s14475_s28 + $0x454] ss:$24 sps:$4 sm:$0xff]   ;;  %v5934_v44 = vadd.f32 1.0, %v17083_v24  ;;  %v17280_v7 = vpop.f32.mrb[93].mxu0 }
 0x3a7   : > { %20168 = vst [vmem:[#allocation23_spill] sm:$0xff] %v17247_v58  ;;  %13546 = vtanh.f32 %v5577_v11  ;;  %v17267_v62 = vpop.eup %13540  ;;  %8096 = vmatmul.mubr.bf16.gmra.mrb[148].mxu0 %v17247_v58  ;;  %v4818_v54 = vmul.f32 %v17251_v16, %v17251_v16  ;;  %v5938_v55 = vadd.f32 1.0, %v17107_v23  ;;  %8483 = vmatprep.subr.bf16.mxu1 %v13195_v32  ;;  %v13201_v26 = vld [vmem:[%s14475_s28 + $0x9c] ss:$24 sps:$4 sm:$0xff]   ;;  %v5933_v22 = vadd.f32 1.0, %v17058_v1  ;;  %v17284_v52 = vpop.f32.mrb[94].mxu0 }
 0x3a8   : > { %13548 = vtanh.f32 %v5578_v60  ;;  %v5197_v11 = vmul.f32 0.044715, %v5005_v63  ;;  %v5006_v49 = vmul.f32 %v17236_v29, %v4814_v18  ;;  %v5009_v20 = vmul.f32 %v17240_v31, %v4817_v48  ;;  %8220 = vmatprep.subr.bf16.mxu0 %v13198_v17  ;;  %v13199_v32 = vld [vmem:[%s14475_s28 + $0x98] ss:$24 sps:$4 sm:$0xff]   ;;  %v17288_v1 = vpop.f32.mrb[95].mxu0 }
 0x3a9   : > { %v5010_v60 = vmul.f32 %v17251_v16, %v4818_v54  ;;  %v6126_v24 = vmul.f32 0.5, %v5934_v44  ;;  %v6130_v46 = vmul.f32 0.5, %v5938_v55  ;;  %v5937_v23 = vadd.f32 1.0, %v17099_v43  ;;  %8221 = vmatpush1.bf16.msra.mxu0 %v13196_v4 }
 0x3aa   : > { %8484 = vmatpush1.bf16.msra.mxu1 %v13193_v37  ;;  %v5389_v63 = vadd.f32 %v17223_v25, %v5197_v11  ;;  %v5198_v18 = vmul.f32 0.044715, %v5006_v49  ;;  %v5201_v48 = vmul.f32 0.044715, %v5009_v20  ;;  %v6125_v58 = vmul.f32 0.5, %v5933_v22  ;;  %v20171_v22 = vld [vmem:[#allocation30_spill] sm:$0xff] }
 0x3ab   : > { %8485 = vmatprep.subr.bf16.mxu1 %v13201_v26  ;;  %v5202_v17 = vmul.f32 0.044715, %v5010_v60  ;;  %v6318_v54 = vmul.f32 %v16934_v6, %v6126_v24  ;;  %v6322_v44 = vmul.f32 %v16949_v45, %v6130_v46  ;;  %v6129_v43 = vmul.f32 0.5, %v5937_v23  ;;  %v13882_v49 = vld [vmem:[%s19790_s0 + $0x70] ss:$24 sps:$4 sm:$0xff]  }
 0x3ac   : > { %v5581_v55 = vmul.f32 0.7978846, %v5389_v63  ;;  %v5390_v37 = vadd.f32 %v17236_v29, %v5198_v18  ;;  %v5393_v4 = vadd.f32 %v17240_v31, %v5201_v48  ;;  %v6317_v11 = vmul.f32 %v16912_v8, %v6125_v58  ;;  %v13883_v8 = vld [vmem:[%s19790_s0 + $0xa4] ss:$24 sps:$4 sm:$0xff]   ;;  %v13202_v58 = vld [vmem:[%s14475_s28 + $0xc8] ss:$24 sps:$4 sm:$0xff]  }
 0x3ad   : > { %4449 = vmatmul.mubr.bf16.gmra.mrb[104].mxu1 %v13882_v49  ;;  %v17298_v26 = vpop.eup %13542  ;;  %v5394_v6 = vadd.f32 %v17251_v16, %v5202_v17  ;;  %v17301_v45 = vpack.c.bf16 %v6322_v44, %v6318_v54  ;;  %v6321_v20 = vmul.f32 %v16943_v19, %v6129_v43  ;;  %v17306_v60 = vadd.f32 %v17034_v59, %v20171_v22  ;;  %v13204_v24 = vld [vmem:[%s14475_s28 + $0xcc] ss:$24 sps:$4 sm:$0xff]   ;;  %v13207_v19 = vld [vmem:[%s14475_s28 + $0xfc] ss:$24 sps:$4 sm:$0xff]  }
 0x3ae   : > { %4458 = vmatprep.mubr.bf16.mxu1 %v13883_v8  ;;  %13550 = vtanh.f32 %v5581_v55  ;;  %v5582_v46 = vmul.f32 0.7978846, %v5390_v37  ;;  %v5585_v23 = vmul.f32 0.7978846, %v5393_v4  ;;  %v20172_v63 = vld [vmem:[#allocation31_spill] sm:$0xff]  ;;  %8486 = vmatpush1.bf16.msra.mxu1 %v13199_v32  ;;  %v20174_v44 = vld [vmem:[#allocation32_spill] sm:$0xff] }
 0x3af   : > { %20170 = vst [vmem:[#allocation24_spill] sm:$0xff] %v17301_v45  ;;  %v17315_v18 = vadd.f32 %v17039_v50, %v20172_v63  ;;  %v17318_v59 = vpop.eup %13544  ;;  %v5586_v48 = vmul.f32 0.7978846, %v5394_v6  ;;  %8105 = vmatprep.mubr.bf16.mxu0 %v17301_v45  ;;  %v17321_v17 = vpack.c.bf16 %v6321_v20, %v6317_v11  ;;  %v4821_v54 = vmul.f32 %v17306_v60, %v17306_v60  ;;  %v13208_v55 = vld [vmem:[%s14475_s28 + $0x480] ss:$24 sps:$4 sm:$0xff]  }
 0x3b0   : > { %v17327_v43 = vadd.f32 %v17044_v47, %v20174_v44  ;;  %8487 = vmatprep.subr.bf16.mxu1 %v13204_v24  ;;  %v13210_v50 = vld [vmem:[%s14475_s28 + $0x484] ss:$24 sps:$4 sm:$0xff]   ;;  %13552 = vtanh.f32 %v5582_v46  ;;  %v5942_v49 = vadd.f32 1.0, %v17160_v35  ;;  %v5946_v22 = vadd.f32 1.0, %v17181_v51  ;;  %v13205_v24 = vld [vmem:[%s14475_s28 + $0xf8] ss:$24 sps:$4 sm:$0xff]  }
 0x3b1   : > { %20173 = vst [vmem:[#allocation50_spill] sm:$0xff] %v17321_v17  ;;  %v17331_v37 = vpop.eup %13546  ;;  %v4822_v32 = vmul.f32 %v17315_v18, %v17315_v18  ;;  %v20175_v4 = vld [vmem:[#allocation33_spill] sm:$0xff]  ;;  %13554 = vtanh.f32 %v5585_v23  ;;  %8106 = vmatmul.mubr.bf16.gmra.mrb[152].mxu0 %v17321_v17  ;;  %v5013_v47 = vmul.f32 %v17306_v60, %v4821_v54  ;;  %8222 = vmatprep.subr.bf16.mxu0 %v13210_v50  ;;  %v5941_v54 = vadd.f32 1.0, %v17142_v9 }
 0x3b2   : > { %v17337_v11 = vadd.f32 %v17049_v57, %v20175_v4  ;;  %v17340_v6 = vpop.eup %13548  ;;  %v4825_v20 = vmul.f32 %v17327_v43, %v17327_v43  ;;  %13556 = vtanh.f32 %v5586_v48  ;;  %v6134_v35 = vmul.f32 0.5, %v5942_v49  ;;  %8488 = vmatpush1.bf16.msra.mxu1 %v13202_v58  ;;  %8223 = vmatpush1.bf16.msra.mxu0 %v13208_v55  ;;  %v13884_v58 = vld [vmem:[%s19790_s0 + $0xa0] ss:$24 sps:$4 sm:$0xff]   ;;  %v13885_v4 = vld [vmem:[%s19790_s0 + $0xd4] ss:$24 sps:$4 sm:$0xff]  }
 0x3b3   : > { %v5014_v8 = vmul.f32 %v17315_v18, %v4822_v32  ;;  %v5205_v46 = vmul.f32 0.044715, %v5013_v47  ;;  %v6138_v63 = vmul.f32 0.5, %v5946_v22  ;;  %8489 = vmatprep.subr.bf16.mxu1 %v13207_v19  ;;  %v5945_v50 = vadd.f32 1.0, %v17171_v33 }
 0x3b4   : > { %v4826_v57 = vmul.f32 %v17337_v11, %v17337_v11  ;;  %v5017_v23 = vmul.f32 %v17327_v43, %v4825_v20  ;;  %v6326_v44 = vmul.f32 %v16998_v0, %v6134_v35  ;;  %v6133_v19 = vmul.f32 0.5, %v5941_v54  ;;  %v13211_v0 = vld [vmem:[%s14475_s28 + $0x128] ss:$24 sps:$4 sm:$0xff]  }
 0x3b5   : > { %v5206_v51 = vmul.f32 0.044715, %v5014_v8  ;;  %4459 = vmatmul.mubr.bf16.gmra.mrb[108].mxu1 %v13884_v58  ;;  %v5397_v55 = vadd.f32 %v17306_v60, %v5205_v46  ;;  %v6330_v9 = vmul.f32 %v17013_v14, %v6138_v63  ;;  %v6137_v47 = vmul.f32 0.5, %v5945_v50  ;;  %v20176_v20 = vld [vmem:[#allocation34_spill] sm:$0xff]  ;;  %v20179_v50 = vld [vmem:[#allocation37_spill] sm:$0xff] }
 0x3b6   : > { %v5018_v48 = vmul.f32 %v17337_v11, %v4826_v57  ;;  %v5209_v32 = vmul.f32 0.044715, %v5017_v23  ;;  %4468 = vmatprep.mubr.bf16.mxu1 %v13885_v4  ;;  %v17368_v22 = vadd.f32 %v17081_v34, %v20176_v20  ;;  %8490 = vmatpush1.bf16.msra.mxu1 %v13205_v24  ;;  %v13213_v8 = vld [vmem:[%s14475_s28 + $0x12c] ss:$24 sps:$4 sm:$0xff]   ;;  %v6325_v46 = vmul.f32 %v16983_v53, %v6133_v19  ;;  %v13216_v23 = vld [vmem:[%s14475_s28 + $0x15c] ss:$24 sps:$4 sm:$0xff]  }
 0x3b7   : > { %v5398_v33 = vadd.f32 %v17315_v18, %v5206_v51  ;;  %v5589_v57 = vmul.f32 0.7978846, %v5397_v55  ;;  %v17372_v35 = vpack.c.bf16 %v6330_v9, %v6326_v44  ;;  %8491 = vmatprep.subr.bf16.mxu1 %v13213_v8  ;;  %v20178_v44 = vld [vmem:[#allocation35_spill] sm:$0xff]  ;;  %v17389_v58 = vadd.f32 %v17105_v2, %v20179_v50  ;;  %v13214_v19 = vld [vmem:[%s14475_s28 + $0x158] ss:$24 sps:$4 sm:$0xff]  }
 0x3b8   : > { %v5210_v49 = vmul.f32 0.044715, %v5018_v48  ;;  %v5401_v14 = vadd.f32 %v17327_v43, %v5209_v32  ;;  %v17376_v63 = vpop.eup %13550  ;;  %v6329_v48 = vmul.f32 %v17009_v3, %v6137_v47  ;;  %v4829_v34 = vmul.f32 %v17368_v22, %v17368_v22 }
 0x3b9   : > { %20177 = vst [vmem:[#allocation49_spill] sm:$0xff] %v17372_v35  ;;  %v5590_v54 = vmul.f32 0.7978846, %v5398_v33  ;;  %13558 = vtanh.f32 %v5589_v57  ;;  %8115 = vmatprep.mubr.bf16.mxu0 %v17372_v35  ;;  %v17385_v53 = vadd.f32 %v17096_v56, %v20178_v44  ;;  %v4833_v2 = vmul.f32 %v17389_v58, %v17389_v58  ;;  %v20181_v33 = vld [vmem:[#allocation38_spill] sm:$0xff]  ;;  %v13886_v57 = vld [vmem:[%s19790_s0 + $0xd0] ss:$24 sps:$4 sm:$0xff]  }
 0x3ba   : > { %v5402_v51 = vadd.f32 %v17337_v11, %v5210_v49  ;;  %v5593_v24 = vmul.f32 0.7978846, %v5401_v14  ;;  %v17391_v55 = vpop.eup %13552  ;;  %v17393_v32 = vpack.c.bf16 %v6329_v48, %v6325_v46  ;;  %v5021_v9 = vmul.f32 %v17368_v22, %v4829_v34  ;;  %8492 = vmatpush1.bf16.msra.mxu1 %v13211_v0  ;;  %v13220_v44 = vld [vmem:[%s14475_s28 + $0x4b0] ss:$24 sps:$4 sm:$0xff]  }
 0x3bb   : > { %13560 = vtanh.f32 %v5590_v54  ;;  %v17397_v4 = vpop.eup %13554  ;;  %v4830_v56 = vmul.f32 %v17385_v53, %v17385_v53  ;;  %v17405_v49 = vadd.f32 %v17114_v27, %v20181_v33  ;;  %8493 = vmatprep.subr.bf16.mxu1 %v13216_v23  ;;  %v5950_v20 = vadd.f32 1.0, %v17245_v10  ;;  %v13887_v10 = vld [vmem:[%s19790_s0 + $0x104] ss:$24 sps:$4 sm:$0xff]  }
 0x3bc   : > { %v5594_v3 = vmul.f32 0.7978846, %v5402_v51  ;;  %20180 = vst [vmem:[#allocation25_spill] sm:$0xff] %v17393_v32  ;;  %13562 = vtanh.f32 %v5593_v24  ;;  %v17407_v47 = vpop.eup %13556  ;;  %8116 = vmatmul.mubr.bf16.gmra.mrb[156].mxu0 %v17393_v32  ;;  %v5213_v0 = vmul.f32 0.044715, %v5021_v9  ;;  %v5954_v8 = vadd.f32 1.0, %v17267_v62 }
 0x3bd   : > { %4469 = vmatmul.mubr.bf16.gmra.mrb[112].mxu1 %v13886_v57  ;;  %v5022_v27 = vmul.f32 %v17385_v53, %v4830_v56  ;;  %v5025_v14 = vmul.f32 %v17389_v58, %v4833_v2  ;;  %v4834_v46 = vmul.f32 %v17405_v49, %v17405_v49  ;;  %v5949_v23 = vadd.f32 1.0, %v17227_v40  ;;  %v13217_v62 = vld [vmem:[%s14475_s28 + $0x188] ss:$24 sps:$4 sm:$0xff]   ;;  %v13219_v54 = vld [vmem:[%s14475_s28 + $0x18c] ss:$24 sps:$4 sm:$0xff]  }
 0x3be   : > { %13564 = vtanh.f32 %v5594_v3  ;;  %4478 = vmatprep.mubr.bf16.mxu1 %v13887_v10  ;;  %v5405_v51 = vadd.f32 %v17368_v22, %v5213_v0  ;;  %v6142_v48 = vmul.f32 0.5, %v5950_v20  ;;  %v6146_v34 = vmul.f32 0.5, %v5954_v8  ;;  %8494 = vmatpush1.bf16.msra.mxu1 %v13214_v19  ;;  %v13222_v0 = vld [vmem:[%s14475_s28 + $0x4b4] ss:$24 sps:$4 sm:$0xff]   ;;  %v20182_v8 = vld [vmem:[#allocation13_spill] sm:$0xff] }
 0x3bf   : > { %v5953_v24 = vadd.f32 1.0, %v17258_v13  ;;  %v5214_v50 = vmul.f32 0.044715, %v5022_v27  ;;  %v5217_v3 = vmul.f32 0.044715, %v5025_v14  ;;  %v5026_v40 = vmul.f32 %v17405_v49, %v4834_v46  ;;  %8495 = vmatprep.subr.bf16.mxu1 %v13219_v54  ;;  %v20184_v10 = vld [vmem:[#allocation39_spill] sm:$0xff]  ;;  %8224 = vmatprep.subr.bf16.mxu0 %v13222_v0 }
 0x3c0   : > { %v6141_v9 = vmul.f32 0.5, %v5949_v23  ;;  %v5597_v56 = vmul.f32 0.7978846, %v5405_v51  ;;  %v6334_v2 = vmul.f32 %v17079_v28, %v6142_v48  ;;  %v6338_v33 = vmul.f32 %v17094_v30, %v6146_v34  ;;  %v13225_v14 = vld [vmem:[%s14475_s28 + $0x1bc] ss:$24 sps:$4 sm:$0xff]   ;;  %8225 = vmatpush1.bf16.msra.mxu0 %v13220_v44 }
 0x3c1   : > { %v6145_v57 = vmul.f32 0.5, %v5953_v24  ;;  %v5406_v20 = vadd.f32 %v17385_v53, %v5214_v50  ;;  %v5409_v13 = vadd.f32 %v17389_v58, %v5217_v3  ;;  %v5218_v19 = vmul.f32 0.044715, %v5026_v40  ;;  %v20185_v34 = vld [vmem:[#allocation57_spill] sm:$0xff]  ;;  %v20186_v24 = vld [vmem:[#allocation18_spill] sm:$0xff] }
 0x3c2   : > { %v6333_v27 = vmul.f32 %v20182_v8, %v6141_v9  ;;  %13566 = vtanh.f32 %v5597_v56  ;;  %v17436_v46 = vpack.c.bf16 %v6338_v33, %v6334_v2  ;;  %v17441_v28 = vadd.f32 %v17139_v41, %v20184_v10  ;;  %8496 = vmatpush1.bf16.msra.mxu1 %v13217_v62  ;;  %v13223_v3 = vld [vmem:[%s14475_s28 + $0x1b8] ss:$24 sps:$4 sm:$0xff]   ;;  %v20188_v40 = vld [vmem:[#allocation58_spill] sm:$0xff]  ;;  %v20189_v9 = vld [vmem:[#allocation19_spill] sm:$0xff] }
 0x3c3   : > { %v6337_v23 = vmul.f32 %v17090_v36, %v6145_v57  ;;  %v17443_v30 = vpop.eup %13558  ;;  %v5598_v54 = vmul.f32 0.7978846, %v5406_v20  ;;  %v5601_v51 = vmul.f32 0.7978846, %v5409_v13  ;;  %v5410_v48 = vadd.f32 %v17405_v49, %v5218_v19  ;;  %8497 = vmatprep.subr.bf16.mxu1 %v13225_v14  ;;  %v20190_v2 = vld [vmem:[#allocation40_spill] sm:$0xff]  ;;  %v20191_v33 = vld [vmem:[#allocation21_spill] sm:$0xff] }
 0x3c4   : > { %20183 = vst [vmem:[#allocation54_spill] sm:$0xff] %v17436_v46  ;;  %v17448_v50 = vadd.f32 %v20186_v24, %v20185_v34  ;;  %8125 = vmatprep.mubr.bf16.mxu0 %v17436_v46  ;;  %v4837_v62 = vmul.f32 %v17441_v28, %v17441_v28  ;;  %v17460_v56 = vadd.f32 %v20189_v9, %v20188_v40  ;;  %v5958_v13 = vadd.f32 1.0, %v17318_v59  ;;  %v13888_v19 = vld [vmem:[%s19790_s0 + $0x100] ss:$24 sps:$4 sm:$0xff]   ;;  %v20193_v46 = vld [vmem:[#allocation47_spill] sm:$0xff] }
 0x3c5   : > { %v17451_v36 = vpop.eup %13560  ;;  %v17454_v41 = vpack.c.bf16 %v6337_v23, %v6333_v27  ;;  %v17464_v57 = vadd.f32 %v20191_v33, %v20190_v2  ;;  %13568 = vtanh.f32 %v5598_v54  ;;  %v5602_v0 = vmul.f32 0.7978846, %v5410_v48  ;;  %4479 = vmatmul.mubr.bf16.gmra.mrb[116].mxu1 %v13888_v19  ;;  %v13889_v23 = vld [vmem:[%s19790_s0 + $0x134] ss:$24 sps:$4 sm:$0xff]   ;;  %v13226_v10 = vld [vmem:[%s14475_s28 + $0x1e8] ss:$24 sps:$4 sm:$0xff]  }
 0x3c6   : > { %v17466_v44 = vpop.eup %13562  ;;  %v4838_v20 = vmul.f32 %v17448_v50, %v17448_v50  ;;  %13570 = vtanh.f32 %v5601_v51  ;;  %v5029_v27 = vmul.f32 %v17441_v28, %v4837_v62  ;;  %v4841_v14 = vmul.f32 %v17460_v56, %v17460_v56  ;;  %4488 = vmatprep.mubr.bf16.mxu1 %v13889_v23  ;;  %v13228_v54 = vld [vmem:[%s14475_s28 + $0x1ec] ss:$24 sps:$4 sm:$0xff]   ;;  %8498 = vmatpush1.bf16.msra.mxu1 %v13223_v3  ;;  %v13232_v24 = vld [vmem:[%s14475_s28 + $0x4e0] ss:$24 sps:$4 sm:$0xff]   ;;  %v13231_v19 = vld [vmem:[%s14475_s28 + $0x21c] ss:$24 sps:$4 sm:$0xff]  }
 0x3c7   : > { %20187 = vst [vmem:[#allocation26_spill] sm:$0xff] %v17454_v41  ;;  %8126 = vmatmul.mubr.bf16.gmra.mrb[160].mxu0 %v17454_v41  ;;  %v4842_v59 = vmul.f32 %v17464_v57, %v17464_v57  ;;  %13572 = vtanh.f32 %v5602_v0  ;;  %v5962_v48 = vadd.f32 1.0, %v17340_v6  ;;  %v6150_v34 = vmul.f32 0.5, %v5958_v13  ;;  %v13234_v62 = vld [vmem:[%s14475_s28 + $0x4e4] ss:$24 sps:$4 sm:$0xff]   ;;  %8499 = vmatprep.subr.bf16.mxu1 %v13228_v54  ;;  %v20192_v54 = vld [vmem:[#allocation59_spill] sm:$0xff] }
 0x3c8   : > { %v17474_v8 = vpop.eup %13564  ;;  %v5030_v51 = vmul.f32 %v17448_v50, %v4838_v20  ;;  %v5221_v40 = vmul.f32 0.044715, %v5029_v27  ;;  %v5033_v9 = vmul.f32 %v17460_v56, %v4841_v14  ;;  %v5957_v33 = vadd.f32 1.0, %v17298_v26  ;;  %8226 = vmatprep.subr.bf16.mxu0 %v13234_v62 }
 0x3c9   : > { %v5034_v2 = vmul.f32 %v17464_v57, %v4842_v59  ;;  %v6154_v0 = vmul.f32 0.5, %v5962_v48  ;;  %v6342_v20 = vmul.f32 %v17156_v15, %v6150_v34  ;;  %v5961_v6 = vadd.f32 1.0, %v17331_v37  ;;  %8227 = vmatpush1.bf16.msra.mxu0 %v13232_v24  ;;  %v13229_v15 = vld [vmem:[%s14475_s28 + $0x218] ss:$24 sps:$4 sm:$0xff]  }
 0x3ca   : > { %v5222_v23 = vmul.f32 0.044715, %v5030_v51  ;;  %v5413_v3 = vadd.f32 %v17441_v28, %v5221_v40  ;;  %v5225_v13 = vmul.f32 0.044715, %v5033_v9  ;;  %v6149_v41 = vmul.f32 0.5, %v5957_v33  ;;  %8500 = vmatpush1.bf16.msra.mxu1 %v13226_v10  ;;  %v20194_v24 = vld [vmem:[#allocation16_spill] sm:$0xff] }
 0x3cb   : > { %v5226_v27 = vmul.f32 0.044715, %v5034_v2  ;;  %v6346_v26 = vmul.f32 %v17178_v38, %v6154_v0  ;;  %v6153_v59 = vmul.f32 0.5, %v5961_v6  ;;  %v17502_v51 = vadd.f32 %v20193_v46, %v20192_v54  ;;  %8501 = vmatprep.subr.bf16.mxu1 %v13231_v19  ;;  %v13890_v10 = vld [vmem:[%s19790_s0 + $0x130] ss:$24 sps:$4 sm:$0xff]  }
 0x3cc   : > { %v5414_v14 = vadd.f32 %v17448_v50, %v5222_v23  ;;  %v17505_v37 = vpop.eup %13566  ;;  %v5605_v48 = vmul.f32 0.7978846, %v5413_v3  ;;  %v5417_v34 = vadd.f32 %v17460_v56, %v5225_v13  ;;  %v6341_v40 = vmul.f32 %v20194_v24, %v6149_v41  ;;  %v13237_v33 = vld [vmem:[%s14475_s28 + $0x24c] ss:$24 sps:$4 sm:$0xff]   ;;  %v20196_v41 = vld [vmem:[#allocation60_spill] sm:$0xff]  ;;  %v20198_v13 = vld [vmem:[#allocation61_spill] sm:$0xff] }
 0x3cd   : > { %v5418_v62 = vadd.f32 %v17464_v57, %v5226_v27  ;;  %v17510_v38 = vpack.c.bf16 %v6346_v26, %v6342_v20  ;;  %v6345_v2 = vmul.f32 %v17167_v21, %v6153_v59  ;;  %v4845_v46 = vmul.f32 %v17502_v51, %v17502_v51  ;;  %4489 = vmatmul.mubr.bf16.gmra.mrb[120].mxu1 %v13890_v10  ;;  %v13891_v21 = vld [vmem:[%s19790_s0 + $0x164] ss:$24 sps:$4 sm:$0xff]  }
 0x3ce   : > { %v5606_v9 = vmul.f32 0.7978846, %v5414_v14  ;;  %13574 = vtanh.f32 %v5605_v48  ;;  %v5609_v23 = vmul.f32 0.7978846, %v5417_v34  ;;  %v17521_v19 = vadd.f32 %v17211_v5, %v20196_v41  ;;  %4498 = vmatprep.mubr.bf16.mxu1 %v13891_v21  ;;  %8502 = vmatpush1.bf16.msra.mxu1 %v13229_v15  ;;  %v13235_v5 = vld [vmem:[%s14475_s28 + $0x248] ss:$24 sps:$4 sm:$0xff]  }
 0x3cf   : > { %20195 = vst [vmem:[#allocation27_spill] sm:$0xff] %v17510_v38  ;;  %v5610_v0 = vmul.f32 0.7978846, %v5418_v62  ;;  %v17526_v20 = vpop.eup %13568  ;;  %8135 = vmatprep.mubr.bf16.mxu0 %v17510_v38  ;;  %v17529_v6 = vpack.c.bf16 %v6345_v2, %v6341_v40  ;;  %v5037_v3 = vmul.f32 %v17502_v51, %v4845_v46  ;;  %v17534_v27 = vadd.f32 %v17215_v12, %v20198_v13  ;;  %v20199_v59 = vld [vmem:[#allocation62_spill] sm:$0xff]  ;;  %v13240_v34 = vld [vmem:[%s14475_s28 + $0x27c] ss:$24 sps:$4 sm:$0xff]  }
 0x3d0   : > { %13576 = vtanh.f32 %v5606_v9  ;;  %v17537_v14 = vpop.eup %13570  ;;  %v4846_v26 = vmul.f32 %v17521_v19, %v17521_v19  ;;  %v17543_v54 = vadd.f32 %v17225_v42, %v20199_v59  ;;  %v5966_v48 = vadd.f32 1.0, %v17391_v55  ;;  %8503 = vmatprep.subr.bf16.mxu1 %v13237_v33  ;;  %v20248_v38 = vld [vmem:[#allocation17_spill] sm:$0xff] }
 0x3d1   : > { %20197 = vst [vmem:[#allocation55_spill] sm:$0xff] %v17529_v6  ;;  %13578 = vtanh.f32 %v5609_v23  ;;  %v17547_v62 = vpop.eup %13572  ;;  %8136 = vmatmul.mubr.bf16.gmra.mrb[164].mxu0 %v17529_v6  ;;  %v5229_v12 = vmul.f32 0.044715, %v5037_v3  ;;  %v4849_v15 = vmul.f32 %v17534_v27, %v17534_v27  ;;  %v5970_v24 = vadd.f32 1.0, %v17407_v47  ;;  %v13238_v23 = vld [vmem:[%s14475_s28 + $0x278] ss:$24 sps:$4 sm:$0xff]  }
 0x3d2   : > { %13580 = vtanh.f32 %v5610_v0  ;;  %v5038_v40 = vmul.f32 %v17521_v19, %v4846_v26  ;;  %v4850_v42 = vmul.f32 %v17543_v54, %v17543_v54  ;;  %v6158_v55 = vmul.f32 0.5, %v5966_v48  ;;  %8504 = vmatpush1.bf16.msra.mxu1 %v13235_v5  ;;  %v20200_v48 = vld [vmem:[#allocation63_spill] sm:$0xff] }
 0x3d3   : > { %v5965_v9 = vadd.f32 1.0, %v17376_v63  ;;  %v5421_v2 = vadd.f32 %v17502_v51, %v5229_v12  ;;  %v5041_v46 = vmul.f32 %v17534_v27, %v4849_v15  ;;  %v6162_v10 = vmul.f32 0.5, %v5970_v24  ;;  %8505 = vmatprep.subr.bf16.mxu1 %v13240_v34  ;;  %v13243_v12 = vld [vmem:[%s14475_s28 + $0x2ac] ss:$24 sps:$4 sm:$0xff]  }
 0x3d4   : > { %v5969_v33 = vadd.f32 1.0, %v17397_v4  ;;  %v5230_v0 = vmul.f32 0.044715, %v5038_v40  ;;  %v5042_v47 = vmul.f32 %v17543_v54, %v4850_v42  ;;  %v6350_v41 = vmul.f32 %v17236_v29, %v6158_v55  ;;  %v13892_v4 = vld [vmem:[%s19790_s0 + $0x160] ss:$24 sps:$4 sm:$0xff]  }
 0x3d5   : > { %v6157_v21 = vmul.f32 0.5, %v5965_v9  ;;  %v5613_v3 = vmul.f32 0.7978846, %v5421_v2  ;;  %v5233_v13 = vmul.f32 0.044715, %v5041_v46  ;;  %v6354_v63 = vmul.f32 %v17251_v16, %v6162_v10  ;;  %4499 = vmatmul.mubr.bf16.gmra.mrb[124].mxu1 %v13892_v4  ;;  %v20202_v10 = vld [vmem:[#allocation64_spill] sm:$0xff] }
 0x3d6   : > { %v6161_v26 = vmul.f32 0.5, %v5969_v33  ;;  %v5422_v5 = vadd.f32 %v17521_v19, %v5230_v0  ;;  %v5234_v59 = vmul.f32 0.044715, %v5042_v47  ;;  %v17571_v34 = vadd.f32 %v17274_v39, %v20200_v48  ;;  %v13893_v16 = vld [vmem:[%s19790_s0 + $0x194] ss:$24 sps:$4 sm:$0xff]   ;;  %8506 = vmatpush1.bf16.msra.mxu1 %v13238_v23 }
 0x3d7   : > { %v6349_v29 = vmul.f32 %v17223_v25, %v6157_v21  ;;  %4508 = vmatprep.mubr.bf16.mxu1 %v13893_v16  ;;  %13582 = vtanh.f32 %v5613_v3  ;;  %v5425_v15 = vadd.f32 %v17534_v27, %v5233_v13  ;;  %v17578_v24 = vpack.c.bf16 %v6354_v63, %v6350_v41  ;;  %v13241_v25 = vld [vmem:[%s14475_s28 + $0x2a8] ss:$24 sps:$4 sm:$0xff]   ;;  %v13246_v55 = vld [vmem:[%s14475_s28 + $0x514] ss:$24 sps:$4 sm:$0xff]   ;;  %8507 = vmatprep.subr.bf16.mxu1 %v13243_v12  ;;  %v20204_v41 = vld [vmem:[#allocation65_spill] sm:$0xff] }
 0x3d8   : > { %v6353_v40 = vmul.f32 %v17240_v31, %v6161_v26  ;;  %v13244_v42 = vld [vmem:[%s14475_s28 + $0x510] ss:$24 sps:$4 sm:$0xff]   ;;  %v17584_v39 = vpop.eup %13574  ;;  %v5614_v9 = vmul.f32 0.7978846, %v5422_v5  ;;  %v5426_v2 = vadd.f32 %v17543_v54, %v5234_v59  ;;  %v4853_v46 = vmul.f32 %v17571_v34, %v17571_v34  ;;  %v13249_v0 = vld [vmem:[%s14475_s28 + $0x2dc] ss:$24 sps:$4 sm:$0xff]   ;;  %8228 = vmatprep.subr.bf16.mxu0 %v13246_v55 }
 0x3d9   : > { %20201 = vst [vmem:[#allocation56_spill] sm:$0xff] %v17578_v24  ;;  %v17591_v33 = vadd.f32 %v17280_v7, %v20202_v10  ;;  %v5617_v31 = vmul.f32 0.7978846, %v5425_v15  ;;  %8145 = vmatprep.mubr.bf16.mxu0 %v17578_v24  ;;  %v17601_v21 = vadd.f32 %v17284_v52, %v20204_v41  ;;  %v20205_v3 = vld [vmem:[#allocation41_spill] sm:$0xff]  ;;  %8229 = vmatpush1.bf16.msra.mxu0 %v13244_v42  ;;  %v5974_v59 = vadd.f32 1.0, %v17451_v36 }
 0x3da   : > { %v17594_v47 = vpop.eup %13576  ;;  %v17597_v23 = vpack.c.bf16 %v6353_v40, %v6349_v29  ;;  %v17605_v13 = vadd.f32 %v17288_v1, %v20205_v3  ;;  %13584 = vtanh.f32 %v5614_v9  ;;  %v5618_v63 = vmul.f32 0.7978846, %v5426_v2  ;;  %8508 = vmatpush1.bf16.msra.mxu1 %v13241_v25  ;;  %v13247_v29 = vld [vmem:[%s14475_s28 + $0x2d8] ss:$24 sps:$4 sm:$0xff]   ;;  %v13306_v6 = vld [vmem:[%s14475_s28 + $0x194] ss:$24 sps:$4 sm:$0xff]  }
 0x3db   : > { %v17607_v7 = vpop.eup %13578  ;;  %v5045_v26 = vmul.f32 %v17571_v34, %v4853_v46  ;;  %v4854_v4 = vmul.f32 %v17591_v33, %v17591_v33  ;;  %13586 = vtanh.f32 %v5617_v31  ;;  %v4857_v52 = vmul.f32 %v17601_v21, %v17601_v21  ;;  %8509 = vmatprep.subr.bf16.mxu1 %v13249_v0  ;;  %v13894_v36 = vld [vmem:[%s19790_s0 + $0x190] ss:$24 sps:$4 sm:$0xff]   ;;  %v13895_v46 = vld [vmem:[%s19790_s0 + $0x1c4] ss:$24 sps:$4 sm:$0xff]   ;;  %v13250_v10 = vld [vmem:[%s14475_s28 + $0x540] ss:$24 sps:$4 sm:$0xff]  }
 0x3dc   : > { %20203 = vst [vmem:[#allocation28_spill] sm:$0xff] %v17597_v23  ;;  %v17612_v5 = vpop.eup %13580  ;;  %8146 = vmatmul.mubr.bf16.gmra.mrb[168].mxu0 %v17597_v23  ;;  %v4858_v1 = vmul.f32 %v17605_v13, %v17605_v13  ;;  %13588 = vtanh.f32 %v5618_v63  ;;  %v5978_v12 = vadd.f32 1.0, %v17474_v8  ;;  %v6166_v42 = vmul.f32 0.5, %v5974_v59 }
 0x3dd   : > { %v5237_v48 = vmul.f32 0.044715, %v5045_v26  ;;  %v5046_v16 = vmul.f32 %v17591_v33, %v4854_v4  ;;  %v5049_v15 = vmul.f32 %v17601_v21, %v4857_v52  ;;  %v5973_v55 = vadd.f32 1.0, %v17443_v30  ;;  %4509 = vmatmul.mubr.bf16.gmra.mrb[128].mxu1 %v13894_v36  ;;  %v13252_v52 = vld [vmem:[%s14475_s28 + $0x544] ss:$24 sps:$4 sm:$0xff]  }
 0x3de   : > { %v5050_v40 = vmul.f32 %v17605_v13, %v4858_v1  ;;  %v6170_v2 = vmul.f32 0.5, %v5978_v12  ;;  %v5977_v8 = vadd.f32 1.0, %v17466_v44  ;;  %4518 = vmatprep.mubr.bf16.mxu1 %v13895_v46  ;;  %v6358_v31 = vmul.f32 %v17315_v18, %v6166_v42  ;;  %8510 = vmatpush1.bf16.msra.mxu1 %v13247_v29 }
 0x3df   : > { %v5429_v25 = vadd.f32 %v17571_v34, %v5237_v48  ;;  %v5238_v9 = vmul.f32 0.044715, %v5046_v16  ;;  %v5241_v0 = vmul.f32 0.044715, %v5049_v15  ;;  %v6165_v41 = vmul.f32 0.5, %v5973_v55  ;;  %8230 = vmatprep.subr.bf16.mxu0 %v13252_v52 }
 0x3e0   : > { %v5242_v30 = vmul.f32 0.044715, %v5050_v40  ;;  %v6362_v26 = vmul.f32 %v17337_v11, %v6170_v2  ;;  %v6169_v4 = vmul.f32 0.5, %v5977_v8  ;;  %v5982_v16 = vadd.f32 1.0, %v17526_v20  ;;  %8231 = vmatpush1.bf16.msra.mxu0 %v13250_v10  ;;  %v13897_v10 = vld [vmem:[%s19790_s0 + $0x1f4] ss:$24 sps:$4 sm:$0xff]  }
 0x3e1   : > { %v5621_v3 = vmul.f32 0.7978846, %v5429_v25  ;;  %v5430_v63 = vadd.f32 %v17591_v33, %v5238_v9  ;;  %v13583_v44 = vpop.eup %13582  ;;  %v5433_v1 = vadd.f32 %v17601_v21, %v5241_v0  ;;  %v6357_v48 = vmul.f32 %v17306_v60, %v6165_v41 }
 0x3e2   : > { %v5434_v59 = vadd.f32 %v17605_v13, %v5242_v30  ;;  %v17643_v12 = vpack.c.bf16 %v6362_v26, %v6358_v31  ;;  %v6361_v29 = vmul.f32 %v17327_v43, %v6169_v4  ;;  %v5986_v40 = vadd.f32 1.0, %v17547_v62  ;;  %v13896_v62 = vld [vmem:[%s19790_s0 + $0x1c0] ss:$24 sps:$4 sm:$0xff]  }
 0x3e3   : > { %13590 = vtanh.f32 %v5621_v3  ;;  %v5622_v18 = vmul.f32 0.7978846, %v5430_v63  ;;  %v5625_v15 = vmul.f32 0.7978846, %v5433_v1  ;;  %v6174_v42 = vmul.f32 0.5, %v5982_v16 }
 0x3e4   : > { %20206 = vst [vmem:[#allocation29_spill] sm:$0xff] %v17643_v12  ;;  %v5626_v11 = vmul.f32 0.7978846, %v5434_v59  ;;  %v13585_v55 = vpop.eup %13584  ;;  %8155 = vmatprep.mubr.bf16.mxu0 %v17643_v12  ;;  %v17648_v60 = vpack.c.bf16 %v6361_v29, %v6357_v48  ;;  %v5981_v20 = vadd.f32 1.0, %v17505_v37  ;;  %v5985_v36 = vadd.f32 1.0, %v17537_v14 }
 0x3e5   : > { %13592 = vtanh.f32 %v5622_v18  ;;  %v13587_v25 = vpop.eup %13586  ;;  %v6178_v43 = vmul.f32 0.5, %v5986_v40  ;;  %v6366_v9 = vmul.f32 %v17385_v53, %v6174_v42  ;;  %v5990_v2 = vadd.f32 1.0, %v17594_v47  ;;  %4519 = vmatmul.mubr.bf16.gmra.mrb[132].mxu1 %v13896_v62 }
 0x3e6   : > { %20207 = vst [vmem:[#allocation30_spill] sm:$0xff] %v17648_v60  ;;  %13594 = vtanh.f32 %v5625_v15  ;;  %v13589_v8 = vpop.eup %13588  ;;  %8156 = vmatmul.mubr.bf16.gmra.mrb[172].mxu0 %v17648_v60  ;;  %v6173_v46 = vmul.f32 0.5, %v5981_v20  ;;  %v6177_v37 = vmul.f32 0.5, %v5985_v36  ;;  %v5994_v14 = vadd.f32 1.0, %v17612_v5  ;;  %4528 = vmatprep.mubr.bf16.mxu1 %v13897_v10 }
 0x3e7   : > { %13596 = vtanh.f32 %v5626_v11  ;;  %v6370_v53 = vmul.f32 %v17405_v49, %v6178_v43  ;;  %v6182_v47 = vmul.f32 0.5, %v5990_v2  ;;  %v5989_v0 = vadd.f32 1.0, %v17584_v39 }
 0x3e8   : > { %v5993_v30 = vadd.f32 1.0, %v17607_v7  ;;  %v6365_v31 = vmul.f32 %v17368_v22, %v6173_v46  ;;  %v6369_v41 = vmul.f32 %v17389_v58, %v6177_v37  ;;  %v6186_v3 = vmul.f32 0.5, %v5994_v14 }
 0x3e9   : > { %v5998_v63 = vadd.f32 1.0, %v13585_v55  ;;  %v17667_v26 = vpack.c.bf16 %v6370_v53, %v6366_v9  ;;  %v6374_v5 = vmul.f32 %v17448_v50, %v6182_v47  ;;  %v6181_v4 = vmul.f32 0.5, %v5989_v0  ;;  %v13900_v53 = vld [vmem:[%s19790_s0 + $0x220] ss:$24 sps:$4 sm:$0xff]  }
 0x3ea   : > { %v6185_v52 = vmul.f32 0.5, %v5993_v30  ;;  %v17670_v1 = vpack.c.bf16 %v6369_v41, %v6365_v31  ;;  %v6378_v49 = vmul.f32 %v17464_v57, %v6186_v3  ;;  %v6002_v59 = vadd.f32 1.0, %v13589_v8  ;;  %v13898_v57 = vld [vmem:[%s19790_s0 + $0x1f0] ss:$24 sps:$4 sm:$0xff]   ;;  %v13904_v0 = vld [vmem:[%s19790_s0 + $0x280] ss:$24 sps:$4 sm:$0xff]  }
 0x3eb   : > { %20208 = vst [vmem:[#allocation31_spill] sm:$0xff] %v17667_v26  ;;  %v6190_v39 = vmul.f32 0.5, %v5998_v63  ;;  %8165 = vmatprep.mubr.bf16.mxu0 %v17667_v26  ;;  %v6373_v22 = vmul.f32 %v17441_v28, %v6181_v4  ;;  %v5997_v7 = vadd.f32 1.0, %v13583_v44  ;;  %v6001_v48 = vadd.f32 1.0, %v13587_v25  ;;  %v13899_v44 = vld [vmem:[%s19790_s0 + $0x224] ss:$24 sps:$4 sm:$0xff]  }
 0x3ec   : > { %20209 = vst [vmem:[#allocation32_spill] sm:$0xff] %v17670_v1  ;;  %v6377_v58 = vmul.f32 %v17460_v56, %v6185_v52  ;;  %v17676_v18 = vpack.c.bf16 %v6378_v49, %v6374_v5  ;;  %v6194_v50 = vmul.f32 0.5, %v6002_v59  ;;  %v13905_v30 = vld [vmem:[%s19790_s0 + $0x2b4] ss:$24 sps:$4 sm:$0xff]   ;;  %v13253_v31 = vld [vmem:[%s14475_s28 + $0x570] ss:$24 sps:$4 sm:$0xff]  }
 0x3ed   : > { %v13591_v16 = vpop.eup %13590  ;;  %v6189_v15 = vmul.f32 0.5, %v5997_v7  ;;  %v6193_v11 = vmul.f32 0.5, %v6001_v48  ;;  %4529 = vmatmul.mubr.bf16.gmra.mrb[136].mxu1 %v13898_v57  ;;  %v6382_v28 = vmul.f32 %v17521_v19, %v6190_v39  ;;  %v13255_v41 = vld [vmem:[%s14475_s28 + $0x574] ss:$24 sps:$4 sm:$0xff]   ;;  %v13906_v3 = vld [vmem:[%s19790_s0 + $0x2b0] ss:$24 sps:$4 sm:$0xff]  }
 0x3ee   : > { %20210 = vst [vmem:[#allocation33_spill] sm:$0xff] %v17676_v18  ;;  %v17678_v29 = vpack.c.bf16 %v6377_v58, %v6373_v22  ;;  %v6005_v40 = vadd.f32 1.0, %v13591_v16  ;;  %8166 = vmatmul.mubr.bf16.gmra.mrb[176].mxu0 %v17670_v1  ;;  %v6386_v56 = vmul.f32 %v17543_v54, %v6194_v50  ;;  %4538 = vmatprep.mubr.bf16.mxu1 %v13899_v44  ;;  %v13907_v63 = vld [vmem:[%s19790_s0 + $0x2e4] ss:$24 sps:$4 sm:$0xff]   ;;  %v13256_v5 = vld [vmem:[%s14475_s28 + $0x5a0] ss:$24 sps:$4 sm:$0xff]  }
 0x3ef   : > { %v13593_v42 = vpop.eup %13592  ;;  %8175 = vmatprep.mubr.bf16.mxu0 %v17676_v18  ;;  %v6381_v20 = vmul.f32 %v17502_v51, %v6189_v15  ;;  %v6385_v36 = vmul.f32 %v17534_v27, %v6193_v11  ;;  %8232 = vmatprep.subr.bf16.mxu0 %v13255_v41  ;;  %v13258_v4 = vld [vmem:[%s14475_s28 + $0x5a4] ss:$24 sps:$4 sm:$0xff]   ;;  %v13259_v52 = vld [vmem:[%s14475_s28 + $0x5d0] ss:$24 sps:$4 sm:$0xff]   ;;  %v13261_v49 = vld [vmem:[%s14475_s28 + $0x5d4] ss:$24 sps:$4 sm:$0xff]  }
 0x3f0   : > { %20211 = vst [vmem:[#allocation34_spill] sm:$0xff] %v17678_v29  ;;  %v13595_v55 = vpop.eup %13594  ;;  %v6006_v25 = vadd.f32 1.0, %v13593_v42  ;;  %v17692_v9 = vpack.c.bf16 %v6386_v56, %v6382_v28  ;;  %v6197_v19 = vmul.f32 0.5, %v6005_v40  ;;  %8233 = vmatpush1.bf16.msra.mxu0 %v13253_v31  ;;  %v13908_v59 = vld [vmem:[%s19790_s0 + $0x2e0] ss:$24 sps:$4 sm:$0xff]  }
 0x3f1   : > { %v13597_v43 = vpop.eup %13596  ;;  %v6009_v2 = vadd.f32 1.0, %v13595_v55  ;;  %v17694_v62 = vpack.c.bf16 %v6385_v36, %v6381_v20  ;;  %8234 = vmatprep.subr.bf16.mxu0 %v13258_v4  ;;  %v13909_v39 = vld [vmem:[%s19790_s0 + $0x314] ss:$24 sps:$4 sm:$0xff]   ;;  %v13910_v22 = vld [vmem:[%s19790_s0 + $0x310] ss:$24 sps:$4 sm:$0xff]   ;;  %v20216_v36 = vld [vmem:[#allocation66_spill] sm:$0xff] }
 0x3f2   : > { %20212 = vst [vmem:[#allocation35_spill] sm:$0xff] %v17692_v9  ;;  %v6010_v54 = vadd.f32 1.0, %v13597_v43  ;;  %v6198_v8 = vmul.f32 0.5, %v6006_v25  ;;  %v6389_v14 = vmul.f32 %v17571_v34, %v6197_v19  ;;  %v13901_v34 = vld [vmem:[%s19790_s0 + $0x254] ss:$24 sps:$4 sm:$0xff]   ;;  %v20217_v25 = vld [vmem:[#allocation42_spill] sm:$0xff] }
 0x3f3   : > { %20213 = vst [vmem:[#allocation37_spill] sm:$0xff] %v17694_v62  ;;  %v6201_v46 = vmul.f32 0.5, %v6009_v2  ;;  %v13911_v58 = vld [vmem:[%s19790_s0 + $0x344] ss:$24 sps:$4 sm:$0xff]   ;;  %v13264_v7 = vld [vmem:[%s14475_s28 + $0x14] ss:$24 sps:$4 sm:$0xff]  }
 0x3f4   : > { %v6202_v37 = vmul.f32 0.5, %v6010_v54  ;;  %v6390_v51 = vmul.f32 %v17591_v33, %v6198_v8  ;;  %8235 = vmatpush1.bf16.msra.mxu0 %v13256_v5  ;;  %v13912_v48 = vld [vmem:[%s19790_s0 + $0x340] ss:$24 sps:$4 sm:$0xff]   ;;  %v13913_v16 = vld [vmem:[%s19790_s0 + $0x374] ss:$24 sps:$4 sm:$0xff]  }
 0x3f5   : > { %v6393_v10 = vmul.f32 %v17601_v21, %v6201_v46  ;;  %4539 = vmatmul.mubr.bf16.gmra.mrb[140].mxu1 %v13900_v53  ;;  %v13902_v21 = vld [vmem:[%s19790_s0 + $0x250] ss:$24 sps:$4 sm:$0xff]   ;;  %8236 = vmatprep.subr.bf16.mxu0 %v13261_v49  ;;  %v13915_v15 = vld [vmem:[%s19790_s0 + $0x3a4] ss:$24 sps:$4 sm:$0xff]   ;;  %v13916_v11 = vld [vmem:[%s19790_s0 + $0x3a0] ss:$24 sps:$4 sm:$0xff]  }
 0x3f6   : > { %v6394_v27 = vmul.f32 %v17605_v13, %v6202_v37  ;;  %8176 = vmatmul.mubr.bf16.gmra.mrb[180].mxu0 %v17678_v29  ;;  %4548 = vmatprep.mubr.bf16.mxu1 %v13901_v34  ;;  %v13903_v13 = vld [vmem:[%s19790_s0 + $0x284] ss:$24 sps:$4 sm:$0xff]   ;;  %v13914_v50 = vld [vmem:[%s19790_s0 + $0x370] ss:$24 sps:$4 sm:$0xff]   ;;  %v13917_v40 = vld [vmem:[%s19790_s0 + $0x3d4] ss:$24 sps:$4 sm:$0xff]  }
 0x3f7   : > { %v17704_v47 = vpack.c.bf16 %v6393_v10, %v6389_v14  ;;  %8185 = vmatprep.mubr.bf16.mxu0 %v17692_v9  ;;  %v13918_v57 = vld [vmem:[%s19790_s0 + $0x3d0] ss:$24 sps:$4 sm:$0xff]   ;;  %v13919_v42 = vld [vmem:[%s19790_s0 + $0x404] ss:$24 sps:$4 sm:$0xff]   ;;  %v13920_v28 = vld [vmem:[%s19790_s0 + $0x400] ss:$24 sps:$4 sm:$0xff]  }
 0x3f8   : > { %v17710_v33 = vpack.c.bf16 %v6394_v27, %v6390_v51  ;;  %8237 = vmatpush1.bf16.msra.mxu0 %v13259_v52  ;;  %v13921_v56 = vld [vmem:[%s19790_s0 + $0x434] ss:$24 sps:$4 sm:$0xff]   ;;  %v13922_v44 = vld [vmem:[%s19790_s0 + $0x430] ss:$24 sps:$4 sm:$0xff]   ;;  %v13923_v55 = vld [vmem:[%s19790_s0 + $0x464] ss:$24 sps:$4 sm:$0xff]  }
 0x3f9   : > { %20214 = vst [vmem:[#allocation38_spill] sm:$0xff] %v17704_v47  ;;  %9025 = vmatprep.subr.bf16.mxu0 %v13264_v7  ;;  %v13924_v20 = vld [vmem:[%s19790_s0 + $0x460] ss:$24 sps:$4 sm:$0xff]   ;;  %v20218_v43 = vld [vmem:[#allocation67_spill] sm:$0xff]  ;;  %v20220_v19 = vld [vmem:[#allocation68_spill] sm:$0xff] }
 0x3fa   : > { %20215 = vst [vmem:[#allocation13_spill] sm:$0xff] %v17710_v33  ;;  %v20219_v2 = vld [vmem:[#allocation43_spill] sm:$0xff]  ;;  %v20221_v54 = vld [vmem:[#allocation36_spill] sm:$0xff]  ;;  %v13925_v37 = vld [vmem:[%s14470_s16] sm:$0xf] }
 0x3fb   : > { %v19865_v8 = vsub.s32 2, %v20221_v54  ;;  %v19864_v46 = vsub.s32 3, %v20221_v54  ;;  %v20222_v10 = vld [vmem:[#allocation44_spill] sm:$0xff]  ;;  %v20223_v27 = vld [vmem:[#allocation69_spill] sm:$0xff]  ;;  %v13307_v1 = vld [vmem:[%s14475_s28 + $0x428] ss:$24 sps:$4 sm:$0xff]  }
 0x3fd   : > { %4549 = vmatmul.mubr.bf16.gmra.mrb[144].mxu1 %v13902_v21  ;;  %v17801_v14 = vrot.slane %v13925_v37, %v19865_v8  ;;  %v17806_v51 = vrot.slane %v13925_v37, %v19864_v46 }
 0x3fe   : > { %8186 = vmatmul.mubr.bf16.gmra.mrb[184].mxu0 %v17694_v62  ;;  %4558 = vmatprep.mubr.bf16.mxu1 %v13903_v13  ;;  %v13309_v62 = vld [vmem:[%s14475_s28 + $0x42c] ss:$24 sps:$4 sm:$0xff]  }
 0x3ff   : > { %8195 = vmatprep.mubr.bf16.mxu0 %v17710_v33 }
 0x405   : > { %4559 = vmatmul.mubr.bf16.gmra.mrb[148].mxu1 %v13904_v0 }
 0x406   : > { %8196 = vmatmul.mubr.bf16.gmra.mrb[188].mxu0 %v17704_v47  ;;  %4568 = vmatprep.mubr.bf16.mxu1 %v13905_v30 }
 0x40d   : > { %4569 = vmatmul.mubr.bf16.gmra.mrb[152].mxu1 %v13906_v3 }
 0x40e   : > { %4578 = vmatprep.mubr.bf16.mxu1 %v13907_v63 }
 0x415   : > { %4579 = vmatmul.mubr.bf16.gmra.mrb[156].mxu1 %v13908_v59  ;;  %v20224_v59 = vld [vmem:[#allocation70_spill] sm:$0xff] }
 0x416   : > { %4588 = vmatprep.mubr.bf16.mxu1 %v13909_v39 }
 0x41d   : > { %4589 = vmatmul.mubr.bf16.gmra.mrb[160].mxu1 %v13910_v22 }
 0x41e   : > { %4598 = vmatprep.mubr.bf16.mxu1 %v13911_v58  ;;  %v20225_v58 = vld [vmem:[#allocation71_spill] sm:$0xff] }
 0x425   : > { %4599 = vmatmul.mubr.bf16.gmra.mrb[164].mxu1 %v13912_v48 }
 0x426   : > { %4608 = vmatprep.mubr.bf16.mxu1 %v13913_v16 }
 0x42d   : > { %4609 = vmatmul.mubr.bf16.gmra.mrb[168].mxu1 %v13914_v50 }
 0x42e   : > { %4618 = vmatprep.mubr.bf16.mxu1 %v13915_v15 }
 0x435   : > { %4619 = vmatmul.mubr.bf16.gmra.mrb[172].mxu1 %v13916_v11 }
 0x436   : > { %4628 = vmatprep.mubr.bf16.mxu1 %v13917_v40 }
 0x43d   : > { %4629 = vmatmul.mubr.bf16.gmra.mrb[176].mxu1 %v13918_v57 }
 0x43e   : > { %4638 = vmatprep.mubr.bf16.mxu1 %v13919_v42 }
 0x445   : > { %4639 = vmatmul.mubr.bf16.gmra.mrb[180].mxu1 %v13920_v28 }
 0x446   : > { %4648 = vmatprep.mubr.bf16.mxu1 %v13921_v56 }
 0x44d   : > { %4649 = vmatmul.mubr.bf16.gmra.mrb[184].mxu1 %v13922_v44 }
 0x44e   : > { %4658 = vmatprep.mubr.bf16.mxu1 %v13923_v55 }
 0x455   : > { %4659 = vmatmul.mubr.bf16.gmra.mrb[188].mxu1 %v13924_v20 }
 0x456   : > { %8511 = vmatprep.mubr.bf16.mxu1 %v20216_v36  ;;  %v20233_v36 = vld [vmem:[#allocation9_spill] sm:$0xff] }
 0x45d   : > { %8512 = vmatmul.mubr.bf16.vlgmr.msra.gmra.mrb[192].mxu1 %v20217_v25 }
 0x45e   : > { %8521 = vmatprep.mubr.bf16.mxu1 %v20218_v43  ;;  %v13298_v43 = vld [vmem:[%s14475_s28 + $0x3c8] ss:$24 sps:$4 sm:$0xff]  }
 0x465   : > { %8522 = vmatmul.mubr.bf16.gmra.mrb[196].mxu1 %v20219_v2 }
 0x466   : > { %8531 = vmatprep.mubr.bf16.mxu1 %v20220_v19 }
 0x46d   : > { %8532 = vmatmul.mubr.bf16.gmra.mrb[200].mxu1 %v20222_v10 }
 0x46e   : > { %8541 = vmatprep.mubr.bf16.mxu1 %v20223_v27 }
 0x470   : > { %v4430_v53 = vpop.f32.mrb[96].mxu1 }
 0x471   : > { %v17810_v34 = vadd.f32 %v4430_v53, %v17801_v14  ;;  %v4432_v21 = vpop.f32.mrb[97].mxu1 }
 0x472   : > { %v17813_v13 = vadd.f32 %v4432_v21, %v17806_v51  ;;  %v4434_v0 = vpop.f32.mrb[98].mxu1 }
 0x473   : > { %v4671_v30 = vmul.f32 %v17810_v34, %v17810_v34  ;;  %v17818_v31 = vadd.f32 %v4434_v0, %v17801_v14  ;;  %v4436_v41 = vpop.f32.mrb[99].mxu1 }
 0x474   : > { %v4672_v3 = vmul.f32 %v17813_v13, %v17813_v13  ;;  %v17823_v63 = vadd.f32 %v4436_v41, %v17806_v51 }
 0x475   : > { %v4863_v5 = vmul.f32 %v17810_v34, %v4671_v30  ;;  %v4675_v4 = vmul.f32 %v17818_v31, %v17818_v31  ;;  %8542 = vmatmul.mubr.bf16.gmra.mrb[204].mxu1 %v20224_v59 }
 0x476   : > { %v4864_v52 = vmul.f32 %v17813_v13, %v4672_v3  ;;  %v4676_v49 = vmul.f32 %v17823_v63, %v17823_v63  ;;  %8551 = vmatprep.mubr.bf16.mxu1 %v20225_v58 }
 0x477   : > { %v5055_v39 = vmul.f32 0.044715, %v4863_v5  ;;  %v4867_v22 = vmul.f32 %v17818_v31, %v4675_v4 }
 0x478   : > { %v5056_v7 = vmul.f32 0.044715, %v4864_v52  ;;  %v4868_v48 = vmul.f32 %v17823_v63, %v4676_v49  ;;  %v4440_v16 = vpop.f32.mrb[100].mxu1 }
 0x479   : > { %v5247_v50 = vadd.f32 %v17810_v34, %v5055_v39  ;;  %v5059_v15 = vmul.f32 0.044715, %v4867_v22  ;;  %v17837_v11 = vadd.f32 %v4440_v16, %v17801_v14  ;;  %v4442_v40 = vpop.f32.mrb[101].mxu1  ;;  %v20226_v39 = vld [vmem:[#allocation45_spill] sm:$0xff]  ;;  %v13283_v16 = vld [vmem:[%s14475_s28 + $0x308] ss:$24 sps:$4 sm:$0xff]  }
 0x47a   : > { %v5248_v57 = vadd.f32 %v17813_v13, %v5056_v7  ;;  %v5060_v42 = vmul.f32 0.044715, %v4868_v48  ;;  %v17841_v28 = vadd.f32 %v4442_v40, %v17806_v51  ;;  %v4444_v56 = vpop.f32.mrb[102].mxu1  ;;  %v20227_v48 = vld [vmem:[#allocation46_spill] sm:$0xff] }
 0x47b   : > { %v5439_v44 = vmul.f32 0.7978846, %v5247_v50  ;;  %v5251_v55 = vadd.f32 %v17818_v31, %v5059_v15  ;;  %v4679_v20 = vmul.f32 %v17837_v11, %v17837_v11  ;;  %v17847_v54 = vadd.f32 %v4444_v56, %v17801_v14  ;;  %v4446_v37 = vpop.f32.mrb[103].mxu1  ;;  %v13285_v50 = vld [vmem:[%s14475_s28 + $0x30c] ss:$24 sps:$4 sm:$0xff]  }
 0x47c   : > { %v5440_v53 = vmul.f32 0.7978846, %v5248_v57  ;;  %v5252_v21 = vadd.f32 %v17823_v63, %v5060_v42  ;;  %v4680_v0 = vmul.f32 %v17841_v28, %v17841_v28  ;;  %v17853_v30 = vadd.f32 %v4446_v37, %v17806_v51  ;;  %8752 = vmatprep.subr.bf16.mxu1 %v13285_v50 }
 0x47d   : > { %13598 = vtanh.f32 %v5439_v44  ;;  %v5443_v41 = vmul.f32 0.7978846, %v5251_v55  ;;  %v4871_v3 = vmul.f32 %v17837_v11, %v4679_v20  ;;  %v4683_v5 = vmul.f32 %v17847_v54, %v17847_v54  ;;  %8552 = vmatmul.mubr.bf16.gmra.mrb[208].mxu1 %v20226_v39 }
 0x47e   : > { %13600 = vtanh.f32 %v5440_v53  ;;  %v5444_v4 = vmul.f32 0.7978846, %v5252_v21  ;;  %v4872_v52 = vmul.f32 %v17841_v28, %v4680_v0  ;;  %v4684_v49 = vmul.f32 %v17853_v30, %v17853_v30  ;;  %8561 = vmatprep.mubr.bf16.mxu1 %v20227_v48  ;;  %8753 = vmatpush1.bf16.msra.mxu1 %v13283_v16 }
 0x47f   : > { %13602 = vtanh.f32 %v5443_v41  ;;  %v5063_v22 = vmul.f32 0.044715, %v4871_v3  ;;  %v4875_v7 = vmul.f32 %v17847_v54, %v4683_v5 }
 0x480   : > { %v5064_v15 = vmul.f32 0.044715, %v4872_v52  ;;  %v4876_v40 = vmul.f32 %v17853_v30, %v4684_v49  ;;  %v4450_v57 = vpop.f32.mrb[104].mxu1  ;;  %13604 = vtanh.f32 %v5444_v4 }
 0x481   : > { %v5255_v42 = vadd.f32 %v17837_v11, %v5063_v22  ;;  %v5067_v56 = vmul.f32 0.044715, %v4875_v7  ;;  %v17869_v44 = vadd.f32 %v4450_v57, %v17801_v14  ;;  %v4452_v55 = vpop.f32.mrb[105].mxu1 }
 0x482   : > { %v5256_v20 = vadd.f32 %v17841_v28, %v5064_v15  ;;  %v5068_v37 = vmul.f32 0.044715, %v4876_v40  ;;  %v17873_v53 = vadd.f32 %v4452_v55, %v17806_v51  ;;  %v4454_v21 = vpop.f32.mrb[106].mxu1 }
 0x483   : > { %v5447_v0 = vmul.f32 0.7978846, %v5255_v42  ;;  %v5259_v41 = vadd.f32 %v17847_v54, %v5067_v56  ;;  %v4687_v3 = vmul.f32 %v17869_v44, %v17869_v44  ;;  %v17879_v5 = vadd.f32 %v4454_v21, %v17801_v14  ;;  %v4456_v52 = vpop.f32.mrb[107].mxu1  ;;  %v20228_v56 = vld [vmem:[#allocation48_spill] sm:$0xff]  ;;  %v20229_v21 = vld [vmem:[#allocation6_spill] sm:$0xff] }
 0x484   : > { %v5448_v49 = vmul.f32 0.7978846, %v5256_v20  ;;  %v5260_v4 = vadd.f32 %v17853_v30, %v5068_v37  ;;  %v4688_v22 = vmul.f32 %v17873_v53, %v17873_v53  ;;  %v17885_v7 = vadd.f32 %v4456_v52, %v17806_v51 }
 0x485   : > { %13606 = vtanh.f32 %v5447_v0  ;;  %v5451_v16 = vmul.f32 0.7978846, %v5259_v41  ;;  %v4879_v50 = vmul.f32 %v17869_v44, %v4687_v3  ;;  %v4691_v15 = vmul.f32 %v17879_v5, %v17879_v5  ;;  %8562 = vmatmul.mubr.bf16.gmra.mrb[212].mxu1 %v20228_v56  ;;  %v13286_v0 = vld [vmem:[%s14475_s28 + $0x338] ss:$24 sps:$4 sm:$0xff]   ;;  %v13288_v41 = vld [vmem:[%s14475_s28 + $0x33c] ss:$24 sps:$4 sm:$0xff]  }
 0x486   : > { %13608 = vtanh.f32 %v5448_v49  ;;  %v5452_v40 = vmul.f32 0.7978846, %v5260_v4  ;;  %v4880_v57 = vmul.f32 %v17873_v53, %v4688_v22  ;;  %v4692_v42 = vmul.f32 %v17885_v7, %v17885_v7  ;;  %8571 = vmatprep.mubr.bf16.mxu1 %v20229_v21  ;;  %8754 = vmatprep.subr.bf16.mxu1 %v13288_v41  ;;  %v13289_v21 = vld [vmem:[%s14475_s28 + $0x368] ss:$24 sps:$4 sm:$0xff]  }
 0x487   : > { %v13599_v55 = vpop.eup %13598  ;;  %13610 = vtanh.f32 %v5451_v16  ;;  %v5071_v20 = vmul.f32 0.044715, %v4879_v50  ;;  %v4883_v37 = vmul.f32 %v17879_v5, %v4691_v15  ;;  %8755 = vmatpush1.bf16.msra.mxu1 %v13286_v0 }
 0x488   : > { %v13601_v3 = vpop.eup %13600  ;;  %v5823_v52 = vadd.f32 1.0, %v13599_v55  ;;  %13612 = vtanh.f32 %v5452_v40  ;;  %v5072_v49 = vmul.f32 0.044715, %v4880_v57  ;;  %v4884_v4 = vmul.f32 %v17885_v7, %v4692_v42  ;;  %v4460_v22 = vpop.f32.mrb[108].mxu1 }
 0x489   : > { %v13603_v46 = vpop.eup %13602  ;;  %v5263_v8 = vadd.f32 %v17869_v44, %v5071_v20  ;;  %v5075_v56 = vmul.f32 0.044715, %v4883_v37  ;;  %v17901_v16 = vadd.f32 %v4460_v22, %v17801_v14  ;;  %v4462_v50 = vpop.f32.mrb[109].mxu1  ;;  %v5824_v15 = vadd.f32 1.0, %v13601_v3  ;;  %v13291_v3 = vld [vmem:[%s14475_s28 + $0x36c] ss:$24 sps:$4 sm:$0xff]  }
 0x48a   : > { %v6015_v48 = vmul.f32 0.5, %v5823_v52  ;;  %v5827_v39 = vadd.f32 1.0, %v13603_v46  ;;  %v5264_v40 = vadd.f32 %v17873_v53, %v5072_v49  ;;  %v5076_v57 = vmul.f32 0.044715, %v4884_v4  ;;  %v4464_v55 = vpop.f32.mrb[110].mxu1  ;;  %v13605_v41 = vpop.eup %13604  ;;  %8756 = vmatprep.subr.bf16.mxu1 %v13291_v3 }
 0x48b   : > { %v5455_v42 = vmul.f32 0.7978846, %v5263_v8  ;;  %v5267_v58 = vadd.f32 %v17879_v5, %v5075_v56  ;;  %v4695_v20 = vmul.f32 %v17901_v16, %v17901_v16  ;;  %v17909_v37 = vadd.f32 %v4462_v50, %v17806_v51  ;;  %v4466_v22 = vpop.f32.mrb[111].mxu1  ;;  %8757 = vmatpush1.bf16.msra.mxu1 %v13289_v21 }
 0x48c   : > { %v6207_v52 = vmul.f32 %v17810_v34, %v6015_v48  ;;  %v6019_v46 = vmul.f32 0.5, %v5827_v39  ;;  %v5456_v59 = vmul.f32 0.7978846, %v5264_v40  ;;  %v5268_v49 = vadd.f32 %v17885_v7, %v5076_v57  ;;  %v20230_v34 = vld [vmem:[#allocation7_spill] sm:$0xff] }
 0x48d   : > { %13614 = vtanh.f32 %v5455_v42  ;;  %v5459_v0 = vmul.f32 0.7978846, %v5267_v58  ;;  %v4887_v8 = vmul.f32 %v17901_v16, %v4695_v20  ;;  %v4696_v56 = vmul.f32 %v17909_v37, %v17909_v37  ;;  %8572 = vmatmul.mubr.bf16.gmra.mrb[216].mxu1 %v20230_v34  ;;  %v20231_v57 = vld [vmem:[#allocation51_spill] sm:$0xff] }
 0x48e   : > { %v6211_v4 = vmul.f32 %v17818_v31, %v6019_v46  ;;  %13616 = vtanh.f32 %v5456_v59  ;;  %v5460_v50 = vmul.f32 0.7978846, %v5268_v49  ;;  %v17919_v27 = vadd.f32 %v4464_v55, %v17801_v14  ;;  %8581 = vmatprep.mubr.bf16.mxu1 %v20231_v57 }
 0x48f   : > { %v17922_v39 = vpop.eup %13606  ;;  %13618 = vtanh.f32 %v5459_v0  ;;  %v5079_v48 = vmul.f32 0.044715, %v4887_v8  ;;  %v4888_v58 = vmul.f32 %v17909_v37, %v4696_v56  ;;  %v17926_v40 = vadd.f32 %v4466_v22, %v17806_v51  ;;  %v13295_v0 = vld [vmem:[%s14475_s28 + $0x398] ss:$24 sps:$4 sm:$0xff]  }
 0x490   : > { %v13609_v31 = vpop.eup %13608  ;;  %v17929_v59 = vpack.c.bf16 %v6211_v4, %v6207_v52  ;;  %13620 = vtanh.f32 %v5460_v50  ;;  %v4699_v55 = vmul.f32 %v17919_v27, %v17919_v27  ;;  %v4470_v42 = vpop.f32.mrb[112].mxu1  ;;  %v5828_v20 = vadd.f32 1.0, %v13605_v41 }
 0x491   : > { %v17933_v3 = vpop.eup %13610  ;;  %v5271_v46 = vadd.f32 %v17901_v16, %v5079_v48  ;;  %v5080_v49 = vmul.f32 0.044715, %v4888_v58  ;;  %v4700_v22 = vmul.f32 %v17926_v40, %v17926_v40  ;;  %v17939_v21 = vadd.f32 %v4470_v42, %v17801_v14  ;;  %v4472_v52 = vpop.f32.mrb[113].mxu1  ;;  %v13297_v58 = vld [vmem:[%s14475_s28 + $0x39c] ss:$24 sps:$4 sm:$0xff]  }
 0x492   : > { %20232 = vst [vmem:[#allocation39_spill] sm:$0xff] %v17929_v59  ;;  %v17942_v8 = vpop.eup %13612  ;;  %v4891_v56 = vmul.f32 %v17919_v27, %v4699_v55  ;;  %v17946_v41 = vadd.f32 %v4472_v52, %v17806_v51  ;;  %v4474_v4 = vpop.f32.mrb[114].mxu1  ;;  %v6016_v50 = vmul.f32 0.5, %v5824_v15  ;;  %v6020_v48 = vmul.f32 0.5, %v5828_v20  ;;  %8758 = vmatprep.subr.bf16.mxu1 %v13297_v58  ;;  %v13300_v20 = vld [vmem:[%s14475_s28 + $0x3cc] ss:$24 sps:$4 sm:$0xff]  }
 0x493   : > { %v5463_v57 = vmul.f32 0.7978846, %v5271_v46  ;;  %v5272_v34 = vadd.f32 %v17909_v37, %v5080_v49  ;;  %v4892_v42 = vmul.f32 %v17926_v40, %v4700_v22  ;;  %v4703_v10 = vmul.f32 %v17939_v21, %v17939_v21  ;;  %v4476_v19 = vpop.f32.mrb[115].mxu1  ;;  %8759 = vmatpush1.bf16.msra.mxu1 %v13295_v0  ;;  %v20234_v0 = vld [vmem:[#allocation8_spill] sm:$0xff] }
 0x494   : > { %v5083_v2 = vmul.f32 0.044715, %v4891_v56  ;;  %v4704_v55 = vmul.f32 %v17946_v41, %v17946_v41  ;;  %v17956_v52 = vadd.f32 %v4474_v4, %v17801_v14  ;;  %v17959_v15 = vadd.f32 %v4476_v19, %v17806_v51  ;;  %8760 = vmatprep.subr.bf16.mxu1 %v13300_v20 }
 0x495   : > { %13622 = vtanh.f32 %v5463_v57  ;;  %v5464_v46 = vmul.f32 0.7978846, %v5272_v34  ;;  %v5084_v49 = vmul.f32 0.044715, %v4892_v42  ;;  %v4895_v22 = vmul.f32 %v17939_v21, %v4703_v10  ;;  %8582 = vmatmul.mubr.bf16.gmra.mrb[220].mxu1 %v20233_v36 }
 0x496   : > { %v5275_v56 = vadd.f32 %v17919_v27, %v5083_v2  ;;  %v4896_v25 = vmul.f32 %v17946_v41, %v4704_v55  ;;  %v4707_v4 = vmul.f32 %v17956_v52, %v17956_v52  ;;  %v4708_v19 = vmul.f32 %v17959_v15, %v17959_v15  ;;  %8591 = vmatprep.mubr.bf16.mxu1 %v20234_v0 }
 0x497   : > { %v17971_v58 = vpop.eup %13614  ;;  %13624 = vtanh.f32 %v5464_v46  ;;  %v5276_v34 = vadd.f32 %v17926_v40, %v5084_v49  ;;  %v5087_v10 = vmul.f32 0.044715, %v4895_v22  ;;  %v6208_v57 = vmul.f32 %v17813_v13, %v6016_v50  ;;  %8761 = vmatpush1.bf16.msra.mxu1 %v13298_v43 }
 0x498   : > { %v17976_v2 = vpop.eup %13616  ;;  %v5467_v42 = vmul.f32 0.7978846, %v5275_v56  ;;  %v5088_v55 = vmul.f32 0.044715, %v4896_v25  ;;  %v4899_v47 = vmul.f32 %v17956_v52, %v4707_v4  ;;  %v4900_v33 = vmul.f32 %v17959_v15, %v4708_v19  ;;  %v4480_v13 = vpop.f32.mrb[116].mxu1 }
 0x499   : > { %v17980_v36 = vpop.eup %13618  ;;  %v5468_v46 = vmul.f32 0.7978846, %v5276_v34  ;;  %v5279_v49 = vadd.f32 %v17939_v21, %v5087_v10  ;;  %v6212_v22 = vmul.f32 %v17823_v63, %v6020_v48  ;;  %v5832_v50 = vadd.f32 1.0, %v13609_v31  ;;  %v4482_v19 = vpop.f32.mrb[117].mxu1  ;;  %v13262_v10 = vld [vmem:[%s14475_s28 + $0x10] ss:$24 sps:$4 sm:$0xff]  }
 0x49a   : > { %v17984_v20 = vpop.eup %13620  ;;  %13626 = vtanh.f32 %v5467_v42  ;;  %v5280_v25 = vadd.f32 %v17946_v41, %v5088_v55  ;;  %v5091_v56 = vmul.f32 0.044715, %v4899_v47  ;;  %v5092_v4 = vmul.f32 0.044715, %v4900_v33  ;;  %v4484_v43 = vpop.f32.mrb[118].mxu1 }
 0x49b   : > { %13628 = vtanh.f32 %v5468_v46  ;;  %v5471_v0 = vmul.f32 0.7978846, %v5279_v49  ;;  %v17987_v34 = vpack.c.bf16 %v6212_v22, %v6208_v57  ;;  %v17991_v63 = vadd.f32 %v4480_v13, %v17801_v14  ;;  %v4486_v33 = vpop.f32.mrb[119].mxu1  ;;  %v13267_v55 = vld [vmem:[%s14475_s28 + $0x44] ss:$24 sps:$4 sm:$0xff]  }
 0x49c   : > { %v5472_v31 = vmul.f32 0.7978846, %v5280_v25  ;;  %v5283_v48 = vadd.f32 %v17956_v52, %v5091_v56  ;;  %v5284_v42 = vadd.f32 %v17959_v15, %v5092_v4  ;;  %v17996_v47 = vadd.f32 %v4482_v19, %v17806_v51  ;;  %v13301_v22 = vld [vmem:[%s14475_s28 + $0x3f8] ss:$24 sps:$4 sm:$0xff]   ;;  %v13303_v13 = vld [vmem:[%s14475_s28 + $0x3fc] ss:$24 sps:$4 sm:$0xff]  }
 0x49d   : > { %20235 = vst [vmem:[#allocation57_spill] sm:$0xff] %v17987_v34  ;;  %13630 = vtanh.f32 %v5471_v0  ;;  %8238 = vmatprep.mubr.bf16.mxu0 %v17987_v34  ;;  %v4711_v57 = vmul.f32 %v17991_v63, %v17991_v63  ;;  %v18003_v46 = vadd.f32 %v4484_v43, %v17801_v14  ;;  %v18006_v49 = vadd.f32 %v4486_v33, %v17806_v51  ;;  %v20236_v4 = vld [vmem:[#allocation52_spill] sm:$0xff] }
 0x49e   : > { %13632 = vtanh.f32 %v5472_v31  ;;  %v5475_v25 = vmul.f32 0.7978846, %v5283_v48  ;;  %v5476_v56 = vmul.f32 0.7978846, %v5284_v42  ;;  %8239 = vmatmul.mubr.bf16.vlgmr.msra.gmra.mrb[96].mxu0 %v17929_v59  ;;  %v4712_v0 = vmul.f32 %v17996_v47, %v17996_v47  ;;  %8592 = vmatmul.mubr.bf16.gmra.mrb[224].mxu1 %v20236_v4  ;;  %v20237_v42 = vld [vmem:[#allocation53_spill] sm:$0xff] }
 0x49f   : > { %v18014_v19 = vpop.eup %13622  ;;  %9026 = vmatpush1.bf16.msra.mxu0 %v13262_v10  ;;  %v4903_v43 = vmul.f32 %v17991_v63, %v4711_v57  ;;  %v4715_v33 = vmul.f32 %v18003_v46, %v18003_v46  ;;  %v4716_v31 = vmul.f32 %v18006_v49, %v18006_v49  ;;  %v5836_v48 = vadd.f32 1.0, %v17942_v8  ;;  %8601 = vmatprep.mubr.bf16.mxu1 %v20237_v42  ;;  %v13265_v59 = vld [vmem:[%s14475_s28 + $0x40] ss:$24 sps:$4 sm:$0xff]   ;;  %v13270_v57 = vld [vmem:[%s14475_s28 + $0x74] ss:$24 sps:$4 sm:$0xff]  }
 0x4a0   : > { %13634 = vtanh.f32 %v5475_v25  ;;  %v4904_v4 = vmul.f32 %v17996_v47, %v4712_v0  ;;  %v6024_v34 = vmul.f32 0.5, %v5832_v50  ;;  %v5831_v10 = vadd.f32 1.0, %v17922_v39  ;;  %9027 = vmatprep.subr.bf16.mxu0 %v13267_v55  ;;  %8762 = vmatprep.subr.bf16.mxu1 %v13303_v13  ;;  %v4490_v18 = vpop.f32.mrb[120].mxu1  ;;  %v13268_v25 = vld [vmem:[%s14475_s28 + $0x70] ss:$24 sps:$4 sm:$0xff]  }
 0x4a1   : > { %v18028_v9 = vpop.eup %13624  ;;  %13636 = vtanh.f32 %v5476_v56  ;;  %v5095_v29 = vmul.f32 0.044715, %v4903_v43  ;;  %v4907_v8 = vmul.f32 %v18003_v46, %v4715_v33  ;;  %v4908_v42 = vmul.f32 %v18006_v49, %v4716_v31  ;;  %8763 = vmatpush1.bf16.msra.mxu1 %v13301_v22  ;;  %v4492_v13 = vpop.f32.mrb[121].mxu1 }
 0x4a2   : > { %v5096_v0 = vmul.f32 0.044715, %v4904_v4  ;;  %v6028_v50 = vmul.f32 0.5, %v5836_v48  ;;  %v6216_v39 = vmul.f32 %v17841_v28, %v6024_v34  ;;  %v5835_v55 = vadd.f32 1.0, %v17933_v3  ;;  %8764 = vmatprep.subr.bf16.mxu1 %v13309_v62  ;;  %v4494_v31 = vpop.f32.mrb[122].mxu1 }
 0x4a3   : > { %v5287_v56 = vadd.f32 %v17991_v63, %v5095_v29  ;;  %v5099_v43 = vmul.f32 0.044715, %v4907_v8  ;;  %v5100_v26 = vmul.f32 0.044715, %v4908_v42  ;;  %v6023_v33 = vmul.f32 0.5, %v5831_v10  ;;  %9028 = vmatpush1.bf16.msra.mxu0 %v13265_v59  ;;  %v4496_v62 = vpop.f32.mrb[123].mxu1 }
 0x4a4   : > { %v18037_v60 = vpop.eup %13626  ;;  %v5288_v22 = vadd.f32 %v17996_v47, %v5096_v0  ;;  %v6220_v4 = vmul.f32 %v17853_v30, %v6028_v50  ;;  %v6027_v48 = vmul.f32 0.5, %v5835_v55  ;;  %v18042_v28 = vadd.f32 %v4490_v18, %v17801_v14  ;;  %9029 = vmatprep.subr.bf16.mxu0 %v13270_v57  ;;  %v13273_v29 = vld [vmem:[%s14475_s28 + $0xa4] ss:$24 sps:$4 sm:$0xff]   ;;  %v13310_v50 = vld [vmem:[%s14475_s28 + $0x458] ss:$24 sps:$4 sm:$0xff]  }
 0x4a5   : > { %v18045_v3 = vpop.eup %13628  ;;  %v5479_v34 = vmul.f32 0.7978846, %v5287_v56  ;;  %v5291_v59 = vadd.f32 %v18003_v46, %v5099_v43  ;;  %v5292_v42 = vadd.f32 %v18006_v49, %v5100_v26  ;;  %v6215_v10 = vmul.f32 %v17837_v11, %v6023_v33  ;;  %8765 = vmatpush1.bf16.msra.mxu1 %v13307_v1  ;;  %v20239_v0 = vld [vmem:[#allocation10_spill] sm:$0xff]  ;;  %v13312_v55 = vld [vmem:[%s14475_s28 + $0x45c] ss:$24 sps:$4 sm:$0xff]  }
 0x4a6   : > { %v5480_v30 = vmul.f32 0.7978846, %v5288_v22  ;;  %v18050_v8 = vpack.c.bf16 %v6220_v4, %v6216_v39  ;;  %v6219_v18 = vmul.f32 %v17847_v54, %v6027_v48  ;;  %v4719_v57 = vmul.f32 %v18042_v28, %v18042_v28  ;;  %8602 = vmatmul.mubr.bf16.gmra.mrb[228].mxu1 %v20239_v0  ;;  %v20240_v39 = vld [vmem:[#allocation11_spill] sm:$0xff]  ;;  %v13271_v54 = vld [vmem:[%s14475_s28 + $0xa0] ss:$24 sps:$4 sm:$0xff]   ;;  %8766 = vmatprep.subr.bf16.mxu1 %v13312_v55 }
 0x4a7   : > { %v18058_v56 = vpop.eup %13630  ;;  %13638 = vtanh.f32 %v5479_v34  ;;  %v5483_v26 = vmul.f32 0.7978846, %v5291_v59  ;;  %v5484_v11 = vmul.f32 0.7978846, %v5292_v42  ;;  %v18061_v1 = vadd.f32 %v4492_v13, %v17806_v51  ;;  %8611 = vmatprep.mubr.bf16.mxu1 %v20240_v39  ;;  %9030 = vmatpush1.bf16.msra.mxu0 %v13268_v25  ;;  %v13276_v13 = vld [vmem:[%s14475_s28 + $0xd4] ss:$24 sps:$4 sm:$0xff]  }
 0x4a8   : > { %20238 = vst [vmem:[#allocation18_spill] sm:$0xff] %v18050_v8  ;;  %v18065_v43 = vpop.eup %13632  ;;  %13640 = vtanh.f32 %v5480_v30  ;;  %8248 = vmatprep.mubr.bf16.mxu0 %v18050_v8  ;;  %v18068_v33 = vpack.c.bf16 %v6219_v18, %v6215_v10  ;;  %v4911_v22 = vmul.f32 %v18042_v28, %v4719_v57  ;;  %v18072_v4 = vadd.f32 %v4494_v31, %v17801_v14  ;;  %v13315_v48 = vld [vmem:[%s14475_s28 + $0x48c] ss:$24 sps:$4 sm:$0xff]   ;;  %v4500_v42 = vpop.f32.mrb[124].mxu1  ;;  %v13274_v57 = vld [vmem:[%s14475_s28 + $0xd0] ss:$24 sps:$4 sm:$0xff]  }
 0x4a9   : > { %9031 = vmatprep.subr.bf16.mxu0 %v13273_v29  ;;  %13642 = vtanh.f32 %v5483_v26  ;;  %v4720_v25 = vmul.f32 %v18061_v1, %v18061_v1  ;;  %v18079_v34 = vadd.f32 %v4496_v62, %v17806_v51  ;;  %v5840_v59 = vadd.f32 1.0, %v17976_v2  ;;  %v4502_v18 = vpop.f32.mrb[125].mxu1  ;;  %8767 = vmatpush1.bf16.msra.mxu1 %v13310_v50  ;;  %v13279_v39 = vld [vmem:[%s14475_s28 + $0x104] ss:$24 sps:$4 sm:$0xff]  }
 0x4aa   : > { %20241 = vst [vmem:[#allocation58_spill] sm:$0xff] %v18068_v33  ;;  %20242 = vst [vmem:[#allocation19_spill] sm:$0xff] %v18072_v4  ;;  %v18082_v10 = vpop.eup %13634  ;;  %13644 = vtanh.f32 %v5484_v11  ;;  %8249 = vmatmul.mubr.bf16.gmra.mrb[100].mxu0 %v18068_v33  ;;  %v5103_v31 = vmul.f32 0.044715, %v4911_v22  ;;  %v4723_v29 = vmul.f32 %v18072_v4, %v18072_v4  ;;  %v5844_v30 = vadd.f32 1.0, %v17984_v20  ;;  %v4504_v22 = vpop.f32.mrb[126].mxu1  ;;  %8768 = vmatprep.subr.bf16.mxu1 %v13315_v48 }
 0x4ab   : > { %v18089_v62 = vpop.eup %13636  ;;  %v4912_v2 = vmul.f32 %v18061_v1, %v4720_v25  ;;  %v4724_v55 = vmul.f32 %v18079_v34, %v18079_v34  ;;  %v6032_v26 = vmul.f32 0.5, %v5840_v59  ;;  %v5839_v11 = vadd.f32 1.0, %v17971_v58  ;;  %9032 = vmatpush1.bf16.msra.mxu0 %v13271_v54  ;;  %v4506_v8 = vpop.f32.mrb[127].mxu1  ;;  %v13313_v25 = vld [vmem:[%s14475_s28 + $0x488] ss:$24 sps:$4 sm:$0xff]  }
 0x4ac   : > { %v5295_v20 = vadd.f32 %v18042_v28, %v5103_v31  ;;  %v4915_v0 = vmul.f32 %v18072_v4, %v4723_v29  ;;  %v6036_v50 = vmul.f32 0.5, %v5844_v30  ;;  %v5843_v33 = vadd.f32 1.0, %v17980_v36  ;;  %9033 = vmatprep.subr.bf16.mxu0 %v13276_v13  ;;  %v20243_v29 = vld [vmem:[#allocation12_spill] sm:$0xff] }
 0x4ad   : > { %v5104_v12 = vmul.f32 0.044715, %v4912_v2  ;;  %v4916_v59 = vmul.f32 %v18079_v34, %v4724_v55  ;;  %v6224_v58 = vmul.f32 %v17873_v53, %v6032_v26  ;;  %v6031_v23 = vmul.f32 0.5, %v5839_v11  ;;  %v20244_v55 = vld [vmem:[#allocation14_spill] sm:$0xff]  ;;  %8769 = vmatpush1.bf16.msra.mxu1 %v13313_v25 }
 0x4ae   : > { %v5487_v54 = vmul.f32 0.7978846, %v5295_v20  ;;  %v5107_v24 = vmul.f32 0.044715, %v4915_v0  ;;  %v6228_v48 = vmul.f32 %v17885_v7, %v6036_v50  ;;  %v6035_v31 = vmul.f32 0.5, %v5843_v33  ;;  %8612 = vmatmul.mubr.bf16.gmra.mrb[232].mxu1 %v20243_v29 }
 0x4af   : > { %v5296_v36 = vadd.f32 %v18061_v1, %v5104_v12  ;;  %v5108_v30 = vmul.f32 0.044715, %v4916_v59  ;;  %v6223_v13 = vmul.f32 %v17869_v44, %v6031_v23  ;;  %v18107_v2 = vadd.f32 %v4500_v42, %v17801_v14  ;;  %8621 = vmatprep.mubr.bf16.mxu1 %v20244_v55  ;;  %9034 = vmatpush1.bf16.msra.mxu0 %v13274_v57  ;;  %v13277_v53 = vld [vmem:[%s14475_s28 + $0x100] ss:$24 sps:$4 sm:$0xff]   ;;  %v13282_v12 = vld [vmem:[%s14475_s28 + $0x134] ss:$24 sps:$4 sm:$0xff]  }
 0x4b0   : > { %13646 = vtanh.f32 %v5487_v54  ;;  %v5299_v0 = vadd.f32 %v18072_v4, %v5107_v24  ;;  %v18112_v26 = vpack.c.bf16 %v6228_v48, %v6224_v58  ;;  %v6227_v7 = vmul.f32 %v17879_v5, %v6035_v31  ;;  %9035 = vmatprep.subr.bf16.mxu0 %v13279_v39  ;;  %v18124_v24 = vpop.f32.mrb[128].mxu1 }
 0x4b1   : > { %v18116_v33 = vpop.eup %13638  ;;  %v5488_v23 = vmul.f32 0.7978846, %v5296_v36  ;;  %v5300_v44 = vadd.f32 %v18079_v34, %v5108_v30  ;;  %v4727_v42 = vmul.f32 %v18107_v2, %v18107_v2  ;;  %v18122_v57 = vadd.f32 %v4502_v18, %v17806_v51  ;;  %v18137_v25 = vpop.f32.mrb[129].mxu1  ;;  %v13321_v18 = vld [vmem:[%s14475_s28 + $0x4bc] ss:$24 sps:$4 sm:$0xff]  }
 0x4b2   : > { %20245 = vst [vmem:[#allocation40_spill] sm:$0xff] %v18112_v26  ;;  %v18126_v11 = vpop.eup %13640  ;;  %v5491_v5 = vmul.f32 0.7978846, %v5299_v0  ;;  %8258 = vmatprep.mubr.bf16.mxu0 %v18112_v26  ;;  %v18129_v39 = vpack.c.bf16 %v6227_v7, %v6223_v13  ;;  %v18132_v20 = vadd.f32 %v4504_v22, %v17801_v14  ;;  %v18135_v50 = vadd.f32 %v4506_v8, %v17806_v51  ;;  %v18145_v31 = vpop.f32.mrb[130].mxu1  ;;  %v13280_v22 = vld [vmem:[%s14475_s28 + $0x130] ss:$24 sps:$4 sm:$0xff]  }
 0x4b3   : > { %v18140_v59 = vpop.eup %13642  ;;  %13648 = vtanh.f32 %v5488_v23  ;;  %v5492_v58 = vmul.f32 0.7978846, %v5300_v44  ;;  %v4919_v54 = vmul.f32 %v18107_v2, %v4727_v42  ;;  %v4728_v48 = vmul.f32 %v18122_v57, %v18122_v57  ;;  %9036 = vmatpush1.bf16.msra.mxu0 %v13277_v53  ;;  %v4516_v0 = vpop.f32.mrb[131].mxu1  ;;  %v13294_v53 = vld [vmem:[%s14475_s28 + $0x164] ss:$24 sps:$4 sm:$0xff]   ;;  %8770 = vmatprep.subr.bf16.mxu1 %v13321_v18  ;;  %v20247_v26 = vld [vmem:[#allocation15_spill] sm:$0xff] }
 0x4b4   : > { %20246 = vst [vmem:[#allocation21_spill] sm:$0xff] %v18129_v39  ;;  %v18148_v8 = vpop.eup %13644  ;;  %13650 = vtanh.f32 %v5491_v5  ;;  %8259 = vmatmul.mubr.bf16.gmra.mrb[104].mxu0 %v18129_v39  ;;  %v4731_v36 = vmul.f32 %v18132_v20, %v18132_v20  ;;  %v4732_v30 = vmul.f32 %v18135_v50, %v18135_v50  ;;  %v5848_v13 = vadd.f32 1.0, %v18028_v9  ;;  %9037 = vmatprep.subr.bf16.mxu0 %v13282_v12  ;;  %v13319_v7 = vld [vmem:[%s14475_s28 + $0x4b8] ss:$24 sps:$4 sm:$0xff]   ;;  %v13324_v5 = vld [vmem:[%s14475_s28 + $0x4ec] ss:$24 sps:$4 sm:$0xff]  }
 0x4b5   : > { %13652 = vtanh.f32 %v5492_v58  ;;  %v5111_v23 = vmul.f32 0.044715, %v4919_v54  ;;  %v4920_v44 = vmul.f32 %v18122_v57, %v4728_v48  ;;  %v5852_v42 = vadd.f32 1.0, %v18045_v3  ;;  %v13292_v12 = vld [vmem:[%s14475_s28 + $0x160] ss:$24 sps:$4 sm:$0xff]   ;;  %8771 = vmatpush1.bf16.msra.mxu1 %v13319_v7 }
 0x4b6   : > { %v4923_v55 = vmul.f32 %v18132_v20, %v4731_v36  ;;  %v4924_v29 = vmul.f32 %v18135_v50, %v4732_v30  ;;  %v6040_v9 = vmul.f32 0.5, %v5848_v13  ;;  %v5847_v39 = vadd.f32 1.0, %v18014_v19  ;;  %8622 = vmatmul.mubr.bf16.gmra.mrb[236].mxu1 %v20247_v26  ;;  %v13322_v18 = vld [vmem:[%s14475_s28 + $0x4e8] ss:$24 sps:$4 sm:$0xff]   ;;  %8772 = vmatprep.subr.bf16.mxu1 %v13324_v5 }
 0x4b7   : > { %v5303_v58 = vadd.f32 %v18107_v2, %v5111_v23  ;;  %v5112_v54 = vmul.f32 0.044715, %v4920_v44  ;;  %v6044_v48 = vmul.f32 0.5, %v5852_v42  ;;  %v5851_v3 = vadd.f32 1.0, %v18037_v60  ;;  %8631 = vmatprep.mubr.bf16.mxu1 %v20248_v38  ;;  %9038 = vmatpush1.bf16.msra.mxu0 %v13280_v22 }
 0x4b8   : > { %v5115_v36 = vmul.f32 0.044715, %v4923_v55  ;;  %v5116_v4 = vmul.f32 0.044715, %v4924_v29  ;;  %v6232_v30 = vmul.f32 %v17909_v37, %v6040_v9  ;;  %v6039_v13 = vmul.f32 0.5, %v5847_v39  ;;  %9039 = vmatprep.subr.bf16.mxu0 %v13294_v53  ;;  %v18174_v42 = vpop.f32.mrb[132].mxu1 }
 0x4b9   : > { %v5495_v19 = vmul.f32 0.7978846, %v5303_v58  ;;  %v5304_v26 = vadd.f32 %v18122_v57, %v5112_v54  ;;  %v6236_v23 = vmul.f32 %v17926_v40, %v6044_v48  ;;  %v6043_v44 = vmul.f32 0.5, %v5851_v3  ;;  %v18185_v22 = vpop.f32.mrb[133].mxu1  ;;  %8773 = vmatpush1.bf16.msra.mxu1 %v13322_v18  ;;  %v13325_v3 = vld [vmem:[%s14475_s28 + $0x518] ss:$24 sps:$4 sm:$0xff]  }
 0x4ba   : > { %v18176_v60 = vpop.eup %13646  ;;  %v5307_v55 = vadd.f32 %v18132_v20, %v5115_v36  ;;  %v5308_v29 = vadd.f32 %v18135_v50, %v5116_v4  ;;  %v6231_v37 = vmul.f32 %v17901_v16, %v6039_v13  ;;  %v18183_v39 = vadd.f32 %v18124_v24, %v17801_v14  ;;  %v18190_v5 = vpop.f32.mrb[134].mxu1  ;;  %v13304_v4 = vld [vmem:[%s14475_s28 + $0x190] ss:$24 sps:$4 sm:$0xff]   ;;  %v13327_v36 = vld [vmem:[%s14475_s28 + $0x51c] ss:$24 sps:$4 sm:$0xff]  }
 0x4bb   : > { %13654 = vtanh.f32 %v5495_v19  ;;  %v5496_v40 = vmul.f32 0.7978846, %v5304_v26  ;;  %v18187_v53 = vpack.c.bf16 %v6236_v23, %v6232_v30  ;;  %v6235_v7 = vmul.f32 %v17919_v27, %v6043_v44  ;;  %9040 = vmatpush1.bf16.msra.mxu0 %v13292_v12  ;;  %v18199_v26 = vpop.f32.mrb[135].mxu1  ;;  %v20251_v19 = vld [vmem:[#allocation20_spill] sm:$0xff]  ;;  %8774 = vmatprep.subr.bf16.mxu1 %v13327_v36 }
 0x4bc   : > { %v5499_v16 = vmul.f32 0.7978846, %v5307_v55  ;;  %v5500_v9 = vmul.f32 0.7978846, %v5308_v29  ;;  %v4735_v24 = vmul.f32 %v18183_v39, %v18183_v39  ;;  %v18197_v58 = vadd.f32 %v18137_v25, %v17806_v51  ;;  %9041 = vmatprep.subr.bf16.mxu0 %v13306_v6  ;;  %v13318_v25 = vld [vmem:[%s14475_s28 + $0x1c4] ss:$24 sps:$4 sm:$0xff]  }
 0x4bd   : > { %20249 = vst [vmem:[#allocation59_spill] sm:$0xff] %v18187_v53  ;;  %v18201_v27 = vpop.eup %13648  ;;  %13656 = vtanh.f32 %v5496_v40  ;;  %8268 = vmatprep.mubr.bf16.mxu0 %v18187_v53  ;;  %v18204_v12 = vpack.c.bf16 %v6235_v7, %v6231_v37  ;;  %v18208_v54 = vadd.f32 %v18145_v31, %v17801_v14  ;;  %v18211_v48 = vadd.f32 %v4516_v0, %v17806_v51  ;;  %v13333_v31 = vld [vmem:[%s14475_s28 + $0x54c] ss:$24 sps:$4 sm:$0xff]   ;;  %v13316_v7 = vld [vmem:[%s14475_s28 + $0x1c0] ss:$24 sps:$4 sm:$0xff]  }
 0x4be   : > { %v18216_v6 = vpop.eup %13650  ;;  %13658 = vtanh.f32 %v5499_v16  ;;  %v4927_v18 = vmul.f32 %v18183_v39, %v4735_v24  ;;  %v4736_v30 = vmul.f32 %v18197_v58, %v18197_v58  ;;  %v5856_v13 = vadd.f32 1.0, %v18065_v43  ;;  %8632 = vmatmul.mubr.bf16.gmra.mrb[240].mxu1 %v20251_v19 }
 0x4bf   : > { %20250 = vst [vmem:[#allocation47_spill] sm:$0xff] %v18204_v12  ;;  %v18224_v23 = vpop.eup %13652  ;;  %13660 = vtanh.f32 %v5500_v9  ;;  %8269 = vmatmul.mubr.bf16.gmra.mrb[108].mxu0 %v18204_v12  ;;  %v4739_v0 = vmul.f32 %v18208_v54, %v18208_v54  ;;  %v4740_v44 = vmul.f32 %v18211_v48, %v18211_v48  ;;  %v5860_v55 = vadd.f32 1.0, %v18089_v62  ;;  %8641 = vmatprep.mubr.bf16.mxu1 %v17218_v61 }
 0x4c0   : > { %v5119_v43 = vmul.f32 0.044715, %v4927_v18  ;;  %v4928_v29 = vmul.f32 %v18197_v58, %v4736_v30  ;;  %v6048_v37 = vmul.f32 0.5, %v5856_v13  ;;  %v5855_v40 = vadd.f32 1.0, %v18058_v56  ;;  %9042 = vmatpush1.bf16.msra.mxu0 %v13304_v4  ;;  %v18239_v19 = vpop.f32.mrb[136].mxu1  ;;  %8775 = vmatpush1.bf16.msra.mxu1 %v13325_v3 }
 0x4c1   : > { %v4931_v16 = vmul.f32 %v18208_v54, %v4739_v0  ;;  %v4932_v9 = vmul.f32 %v18211_v48, %v4740_v44  ;;  %v6052_v24 = vmul.f32 0.5, %v5860_v55  ;;  %v5859_v62 = vadd.f32 1.0, %v18082_v10  ;;  %9043 = vmatprep.subr.bf16.mxu0 %v13318_v25  ;;  %v13330_v18 = vld [vmem:[%s14475_s28 + $0x1f4] ss:$24 sps:$4 sm:$0xff]   ;;  %v18244_v36 = vpop.f32.mrb[137].mxu1  ;;  %8776 = vmatprep.subr.bf16.mxu1 %v13333_v31 }
 0x4c2   : > { %v5311_v30 = vadd.f32 %v18183_v39, %v5119_v43  ;;  %v5120_v13 = vmul.f32 0.044715, %v4928_v29  ;;  %v6240_v56 = vmul.f32 %v17946_v41, %v6048_v37  ;;  %v6047_v4 = vmul.f32 0.5, %v5855_v40  ;;  %v13328_v0 = vld [vmem:[%s14475_s28 + $0x1f0] ss:$24 sps:$4 sm:$0xff]   ;;  %v18248_v38 = vpop.f32.mrb[138].mxu1 }
 0x4c3   : > { %v5123_v44 = vmul.f32 0.044715, %v4931_v16  ;;  %v5124_v55 = vmul.f32 0.044715, %v4932_v9  ;;  %v6244_v10 = vmul.f32 %v17959_v15, %v6052_v24  ;;  %v6051_v61 = vmul.f32 0.5, %v5859_v62  ;;  %v18256_v29 = vpop.f32.mrb[139].mxu1 }
 0x4c4   : > { %v5503_v25 = vmul.f32 0.7978846, %v5311_v30  ;;  %v5312_v3 = vadd.f32 %v18197_v58, %v5120_v13  ;;  %v6239_v43 = vmul.f32 %v17939_v21, %v6047_v4  ;;  %v18254_v41 = vadd.f32 %v18174_v42, %v17801_v14  ;;  %9044 = vmatpush1.bf16.msra.mxu0 %v13316_v7  ;;  %v13331_v31 = vld [vmem:[%s14475_s28 + $0x548] ss:$24 sps:$4 sm:$0xff]   ;;  %v13336_v62 = vld [vmem:[%s14475_s28 + $0x57c] ss:$24 sps:$4 sm:$0xff]  }
 0x4c5   : > { %v18259_v37 = vpop.eup %13654  ;;  %v5315_v15 = vadd.f32 %v18208_v54, %v5123_v44  ;;  %v5316_v40 = vadd.f32 %v18211_v48, %v5124_v55  ;;  %v18263_v16 = vpack.c.bf16 %v6244_v10, %v6240_v56  ;;  %v6243_v9 = vmul.f32 %v17956_v52, %v6051_v61  ;;  %9045 = vmatprep.subr.bf16.mxu0 %v13330_v18  ;;  %v20253_v24 = vld [vmem:[#allocation23_spill] sm:$0xff]  ;;  %v13334_v55 = vld [vmem:[%s14475_s28 + $0x578] ss:$24 sps:$4 sm:$0xff]  }
 0x4c6   : > { %13662 = vtanh.f32 %v5503_v25  ;;  %v5504_v21 = vmul.f32 0.7978846, %v5312_v3  ;;  %v4743_v42 = vmul.f32 %v18254_v41, %v18254_v41  ;;  %v18270_v7 = vadd.f32 %v18185_v22, %v17806_v51  ;;  %8642 = vmatmul.mubr.bf16.gmra.mrb[244].mxu1 %v20253_v24 }
 0x4c7   : > { %20252 = vst [vmem:[#allocation16_spill] sm:$0xff] %v18263_v16  ;;  %v18274_v30 = vpop.eup %13656  ;;  %v5507_v13 = vmul.f32 0.7978846, %v5315_v15  ;;  %v5508_v56 = vmul.f32 0.7978846, %v5316_v40  ;;  %8278 = vmatprep.mubr.bf16.mxu0 %v18263_v16  ;;  %v18277_v61 = vpack.c.bf16 %v6243_v9, %v6239_v43  ;;  %v18281_v52 = vadd.f32 %v18190_v5, %v17801_v14  ;;  %8651 = vmatprep.mubr.bf16.mxu1 %v17301_v45 }
 0x4c8   : > { %v18284_v22 = vpop.eup %13658  ;;  %13664 = vtanh.f32 %v5504_v21  ;;  %v4935_v18 = vmul.f32 %v18254_v41, %v4743_v42  ;;  %v4744_v4 = vmul.f32 %v18270_v7, %v18270_v7  ;;  %v18291_v44 = vadd.f32 %v18199_v26, %v17806_v51  ;;  %9046 = vmatpush1.bf16.msra.mxu0 %v13328_v0  ;;  %8777 = vmatpush1.bf16.msra.mxu1 %v13331_v31  ;;  %v18301_v43 = vpop.f32.mrb[140].mxu1  ;;  %v13339_v26 = vld [vmem:[%s14475_s28 + $0x5ac] ss:$24 sps:$4 sm:$0xff]   ;;  %v13337_v45 = vld [vmem:[%s14475_s28 + $0x5a8] ss:$24 sps:$4 sm:$0xff]  }
 0x4c9   : > { %20254 = vst [vmem:[#allocation60_spill] sm:$0xff] %v18277_v61  ;;  %v18294_v5 = vpop.eup %13660  ;;  %13666 = vtanh.f32 %v5507_v13  ;;  %8279 = vmatmul.mubr.bf16.gmra.mrb[112].mxu0 %v18277_v61  ;;  %v4747_v10 = vmul.f32 %v18281_v52, %v18281_v52  ;;  %v5864_v25 = vadd.f32 1.0, %v18126_v11  ;;  %v5868_v3 = vadd.f32 1.0, %v18148_v8  ;;  %8778 = vmatprep.subr.bf16.mxu1 %v13336_v62  ;;  %v18307_v40 = vpop.f32.mrb[141].mxu1 }
 0x4ca   : > { %13668 = vtanh.f32 %v5508_v56  ;;  %v5127_v0 = vmul.f32 0.044715, %v4935_v18  ;;  %v4936_v31 = vmul.f32 %v18270_v7, %v4744_v4  ;;  %v4748_v15 = vmul.f32 %v18291_v44, %v18291_v44  ;;  %v18311_v42 = vpop.f32.mrb[142].mxu1 }
 0x4cb   : > { %v4939_v9 = vmul.f32 %v18281_v52, %v4747_v10  ;;  %v6056_v21 = vmul.f32 0.5, %v5864_v25  ;;  %v6060_v11 = vmul.f32 0.5, %v5868_v3  ;;  %v5863_v8 = vadd.f32 1.0, %v18116_v33  ;;  %v18316_v4 = vpop.f32.mrb[143].mxu1 }
 0x4cc   : > { %v5319_v62 = vadd.f32 %v18254_v41, %v5127_v0  ;;  %v5128_v13 = vmul.f32 0.044715, %v4936_v31  ;;  %v4940_v56 = vmul.f32 %v18291_v44, %v4748_v15  ;;  %v5867_v18 = vadd.f32 1.0, %v18140_v59  ;;  %8779 = vmatpush1.bf16.msra.mxu1 %v13334_v55 }
 0x4cd   : > { %v5131_v24 = vmul.f32 0.044715, %v4939_v9  ;;  %v6248_v10 = vmul.f32 %v17996_v47, %v6056_v21  ;;  %v6252_v33 = vmul.f32 %v18006_v49, %v6060_v11  ;;  %v6055_v25 = vmul.f32 0.5, %v5863_v8  ;;  %8780 = vmatprep.subr.bf16.mxu1 %v13339_v26  ;;  %v13340_v49 = vld [vmem:[%s14475_s28 + $0x220] ss:$24 sps:$4 sm:$0xff]  }
 0x4ce   : > { %v5511_v3 = vmul.f32 0.7978846, %v5319_v62  ;;  %v5320_v0 = vadd.f32 %v18270_v7, %v5128_v13  ;;  %v5132_v31 = vmul.f32 0.044715, %v4940_v56  ;;  %v6059_v15 = vmul.f32 0.5, %v5867_v18  ;;  %8652 = vmatmul.mubr.bf16.gmra.mrb[248].mxu1 %v17321_v17 }
 0x4cf   : > { %v5323_v59 = vadd.f32 %v18281_v52, %v5131_v24  ;;  %v18324_v55 = vpack.c.bf16 %v6252_v33, %v6248_v10  ;;  %v6247_v9 = vmul.f32 %v17991_v63, %v6055_v25  ;;  %v18329_v47 = vadd.f32 %v18239_v19, %v17801_v14  ;;  %8661 = vmatprep.mubr.bf16.mxu1 %v17372_v35  ;;  %v13342_v26 = vld [vmem:[%s14475_s28 + $0x224] ss:$24 sps:$4 sm:$0xff]   ;;  %v13343_v62 = vld [vmem:[%s14475_s28 + $0x5d8] ss:$24 sps:$4 sm:$0xff]  }
 0x4d0   : > { %v18334_v21 = vpop.eup %13662  ;;  %13670 = vtanh.f32 %v5511_v3  ;;  %v5512_v11 = vmul.f32 0.7978846, %v5320_v0  ;;  %v5324_v8 = vadd.f32 %v18291_v44, %v5132_v31  ;;  %v6251_v24 = vmul.f32 %v18003_v46, %v6059_v15  ;;  %8781 = vmatpush1.bf16.msra.mxu1 %v13337_v45  ;;  %v13345_v13 = vld [vmem:[%s14475_s28 + $0x5dc] ss:$24 sps:$4 sm:$0xff]   ;;  %v18351_v10 = vpop.f32.mrb[144].mxu1  ;;  %9047 = vmatprep.subr.bf16.mxu0 %v13342_v26 }
 0x4d1   : > { %20255 = vst [vmem:[#allocation61_spill] sm:$0xff] %v18324_v55  ;;  %v5515_v63 = vmul.f32 0.7978846, %v5323_v59  ;;  %8288 = vmatprep.mubr.bf16.mxu0 %v18324_v55  ;;  %v4751_v19 = vmul.f32 %v18329_v47, %v18329_v47  ;;  %v18345_v56 = vadd.f32 %v18244_v36, %v17806_v51  ;;  %v18349_v18 = vadd.f32 %v18248_v38, %v17801_v14  ;;  %v18361_v3 = vpop.f32.mrb[145].mxu1 }
 0x4d2   : > { %v18353_v45 = vpop.eup %13664  ;;  %13672 = vtanh.f32 %v5512_v11  ;;  %v5516_v46 = vmul.f32 0.7978846, %v5324_v8  ;;  %v18355_v33 = vpack.c.bf16 %v6251_v24, %v6247_v9  ;;  %v18359_v25 = vadd.f32 %v18256_v29, %v17806_v51  ;;  %8782 = vmatprep.subr.bf16.mxu1 %v13345_v13  ;;  %9048 = vmatpush1.bf16.msra.mxu0 %v13340_v49  ;;  %v18370_v15 = vpop.f32.mrb[146].mxu1 }
 0x4d3   : > { %v18363_v36 = vpop.eup %13666  ;;  %13674 = vtanh.f32 %v5515_v63  ;;  %v4943_v38 = vmul.f32 %v18329_v47, %v4751_v19  ;;  %v4752_v0 = vmul.f32 %v18345_v56, %v18345_v56  ;;  %v4755_v31 = vmul.f32 %v18349_v18, %v18349_v18  ;;  %v18379_v26 = vpop.f32.mrb[147].mxu1 }
 0x4d4   : > { %20256 = vst [vmem:[#allocation62_spill] sm:$0xff] %v18355_v33  ;;  %v18372_v59 = vpop.eup %13668  ;;  %13676 = vtanh.f32 %v5516_v46  ;;  %8289 = vmatmul.mubr.bf16.gmra.mrb[116].mxu0 %v18355_v33  ;;  %v4756_v29 = vmul.f32 %v18359_v25, %v18359_v25  ;;  %v5872_v9 = vadd.f32 1.0, %v18201_v27  ;;  %v5876_v49 = vadd.f32 1.0, %v18224_v23  ;;  %8783 = vmatpush1.bf16.msra.mxu1 %v13343_v62 }
 0x4d5   : > { %v5135_v11 = vmul.f32 0.044715, %v4943_v38  ;;  %v4944_v8 = vmul.f32 %v18345_v56, %v4752_v0  ;;  %v4947_v24 = vmul.f32 %v18349_v18, %v4755_v31  ;;  %v5871_v13 = vadd.f32 1.0, %v18176_v60  ;;  %v20257_v38 = vld [vmem:[#allocation54_spill] sm:$0xff] }
 0x4d6   : > { %v4948_v63 = vmul.f32 %v18359_v25, %v4756_v29  ;;  %v6064_v19 = vmul.f32 0.5, %v5872_v9  ;;  %v6068_v46 = vmul.f32 0.5, %v5876_v49  ;;  %v5875_v35 = vadd.f32 1.0, %v18216_v6  ;;  %8662 = vmatmul.mubr.bf16.gmra.mrb[252].mxu1 %v17393_v32 }
 0x4d7   : > { %v5327_v27 = vadd.f32 %v18329_v47, %v5135_v11  ;;  %v5136_v23 = vmul.f32 0.044715, %v4944_v8  ;;  %v5139_v17 = vmul.f32 0.044715, %v4947_v24  ;;  %v6063_v62 = vmul.f32 0.5, %v5871_v13  ;;  %8671 = vmatprep.mubr.bf16.mxu1 %v20257_v38  ;;  %v20259_v13 = vld [vmem:[#allocation19_spill] sm:$0xff] }
 0x4d8   : > { %v5140_v0 = vmul.f32 0.044715, %v4948_v63  ;;  %v6256_v31 = vmul.f32 %v18061_v1, %v6064_v19  ;;  %v6260_v60 = vmul.f32 %v18079_v34, %v6068_v46  ;;  %v6067_v33 = vmul.f32 0.5, %v5875_v35  ;;  %v18394_v32 = vpop.f32.mrb[148].mxu1 }
 0x4d9   : > { %v5519_v29 = vmul.f32 0.7978846, %v5327_v27  ;;  %v5328_v9 = vadd.f32 %v18345_v56, %v5136_v23  ;;  %v5331_v6 = vadd.f32 %v18349_v18, %v5139_v17  ;;  %v6255_v49 = vmul.f32 %v18042_v28, %v6063_v62  ;;  %v18406_v34 = vpop.f32.mrb[149].mxu1 }
 0x4da   : > { %v18396_v11 = vpop.eup %13670  ;;  %v5332_v8 = vadd.f32 %v18359_v25, %v5140_v0  ;;  %v18399_v24 = vpack.c.bf16 %v6260_v60, %v6256_v31  ;;  %v6259_v1 = vmul.f32 %v20259_v13, %v6067_v33  ;;  %v18404_v35 = vadd.f32 %v18301_v43, %v17801_v14  ;;  %v18412_v19 = vpop.f32.mrb[150].mxu1  ;;  %v20261_v13 = vld [vmem:[#allocation26_spill] sm:$0xff] }
 0x4db   : > { %13678 = vtanh.f32 %v5519_v29  ;;  %v5520_v17 = vmul.f32 0.7978846, %v5328_v9  ;;  %v5523_v28 = vmul.f32 0.7978846, %v5331_v6  ;;  %v18410_v63 = vadd.f32 %v18307_v40, %v17806_v51  ;;  %v18425_v62 = vpop.f32.mrb[151].mxu1 }
 0x4dc   : > { %20258 = vst [vmem:[#allocation63_spill] sm:$0xff] %v18399_v24  ;;  %v18414_v46 = vpop.eup %13672  ;;  %v5524_v33 = vmul.f32 0.7978846, %v5332_v8  ;;  %8298 = vmatprep.mubr.bf16.mxu0 %v18399_v24  ;;  %v18417_v43 = vpack.c.bf16 %v6259_v1, %v6255_v49  ;;  %v4759_v27 = vmul.f32 %v18404_v35, %v18404_v35  ;;  %v18423_v23 = vadd.f32 %v18311_v42, %v17801_v14  ;;  %v13346_v29 = vld [vmem:[%s14475_s28 + $0x250] ss:$24 sps:$4 sm:$0xff]  }
 0x4dd   : > { %v18427_v40 = vpop.eup %13674  ;;  %13680 = vtanh.f32 %v5520_v17  ;;  %v4760_v0 = vmul.f32 %v18410_v63, %v18410_v63  ;;  %v18433_v31 = vadd.f32 %v18316_v4, %v17806_v51  ;;  %v5880_v60 = vadd.f32 1.0, %v18274_v30  ;;  %v13348_v9 = vld [vmem:[%s14475_s28 + $0x254] ss:$24 sps:$4 sm:$0xff]  }
 0x4de   : > { %20260 = vst [vmem:[#allocation64_spill] sm:$0xff] %v18417_v43  ;;  %v18438_v6 = vpop.eup %13676  ;;  %13682 = vtanh.f32 %v5523_v28  ;;  %8299 = vmatmul.mubr.bf16.gmra.mrb[120].mxu0 %v18417_v43  ;;  %v4951_v42 = vmul.f32 %v18404_v35, %v4759_v27  ;;  %v4763_v49 = vmul.f32 %v18423_v23, %v18423_v23  ;;  %v5884_v8 = vadd.f32 1.0, %v18294_v5  ;;  %8672 = vmatmul.mubr.bf16.gmra.mrb[0].mxu1 %v20261_v13  ;;  %v20262_v17 = vld [vmem:[#allocation27_spill] sm:$0xff] }
 0x4df   : > { %13684 = vtanh.f32 %v5524_v33  ;;  %v4952_v4 = vmul.f32 %v18410_v63, %v4760_v0  ;;  %v4764_v30 = vmul.f32 %v18433_v31, %v18433_v31  ;;  %v6072_v1 = vmul.f32 0.5, %v5880_v60  ;;  %8681 = vmatprep.mubr.bf16.mxu1 %v20262_v17  ;;  %9049 = vmatprep.subr.bf16.mxu0 %v13348_v9 }
 0x4e0   : > { %v5143_v28 = vmul.f32 0.044715, %v4951_v42  ;;  %v4955_v27 = vmul.f32 %v18423_v23, %v4763_v49  ;;  %v6076_v38 = vmul.f32 0.5, %v5884_v8  ;;  %v5879_v43 = vadd.f32 1.0, %v18259_v37  ;;  %9050 = vmatpush1.bf16.msra.mxu0 %v13346_v29  ;;  %v18455_v24 = vpop.f32.mrb[152].mxu1 }
 0x4e1   : > { %v5144_v5 = vmul.f32 0.044715, %v4952_v4  ;;  %v4956_v13 = vmul.f32 %v18433_v31, %v4764_v30  ;;  %v6264_v33 = vmul.f32 %v18122_v57, %v6072_v1  ;;  %v5883_v0 = vadd.f32 1.0, %v18284_v22  ;;  %v18459_v49 = vpop.f32.mrb[153].mxu1 }
 0x4e2   : > { %v5335_v60 = vadd.f32 %v18404_v35, %v5143_v28  ;;  %v5147_v17 = vmul.f32 0.044715, %v4955_v27  ;;  %v6268_v9 = vmul.f32 %v18135_v50, %v6076_v38  ;;  %v6071_v42 = vmul.f32 0.5, %v5879_v43  ;;  %v18466_v57 = vpop.f32.mrb[154].mxu1 }
 0x4e3   : > { %v5336_v37 = vadd.f32 %v18410_v63, %v5144_v5  ;;  %v5148_v29 = vmul.f32 0.044715, %v4956_v13  ;;  %v6075_v8 = vmul.f32 0.5, %v5883_v0  ;;  %v18464_v4 = vadd.f32 %v18351_v10, %v17801_v14  ;;  %v18472_v38 = vpop.f32.mrb[155].mxu1 }
 0x4e4   : > { %v5527_v22 = vmul.f32 0.7978846, %v5335_v60  ;;  %v5339_v30 = vadd.f32 %v18423_v23, %v5147_v17  ;;  %v18469_v1 = vpack.c.bf16 %v6268_v9, %v6264_v33  ;;  %v6263_v50 = vmul.f32 %v18107_v2, %v6071_v42  ;;  %v20264_v33 = vld [vmem:[#allocation55_spill] sm:$0xff]  ;;  %v20266_v42 = vld [vmem:[#allocation56_spill] sm:$0xff] }
 0x4e5   : > { %v18474_v43 = vpop.eup %13678  ;;  %v5528_v28 = vmul.f32 0.7978846, %v5336_v37  ;;  %v5340_v13 = vadd.f32 %v18433_v31, %v5148_v29  ;;  %v6267_v10 = vmul.f32 %v18132_v20, %v6075_v8  ;;  %v4767_v27 = vmul.f32 %v18464_v4, %v18464_v4  ;;  %v13349_v37 = vld [vmem:[%s14475_s28 + $0x280] ss:$24 sps:$4 sm:$0xff]   ;;  %v13351_v29 = vld [vmem:[%s14475_s28 + $0x284] ss:$24 sps:$4 sm:$0xff]  }
 0x4e6   : > { %20263 = vst [vmem:[#allocation65_spill] sm:$0xff] %v18469_v1  ;;  %13686 = vtanh.f32 %v5527_v22  ;;  %v5531_v17 = vmul.f32 0.7978846, %v5339_v30  ;;  %8308 = vmatprep.mubr.bf16.mxu0 %v18469_v1  ;;  %v18483_v2 = vadd.f32 %v18361_v3, %v17806_v51  ;;  %v18487_v5 = vadd.f32 %v18370_v15, %v17801_v14  ;;  %8682 = vmatmul.mubr.bf16.gmra.mrb[4].mxu1 %v20264_v33 }
 0x4e7   : > { %v18490_v0 = vpop.eup %13680  ;;  %13688 = vtanh.f32 %v5528_v28  ;;  %v5532_v20 = vmul.f32 0.7978846, %v5340_v13  ;;  %v18492_v60 = vpack.c.bf16 %v6267_v10, %v6263_v50  ;;  %v4959_v9 = vmul.f32 %v18464_v4, %v4767_v27  ;;  %8691 = vmatprep.mubr.bf16.mxu1 %v20266_v42  ;;  %9051 = vmatprep.subr.bf16.mxu0 %v13351_v29 }
 0x4e8   : > { %v18498_v3 = vpop.eup %13682  ;;  %13690 = vtanh.f32 %v5531_v17  ;;  %v4768_v15 = vmul.f32 %v18483_v2, %v18483_v2  ;;  %v4771_v8 = vmul.f32 %v18487_v5, %v18487_v5  ;;  %v18506_v22 = vadd.f32 %v18379_v26, %v17806_v51  ;;  %v18513_v10 = vpop.f32.mrb[156].mxu1  ;;  %9052 = vmatpush1.bf16.msra.mxu0 %v13349_v37 }
 0x4e9   : > { %20265 = vst [vmem:[#allocation41_spill] sm:$0xff] %v18492_v60  ;;  %v18508_v30 = vpop.eup %13684  ;;  %13692 = vtanh.f32 %v5532_v20  ;;  %8309 = vmatmul.mubr.bf16.gmra.mrb[124].mxu0 %v18492_v60  ;;  %v5151_v50 = vmul.f32 0.044715, %v4959_v9  ;;  %v5888_v28 = vadd.f32 1.0, %v18353_v45  ;;  %v5892_v13 = vadd.f32 1.0, %v18372_v59  ;;  %v18520_v20 = vpop.f32.mrb[157].mxu1 }
 0x4ea   : > { %v4960_v27 = vmul.f32 %v18483_v2, %v4768_v15  ;;  %v4963_v17 = vmul.f32 %v18487_v5, %v4771_v8  ;;  %v4772_v26 = vmul.f32 %v18506_v22, %v18506_v22  ;;  %v5887_v42 = vadd.f32 1.0, %v18334_v21  ;;  %v18524_v60 = vpop.f32.mrb[158].mxu1 }
 0x4eb   : > { %v5343_v9 = vadd.f32 %v18464_v4, %v5151_v50  ;;  %v6080_v45 = vmul.f32 0.5, %v5888_v28  ;;  %v6084_v33 = vmul.f32 0.5, %v5892_v13  ;;  %v5891_v59 = vadd.f32 1.0, %v18363_v36  ;;  %v18527_v55 = vpop.f32.mrb[159].mxu1 }
 0x4ec   : > { %v5152_v29 = vmul.f32 0.044715, %v4960_v27  ;;  %v5155_v15 = vmul.f32 0.044715, %v4963_v17  ;;  %v4964_v8 = vmul.f32 %v18506_v22, %v4772_v26  ;;  %v6079_v1 = vmul.f32 0.5, %v5887_v42  ;;  %v20267_v27 = vld [vmem:[#allocation28_spill] sm:$0xff] }
 0x4ed   : > { %v5535_v61 = vmul.f32 0.7978846, %v5343_v9  ;;  %v6272_v21 = vmul.f32 %v18197_v58, %v6080_v45  ;;  %v6276_v37 = vmul.f32 %v18211_v48, %v6084_v33  ;;  %v6083_v16 = vmul.f32 0.5, %v5891_v59  ;;  %v20269_v48 = vld [vmem:[#allocation29_spill] sm:$0xff] }
 0x4ee   : > { %v5344_v50 = vadd.f32 %v18483_v2, %v5152_v29  ;;  %v5347_v28 = vadd.f32 %v18487_v5, %v5155_v15  ;;  %v5156_v36 = vmul.f32 0.044715, %v4964_v8  ;;  %v6271_v13 = vmul.f32 %v18183_v39, %v6079_v1  ;;  %8692 = vmatmul.mubr.bf16.gmra.mrb[8].mxu1 %v20267_v27 }
 0x4ef   : > { %13694 = vtanh.f32 %v5535_v61  ;;  %v18535_v17 = vpack.c.bf16 %v6276_v37, %v6272_v21  ;;  %v6275_v42 = vmul.f32 %v18208_v54, %v6083_v16  ;;  %v18540_v58 = vadd.f32 %v18394_v32, %v17801_v14  ;;  %8701 = vmatprep.mubr.bf16.mxu1 %v20269_v48 }
 0x4f0   : > { %v18543_v33 = vpop.eup %13686  ;;  %v5536_v26 = vmul.f32 0.7978846, %v5344_v50  ;;  %v5539_v9 = vmul.f32 0.7978846, %v5347_v28  ;;  %v5348_v45 = vadd.f32 %v18506_v22, %v5156_v36  ;;  %v18548_v39 = vadd.f32 %v18406_v34, %v17806_v51  ;;  %v18565_v59 = vpop.f32.mrb[160].mxu1 }
 0x4f1   : > { %20268 = vst [vmem:[#allocation19_spill] sm:$0xff] %v18535_v17  ;;  %v18550_v61 = vpop.eup %13688  ;;  %8318 = vmatprep.mubr.bf16.mxu0 %v18535_v17  ;;  %v18553_v54 = vpack.c.bf16 %v6275_v42, %v6271_v13  ;;  %v4775_v32 = vmul.f32 %v18540_v58, %v18540_v58  ;;  %v18559_v16 = vadd.f32 %v18412_v19, %v17801_v14  ;;  %v5896_v8 = vadd.f32 1.0, %v18414_v46  ;;  %v18572_v21 = vpop.f32.mrb[161].mxu1 }
 0x4f2   : > { %v18563_v1 = vadd.f32 %v18425_v62, %v17806_v51  ;;  %v18567_v34 = vpop.eup %13690  ;;  %13696 = vtanh.f32 %v5536_v26  ;;  %v5540_v29 = vmul.f32 0.7978846, %v5348_v45  ;;  %v4776_v15 = vmul.f32 %v18548_v39, %v18548_v39  ;;  %v18582_v28 = vpop.f32.mrb[162].mxu1 }
 0x4f3   : > { %20270 = vst [vmem:[#allocation72_spill] sm:$0xff] %v18553_v54  ;;  %20271 = vst [vmem:[#allocation73_spill] sm:$0xff] %v18559_v16  ;;  %v18574_v37 = vpop.eup %13692  ;;  %13698 = vtanh.f32 %v5539_v9  ;;  %8319 = vmatmul.mubr.bf16.gmra.mrb[128].mxu0 %v18553_v54  ;;  %v4967_v19 = vmul.f32 %v18540_v58, %v4775_v32  ;;  %v4779_v62 = vmul.f32 %v18559_v16, %v18559_v16  ;;  %v5900_v36 = vadd.f32 1.0, %v18438_v6  ;;  %v18586_v42 = vpop.f32.mrb[163].mxu1  ;;  %v20272_v54 = vld [vmem:[#allocation30_spill] sm:$0xff] }
 0x4f4   : > { %v4780_v50 = vmul.f32 %v18563_v1, %v18563_v1  ;;  %13700 = vtanh.f32 %v5540_v29  ;;  %v4968_v46 = vmul.f32 %v18548_v39, %v4776_v15  ;;  %v6088_v13 = vmul.f32 0.5, %v5896_v8 }
 0x4f5   : > { %v5159_v26 = vmul.f32 0.044715, %v4967_v19  ;;  %v4971_v9 = vmul.f32 %v18559_v16, %v4779_v62  ;;  %v5895_v32 = vadd.f32 1.0, %v18396_v11  ;;  %v6092_v27 = vmul.f32 0.5, %v5900_v36  ;;  %v20273_v62 = vld [vmem:[#allocation31_spill] sm:$0xff] }
 0x4f6   : > { %v4972_v45 = vmul.f32 %v18563_v1, %v4780_v50  ;;  %v5160_v48 = vmul.f32 0.044715, %v4968_v46  ;;  %v6280_v29 = vmul.f32 %v18270_v7, %v6088_v13  ;;  %v5899_v15 = vadd.f32 1.0, %v18427_v40  ;;  %8702 = vmatmul.mubr.bf16.gmra.mrb[12].mxu1 %v20272_v54  ;;  %v13352_v7 = vld [vmem:[%s14475_s28 + $0x2b0] ss:$24 sps:$4 sm:$0xff]  }
 0x4f7   : > { %v5351_v6 = vadd.f32 %v18540_v58, %v5159_v26  ;;  %v5163_v8 = vmul.f32 0.044715, %v4971_v9  ;;  %v6087_v17 = vmul.f32 0.5, %v5895_v32  ;;  %8711 = vmatprep.mubr.bf16.mxu1 %v20273_v62  ;;  %v6284_v11 = vmul.f32 %v18291_v44, %v6092_v27  ;;  %v13354_v40 = vld [vmem:[%s14475_s28 + $0x2b4] ss:$24 sps:$4 sm:$0xff]  }
 0x4f8   : > { %v5164_v19 = vmul.f32 0.044715, %v4972_v45  ;;  %v5352_v50 = vadd.f32 %v18548_v39, %v5160_v48  ;;  %v6091_v12 = vmul.f32 0.5, %v5899_v15  ;;  %v18600_v46 = vadd.f32 %v18455_v24, %v17801_v14  ;;  %v18609_v32 = vpop.f32.mrb[164].mxu1  ;;  %9053 = vmatprep.subr.bf16.mxu0 %v13354_v40 }
 0x4f9   : > { %v18604_v36 = vpop.eup %13694  ;;  %v5543_v13 = vmul.f32 0.7978846, %v5351_v6  ;;  %v5355_v26 = vadd.f32 %v18559_v16, %v5163_v8  ;;  %v6279_v45 = vmul.f32 %v18254_v41, %v6087_v17  ;;  %v18611_v44 = vpack.c.bf16 %v6284_v11, %v6280_v29  ;;  %v18616_v15 = vpop.f32.mrb[165].mxu1  ;;  %9054 = vmatpush1.bf16.msra.mxu0 %v13352_v7 }
 0x4fa   : > { %v5356_v9 = vadd.f32 %v18563_v1, %v5164_v19  ;;  %v5544_v48 = vmul.f32 0.7978846, %v5352_v50  ;;  %v6283_v27 = vmul.f32 %v18281_v52, %v6091_v12  ;;  %v4783_v24 = vmul.f32 %v18600_v46, %v18600_v46  ;;  %v18622_v41 = vpop.f32.mrb[166].mxu1 }
 0x4fb   : > { %20274 = vst [vmem:[#allocation74_spill] sm:$0xff] %v18611_v44  ;;  %13702 = vtanh.f32 %v5543_v13  ;;  %v5547_v6 = vmul.f32 0.7978846, %v5355_v26  ;;  %v18620_v19 = vadd.f32 %v18459_v49, %v17806_v51  ;;  %8328 = vmatprep.mubr.bf16.mxu0 %v18611_v44  ;;  %v18632_v29 = vadd.f32 %v18466_v57, %v17801_v14  ;;  %v18634_v50 = vpop.f32.mrb[167].mxu1 }
 0x4fc   : > { %v5548_v8 = vmul.f32 0.7978846, %v5356_v9  ;;  %v18624_v17 = vpop.eup %13696  ;;  %13704 = vtanh.f32 %v5544_v48  ;;  %v18627_v12 = vpack.c.bf16 %v6283_v27, %v6279_v45  ;;  %v4975_v52 = vmul.f32 %v18600_v46, %v4783_v24  ;;  %v20276_v45 = vld [vmem:[#allocation32_spill] sm:$0xff]  ;;  %v20277_v24 = vld [vmem:[#allocation33_spill] sm:$0xff] }
 0x4fd   : > { %v18636_v49 = vpop.eup %13698  ;;  %13706 = vtanh.f32 %v5547_v6  ;;  %v4784_v11 = vmul.f32 %v18620_v19, %v18620_v19  ;;  %v18642_v7 = vadd.f32 %v18472_v38, %v17806_v51  ;;  %v5904_v40 = vadd.f32 1.0, %v18490_v0  ;;  %v13355_v6 = vld [vmem:[%s14475_s28 + $0x2e0] ss:$24 sps:$4 sm:$0xff]  }
 0x4fe   : > { %20275 = vst [vmem:[#allocation75_spill] sm:$0xff] %v18627_v12  ;;  %v18645_v13 = vpop.eup %13700  ;;  %13708 = vtanh.f32 %v5548_v8  ;;  %8329 = vmatmul.mubr.bf16.gmra.mrb[132].mxu0 %v18627_v12  ;;  %v5167_v57 = vmul.f32 0.044715, %v4975_v52  ;;  %v4787_v26 = vmul.f32 %v18632_v29, %v18632_v29  ;;  %v5908_v9 = vadd.f32 1.0, %v18508_v30  ;;  %8712 = vmatmul.mubr.bf16.gmra.mrb[16].mxu1 %v20276_v45  ;;  %v13357_v8 = vld [vmem:[%s14475_s28 + $0x2e4] ss:$24 sps:$4 sm:$0xff]  }
 0x4ff   : > { %v4976_v48 = vmul.f32 %v18620_v19, %v4784_v11  ;;  %v4788_v38 = vmul.f32 %v18642_v7, %v18642_v7  ;;  %v6096_v27 = vmul.f32 0.5, %v5904_v40  ;;  %v5903_v0 = vadd.f32 1.0, %v18474_v43  ;;  %8721 = vmatprep.mubr.bf16.mxu1 %v20277_v24  ;;  %9055 = vmatprep.subr.bf16.mxu0 %v13357_v8 }
 0x500   : > { %v5359_v52 = vadd.f32 %v18600_v46, %v5167_v57  ;;  %v4979_v62 = vmul.f32 %v18632_v29, %v4787_v26  ;;  %v6100_v54 = vmul.f32 0.5, %v5908_v9  ;;  %v5907_v30 = vadd.f32 1.0, %v18498_v3  ;;  %v18664_v40 = vpop.f32.mrb[168].mxu1  ;;  %9056 = vmatpush1.bf16.msra.mxu0 %v13355_v6 }
 0x501   : > { %v5168_v45 = vmul.f32 0.044715, %v4976_v48  ;;  %v4980_v11 = vmul.f32 %v18642_v7, %v4788_v38  ;;  %v6288_v12 = vmul.f32 %v18345_v56, %v6096_v27  ;;  %v6095_v44 = vmul.f32 0.5, %v5903_v0  ;;  %v18667_v57 = vpop.f32.mrb[169].mxu1 }
 0x502   : > { %v5551_v43 = vmul.f32 0.7978846, %v5359_v52  ;;  %v5171_v24 = vmul.f32 0.044715, %v4979_v62  ;;  %v6292_v53 = vmul.f32 %v18359_v25, %v6100_v54  ;;  %v6099_v16 = vmul.f32 0.5, %v5907_v30  ;;  %v18675_v48 = vpop.f32.mrb[170].mxu1 }
 0x503   : > { %v5360_v26 = vadd.f32 %v18620_v19, %v5168_v45  ;;  %v5172_v3 = vmul.f32 0.044715, %v4980_v11  ;;  %v6287_v9 = vmul.f32 %v18329_v47, %v6095_v44  ;;  %v18673_v56 = vadd.f32 %v18513_v10, %v17801_v14  ;;  %v18681_v54 = vpop.f32.mrb[171].mxu1  ;;  %v20281_v30 = vld [vmem:[#allocation35_spill] sm:$0xff] }
 0x504   : > { %13710 = vtanh.f32 %v5551_v43  ;;  %v5363_v62 = vadd.f32 %v18632_v29, %v5171_v24  ;;  %v18678_v38 = vpack.c.bf16 %v6292_v53, %v6288_v12  ;;  %v6291_v25 = vmul.f32 %v18349_v18, %v6099_v16  ;;  %v20280_v24 = vld [vmem:[#allocation34_spill] sm:$0xff] }
 0x505   : > { %v18683_v27 = vpop.eup %13702  ;;  %v5552_v45 = vmul.f32 0.7978846, %v5360_v26  ;;  %v5364_v47 = vadd.f32 %v18642_v7, %v5172_v3  ;;  %v4791_v10 = vmul.f32 %v18673_v56, %v18673_v56  ;;  %v18690_v44 = vadd.f32 %v18520_v20, %v17806_v51 }
 0x506   : > { %20278 = vst [vmem:[#allocation76_spill] sm:$0xff] %v18678_v38  ;;  %v18692_v0 = vpop.eup %13704  ;;  %v5555_v53 = vmul.f32 0.7978846, %v5363_v62  ;;  %8338 = vmatprep.mubr.bf16.mxu0 %v18678_v38  ;;  %v18695_v18 = vpack.c.bf16 %v6291_v25, %v6287_v9  ;;  %v18699_v16 = vadd.f32 %v18524_v60, %v17801_v14  ;;  %v18703_v12 = vadd.f32 %v18527_v55, %v17806_v51 }
 0x507   : > { %8722 = vmatmul.mubr.bf16.gmra.mrb[20].mxu1 %v20280_v24  ;;  %v18706_v6 = vpop.eup %13706  ;;  %13712 = vtanh.f32 %v5552_v45  ;;  %v5556_v20 = vmul.f32 0.7978846, %v5364_v47  ;;  %v4983_v8 = vmul.f32 %v18673_v56, %v4791_v10  ;;  %v4792_v52 = vmul.f32 %v18690_v44, %v18690_v44 }
 0x508   : > { %20279 = vst [vmem:[#allocation77_spill] sm:$0xff] %v18695_v18  ;;  %8731 = vmatprep.mubr.bf16.mxu1 %v20281_v30  ;;  %v18712_v11 = vpop.eup %13708  ;;  %13714 = vtanh.f32 %v5555_v53  ;;  %8339 = vmatmul.mubr.bf16.gmra.mrb[136].mxu0 %v18695_v18  ;;  %v4795_v55 = vmul.f32 %v18699_v16, %v18699_v16  ;;  %v4796_v60 = vmul.f32 %v18703_v12, %v18703_v12  ;;  %v5912_v43 = vadd.f32 1.0, %v18550_v61  ;;  %v18722_v62 = vpop.f32.mrb[172].mxu1 }
 0x509   : > { %13716 = vtanh.f32 %v5556_v20  ;;  %v5175_v26 = vmul.f32 0.044715, %v4983_v8  ;;  %v4984_v3 = vmul.f32 %v18690_v44, %v4792_v52  ;;  %v5916_v9 = vadd.f32 1.0, %v18574_v37  ;;  %v18727_v53 = vpop.f32.mrb[173].mxu1 }
 0x50a   : > { %v4987_v25 = vmul.f32 %v18699_v16, %v4795_v55  ;;  %v4988_v45 = vmul.f32 %v18703_v12, %v4796_v60  ;;  %v6104_v47 = vmul.f32 0.5, %v5912_v43  ;;  %v5911_v10 = vadd.f32 1.0, %v18543_v33  ;;  %v18731_v52 = vpop.f32.mrb[174].mxu1 }
 0x50b   : > { %v5367_v30 = vadd.f32 %v18673_v56, %v5175_v26  ;;  %v5176_v61 = vmul.f32 0.044715, %v4984_v3  ;;  %v6108_v20 = vmul.f32 0.5, %v5916_v9  ;;  %v5915_v8 = vadd.f32 1.0, %v18567_v34  ;;  %v18734_v38 = vpop.f32.mrb[175].mxu1 }
 0x50c   : > { %v5179_v37 = vmul.f32 0.044715, %v4987_v25  ;;  %v5180_v24 = vmul.f32 0.044715, %v4988_v45  ;;  %v6296_v18 = vmul.f32 %v18410_v63, %v6104_v47  ;;  %v6103_v55 = vmul.f32 0.5, %v5911_v10  ;;  %v20282_v45 = vld [vmem:[#allocation37_spill] sm:$0xff] }
 0x50d   : > { %v5559_v60 = vmul.f32 0.7978846, %v5367_v30  ;;  %v5368_v33 = vadd.f32 %v18690_v44, %v5176_v61  ;;  %v6300_v43 = vmul.f32 %v18433_v31, %v6108_v20  ;;  %v6107_v26 = vmul.f32 0.5, %v5915_v8  ;;  %v20284_v10 = vld [vmem:[#allocation13_spill] sm:$0xff]  ;;  %v13360_v61 = vld [vmem:[%s14475_s28 + $0x314] ss:$24 sps:$4 sm:$0xff]  }
 0x50e   : > { %v18738_v3 = vpop.eup %13710  ;;  %v5371_v34 = vadd.f32 %v18699_v16, %v5179_v37  ;;  %v5372_v9 = vadd.f32 %v18703_v12, %v5180_v24  ;;  %v6295_v25 = vmul.f32 %v18404_v35, %v6103_v55  ;;  %v18745_v63 = vadd.f32 %v18565_v59, %v17801_v14  ;;  %9298 = vmatprep.subr.bf16.mxu0 %v13360_v61 }
 0x50f   : > { %8732 = vmatmul.mubr.bf16.gmra.mrb[24].mxu1 %v20282_v45  ;;  %13718 = vtanh.f32 %v5559_v60  ;;  %v5560_v30 = vmul.f32 0.7978846, %v5368_v33  ;;  %v18748_v47 = vpack.c.bf16 %v6300_v43, %v6296_v18  ;;  %v6299_v31 = vmul.f32 %v18423_v23, %v6107_v26 }
 0x510   : > { %8741 = vmatprep.mubr.bf16.mxu1 %v20284_v10  ;;  %v5563_v20 = vmul.f32 0.7978846, %v5371_v34  ;;  %v5564_v8 = vmul.f32 0.7978846, %v5372_v9  ;;  %v4799_v35 = vmul.f32 %v18745_v63, %v18745_v63  ;;  %v18757_v59 = vadd.f32 %v18572_v21, %v17806_v51  ;;  %v18772_v55 = vpop.f32.mrb[176].mxu1 }
 0x511   : > { %20283 = vst [vmem:[#allocation78_spill] sm:$0xff] %v18748_v47  ;;  %v18759_v24 = vpop.eup %13712  ;;  %13720 = vtanh.f32 %v5560_v30  ;;  %8348 = vmatprep.mubr.bf16.mxu0 %v18748_v47  ;;  %v18762_v18 = vpack.c.bf16 %v6299_v31, %v6295_v25  ;;  %v18766_v23 = vadd.f32 %v18582_v28, %v17801_v14  ;;  %v18770_v37 = vadd.f32 %v18586_v42, %v17806_v51  ;;  %v18780_v26 = vpop.f32.mrb[177].mxu1 }
 0x512   : > { %v18774_v21 = vpop.eup %13714  ;;  %13722 = vtanh.f32 %v5563_v20  ;;  %v4991_v60 = vmul.f32 %v18745_v63, %v4799_v35  ;;  %v4800_v33 = vmul.f32 %v18757_v59, %v18757_v59  ;;  %v5920_v43 = vadd.f32 1.0, %v18624_v17  ;;  %20286 = vst [vmem:[#allocation80_spill] sm:$0xff] %v18780_v26  ;;  %v18790_v25 = vpop.f32.mrb[178].mxu1  ;;  %v20290_v26 = vld [vmem:[#allocation57_spill] sm:$0xff] }
 0x513   : > { %20285 = vst [vmem:[#allocation79_spill] sm:$0xff] %v18762_v18  ;;  %v18782_v28 = vpop.eup %13716  ;;  %13724 = vtanh.f32 %v5564_v8  ;;  %8349 = vmatmul.mubr.bf16.gmra.mrb[140].mxu0 %v18762_v18  ;;  %v4803_v42 = vmul.f32 %v18766_v23, %v18766_v23  ;;  %v4804_v34 = vmul.f32 %v18770_v37, %v18770_v37  ;;  %v5924_v9 = vadd.f32 1.0, %v18645_v13  ;;  %20287 = vst [vmem:[#allocation81_spill] sm:$0xff] %v18790_v25  ;;  %v18794_v20 = vpop.f32.mrb[179].mxu1  ;;  %v20289_v25 = vld [vmem:[#allocation38_spill] sm:$0xff] }
 0x514   : > { %v5183_v30 = vmul.f32 0.044715, %v4991_v60  ;;  %v4992_v17 = vmul.f32 %v18757_v59, %v4800_v33  ;;  %v6112_v31 = vmul.f32 0.5, %v5920_v43  ;;  %v5919_v61 = vadd.f32 1.0, %v18604_v36  ;;  %20288 = vst [vmem:[#allocation82_spill] sm:$0xff] %v18794_v20 }
 0x515   : > { %v4995_v8 = vmul.f32 %v18766_v23, %v4803_v42  ;;  %v4996_v35 = vmul.f32 %v18770_v37, %v4804_v34  ;;  %v6116_v10 = vmul.f32 0.5, %v5924_v9  ;;  %v5923_v45 = vadd.f32 1.0, %v18636_v49 }
 0x516   : > { %v5375_v18 = vadd.f32 %v18745_v63, %v5183_v30  ;;  %v5184_v13 = vmul.f32 0.044715, %v4992_v17  ;;  %v6304_v47 = vmul.f32 %v18483_v2, %v6112_v31  ;;  %v6111_v60 = vmul.f32 0.5, %v5919_v61 }
 0x517   : > { %8742 = vmatmul.mubr.bf16.gmra.mrb[28].mxu1 %v20289_v25  ;;  %v5187_v33 = vmul.f32 0.044715, %v4995_v8  ;;  %v5188_v43 = vmul.f32 0.044715, %v4996_v35  ;;  %v6308_v36 = vmul.f32 %v18506_v22, %v6116_v10  ;;  %v6115_v20 = vmul.f32 0.5, %v5923_v45 }
 0x518   : > { %8784 = vmatprep.mubr.bf16.mxu1 %v20290_v26  ;;  %v5567_v42 = vmul.f32 0.7978846, %v5375_v18  ;;  %v5376_v34 = vadd.f32 %v18757_v59, %v5184_v13  ;;  %v6303_v49 = vmul.f32 %v18464_v4, %v6111_v60  ;;  %v18808_v9 = vadd.f32 %v18609_v32, %v17801_v14  ;;  %v18817_v45 = vpop.f32.mrb[180].mxu1  ;;  %v20294_v26 = vld [vmem:[#allocation18_spill] sm:$0xff] }
 0x519   : > { %v18810_v2 = vpop.eup %13718  ;;  %v5379_v30 = vadd.f32 %v18766_v23, %v5187_v33  ;;  %v5380_v17 = vadd.f32 %v18770_v37, %v5188_v43  ;;  %v18814_v31 = vpack.c.bf16 %v6308_v36, %v6304_v47  ;;  %v6307_v22 = vmul.f32 %v18487_v5, %v6115_v20  ;;  %v18825_v18 = vpop.f32.mrb[181].mxu1 }
 0x51a   : > { %13726 = vtanh.f32 %v5567_v42  ;;  %v5568_v10 = vmul.f32 0.7978846, %v5376_v34  ;;  %v4807_v4 = vmul.f32 %v18808_v9, %v18808_v9  ;;  %v18823_v32 = vadd.f32 %v18616_v15, %v17806_v51  ;;  %v18836_v35 = vpop.f32.mrb[182].mxu1 }
 0x51b   : > { %20291 = vst [vmem:[#allocation83_spill] sm:$0xff] %v18814_v31  ;;  %v18827_v61 = vpop.eup %13720  ;;  %v5571_v8 = vmul.f32 0.7978846, %v5379_v30  ;;  %v5572_v47 = vmul.f32 0.7978846, %v5380_v17  ;;  %8358 = vmatprep.mubr.bf16.mxu0 %v18814_v31  ;;  %v18830_v5 = vpack.c.bf16 %v6307_v22, %v6303_v49  ;;  %v18834_v20 = vadd.f32 %v18622_v41, %v17801_v14  ;;  %v18847_v43 = vpop.f32.mrb[183].mxu1 }
 0x51c   : > { %v18838_v13 = vpop.eup %13722  ;;  %13728 = vtanh.f32 %v5568_v10  ;;  %v4999_v15 = vmul.f32 %v18808_v9, %v4807_v4  ;;  %v4808_v60 = vmul.f32 %v18823_v32, %v18823_v32  ;;  %v18845_v33 = vadd.f32 %v18634_v50, %v17806_v51  ;;  %v20293_v17 = vld [vmem:[#allocation39_spill] sm:$0xff] }
 0x51d   : > { %20292 = vst [vmem:[#allocation84_spill] sm:$0xff] %v18830_v5  ;;  %v18849_v36 = vpop.eup %13724  ;;  %13730 = vtanh.f32 %v5571_v8  ;;  %8359 = vmatmul.mubr.bf16.gmra.mrb[144].mxu0 %v18830_v5  ;;  %v4811_v41 = vmul.f32 %v18834_v20, %v18834_v20  ;;  %v5928_v42 = vadd.f32 1.0, %v18692_v0  ;;  %v5932_v34 = vadd.f32 1.0, %v18712_v11 }
 0x51e   : > { %13732 = vtanh.f32 %v5572_v47  ;;  %v5191_v49 = vmul.f32 0.044715, %v4999_v15  ;;  %v5000_v30 = vmul.f32 %v18823_v32, %v4808_v60  ;;  %v4812_v50 = vmul.f32 %v18845_v33, %v18845_v33 }
 0x51f   : > { %8785 = vmatmul.mubr.bf16.vlgmr.msra.gmra.mrb[192].mxu1 %v20293_v17  ;;  %v5003_v22 = vmul.f32 %v18834_v20, %v4811_v41  ;;  %v6120_v10 = vmul.f32 0.5, %v5928_v42  ;;  %v6124_v4 = vmul.f32 0.5, %v5932_v34  ;;  %v5927_v8 = vadd.f32 1.0, %v18683_v27 }
 0x520   : > { %8794 = vmatprep.mubr.bf16.mxu1 %v20294_v26  ;;  %v5383_v0 = vadd.f32 %v18808_v9, %v5191_v49  ;;  %v5192_v11 = vmul.f32 0.044715, %v5000_v30  ;;  %v5004_v47 = vmul.f32 %v18845_v33, %v4812_v50  ;;  %v5931_v15 = vadd.f32 1.0, %v18706_v6  ;;  %v18868_v41 = vpop.f32.mrb[184].mxu1 }
 0x521   : > { %v5195_v60 = vmul.f32 0.044715, %v5003_v22  ;;  %v6312_v25 = vmul.f32 %v18548_v39, %v6120_v10  ;;  %v6316_v17 = vmul.f32 %v18563_v1, %v6124_v4  ;;  %v6119_v5 = vmul.f32 0.5, %v5927_v8  ;;  %v18871_v31 = vpop.f32.mrb[185].mxu1  ;;  %v20296_v4 = vld [vmem:[#allocation73_spill] sm:$0xff] }
 0x522   : > { %v5575_v42 = vmul.f32 0.7978846, %v5383_v0  ;;  %v5384_v27 = vadd.f32 %v18823_v32, %v5192_v11  ;;  %v5196_v34 = vmul.f32 0.044715, %v5004_v47  ;;  %v6123_v26 = vmul.f32 0.5, %v5931_v15  ;;  %v18881_v1 = vpop.f32.mrb[186].mxu1 }
 0x523   : > { %v5387_v49 = vadd.f32 %v18834_v20, %v5195_v60  ;;  %v18874_v30 = vpack.c.bf16 %v6316_v17, %v6312_v25  ;;  %v6311_v6 = vmul.f32 %v18540_v58, %v6119_v5  ;;  %v18879_v39 = vadd.f32 %v18664_v40, %v17801_v14  ;;  %v18887_v0 = vpop.f32.mrb[187].mxu1  ;;  %v20299_v15 = vld [vmem:[#allocation58_spill] sm:$0xff] }
 0x524   : > { %v18883_v50 = vpop.eup %13726  ;;  %13734 = vtanh.f32 %v5575_v42  ;;  %v5576_v22 = vmul.f32 0.7978846, %v5384_v27  ;;  %v5388_v10 = vadd.f32 %v18845_v33, %v5196_v34  ;;  %v6315_v8 = vmul.f32 %v20296_v4, %v6123_v26  ;;  %20297 = vst [vmem:[#allocation73_spill] sm:$0xff] %v18887_v0  ;;  %v20300_v27 = vld [vmem:[#allocation40_spill] sm:$0xff] }
 0x525   : > { %20295 = vst [vmem:[#allocation85_spill] sm:$0xff] %v18874_v30  ;;  %v5579_v25 = vmul.f32 0.7978846, %v5387_v49  ;;  %8368 = vmatprep.mubr.bf16.mxu0 %v18874_v30  ;;  %v4815_v58 = vmul.f32 %v18879_v39, %v18879_v39  ;;  %v18894_v40 = vadd.f32 %v18667_v57, %v17806_v51  ;;  %v18898_v5 = vadd.f32 %v18675_v48, %v17801_v14 }
 0x526   : > { %v18900_v17 = vpop.eup %13728  ;;  %13736 = vtanh.f32 %v5576_v22  ;;  %v5580_v26 = vmul.f32 0.7978846, %v5388_v10  ;;  %v18902_v11 = vpack.c.bf16 %v6315_v8, %v6311_v6  ;;  %v18906_v47 = vadd.f32 %v18681_v54, %v17806_v51 }
 0x527   : > { %8795 = vmatmul.mubr.bf16.gmra.mrb[196].mxu1 %v20299_v15  ;;  %v18909_v60 = vpop.eup %13730  ;;  %13738 = vtanh.f32 %v5579_v25  ;;  %v5007_v57 = vmul.f32 %v18879_v39, %v4815_v58  ;;  %v4816_v48 = vmul.f32 %v18894_v40, %v18894_v40  ;;  %v4819_v42 = vmul.f32 %v18898_v5, %v18898_v5 }
 0x528   : > { %20298 = vst [vmem:[#allocation86_spill] sm:$0xff] %v18902_v11  ;;  %8804 = vmatprep.mubr.bf16.mxu1 %v20300_v27  ;;  %v18917_v34 = vpop.eup %13732  ;;  %13740 = vtanh.f32 %v5580_v26  ;;  %8369 = vmatmul.mubr.bf16.gmra.mrb[148].mxu0 %v18902_v11  ;;  %v4820_v54 = vmul.f32 %v18906_v47, %v18906_v47  ;;  %v5936_v49 = vadd.f32 1.0, %v18759_v24  ;;  %v5940_v6 = vadd.f32 1.0, %v18782_v28  ;;  %v18927_v25 = vpop.f32.mrb[188].mxu1 }
 0x529   : > { %v5199_v22 = vmul.f32 0.044715, %v5007_v57  ;;  %v5008_v10 = vmul.f32 %v18894_v40, %v4816_v48  ;;  %v5011_v4 = vmul.f32 %v18898_v5, %v4819_v42  ;;  %v5935_v8 = vadd.f32 1.0, %v18738_v3  ;;  %20301 = vst [vmem:[#allocation87_spill] sm:$0xff] %v18927_v25  ;;  %v18931_v11 = vpop.f32.mrb[189].mxu1 }
 0x52a   : > { %v5012_v58 = vmul.f32 %v18906_v47, %v4820_v54  ;;  %v6128_v26 = vmul.f32 0.5, %v5936_v49  ;;  %v6132_v27 = vmul.f32 0.5, %v5940_v6  ;;  %v5939_v15 = vadd.f32 1.0, %v18774_v21  ;;  %v18934_v48 = vpop.f32.mrb[190].mxu1 }
 0x52b   : > { %v5391_v24 = vadd.f32 %v18879_v39, %v5199_v22  ;;  %v5200_v28 = vmul.f32 0.044715, %v5008_v10  ;;  %v5203_v57 = vmul.f32 0.044715, %v5011_v4  ;;  %v6127_v30 = vmul.f32 0.5, %v5935_v8  ;;  %v18938_v54 = vpop.f32.mrb[191].mxu1 }
 0x52c   : > { %v5204_v42 = vmul.f32 0.044715, %v5012_v58  ;;  %v6320_v3 = vmul.f32 %v18620_v19, %v6128_v26  ;;  %v6324_v25 = vmul.f32 %v18642_v7, %v6132_v27  ;;  %v6131_v0 = vmul.f32 0.5, %v5939_v15  ;;  %v20302_v15 = vld [vmem:[#allocation21_spill] sm:$0xff] }
 0x52d   : > { %v5583_v49 = vmul.f32 0.7978846, %v5391_v24  ;;  %v5392_v21 = vadd.f32 %v18894_v40, %v5200_v28  ;;  %v5395_v6 = vadd.f32 %v18898_v5, %v5203_v57  ;;  %v6319_v22 = vmul.f32 %v18600_v46, %v6127_v30  ;;  %v20303_v30 = vld [vmem:[#allocation59_spill] sm:$0xff] }
 0x52e   : > { %v18943_v10 = vpop.eup %13734  ;;  %v5396_v4 = vadd.f32 %v18906_v47, %v5204_v42  ;;  %v18946_v8 = vpack.c.bf16 %v6324_v25, %v6320_v3  ;;  %v6323_v19 = vmul.f32 %v18632_v29, %v6131_v0  ;;  %v18951_v7 = vadd.f32 %v18722_v62, %v17801_v14 }
 0x52f   : > { %8805 = vmatmul.mubr.bf16.gmra.mrb[200].mxu1 %v20302_v15  ;;  %13742 = vtanh.f32 %v5583_v49  ;;  %v5584_v27 = vmul.f32 0.7978846, %v5392_v21  ;;  %v5587_v58 = vmul.f32 0.7978846, %v5395_v6  ;;  %v18956_v46 = vadd.f32 %v18727_v53, %v17806_v51 }
 0x530   : > { %8814 = vmatprep.mubr.bf16.mxu1 %v20303_v30  ;;  %v18959_v26 = vpop.eup %13736  ;;  %v5588_v25 = vmul.f32 0.7978846, %v5396_v4  ;;  %8378 = vmatprep.mubr.bf16.mxu0 %v18946_v8  ;;  %v18962_v29 = vpack.c.bf16 %v6323_v19, %v6319_v22  ;;  %v4823_v62 = vmul.f32 %v18951_v7, %v18951_v7  ;;  %v18968_v0 = vadd.f32 %v18731_v52, %v17801_v14 }
 0x531   : > { %v18970_v24 = vpop.eup %13738  ;;  %13744 = vtanh.f32 %v5584_v27  ;;  %v4824_v53 = vmul.f32 %v18956_v46, %v18956_v46  ;;  %v18976_v28 = vadd.f32 %v18734_v38, %v17806_v51  ;;  %v5944_v57 = vadd.f32 1.0, %v18827_v61 }
 0x532   : > { %v18979_v42 = vpop.eup %13740  ;;  %13746 = vtanh.f32 %v5587_v58  ;;  %8379 = vmatmul.mubr.bf16.gmra.mrb[152].mxu0 %v18962_v29  ;;  %v5015_v52 = vmul.f32 %v18951_v7, %v4823_v62  ;;  %v4827_v3 = vmul.f32 %v18968_v0, %v18968_v0  ;;  %v5948_v49 = vadd.f32 1.0, %v18849_v36 }
 0x533   : > { %13748 = vtanh.f32 %v5588_v25  ;;  %v5016_v21 = vmul.f32 %v18956_v46, %v4824_v53  ;;  %v4828_v38 = vmul.f32 %v18976_v28, %v18976_v28  ;;  %v6136_v6 = vmul.f32 0.5, %v5944_v57  ;;  %v20304_v57 = vld [vmem:[#allocation47_spill] sm:$0xff] }
 0x534   : > { %v5207_v61 = vmul.f32 0.044715, %v5015_v52  ;;  %v5019_v22 = vmul.f32 %v18968_v0, %v4827_v3  ;;  %v6140_v4 = vmul.f32 0.5, %v5948_v49  ;;  %v5943_v19 = vadd.f32 1.0, %v18810_v2 }
 0x535   : > { %v5208_v27 = vmul.f32 0.044715, %v5016_v21  ;;  %v5020_v58 = vmul.f32 %v18976_v28, %v4828_v38  ;;  %v6328_v62 = vmul.f32 %v18690_v44, %v6136_v6  ;;  %v5947_v36 = vadd.f32 1.0, %v18838_v13  ;;  %v20305_v21 = vld [vmem:[#allocation16_spill] sm:$0xff] }
 0x536   : > { %v5399_v25 = vadd.f32 %v18951_v7, %v5207_v61  ;;  %v5211_v53 = vmul.f32 0.044715, %v5019_v22  ;;  %v6332_v30 = vmul.f32 %v18703_v12, %v6140_v4  ;;  %v6135_v15 = vmul.f32 0.5, %v5943_v19 }
 0x537   : > { %8815 = vmatmul.mubr.bf16.gmra.mrb[204].mxu1 %v20304_v57  ;;  %v5400_v52 = vadd.f32 %v18956_v46, %v5208_v27  ;;  %v5212_v3 = vmul.f32 0.044715, %v5020_v58  ;;  %v6139_v49 = vmul.f32 0.5, %v5947_v36  ;;  %v19000_v2 = vadd.f32 %v18772_v55, %v17801_v14  ;;  %v20307_v27 = vld [vmem:[#allocation80_spill] sm:$0xff] }
 0x538   : > { %8824 = vmatprep.mubr.bf16.mxu1 %v20305_v21  ;;  %v5591_v44 = vmul.f32 0.7978846, %v5399_v25  ;;  %v5403_v13 = vadd.f32 %v18968_v0, %v5211_v53  ;;  %v19004_v38 = vpack.c.bf16 %v6332_v30, %v6328_v62  ;;  %v6327_v12 = vmul.f32 %v18673_v56, %v6135_v15  ;;  %v20308_v56 = vld [vmem:[#allocation81_spill] sm:$0xff] }
 0x539   : > { %v19007_v6 = vpop.eup %13742  ;;  %v5592_v61 = vmul.f32 0.7978846, %v5400_v52  ;;  %v5404_v22 = vadd.f32 %v18976_v28, %v5212_v3  ;;  %v6331_v4 = vmul.f32 %v18699_v16, %v6139_v49  ;;  %v4831_v55 = vmul.f32 %v19000_v2, %v19000_v2  ;;  %v20310_v3 = vld [vmem:[#allocation82_spill] sm:$0xff] }
 0x53a   : > { %20306 = vst [vmem:[#allocation88_spill] sm:$0xff] %v19004_v38  ;;  %13750 = vtanh.f32 %v5591_v44  ;;  %v5595_v19 = vmul.f32 0.7978846, %v5403_v13  ;;  %8388 = vmatprep.mubr.bf16.mxu0 %v19004_v38  ;;  %v19016_v30 = vadd.f32 %v20307_v27, %v17806_v51  ;;  %v19020_v15 = vadd.f32 %v20308_v56, %v17801_v14  ;;  %v20311_v27 = vld [vmem:[#allocation60_spill] sm:$0xff] }
 0x53b   : > { %v19022_v58 = vpop.eup %13744  ;;  %13752 = vtanh.f32 %v5592_v61  ;;  %v5596_v62 = vmul.f32 0.7978846, %v5404_v22  ;;  %v19024_v16 = vpack.c.bf16 %v6331_v4, %v6327_v12  ;;  %v5023_v36 = vmul.f32 %v19000_v2, %v4831_v55 }
 0x53c   : > { %v19027_v25 = vpop.eup %13746  ;;  %13754 = vtanh.f32 %v5595_v19  ;;  %v4832_v53 = vmul.f32 %v19016_v30, %v19016_v30  ;;  %v4835_v52 = vmul.f32 %v19020_v15, %v19020_v15  ;;  %v19035_v49 = vadd.f32 %v20310_v3, %v17806_v51 }
 0x53d   : > { %20309 = vst [vmem:[#allocation80_spill] sm:$0xff] %v19024_v16  ;;  %v19037_v44 = vpop.eup %13748  ;;  %13756 = vtanh.f32 %v5596_v62  ;;  %8389 = vmatmul.mubr.bf16.gmra.mrb[156].mxu0 %v19024_v16  ;;  %v5215_v13 = vmul.f32 0.044715, %v5023_v36  ;;  %v5952_v12 = vadd.f32 1.0, %v18900_v17  ;;  %v5956_v61 = vadd.f32 1.0, %v18917_v34  ;;  %v20312_v17 = vld [vmem:[#allocation61_spill] sm:$0xff] }
 0x53e   : > { %v5024_v22 = vmul.f32 %v19016_v30, %v4832_v53  ;;  %v5027_v4 = vmul.f32 %v19020_v15, %v4835_v52  ;;  %v4836_v55 = vmul.f32 %v19035_v49, %v19035_v49  ;;  %v5951_v19 = vadd.f32 1.0, %v18883_v50 }
 0x53f   : > { %8825 = vmatmul.mubr.bf16.gmra.mrb[208].mxu1 %v20311_v27  ;;  %v5407_v56 = vadd.f32 %v19000_v2, %v5215_v13  ;;  %v6144_v62 = vmul.f32 0.5, %v5952_v12  ;;  %v6148_v3 = vmul.f32 0.5, %v5956_v61  ;;  %v5955_v36 = vadd.f32 1.0, %v18909_v60 }
 0x540   : > { %8834 = vmatprep.mubr.bf16.mxu1 %v20312_v17  ;;  %v5216_v34 = vmul.f32 0.044715, %v5024_v22  ;;  %v5219_v21 = vmul.f32 0.044715, %v5027_v4  ;;  %v5028_v53 = vmul.f32 %v19035_v49, %v4836_v55  ;;  %v6143_v52 = vmul.f32 0.5, %v5951_v19 }
 0x541   : > { %v5599_v57 = vmul.f32 0.7978846, %v5407_v56  ;;  %v6336_v16 = vmul.f32 %v18757_v59, %v6144_v62  ;;  %v6340_v50 = vmul.f32 %v18770_v37, %v6148_v3  ;;  %v6147_v38 = vmul.f32 0.5, %v5955_v36  ;;  %v20313_v62 = vld [vmem:[#allocation62_spill] sm:$0xff] }
 0x542   : > { %v5408_v27 = vadd.f32 %v19016_v30, %v5216_v34  ;;  %v5411_v13 = vadd.f32 %v19020_v15, %v5219_v21  ;;  %v5220_v12 = vmul.f32 0.044715, %v5028_v53  ;;  %v6335_v60 = vmul.f32 %v18745_v63, %v6143_v52  ;;  %v20314_v34 = vld [vmem:[#allocation63_spill] sm:$0xff] }
 0x543   : > { %13758 = vtanh.f32 %v5599_v57  ;;  %v19057_v61 = vpack.c.bf16 %v6340_v50, %v6336_v16  ;;  %v6339_v22 = vmul.f32 %v18766_v23, %v6147_v38  ;;  %v19062_v4 = vadd.f32 %v18817_v45, %v17801_v14 }
 0x544   : > { %v19064_v59 = vpop.eup %13750  ;;  %v5600_v37 = vmul.f32 0.7978846, %v5408_v27  ;;  %v5603_v55 = vmul.f32 0.7978846, %v5411_v13  ;;  %v5412_v19 = vadd.f32 %v19035_v49, %v5220_v12  ;;  %v19069_v21 = vadd.f32 %v18825_v18, %v17806_v51 }
 0x545   : > { %v19071_v63 = vpop.eup %13752  ;;  %8398 = vmatprep.mubr.bf16.mxu0 %v19057_v61  ;;  %v19074_v57 = vpack.c.bf16 %v6339_v22, %v6335_v60  ;;  %v4839_v23 = vmul.f32 %v19062_v4, %v19062_v4  ;;  %v19080_v45 = vadd.f32 %v18836_v35, %v17801_v14  ;;  %v19084_v38 = vadd.f32 %v18847_v43, %v17806_v51 }
 0x546   : > { %v19086_v16 = vpop.eup %13754  ;;  %13760 = vtanh.f32 %v5600_v37  ;;  %v5604_v18 = vmul.f32 0.7978846, %v5412_v19  ;;  %v4840_v27 = vmul.f32 %v19069_v21, %v19069_v21  ;;  %v5960_v56 = vadd.f32 1.0, %v18959_v26 }
 0x547   : > { %8835 = vmatmul.mubr.bf16.gmra.mrb[212].mxu1 %v20313_v62  ;;  %v19092_v3 = vpop.eup %13756  ;;  %13762 = vtanh.f32 %v5603_v55  ;;  %8399 = vmatmul.mubr.bf16.gmra.mrb[160].mxu0 %v19074_v57  ;;  %v5031_v35 = vmul.f32 %v19062_v4, %v4839_v23  ;;  %v4843_v43 = vmul.f32 %v19080_v45, %v19080_v45  ;;  %v4844_v36 = vmul.f32 %v19084_v38, %v19084_v38 }
 0x548   : > { %8844 = vmatprep.mubr.bf16.mxu1 %v20314_v34  ;;  %13764 = vtanh.f32 %v5604_v18  ;;  %v5032_v26 = vmul.f32 %v19069_v21, %v4840_v27  ;;  %v5964_v53 = vadd.f32 1.0, %v18979_v42  ;;  %v6152_v52 = vmul.f32 0.5, %v5960_v56 }
 0x549   : > { %v5223_v50 = vmul.f32 0.044715, %v5031_v35  ;;  %v5035_v13 = vmul.f32 %v19080_v45, %v4843_v43  ;;  %v5036_v12 = vmul.f32 %v19084_v38, %v4844_v36  ;;  %v5959_v60 = vadd.f32 1.0, %v18943_v10 }
 0x54a   : > { %v5224_v22 = vmul.f32 0.044715, %v5032_v26  ;;  %v6156_v37 = vmul.f32 0.5, %v5964_v53  ;;  %v6344_v55 = vmul.f32 %v18823_v32, %v6152_v52  ;;  %v5963_v19 = vadd.f32 1.0, %v18970_v24 }
 0x54b   : > { %v5415_v23 = vadd.f32 %v19062_v4, %v5223_v50  ;;  %v5227_v18 = vmul.f32 0.044715, %v5035_v13  ;;  %v5228_v27 = vmul.f32 0.044715, %v5036_v12  ;;  %v6151_v34 = vmul.f32 0.5, %v5959_v60  ;;  %v20315_v13 = vld [vmem:[#allocation64_spill] sm:$0xff] }
 0x54c   : > { %v5416_v42 = vadd.f32 %v19069_v21, %v5224_v22  ;;  %v6348_v56 = vmul.f32 %v18845_v33, %v6156_v37  ;;  %v6155_v35 = vmul.f32 0.5, %v5963_v19  ;;  %v19113_v43 = vadd.f32 %v18868_v41, %v17801_v14  ;;  %v20316_v22 = vld [vmem:[#allocation65_spill] sm:$0xff] }
 0x54d   : > { %v19115_v10 = vpop.eup %13758  ;;  %v5607_v36 = vmul.f32 0.7978846, %v5415_v23  ;;  %v5419_v32 = vadd.f32 %v19080_v45, %v5227_v18  ;;  %v5420_v24 = vadd.f32 %v19084_v38, %v5228_v27  ;;  %v6343_v26 = vmul.f32 %v18808_v9, %v6151_v34  ;;  %v20317_v19 = vld [vmem:[#allocation73_spill] sm:$0xff] }
 0x54e   : > { %v5608_v53 = vmul.f32 0.7978846, %v5416_v42  ;;  %v19120_v52 = vpack.c.bf16 %v6348_v56, %v6344_v55  ;;  %v6347_v50 = vmul.f32 %v18834_v20, %v6155_v35  ;;  %v4847_v33 = vmul.f32 %v19113_v43, %v19113_v43 }
 0x54f   : > { %8845 = vmatmul.mubr.bf16.gmra.mrb[216].mxu1 %v20315_v13  ;;  %13766 = vtanh.f32 %v5607_v36  ;;  %v5611_v41 = vmul.f32 0.7978846, %v5419_v32  ;;  %v5612_v12 = vmul.f32 0.7978846, %v5420_v24  ;;  %v19128_v60 = vadd.f32 %v18871_v31, %v17806_v51 }
 0x550   : > { %8854 = vmatprep.mubr.bf16.mxu1 %v20316_v22  ;;  %v19131_v9 = vpop.eup %13760  ;;  %13768 = vtanh.f32 %v5608_v53  ;;  %8408 = vmatprep.mubr.bf16.mxu0 %v19120_v52  ;;  %v19134_v20 = vpack.c.bf16 %v6347_v50, %v6343_v26  ;;  %v5039_v34 = vmul.f32 %v19113_v43, %v4847_v33  ;;  %v19139_v37 = vadd.f32 %v18881_v1, %v17801_v14  ;;  %v20318_v22 = vld [vmem:[#allocation41_spill] sm:$0xff] }
 0x551   : > { %v19141_v55 = vpop.eup %13762  ;;  %13770 = vtanh.f32 %v5611_v41  ;;  %v4848_v31 = vmul.f32 %v19128_v60, %v19128_v60  ;;  %v19147_v23 = vadd.f32 %v20317_v19, %v17806_v51  ;;  %v5968_v18 = vadd.f32 1.0, %v19022_v58 }
 0x552   : > { %v19150_v27 = vpop.eup %13764  ;;  %13772 = vtanh.f32 %v5612_v12  ;;  %8409 = vmatmul.mubr.bf16.gmra.mrb[164].mxu0 %v19134_v20  ;;  %v5231_v42 = vmul.f32 0.044715, %v5039_v34  ;;  %v4851_v1 = vmul.f32 %v19139_v37, %v19139_v37  ;;  %v5972_v56 = vadd.f32 1.0, %v19037_v44 }
 0x553   : > { %v5040_v35 = vmul.f32 %v19128_v60, %v4848_v31  ;;  %v4852_v36 = vmul.f32 %v19147_v23, %v19147_v23  ;;  %v6160_v32 = vmul.f32 0.5, %v5968_v18  ;;  %v5967_v24 = vadd.f32 1.0, %v19007_v6 }
 0x554   : > { %v5423_v58 = vadd.f32 %v19113_v43, %v5231_v42  ;;  %v5043_v26 = vmul.f32 %v19139_v37, %v4851_v1  ;;  %v6164_v53 = vmul.f32 0.5, %v5972_v56  ;;  %v5971_v50 = vadd.f32 1.0, %v19027_v25  ;;  %v20319_v25 = vld [vmem:[#allocation87_spill] sm:$0xff] }
 0x555   : > { %v5232_v33 = vmul.f32 0.044715, %v5040_v35  ;;  %v5044_v41 = vmul.f32 %v19147_v23, %v4852_v36  ;;  %v6352_v44 = vmul.f32 %v18894_v40, %v6160_v32  ;;  %v6159_v12 = vmul.f32 0.5, %v5967_v24  ;;  %v20320_v35 = vld [vmem:[#allocation19_spill] sm:$0xff] }
 0x556   : > { %v5615_v34 = vmul.f32 0.7978846, %v5423_v58  ;;  %v5235_v31 = vmul.f32 0.044715, %v5043_v26  ;;  %v6356_v19 = vmul.f32 %v18906_v47, %v6164_v53  ;;  %v6163_v18 = vmul.f32 0.5, %v5971_v50 }
 0x557   : > { %8855 = vmatmul.mubr.bf16.gmra.mrb[220].mxu1 %v20318_v22  ;;  %v5424_v6 = vadd.f32 %v19128_v60, %v5232_v33  ;;  %v5236_v42 = vmul.f32 0.044715, %v5044_v41  ;;  %v6351_v1 = vmul.f32 %v18879_v39, %v6159_v12  ;;  %v19171_v56 = vadd.f32 %v20319_v25, %v17801_v14 }
 0x558   : > { %8864 = vmatprep.mubr.bf16.mxu1 %v20320_v35  ;;  %13774 = vtanh.f32 %v5615_v34  ;;  %v5427_v40 = vadd.f32 %v19139_v37, %v5235_v31  ;;  %v19175_v36 = vpack.c.bf16 %v6356_v19, %v6352_v44  ;;  %v6355_v47 = vmul.f32 %v18898_v5, %v6163_v18 }
 0x559   : > { %v19178_v32 = vpop.eup %13766  ;;  %v5616_v24 = vmul.f32 0.7978846, %v5424_v6  ;;  %v5428_v58 = vadd.f32 %v19147_v23, %v5236_v42  ;;  %v4855_v39 = vmul.f32 %v19171_v56, %v19171_v56  ;;  %v19185_v26 = vadd.f32 %v18931_v11, %v17806_v51 }
 0x55a   : > { %v13769_v53 = vpop.eup %13768  ;;  %v5619_v50 = vmul.f32 0.7978846, %v5427_v40  ;;  %8418 = vmatprep.mubr.bf16.mxu0 %v19175_v36  ;;  %v19188_v33 = vpack.c.bf16 %v6355_v47, %v6351_v1  ;;  %v19192_v5 = vadd.f32 %v18934_v48, %v17801_v14  ;;  %v19196_v41 = vadd.f32 %v18938_v54, %v17806_v51  ;;  %v20321_v40 = vld [vmem:[#allocation72_spill] sm:$0xff] }
 0x55b   : > { %v19198_v44 = vpop.eup %13770  ;;  %13776 = vtanh.f32 %v5616_v24  ;;  %v5620_v12 = vmul.f32 0.7978846, %v5428_v58  ;;  %v5047_v11 = vmul.f32 %v19171_v56, %v4855_v39  ;;  %v4856_v34 = vmul.f32 %v19185_v26, %v19185_v26  ;;  %v20322_v39 = vld [vmem:[#allocation74_spill] sm:$0xff] }
 0x55c   : > { %v13773_v31 = vpop.eup %13772  ;;  %13778 = vtanh.f32 %v5619_v50  ;;  %8419 = vmatmul.mubr.bf16.gmra.mrb[168].mxu0 %v19188_v33  ;;  %v4859_v14 = vmul.f32 %v19192_v5, %v19192_v5  ;;  %v4860_v51 = vmul.f32 %v19196_v41, %v19196_v41  ;;  %v5976_v48 = vadd.f32 1.0, %v19071_v63 }
 0x55d   : > { %13780 = vtanh.f32 %v5620_v12  ;;  %v5239_v54 = vmul.f32 0.044715, %v5047_v11  ;;  %v5048_v19 = vmul.f32 %v19185_v26, %v4856_v34  ;;  %v5980_v18 = vadd.f32 1.0, %v19092_v3 }
 0x55e   : > { %v5051_v6 = vmul.f32 %v19192_v5, %v4859_v14  ;;  %v5052_v42 = vmul.f32 %v19196_v41, %v4860_v51  ;;  %v6168_v1 = vmul.f32 0.5, %v5976_v48  ;;  %v5975_v25 = vadd.f32 1.0, %v19064_v59 }
 0x55f   : > { %8865 = vmatmul.mubr.bf16.gmra.mrb[224].mxu1 %v20321_v40  ;;  %v5431_v47 = vadd.f32 %v19171_v56, %v5239_v54  ;;  %v5240_v24 = vmul.f32 0.044715, %v5048_v19  ;;  %v6172_v58 = vmul.f32 0.5, %v5980_v18  ;;  %v5979_v63 = vadd.f32 1.0, %v19086_v16 }
 0x560   : > { %8874 = vmatprep.mubr.bf16.mxu1 %v20322_v39  ;;  %v5243_v50 = vmul.f32 0.044715, %v5051_v6  ;;  %v5244_v12 = vmul.f32 0.044715, %v5052_v42  ;;  %v6360_v3 = vmul.f32 %v18956_v46, %v6168_v1  ;;  %v6167_v11 = vmul.f32 0.5, %v5975_v25 }
 0x561   : > { %v5623_v34 = vmul.f32 0.7978846, %v5431_v47  ;;  %v5432_v14 = vadd.f32 %v19185_v26, %v5240_v24  ;;  %v6364_v59 = vmul.f32 %v18976_v28, %v6172_v58  ;;  %v6171_v51 = vmul.f32 0.5, %v5979_v63 }
 0x562   : > { %v13775_v48 = vpop.eup %13774  ;;  %v5435_v54 = vadd.f32 %v19192_v5, %v5243_v50  ;;  %v5436_v19 = vadd.f32 %v19196_v41, %v5244_v12  ;;  %v6359_v16 = vmul.f32 %v18951_v7, %v6167_v11  ;;  %v5984_v18 = vadd.f32 1.0, %v19131_v9 }
 0x563   : > { %13782 = vtanh.f32 %v5623_v34  ;;  %v5624_v6 = vmul.f32 0.7978846, %v5432_v14  ;;  %v19225_v42 = vpack.c.bf16 %v6364_v59, %v6360_v3  ;;  %v6363_v46 = vmul.f32 %v18968_v0, %v6171_v51  ;;  %v20323_v3 = vld [vmem:[#allocation75_spill] sm:$0xff]  ;;  %v20324_v59 = vld [vmem:[#allocation76_spill] sm:$0xff] }
 0x564   : > { %v5627_v1 = vmul.f32 0.7978846, %v5435_v54  ;;  %v5628_v25 = vmul.f32 0.7978846, %v5436_v19  ;;  %v5988_v28 = vadd.f32 1.0, %v19150_v27  ;;  %v6176_v47 = vmul.f32 0.5, %v5984_v18 }
 0x565   : > { %v13777_v24 = vpop.eup %13776  ;;  %13784 = vtanh.f32 %v5624_v6  ;;  %8428 = vmatprep.mubr.bf16.mxu0 %v19225_v42  ;;  %v19230_v58 = vpack.c.bf16 %v6363_v46, %v6359_v16  ;;  %v5983_v7 = vadd.f32 1.0, %v19115_v10  ;;  %v5987_v9 = vadd.f32 1.0, %v19141_v55 }
 0x566   : > { %v13779_v63 = vpop.eup %13778  ;;  %13786 = vtanh.f32 %v5627_v1  ;;  %v6180_v50 = vmul.f32 0.5, %v5988_v28  ;;  %v6368_v0 = vmul.f32 %v19016_v30, %v6176_v47  ;;  %v5992_v12 = vadd.f32 1.0, %v13769_v53 }
 0x567   : > { %8875 = vmatmul.mubr.bf16.gmra.mrb[228].mxu1 %v20323_v3  ;;  %v13781_v27 = vpop.eup %13780  ;;  %13788 = vtanh.f32 %v5628_v25  ;;  %8429 = vmatmul.mubr.bf16.gmra.mrb[172].mxu0 %v19230_v58  ;;  %v6175_v11 = vmul.f32 0.5, %v5983_v7  ;;  %v6179_v34 = vmul.f32 0.5, %v5987_v9  ;;  %v5996_v14 = vadd.f32 1.0, %v13773_v31 }
 0x568   : > { %8884 = vmatprep.mubr.bf16.mxu1 %v20324_v59  ;;  %v6372_v10 = vmul.f32 %v19035_v49, %v6180_v50  ;;  %v6184_v55 = vmul.f32 0.5, %v5992_v12  ;;  %v5991_v51 = vadd.f32 1.0, %v19178_v32  ;;  %v5995_v54 = vadd.f32 1.0, %v19198_v44 }
 0x569   : > { %v6367_v30 = vmul.f32 %v19000_v2, %v6175_v11  ;;  %v6371_v53 = vmul.f32 %v19020_v15, %v6179_v34  ;;  %v6188_v19 = vmul.f32 0.5, %v5996_v14  ;;  %v6000_v16 = vadd.f32 1.0, %v13777_v24  ;;  %v6397_v14 = vld [vmem:[#allocation3] sm:$0xff] }
 0x56a   : > { %v19243_v18 = vpack.c.bf16 %v6372_v10, %v6368_v0  ;;  %v6376_v6 = vmul.f32 %v19069_v21, %v6184_v55  ;;  %v6183_v31 = vmul.f32 0.5, %v5991_v51  ;;  %v6187_v46 = vmul.f32 0.5, %v5995_v54  ;;  %v6398_v10 = vld [vmem:[#allocation3 + $0x8] sm:$0xff] }
 0x56b   : > { %v19246_v1 = vpack.c.bf16 %v6371_v53, %v6367_v30  ;;  %v6380_v49 = vmul.f32 %v19084_v38, %v6188_v19  ;;  %v6004_v25 = vadd.f32 1.0, %v13781_v27  ;;  %v6192_v32 = vmul.f32 0.5, %v6000_v16  ;;  %v20325_v38 = vld [vmem:[#allocation77_spill] sm:$0xff]  ;;  %v6403_v53 = vld [vmem:[#allocation3 + $0x30] sm:$0xff] }
 0x56c   : > { %8438 = vmatprep.mubr.bf16.mxu0 %v19243_v18  ;;  %v6375_v2 = vmul.f32 %v19062_v4, %v6183_v31  ;;  %v6379_v15 = vmul.f32 %v19080_v45, %v6187_v46  ;;  %v5999_v44 = vadd.f32 1.0, %v13775_v48  ;;  %v6003_v28 = vadd.f32 1.0, %v13779_v63  ;;  %v20326_v48 = vld [vmem:[#allocation78_spill] sm:$0xff]  ;;  %v6404_v31 = vld [vmem:[#allocation3 + $0x38] sm:$0xff] }
 0x56d   : > { %v13783_v47 = vpop.eup %13782  ;;  %v19252_v24 = vpack.c.bf16 %v6380_v49, %v6376_v6  ;;  %v6196_v21 = vmul.f32 0.5, %v6004_v25  ;;  %v6384_v4 = vmul.f32 %v19128_v60, %v6192_v32 }
 0x56e   : > { %v19254_v7 = vpack.c.bf16 %v6379_v15, %v6375_v2  ;;  %v6191_v9 = vmul.f32 0.5, %v5999_v44  ;;  %v6195_v50 = vmul.f32 0.5, %v6003_v28  ;;  %v6007_v0 = vadd.f32 1.0, %v13783_v47 }
 0x56f   : > { %8885 = vmatmul.mubr.bf16.gmra.mrb[232].mxu1 %v20325_v38  ;;  %v13785_v12 = vpop.eup %13784  ;;  %8439 = vmatmul.mubr.bf16.gmra.mrb[176].mxu0 %v19246_v1  ;;  %v6388_v45 = vmul.f32 %v19147_v23, %v6196_v21 }
 0x570   : > { %8894 = vmatprep.mubr.bf16.mxu1 %v20326_v48  ;;  %v13787_v63 = vpop.eup %13786  ;;  %8448 = vmatprep.mubr.bf16.mxu0 %v19252_v24  ;;  %v6383_v27 = vmul.f32 %v19113_v43, %v6191_v9  ;;  %v6387_v11 = vmul.f32 %v19139_v37, %v6195_v50  ;;  %v6008_v34 = vadd.f32 1.0, %v13785_v12  ;;  %v6199_v30 = vmul.f32 0.5, %v6007_v0  ;;  %v20327_v9 = vld [vmem:[#allocation79_spill] sm:$0xff] }
 0x571   : > { %v13789_v55 = vpop.eup %13788  ;;  %v19264_v51 = vpack.c.bf16 %v6388_v45, %v6384_v4  ;;  %v6011_v54 = vadd.f32 1.0, %v13787_v63  ;;  %v8240_v60 = vpop.f32.mrb[96].mxu0  ;;  %v20328_v0 = vld [vmem:[#allocation83_spill] sm:$0xff]  ;;  %v6416_v63 = vld [vmem:[#allocation3 + $0x98] sm:$0xff] }
 0x572   : > { %v19266_v23 = vpack.c.bf16 %v6387_v11, %v6383_v27  ;;  %v6012_v19 = vadd.f32 1.0, %v13789_v55  ;;  %v6200_v16 = vmul.f32 0.5, %v6008_v34  ;;  %v8242_v6 = vpop.f32.mrb[97].mxu0  ;;  %v9571_v43 = vadd.f32 %v8240_v60, %v6397_v14  ;;  %v6410_v12 = vld [vmem:[#allocation3 + $0x68] sm:$0xff]  ;;  %v20329_v27 = vld [vmem:[#allocation84_spill] sm:$0xff]  ;;  %v20330_v14 = vld [vmem:[#allocation85_spill] sm:$0xff] }
 0x573   : > { %v6203_v46 = vmul.f32 0.5, %v6011_v54  ;;  %v9572_v49 = vadd.f32 %v8242_v6, %v6398_v10  ;;  %v8244_v37 = vpop.f32.mrb[98].mxu0  ;;  %v6391_v15 = vmul.f32 %v19171_v56, %v6199_v30  ;;  %v6421_v30 = vld [vmem:[#allocation3 + $0xc0] sm:$0xff]  ;;  %v6422_v60 = vld [vmem:[#allocation3 + $0xc8] sm:$0xff] }
 0x574   : > { %v6204_v25 = vmul.f32 0.5, %v6012_v19  ;;  %v9577_v32 = vadd.f32 %v8244_v37, %v6403_v53  ;;  %v8246_v2 = vpop.f32.mrb[99].mxu0  ;;  %9859 = vst [vmem:[#allocation3] sm:$0xff] %v9571_v43  ;;  %v6392_v47 = vmul.f32 %v19185_v26, %v6200_v16  ;;  %v6415_v26 = vld [vmem:[#allocation3 + $0x90] sm:$0xff]  ;;  %v20331_v53 = vld [vmem:[#allocation86_spill] sm:$0xff]  ;;  %v6428_v43 = vld [vmem:[#allocation3 + $0xf8] sm:$0xff] }
 0x575   : > { %v6395_v44 = vmul.f32 %v19192_v5, %v6203_v46  ;;  %9860 = vst [vmem:[#allocation3 + $0x8] sm:$0xff] %v9572_v49  ;;  %v9578_v28 = vadd.f32 %v8246_v2, %v6404_v31  ;;  %v6409_v5 = vld [vmem:[#allocation3 + $0x60] sm:$0xff]  ;;  %v6427_v16 = vld [vmem:[#allocation3 + $0xf0] sm:$0xff] }
 0x576   : > { %v6396_v21 = vmul.f32 %v19196_v41, %v6204_v25  ;;  %9865 = vst [vmem:[#allocation3 + $0x30] sm:$0xff] %v9577_v32  ;;  %v20332_v6 = vld [vmem:[#allocation66_spill] sm:$0xff] }
 0x577   : > { %8895 = vmatmul.mubr.bf16.gmra.mrb[236].mxu1 %v20327_v9  ;;  %8449 = vmatmul.mubr.bf16.gmra.mrb[180].mxu0 %v19254_v7  ;;  %v19274_v50 = vpack.c.bf16 %v6395_v44, %v6391_v15  ;;  %9866 = vst [vmem:[#allocation3 + $0x38] sm:$0xff] %v9578_v28  ;;  %v13358_v15 = vld [vmem:[%s14475_s28 + $0x310] ss:$24 sps:$4 sm:$0xff]   ;;  %v13363_v44 = vld [vmem:[%s14475_s28 + $0x344] ss:$24 sps:$4 sm:$0xff]  }
 0x578   : > { %8904 = vmatprep.mubr.bf16.mxu1 %v20328_v0  ;;  %8458 = vmatprep.mubr.bf16.mxu0 %v19264_v51  ;;  %v19278_v56 = vpack.c.bf16 %v6396_v21, %v6392_v47  ;;  %v20333_v28 = vld [vmem:[#allocation42_spill] sm:$0xff]  ;;  %v20334_v47 = vld [vmem:[#allocation88_spill] sm:$0xff]  ;;  %v20335_v21 = vld [vmem:[#allocation67_spill] sm:$0xff] }
 0x57d   : > { %v8250_v4 = vpop.f32.mrb[100].mxu0 }
 0x57e   : > { %v9583_v45 = vadd.f32 %v8250_v4, %v6409_v5  ;;  %v8252_v41 = vpop.f32.mrb[101].mxu0  ;;  %v13361_v5 = vld [vmem:[%s14475_s28 + $0x340] ss:$24 sps:$4 sm:$0xff]   ;;  %v13366_v4 = vld [vmem:[%s14475_s28 + $0x374] ss:$24 sps:$4 sm:$0xff]  }
 0x57f   : > { %8905 = vmatmul.mubr.bf16.gmra.mrb[240].mxu1 %v20329_v27  ;;  %8459 = vmatmul.mubr.bf16.gmra.mrb[184].mxu0 %v19266_v23  ;;  %v9584_v11 = vadd.f32 %v8252_v41, %v6410_v12  ;;  %v8254_v34 = vpop.f32.mrb[102].mxu0  ;;  %v6433_v12 = vld [vmem:[#allocation3 + $0x120] sm:$0xff]  ;;  %v6439_v41 = vld [vmem:[#allocation3 + $0x150] sm:$0xff] }
 0x580   : > { %8914 = vmatprep.mubr.bf16.mxu1 %v20330_v14  ;;  %8468 = vmatprep.mubr.bf16.mxu0 %v19278_v56  ;;  %9871 = vst [vmem:[#allocation3 + $0x60] sm:$0xff] %v9583_v45  ;;  %v9589_v10 = vadd.f32 %v8254_v34, %v6415_v26  ;;  %v8256_v55 = vpop.f32.mrb[103].mxu0  ;;  %v6434_v26 = vld [vmem:[#allocation3 + $0x128] sm:$0xff]  ;;  %v6440_v34 = vld [vmem:[#allocation3 + $0x158] sm:$0xff] }
 0x581   : > { %9872 = vst [vmem:[#allocation3 + $0x68] sm:$0xff] %v9584_v11  ;;  %v9590_v54 = vadd.f32 %v8256_v55, %v6416_v63 }
 0x582   : > { %9877 = vst [vmem:[#allocation3 + $0x90] sm:$0xff] %v9589_v10  ;;  %v13364_v10 = vld [vmem:[%s14475_s28 + $0x370] ss:$24 sps:$4 sm:$0xff]  }
 0x583   : > { %9878 = vst [vmem:[#allocation3 + $0x98] sm:$0xff] %v9590_v54 }
 0x587   : > { %8915 = vmatmul.mubr.bf16.gmra.mrb[244].mxu1 %v20331_v53  ;;  %8469 = vmatmul.mubr.bf16.gmra.mrb[188].mxu0 %v19274_v50  ;;  %v8260_v19 = vpop.f32.mrb[104].mxu0 }
 0x588   : > { %8924 = vmatprep.mubr.bf16.mxu1 %v18946_v8  ;;  %9057 = vmatprep.mubr.bf16.mxu0 %v20332_v6  ;;  %v9595_v31 = vadd.f32 %v8260_v19, %v6421_v30  ;;  %v8262_v46 = vpop.f32.mrb[105].mxu0  ;;  %v13369_v30 = vld [vmem:[%s14475_s28 + $0x3a4] ss:$24 sps:$4 sm:$0xff]   ;;  %v20336_v6 = vld [vmem:[#allocation80_spill] sm:$0xff] }
 0x589   : > { %v9596_v49 = vadd.f32 %v8262_v46, %v6422_v60  ;;  %v8264_v37 = vpop.f32.mrb[106].mxu0  ;;  %v20338_v46 = vld [vmem:[#allocation68_spill] sm:$0xff] }
 0x58a   : > { %9883 = vst [vmem:[#allocation3 + $0xc0] sm:$0xff] %v9595_v31  ;;  %v9601_v25 = vadd.f32 %v8264_v37, %v6427_v16  ;;  %v8266_v32 = vpop.f32.mrb[107].mxu0  ;;  %v20337_v31 = vld [vmem:[#allocation43_spill] sm:$0xff]  ;;  %v6445_v37 = vld [vmem:[#allocation3 + $0x180] sm:$0xff] }
 0x58b   : > { %9884 = vst [vmem:[#allocation3 + $0xc8] sm:$0xff] %v9596_v49  ;;  %v9602_v2 = vadd.f32 %v8266_v32, %v6428_v43  ;;  %v13367_v43 = vld [vmem:[%s14475_s28 + $0x3a0] ss:$24 sps:$4 sm:$0xff]   ;;  %v13372_v49 = vld [vmem:[%s14475_s28 + $0x3d4] ss:$24 sps:$4 sm:$0xff]  }
 0x58c   : > { %9889 = vst [vmem:[#allocation3 + $0xf0] sm:$0xff] %v9601_v25  ;;  %v6446_v25 = vld [vmem:[#allocation3 + $0x188] sm:$0xff] }
 0x58d   : > { %9890 = vst [vmem:[#allocation3 + $0xf8] sm:$0xff] %v9602_v2  ;;  %v13370_v32 = vld [vmem:[%s14475_s28 + $0x3d0] ss:$24 sps:$4 sm:$0xff]  }
 0x58f   : > { %8925 = vmatmul.mubr.bf16.gmra.mrb[248].mxu1 %v18962_v29  ;;  %9058 = vmatmul.mubr.bf16.vlgmr.msra.gmra.mrb[192].mxu0 %v20333_v28 }
 0x590   : > { %8934 = vmatprep.mubr.bf16.mxu1 %v20334_v47  ;;  %9067 = vmatprep.mubr.bf16.mxu0 %v20335_v21  ;;  %v6452_v21 = vld [vmem:[#allocation3 + $0x1b8] sm:$0xff] }
 0x591   : > { %9299 = vmatpush1.bf16.msra.mxu0 %v13358_v15  ;;  %v6451_v15 = vld [vmem:[#allocation3 + $0x1b0] sm:$0xff] }
 0x592   : > { %9300 = vmatprep.subr.bf16.mxu0 %v13363_v44  ;;  %v8270_v45 = vpop.f32.mrb[108].mxu0 }
 0x593   : > { %v9607_v63 = vadd.f32 %v8270_v45, %v6433_v12  ;;  %v8272_v11 = vpop.f32.mrb[109].mxu0 }
 0x594   : > { %v9608_v55 = vadd.f32 %v8272_v11, %v6434_v26  ;;  %v8274_v54 = vpop.f32.mrb[110].mxu0  ;;  %v20339_v26 = vld [vmem:[#allocation44_spill] sm:$0xff] }
 0x595   : > { %9301 = vmatpush1.bf16.msra.mxu0 %v13361_v5  ;;  %9895 = vst [vmem:[#allocation3 + $0x120] sm:$0xff] %v9607_v63  ;;  %v9613_v60 = vadd.f32 %v8274_v54, %v6439_v41  ;;  %v8276_v19 = vpop.f32.mrb[111].mxu0  ;;  %v13375_v5 = vld [vmem:[%s14475_s28 + $0x404] ss:$24 sps:$4 sm:$0xff]  }
 0x596   : > { %9302 = vmatprep.subr.bf16.mxu0 %v13366_v4  ;;  %9896 = vst [vmem:[#allocation3 + $0x128] sm:$0xff] %v9608_v55  ;;  %v9614_v16 = vadd.f32 %v8276_v19, %v6440_v34  ;;  %v20340_v63 = vld [vmem:[#allocation69_spill] sm:$0xff]  ;;  %v13376_v55 = vld [vmem:[%s14475_s28 + $0x430] ss:$24 sps:$4 sm:$0xff]   ;;  %v6457_v54 = vld [vmem:[#allocation3 + $0x1e0] sm:$0xff] }
 0x597   : > { %8935 = vmatmul.mubr.bf16.gmra.mrb[252].mxu1 %v20336_v6  ;;  %9068 = vmatmul.mubr.bf16.gmra.mrb[196].mxu0 %v20337_v31  ;;  %9901 = vst [vmem:[#allocation3 + $0x150] sm:$0xff] %v9613_v60  ;;  %v13373_v34 = vld [vmem:[%s14475_s28 + $0x400] ss:$24 sps:$4 sm:$0xff]   ;;  %v6458_v60 = vld [vmem:[#allocation3 + $0x1e8] sm:$0xff]  ;;  %v6463_v31 = vld [vmem:[#allocation3 + $0x210] sm:$0xff] }
 0x598   : > { %8944 = vmatprep.mubr.bf16.mxu1 %v19057_v61  ;;  %9077 = vmatprep.mubr.bf16.mxu0 %v20338_v46  ;;  %9902 = vst [vmem:[#allocation3 + $0x158] sm:$0xff] %v9614_v16  ;;  %v20341_v19 = vld [vmem:[#allocation70_spill] sm:$0xff]  ;;  %v20342_v46 = vld [vmem:[#allocation71_spill] sm:$0xff] }
 0x599   : > { %9303 = vmatpush1.bf16.msra.mxu0 %v13364_v10  ;;  %v13378_v10 = vld [vmem:[%s14475_s28 + $0x434] ss:$24 sps:$4 sm:$0xff]  }
 0x59a   : > { %9304 = vmatprep.subr.bf16.mxu0 %v13369_v30  ;;  %v13381_v30 = vld [vmem:[%s14475_s28 + $0x464] ss:$24 sps:$4 sm:$0xff]  }
 0x59c   : > { %v8280_v2 = vpop.f32.mrb[112].mxu0 }
 0x59d   : > { %9305 = vmatpush1.bf16.msra.mxu0 %v13367_v43  ;;  %v9619_v44 = vadd.f32 %v8280_v2, %v6445_v37  ;;  %v8282_v28 = vpop.f32.mrb[113].mxu0  ;;  %v6464_v37 = vld [vmem:[#allocation3 + $0x218] sm:$0xff] }
 0x59e   : > { %9306 = vmatprep.subr.bf16.mxu0 %v13372_v49  ;;  %v9620_v12 = vadd.f32 %v8282_v28, %v6446_v25  ;;  %v8284_v4 = vpop.f32.mrb[114].mxu0  ;;  %v13379_v25 = vld [vmem:[%s14475_s28 + $0x460] ss:$24 sps:$4 sm:$0xff]  }
 0x59f   : > { %8945 = vmatmul.mubr.bf16.gmra.mrb[0].mxu1 %v19074_v57  ;;  %9078 = vmatmul.mubr.bf16.gmra.mrb[200].mxu0 %v20339_v26  ;;  %9907 = vst [vmem:[#allocation3 + $0x180] sm:$0xff] %v9619_v44  ;;  %v9625_v45 = vadd.f32 %v8284_v4, %v6451_v15  ;;  %v8286_v41 = vpop.f32.mrb[115].mxu0  ;;  %v13384_v15 = vld [vmem:[%s14475_s28 + $0x494] ss:$24 sps:$4 sm:$0xff]   ;;  %v20343_v4 = vld [vmem:[#allocation45_spill] sm:$0xff]  ;;  %v6469_v26 = vld [vmem:[#allocation3 + $0x240] sm:$0xff] }
 0x5a0   : > { %8954 = vmatprep.mubr.bf16.mxu1 %v19120_v52  ;;  %9087 = vmatprep.mubr.bf16.mxu0 %v20340_v63  ;;  %9908 = vst [vmem:[#allocation3 + $0x188] sm:$0xff] %v9620_v12  ;;  %v9626_v11 = vadd.f32 %v8286_v41, %v6452_v21  ;;  %v13387_v12 = vld [vmem:[%s14475_s28 + $0x4c4] ss:$24 sps:$4 sm:$0xff]   ;;  %v6470_v41 = vld [vmem:[#allocation3 + $0x248] sm:$0xff]  ;;  %v13385_v63 = vld [vmem:[%s14475_s28 + $0x4c0] ss:$24 sps:$4 sm:$0xff]  }
 0x5a1   : > { %9307 = vmatpush1.bf16.msra.mxu0 %v13370_v32  ;;  %9913 = vst [vmem:[#allocation3 + $0x1b0] sm:$0xff] %v9625_v45  ;;  %v20344_v45 = vld [vmem:[#allocation46_spill] sm:$0xff] }
 0x5a2   : > { %9308 = vmatprep.subr.bf16.mxu0 %v13375_v5  ;;  %9914 = vst [vmem:[#allocation3 + $0x1b8] sm:$0xff] %v9626_v11  ;;  %v13382_v5 = vld [vmem:[%s14475_s28 + $0x490] ss:$24 sps:$4 sm:$0xff]  }
 0x5a5   : > { %9309 = vmatpush1.bf16.msra.mxu0 %v13373_v34  ;;  %v6475_v34 = vld [vmem:[#allocation3 + $0x270] sm:$0xff] }
 0x5a6   : > { %9310 = vmatprep.subr.bf16.mxu0 %v13378_v10  ;;  %v13390_v10 = vld [vmem:[%s14475_s28 + $0x4f4] ss:$24 sps:$4 sm:$0xff]  }
 0x5a7   : > { %8955 = vmatmul.mubr.bf16.gmra.mrb[4].mxu1 %v19134_v20  ;;  %9088 = vmatmul.mubr.bf16.gmra.mrb[204].mxu0 %v20341_v19  ;;  %v8290_v16 = vpop.f32.mrb[116].mxu0 }
 0x5a8   : > { %8964 = vmatprep.mubr.bf16.mxu1 %v19175_v36  ;;  %9097 = vmatprep.mubr.bf16.mxu0 %v20342_v46  ;;  %v9631_v43 = vadd.f32 %v8290_v16, %v6457_v54  ;;  %v8292_v49 = vpop.f32.mrb[117].mxu0  ;;  %v13388_v46 = vld [vmem:[%s14475_s28 + $0x4f0] ss:$24 sps:$4 sm:$0xff]  }
 0x5a9   : > { %9311 = vmatpush1.bf16.msra.mxu0 %v13376_v55  ;;  %v9632_v32 = vadd.f32 %v8292_v49, %v6458_v60  ;;  %v8294_v2 = vpop.f32.mrb[118].mxu0  ;;  %v13393_v49 = vld [vmem:[%s14475_s28 + $0x524] ss:$24 sps:$4 sm:$0xff]  }
 0x5aa   : > { %9312 = vmatprep.subr.bf16.mxu0 %v13381_v30  ;;  %9919 = vst [vmem:[#allocation3 + $0x1e0] sm:$0xff] %v9631_v43  ;;  %v9637_v44 = vadd.f32 %v8294_v2, %v6463_v31  ;;  %v8296_v28 = vpop.f32.mrb[119].mxu0  ;;  %v6476_v30 = vld [vmem:[#allocation3 + $0x278] sm:$0xff]  ;;  %v13396_v2 = vld [vmem:[%s14475_s28 + $0x554] ss:$24 sps:$4 sm:$0xff]  }
 0x5ab   : > { %9920 = vst [vmem:[#allocation3 + $0x1e8] sm:$0xff] %v9632_v32  ;;  %v9638_v21 = vadd.f32 %v8296_v28, %v6464_v37  ;;  %v20345_v37 = vld [vmem:[#allocation48_spill] sm:$0xff]  ;;  %v13391_v32 = vld [vmem:[%s14475_s28 + $0x520] ss:$24 sps:$4 sm:$0xff]  }
 0x5ac   : > { %9925 = vst [vmem:[#allocation3 + $0x210] sm:$0xff] %v9637_v44  ;;  %v6482_v44 = vld [vmem:[#allocation3 + $0x2a8] sm:$0xff] }
 0x5ad   : > { %9313 = vmatpush1.bf16.msra.mxu0 %v13379_v25  ;;  %9926 = vst [vmem:[#allocation3 + $0x218] sm:$0xff] %v9638_v21  ;;  %v20346_v25 = vld [vmem:[#allocation6_spill] sm:$0xff]  ;;  %v6487_v21 = vld [vmem:[#allocation3 + $0x2d0] sm:$0xff] }
 0x5ae   : > { %9314 = vmatprep.subr.bf16.mxu0 %v13384_v15  ;;  %v6481_v15 = vld [vmem:[#allocation3 + $0x2a0] sm:$0xff] }
 0x5af   : > { %8965 = vmatmul.mubr.bf16.gmra.mrb[8].mxu1 %v19188_v33  ;;  %9098 = vmatmul.mubr.bf16.gmra.mrb[208].mxu0 %v20343_v4 }
 0x5b0   : > { %8974 = vmatprep.mubr.bf16.mxu1 %v19225_v42  ;;  %9107 = vmatprep.mubr.bf16.mxu0 %v20344_v45  ;;  %v13399_v45 = vld [vmem:[%s14475_s28 + $0x584] ss:$24 sps:$4 sm:$0xff]  }
 0x5b1   : > { %9315 = vmatpush1.bf16.msra.mxu0 %v13382_v5  ;;  %v8300_v11 = vpop.f32.mrb[120].mxu0  ;;  %v13394_v5 = vld [vmem:[%s14475_s28 + $0x550] ss:$24 sps:$4 sm:$0xff]  }
 0x5b2   : > { %9316 = vmatprep.subr.bf16.mxu0 %v13387_v12  ;;  %v9643_v55 = vadd.f32 %v8300_v11, %v6469_v26  ;;  %v8302_v54 = vpop.f32.mrb[121].mxu0  ;;  %v6488_v26 = vld [vmem:[#allocation3 + $0x2d8] sm:$0xff]  ;;  %v20347_v11 = vld [vmem:[#allocation7_spill] sm:$0xff] }
 0x5b3   : > { %v9644_v60 = vadd.f32 %v8302_v54, %v6470_v41  ;;  %v8304_v19 = vpop.f32.mrb[122].mxu0 }
 0x5b4   : > { %9931 = vst [vmem:[#allocation3 + $0x240] sm:$0xff] %v9643_v55  ;;  %v9649_v16 = vadd.f32 %v8304_v19, %v6475_v34  ;;  %v8306_v31 = vpop.f32.mrb[123].mxu0  ;;  %v20348_v55 = vld [vmem:[#allocation51_spill] sm:$0xff]  ;;  %v6493_v19 = vld [vmem:[#allocation3 + $0x300] sm:$0xff] }
 0x5b5   : > { %9317 = vmatpush1.bf16.msra.mxu0 %v13385_v63  ;;  %9932 = vst [vmem:[#allocation3 + $0x248] sm:$0xff] %v9644_v60  ;;  %v9650_v43 = vadd.f32 %v8306_v31, %v6476_v30  ;;  %v13397_v30 = vld [vmem:[%s14475_s28 + $0x580] ss:$24 sps:$4 sm:$0xff]   ;;  %v13402_v60 = vld [vmem:[%s14475_s28 + $0x5b4] ss:$24 sps:$4 sm:$0xff]  }
 0x5b6   : > { %9318 = vmatprep.subr.bf16.mxu0 %v13390_v10  ;;  %9937 = vst [vmem:[#allocation3 + $0x270] sm:$0xff] %v9649_v16  ;;  %v13400_v16 = vld [vmem:[%s14475_s28 + $0x5b0] ss:$24 sps:$4 sm:$0xff]  }
 0x5b7   : > { %8975 = vmatmul.mubr.bf16.gmra.mrb[12].mxu1 %v19230_v58  ;;  %9108 = vmatmul.mubr.bf16.gmra.mrb[212].mxu0 %v20345_v37  ;;  %9938 = vst [vmem:[#allocation3 + $0x278] sm:$0xff] %v9650_v43  ;;  %v6494_v31 = vld [vmem:[#allocation3 + $0x308] sm:$0xff]  ;;  %v6499_v43 = vld [vmem:[#allocation3 + $0x330] sm:$0xff]  ;;  %v20349_v37 = vld [vmem:[#allocation9_spill] sm:$0xff] }
 0x5b8   : > { %8984 = vmatprep.mubr.bf16.mxu1 %v19243_v18  ;;  %9117 = vmatprep.mubr.bf16.mxu0 %v20346_v25 }
 0x5b9   : > { %9319 = vmatpush1.bf16.msra.mxu0 %v13388_v46 }
 0x5ba   : > { %9320 = vmatprep.subr.bf16.mxu0 %v13393_v49  ;;  %v13405_v49 = vld [vmem:[%s14475_s28 + $0x5e4] ss:$24 sps:$4 sm:$0xff]  }
 0x5bc   : > { %v8310_v28 = vpop.f32.mrb[124].mxu0 }
 0x5bd   : > { %9321 = vmatpush1.bf16.msra.mxu0 %v13391_v32  ;;  %v9655_v12 = vadd.f32 %v8310_v28, %v6481_v15  ;;  %v8312_v4 = vpop.f32.mrb[125].mxu0  ;;  %v20350_v15 = vld [vmem:[#allocation8_spill] sm:$0xff] }
 0x5be   : > { %9322 = vmatprep.subr.bf16.mxu0 %v13396_v2  ;;  %v9656_v41 = vadd.f32 %v8312_v4, %v6482_v44  ;;  %v8314_v63 = vpop.f32.mrb[126].mxu0  ;;  %v6500_v2 = vld [vmem:[#allocation3 + $0x338] sm:$0xff] }
 0x5bf   : > { %8985 = vmatmul.mubr.bf16.gmra.mrb[16].mxu1 %v19246_v1  ;;  %9118 = vmatmul.mubr.bf16.gmra.mrb[216].mxu0 %v20347_v11  ;;  %9943 = vst [vmem:[#allocation3 + $0x2a0] sm:$0xff] %v9655_v12  ;;  %v9661_v34 = vadd.f32 %v8314_v63, %v6487_v21  ;;  %v8316_v10 = vpop.f32.mrb[127].mxu0  ;;  %v13403_v21 = vld [vmem:[%s14475_s28 + $0x5e0] ss:$24 sps:$4 sm:$0xff]   ;;  %v6506_v63 = vld [vmem:[#allocation3 + $0x368] sm:$0xff] }
 0x5c0   : > { %8994 = vmatprep.mubr.bf16.mxu1 %v19252_v24  ;;  %9127 = vmatprep.mubr.bf16.mxu0 %v20348_v55  ;;  %9944 = vst [vmem:[#allocation3 + $0x2a8] sm:$0xff] %v9656_v41  ;;  %v9662_v54 = vadd.f32 %v8316_v10, %v6488_v26  ;;  %v20351_v26 = vld [vmem:[#allocation52_spill] sm:$0xff]  ;;  %v20352_v41 = vld [vmem:[#allocation53_spill] sm:$0xff] }
 0x5c1   : > { %9323 = vmatpush1.bf16.msra.mxu0 %v13394_v5  ;;  %9949 = vst [vmem:[#allocation3 + $0x2d0] sm:$0xff] %v9661_v34  ;;  %v6511_v34 = vld [vmem:[#allocation3 + $0x390] sm:$0xff] }
 0x5c2   : > { %9324 = vmatprep.subr.bf16.mxu0 %v13399_v45  ;;  %9950 = vst [vmem:[#allocation3 + $0x2d8] sm:$0xff] %v9662_v54  ;;  %v6505_v45 = vld [vmem:[#allocation3 + $0x360] sm:$0xff]  ;;  %v6512_v54 = vld [vmem:[#allocation3 + $0x398] sm:$0xff] }
 0x5c5   : > { %9325 = vmatpush1.bf16.msra.mxu0 %v13397_v30 }
 0x5c6   : > { %9326 = vmatprep.subr.bf16.mxu0 %v13402_v60  ;;  %v8320_v46 = vpop.f32.mrb[128].mxu0 }
 0x5c7   : > { %8995 = vmatmul.mubr.bf16.gmra.mrb[20].mxu1 %v19254_v7  ;;  %9128 = vmatmul.mubr.bf16.gmra.mrb[220].mxu0 %v20349_v37  ;;  %v9667_v25 = vadd.f32 %v8320_v46, %v6493_v19  ;;  %v8322_v32 = vpop.f32.mrb[129].mxu0  ;;  %v20353_v46 = vld [vmem:[#allocation10_spill] sm:$0xff]  ;;  %v6518_v37 = vld [vmem:[#allocation3 + $0x3c8] sm:$0xff] }
 0x5c8   : > { %9004 = vmatprep.mubr.bf16.mxu1 %v19264_v51  ;;  %9137 = vmatprep.mubr.bf16.mxu0 %v20350_v15  ;;  %v9668_v44 = vadd.f32 %v8322_v32, %v6494_v31  ;;  %v8324_v28 = vpop.f32.mrb[130].mxu0  ;;  %v6523_v32 = vld [vmem:[#allocation3 + $0x3f0] sm:$0xff] }
 0x5c9   : > { %9327 = vmatpush1.bf16.msra.mxu0 %v13400_v16  ;;  %9955 = vst [vmem:[#allocation3 + $0x300] sm:$0xff] %v9667_v25  ;;  %v9673_v5 = vadd.f32 %v8324_v28, %v6499_v43  ;;  %v8326_v12 = vpop.f32.mrb[131].mxu0  ;;  %v20354_v43 = vld [vmem:[#allocation11_spill] sm:$0xff] }
 0x5ca   : > { %9328 = vmatprep.subr.bf16.mxu0 %v13405_v49  ;;  %9956 = vst [vmem:[#allocation3 + $0x308] sm:$0xff] %v9668_v44  ;;  %v9674_v4 = vadd.f32 %v8326_v12, %v6500_v2  ;;  %v6517_v49 = vld [vmem:[#allocation3 + $0x3c0] sm:$0xff]  ;;  %v6524_v44 = vld [vmem:[#allocation3 + $0x3f8] sm:$0xff] }
 0x5cb   : > { %9961 = vst [vmem:[#allocation3 + $0x330] sm:$0xff] %v9673_v5 }
 0x5cc   : > { %9962 = vst [vmem:[#allocation3 + $0x338] sm:$0xff] %v9674_v4  ;;  %v20355_v4 = vld [vmem:[#allocation12_spill] sm:$0xff] }
 0x5cd   : > { %9329 = vmatpush1.bf16.msra.mxu0 %v13403_v21 }
 0x5cf   : > { %9005 = vmatmul.mubr.bf16.gmra.mrb[24].mxu1 %v19266_v23  ;;  %9138 = vmatmul.mubr.bf16.gmra.mrb[224].mxu0 %v20351_v26 }
 0x5d0   : > { %9014 = vmatprep.mubr.bf16.mxu1 %v19278_v56  ;;  %9147 = vmatprep.mubr.bf16.mxu0 %v20352_v41  ;;  %v6529_v41 = vld [vmem:[#allocation3 + $0x420] sm:$0xff] }
 0x5d1   : > { %v8330_v11 = vpop.f32.mrb[132].mxu0 }
 0x5d2   : > { %v9679_v10 = vadd.f32 %v8330_v11, %v6505_v45  ;;  %v8332_v55 = vpop.f32.mrb[133].mxu0  ;;  %v20356_v45 = vld [vmem:[#allocation14_spill] sm:$0xff] }
 0x5d3   : > { %v9680_v30 = vadd.f32 %v8332_v55, %v6506_v63  ;;  %v8334_v60 = vpop.f32.mrb[134].mxu0  ;;  %v6530_v63 = vld [vmem:[#allocation3 + $0x428] sm:$0xff] }
 0x5d4   : > { %9967 = vst [vmem:[#allocation3 + $0x360] sm:$0xff] %v9679_v10  ;;  %v9685_v19 = vadd.f32 %v8334_v60, %v6511_v34  ;;  %v8336_v16 = vpop.f32.mrb[135].mxu0  ;;  %v6535_v34 = vld [vmem:[#allocation3 + $0x450] sm:$0xff]  ;;  %v20357_v10 = vld [vmem:[#allocation15_spill] sm:$0xff]  ;;  %v20358_v60 = vld [vmem:[#allocation17_spill] sm:$0xff] }
 0x5d5   : > { %9968 = vst [vmem:[#allocation3 + $0x368] sm:$0xff] %v9680_v30  ;;  %v9686_v31 = vadd.f32 %v8336_v16, %v6512_v54  ;;  %v6536_v30 = vld [vmem:[#allocation3 + $0x458] sm:$0xff] }
 0x5d6   : > { %9973 = vst [vmem:[#allocation3 + $0x390] sm:$0xff] %v9685_v19 }
 0x5d7   : > { %9015 = vmatmul.mubr.bf16.gmra.mrb[28].mxu1 %v19274_v50  ;;  %9148 = vmatmul.mubr.bf16.gmra.mrb[228].mxu0 %v20353_v46  ;;  %9974 = vst [vmem:[#allocation3 + $0x398] sm:$0xff] %v9686_v31 }
 0x5d8   : > { %9157 = vmatprep.mubr.bf16.mxu0 %v20354_v43 }
 0x5db   : > { %v8340_v25 = vpop.f32.mrb[136].mxu0 }
 0x5dc   : > { %v9691_v2 = vadd.f32 %v8340_v25, %v6517_v49  ;;  %v8342_v15 = vpop.f32.mrb[137].mxu0  ;;  %v6541_v49 = vld [vmem:[#allocation3 + $0x480] sm:$0xff]  ;;  %v6542_v25 = vld [vmem:[#allocation3 + $0x488] sm:$0xff] }
 0x5dd   : > { %v9692_v28 = vadd.f32 %v8342_v15, %v6518_v37  ;;  %v8344_v21 = vpop.f32.mrb[138].mxu0  ;;  %v20359_v37 = vld [vmem:[#allocation20_spill] sm:$0xff] }
 0x5de   : > { %9979 = vst [vmem:[#allocation3 + $0x3c0] sm:$0xff] %v9691_v2  ;;  %v9697_v5 = vadd.f32 %v8344_v21, %v6523_v32  ;;  %v8346_v12 = vpop.f32.mrb[139].mxu0  ;;  %v6399_v32 = vld [vmem:[#allocation3 + $0x10] sm:$0xff]  ;;  %v20360_v2 = vld [vmem:[#allocation22_spill] sm:$0xff] }
 0x5df   : > { %9158 = vmatmul.mubr.bf16.gmra.mrb[232].mxu0 %v20355_v4  ;;  %9980 = vst [vmem:[#allocation3 + $0x3c8] sm:$0xff] %v9692_v28  ;;  %v9698_v26 = vadd.f32 %v8346_v12, %v6524_v44  ;;  %v6547_v44 = vld [vmem:[#allocation3 + $0x4b0] sm:$0xff]  ;;  %v6400_v28 = vld [vmem:[#allocation3 + $0x18] sm:$0xff] }
 0x5e0   : > { %9167 = vmatprep.mubr.bf16.mxu0 %v20356_v45  ;;  %9985 = vst [vmem:[#allocation3 + $0x3f0] sm:$0xff] %v9697_v5  ;;  %v6548_v12 = vld [vmem:[#allocation3 + $0x4b8] sm:$0xff] }
 0x5e1   : > { %9986 = vst [vmem:[#allocation3 + $0x3f8] sm:$0xff] %v9698_v26  ;;  %v6405_v26 = vld [vmem:[#allocation3 + $0x40] sm:$0xff] }
 0x5e6   : > { %v8350_v11 = vpop.f32.mrb[140].mxu0 }
 0x5e7   : > { %9168 = vmatmul.mubr.bf16.gmra.mrb[236].mxu0 %v20357_v10  ;;  %v9703_v55 = vadd.f32 %v8350_v11, %v6529_v41  ;;  %v8352_v54 = vpop.f32.mrb[141].mxu0 }
 0x5e8   : > { %9177 = vmatprep.mubr.bf16.mxu0 %v20358_v60  ;;  %v9704_v19 = vadd.f32 %v8352_v54, %v6530_v63  ;;  %v8354_v16 = vpop.f32.mrb[142].mxu0 }
 0x5e9   : > { %9991 = vst [vmem:[#allocation3 + $0x420] sm:$0xff] %v9703_v55  ;;  %v9709_v31 = vadd.f32 %v8354_v16, %v6535_v34  ;;  %v8356_v46 = vpop.f32.mrb[143].mxu0  ;;  %v6406_v34 = vld [vmem:[#allocation3 + $0x48] sm:$0xff] }
 0x5ea   : > { %9992 = vst [vmem:[#allocation3 + $0x428] sm:$0xff] %v9704_v19  ;;  %v9710_v43 = vadd.f32 %v8356_v46, %v6536_v30  ;;  %v20361_v46 = vld [vmem:[#allocation23_spill] sm:$0xff] }
 0x5eb   : > { %9997 = vst [vmem:[#allocation3 + $0x450] sm:$0xff] %v9709_v31 }
 0x5ec   : > { %9998 = vst [vmem:[#allocation3 + $0x458] sm:$0xff] %v9710_v43  ;;  %v6411_v43 = vld [vmem:[#allocation3 + $0x70] sm:$0xff] }
 0x5ef   : > { %9178 = vmatmul.mubr.bf16.gmra.mrb[240].mxu0 %v20359_v37  ;;  %v6412_v37 = vld [vmem:[#allocation3 + $0x78] sm:$0xff] }
 0x5f0   : > { %9187 = vmatprep.mubr.bf16.mxu0 %v20360_v2  ;;  %v8360_v15 = vpop.f32.mrb[144].mxu0  ;;  %v6417_v2 = vld [vmem:[#allocation3 + $0xa0] sm:$0xff] }
 0x5f1   : > { %v9715_v21 = vadd.f32 %v8360_v15, %v6541_v49  ;;  %v8362_v5 = vpop.f32.mrb[145].mxu0  ;;  %v20362_v49 = vld [vmem:[#allocation24_spill] sm:$0xff]  ;;  %v6554_v15 = vld [vmem:[#allocation3 + $0x4e8] sm:$0xff] }
 0x5f2   : > { %v8786_v4 = vpop.f32.mrb[192].mxu1  ;;  %v9716_v45 = vadd.f32 %v8362_v5, %v6542_v25  ;;  %v8364_v41 = vpop.f32.mrb[146].mxu0  ;;  %v6553_v25 = vld [vmem:[#allocation3 + $0x4e0] sm:$0xff] }
 0x5f3   : > { %v9573_v63 = vadd.f32 %v8786_v4, %v6399_v32  ;;  %v8788_v11 = vpop.f32.mrb[193].mxu1  ;;  %10003 = vst [vmem:[#allocation3 + $0x480] sm:$0xff] %v9715_v21  ;;  %v9721_v10 = vadd.f32 %v8364_v41, %v6547_v44  ;;  %v8366_v55 = vpop.f32.mrb[147].mxu0  ;;  %v6418_v21 = vld [vmem:[#allocation3 + $0xa8] sm:$0xff] }
 0x5f4   : > { %v9574_v54 = vadd.f32 %v8788_v11, %v6400_v28  ;;  %v8790_v30 = vpop.f32.mrb[194].mxu1  ;;  %10004 = vst [vmem:[#allocation3 + $0x488] sm:$0xff] %v9716_v45  ;;  %v9722_v60 = vadd.f32 %v8366_v55, %v6548_v12  ;;  %v6559_v12 = vld [vmem:[#allocation3 + $0x510] sm:$0xff] }
 0x5f5   : > { %9861 = vst [vmem:[#allocation3 + $0x10] sm:$0xff] %v9573_v63  ;;  %v9579_v19 = vadd.f32 %v8790_v30, %v6405_v26  ;;  %v8792_v16 = vpop.f32.mrb[195].mxu1  ;;  %10009 = vst [vmem:[#allocation3 + $0x4b0] sm:$0xff] %v9721_v10  ;;  %v6560_v63 = vld [vmem:[#allocation3 + $0x518] sm:$0xff] }
 0x5f6   : > { %9862 = vst [vmem:[#allocation3 + $0x18] sm:$0xff] %v9574_v54  ;;  %v9580_v31 = vadd.f32 %v8792_v16, %v6406_v34  ;;  %10010 = vst [vmem:[#allocation3 + $0x4b8] sm:$0xff] %v9722_v60 }
 0x5f7   : > { %9867 = vst [vmem:[#allocation3 + $0x40] sm:$0xff] %v9579_v19  ;;  %9188 = vmatmul.mubr.bf16.gmra.mrb[244].mxu0 %v20361_v46  ;;  %v20363_v19 = vld [vmem:[#allocation50_spill] sm:$0xff]  ;;  %v20364_v46 = vld [vmem:[#allocation49_spill] sm:$0xff] }
 0x5f8   : > { %9868 = vst [vmem:[#allocation3 + $0x48] sm:$0xff] %v9580_v31  ;;  %9197 = vmatprep.mubr.bf16.mxu0 %v20362_v49  ;;  %v6423_v31 = vld [vmem:[#allocation3 + $0xd0] sm:$0xff] }
 0x5fa   : > { %v8796_v32 = vpop.f32.mrb[196].mxu1 }
 0x5fb   : > { %v9585_v44 = vadd.f32 %v8796_v32, %v6411_v43  ;;  %v8798_v28 = vpop.f32.mrb[197].mxu1  ;;  %v8370_v5 = vpop.f32.mrb[148].mxu0  ;;  %v6424_v43 = vld [vmem:[#allocation3 + $0xd8] sm:$0xff] }
 0x5fc   : > { %v9586_v4 = vadd.f32 %v8798_v28, %v6412_v37  ;;  %v8800_v26 = vpop.f32.mrb[198].mxu1  ;;  %v9727_v45 = vadd.f32 %v8370_v5, %v6553_v25  ;;  %v8372_v41 = vpop.f32.mrb[149].mxu0  ;;  %v6429_v37 = vld [vmem:[#allocation3 + $0x100] sm:$0xff] }
 0x5fd   : > { %9873 = vst [vmem:[#allocation3 + $0x70] sm:$0xff] %v9585_v44  ;;  %v9591_v11 = vadd.f32 %v8800_v26, %v6417_v2  ;;  %v8802_v34 = vpop.f32.mrb[199].mxu1  ;;  %v9728_v10 = vadd.f32 %v8372_v41, %v6554_v15  ;;  %v8374_v55 = vpop.f32.mrb[150].mxu0  ;;  %v6430_v2 = vld [vmem:[#allocation3 + $0x108] sm:$0xff]  ;;  %v6565_v15 = vld [vmem:[#allocation3 + $0x540] sm:$0xff]  ;;  %v6571_v26 = vld [vmem:[#allocation3 + $0x570] sm:$0xff] }
 0x5fe   : > { %9874 = vst [vmem:[#allocation3 + $0x78] sm:$0xff] %v9586_v4  ;;  %v9592_v54 = vadd.f32 %v8802_v34, %v6418_v21  ;;  %10015 = vst [vmem:[#allocation3 + $0x4e0] sm:$0xff] %v9727_v45  ;;  %v9733_v30 = vadd.f32 %v8374_v55, %v6559_v12  ;;  %v8376_v60 = vpop.f32.mrb[151].mxu0  ;;  %v6566_v21 = vld [vmem:[#allocation3 + $0x548] sm:$0xff]  ;;  %v20365_v34 = vld [vmem:[#allocation25_spill] sm:$0xff] }
 0x5ff   : > { %9879 = vst [vmem:[#allocation3 + $0xa0] sm:$0xff] %v9591_v11  ;;  %9198 = vmatmul.mubr.bf16.gmra.mrb[248].mxu0 %v20363_v19  ;;  %10016 = vst [vmem:[#allocation3 + $0x4e8] sm:$0xff] %v9728_v10  ;;  %v9734_v16 = vadd.f32 %v8376_v60, %v6560_v63  ;;  %v6572_v11 = vld [vmem:[#allocation3 + $0x578] sm:$0xff] }
 0x600   : > { %9880 = vst [vmem:[#allocation3 + $0xa8] sm:$0xff] %v9592_v54  ;;  %9207 = vmatprep.mubr.bf16.mxu0 %v20364_v46  ;;  %10021 = vst [vmem:[#allocation3 + $0x510] sm:$0xff] %v9733_v30  ;;  %v6435_v54 = vld [vmem:[#allocation3 + $0x130] sm:$0xff]  ;;  %v20366_v30 = vld [vmem:[#allocation54_spill] sm:$0xff] }
 0x601   : > { %10022 = vst [vmem:[#allocation3 + $0x518] sm:$0xff] %v9734_v16  ;;  %v6436_v16 = vld [vmem:[#allocation3 + $0x138] sm:$0xff] }
 0x602   : > { %v8806_v49 = vpop.f32.mrb[200].mxu1 }
 0x603   : > { %v9597_v25 = vadd.f32 %v8806_v49, %v6423_v31  ;;  %v8808_v32 = vpop.f32.mrb[201].mxu1 }
 0x604   : > { %v9598_v44 = vadd.f32 %v8808_v32, %v6424_v43  ;;  %v8810_v28 = vpop.f32.mrb[202].mxu1  ;;  %v6441_v43 = vld [vmem:[#allocation3 + $0x160] sm:$0xff] }
 0x605   : > { %9885 = vst [vmem:[#allocation3 + $0xd0] sm:$0xff] %v9597_v25  ;;  %v9603_v5 = vadd.f32 %v8810_v28, %v6429_v37  ;;  %v8812_v12 = vpop.f32.mrb[203].mxu1  ;;  %v8380_v4 = vpop.f32.mrb[152].mxu0  ;;  %v6442_v25 = vld [vmem:[#allocation3 + $0x168] sm:$0xff] }
 0x606   : > { %9886 = vst [vmem:[#allocation3 + $0xd8] sm:$0xff] %v9598_v44  ;;  %v9604_v45 = vadd.f32 %v8812_v12, %v6430_v2  ;;  %v9739_v41 = vadd.f32 %v8380_v4, %v6565_v15  ;;  %v8382_v63 = vpop.f32.mrb[153].mxu0  ;;  %v6578_v12 = vld [vmem:[#allocation3 + $0x5a8] sm:$0xff]  ;;  %v6447_v4 = vld [vmem:[#allocation3 + $0x190] sm:$0xff] }
 0x607   : > { %9891 = vst [vmem:[#allocation3 + $0x100] sm:$0xff] %v9603_v5  ;;  %9208 = vmatmul.mubr.bf16.gmra.mrb[252].mxu0 %v20365_v34  ;;  %v9740_v10 = vadd.f32 %v8382_v63, %v6566_v21  ;;  %v8384_v55 = vpop.f32.mrb[154].mxu0  ;;  %v6577_v21 = vld [vmem:[#allocation3 + $0x5a0] sm:$0xff]  ;;  %v6448_v63 = vld [vmem:[#allocation3 + $0x198] sm:$0xff] }
 0x608   : > { %9892 = vst [vmem:[#allocation3 + $0x108] sm:$0xff] %v9604_v45  ;;  %9217 = vmatprep.mubr.bf16.mxu0 %v20366_v30  ;;  %10027 = vst [vmem:[#allocation3 + $0x540] sm:$0xff] %v9739_v41  ;;  %v9745_v60 = vadd.f32 %v8384_v55, %v6571_v26  ;;  %v8386_v19 = vpop.f32.mrb[155].mxu0  ;;  %v20367_v5 = vld [vmem:[#allocation26_spill] sm:$0xff]  ;;  %v20368_v26 = vld [vmem:[#allocation27_spill] sm:$0xff] }
 0x609   : > { %10028 = vst [vmem:[#allocation3 + $0x548] sm:$0xff] %v9740_v10  ;;  %v9746_v31 = vadd.f32 %v8386_v19, %v6572_v11  ;;  %v6583_v41 = vld [vmem:[#allocation3 + $0x5d0] sm:$0xff]  ;;  %v6584_v10 = vld [vmem:[#allocation3 + $0x5d8] sm:$0xff] }
 0x60a   : > { %v8816_v46 = vpop.f32.mrb[204].mxu1  ;;  %10033 = vst [vmem:[#allocation3 + $0x570] sm:$0xff] %v9745_v60 }
 0x60b   : > { %v9609_v49 = vadd.f32 %v8816_v46, %v6435_v54  ;;  %v8818_v37 = vpop.f32.mrb[205].mxu1  ;;  %10034 = vst [vmem:[#allocation3 + $0x578] sm:$0xff] %v9746_v31  ;;  %v6453_v54 = vld [vmem:[#allocation3 + $0x1c0] sm:$0xff]  ;;  %v6454_v31 = vld [vmem:[#allocation3 + $0x1c8] sm:$0xff] }
 0x60c   : > { %v9610_v32 = vadd.f32 %v8818_v37, %v6436_v16  ;;  %v8820_v2 = vpop.f32.mrb[206].mxu1 }
 0x60d   : > { %9897 = vst [vmem:[#allocation3 + $0x130] sm:$0xff] %v9609_v49  ;;  %v9615_v15 = vadd.f32 %v8820_v2, %v6441_v43  ;;  %v8822_v44 = vpop.f32.mrb[207].mxu1 }
 0x60e   : > { %9898 = vst [vmem:[#allocation3 + $0x138] sm:$0xff] %v9610_v32  ;;  %v9616_v28 = vadd.f32 %v8822_v44, %v6442_v25  ;;  %v20369_v44 = vld [vmem:[#allocation55_spill] sm:$0xff] }
 0x60f   : > { %9903 = vst [vmem:[#allocation3 + $0x160] sm:$0xff] %v9615_v15  ;;  %9218 = vmatmul.mubr.bf16.gmra.mrb[0].mxu0 %v20367_v5  ;;  %v6589_v5 = vld [vmem:[#allocation3 + $0x600] sm:$0xff] }
 0x610   : > { %9904 = vst [vmem:[#allocation3 + $0x168] sm:$0xff] %v9616_v28  ;;  %9227 = vmatprep.mubr.bf16.mxu0 %v20368_v26  ;;  %v8390_v45 = vpop.f32.mrb[156].mxu0  ;;  %v6459_v28 = vld [vmem:[#allocation3 + $0x1f0] sm:$0xff] }
 0x611   : > { %v9751_v11 = vadd.f32 %v8390_v45, %v6577_v21  ;;  %v8392_v34 = vpop.f32.mrb[157].mxu0  ;;  %v20370_v21 = vld [vmem:[#allocation56_spill] sm:$0xff]  ;;  %v6465_v45 = vld [vmem:[#allocation3 + $0x220] sm:$0xff] }
 0x612   : > { %v8826_v55 = vpop.f32.mrb[208].mxu1  ;;  %v9752_v30 = vadd.f32 %v8392_v34, %v6578_v12  ;;  %v8394_v60 = vpop.f32.mrb[158].mxu0  ;;  %v6460_v12 = vld [vmem:[#allocation3 + $0x1f8] sm:$0xff] }
 0x613   : > { %v9621_v19 = vadd.f32 %v8826_v55, %v6447_v4  ;;  %v8828_v16 = vpop.f32.mrb[209].mxu1  ;;  %10039 = vst [vmem:[#allocation3 + $0x5a0] sm:$0xff] %v9751_v11  ;;  %v9757_v46 = vadd.f32 %v8394_v60, %v6583_v41  ;;  %v8396_v43 = vpop.f32.mrb[159].mxu0  ;;  %v6590_v4 = vld [vmem:[#allocation3 + $0x608] sm:$0xff] }
 0x614   : > { %v9622_v49 = vadd.f32 %v8828_v16, %v6448_v63  ;;  %v8830_v37 = vpop.f32.mrb[210].mxu1  ;;  %10040 = vst [vmem:[#allocation3 + $0x5a8] sm:$0xff] %v9752_v30  ;;  %v9758_v25 = vadd.f32 %v8396_v43, %v6584_v10  ;;  %v6595_v63 = vld [vmem:[#allocation3 + $0x630] sm:$0xff]  ;;  %v6466_v10 = vld [vmem:[#allocation3 + $0x228] sm:$0xff]  ;;  %v6596_v30 = vld [vmem:[#allocation3 + $0x638] sm:$0xff] }
 0x615   : > { %9909 = vst [vmem:[#allocation3 + $0x190] sm:$0xff] %v9621_v19  ;;  %v9627_v32 = vadd.f32 %v8830_v37, %v6453_v54  ;;  %v8832_v2 = vpop.f32.mrb[211].mxu1  ;;  %10045 = vst [vmem:[#allocation3 + $0x5d0] sm:$0xff] %v9757_v46 }
 0x616   : > { %9910 = vst [vmem:[#allocation3 + $0x198] sm:$0xff] %v9622_v49  ;;  %v9628_v15 = vadd.f32 %v8832_v2, %v6454_v31  ;;  %10046 = vst [vmem:[#allocation3 + $0x5d8] sm:$0xff] %v9758_v25  ;;  %v20371_v2 = vld [vmem:[#allocation28_spill] sm:$0xff] }
 0x617   : > { %9915 = vst [vmem:[#allocation3 + $0x1c0] sm:$0xff] %v9627_v32  ;;  %9228 = vmatmul.mubr.bf16.gmra.mrb[4].mxu0 %v20369_v44  ;;  %v20372_v44 = vld [vmem:[#allocation29_spill] sm:$0xff] }
 0x618   : > { %9916 = vst [vmem:[#allocation3 + $0x1c8] sm:$0xff] %v9628_v15  ;;  %9237 = vmatprep.mubr.bf16.mxu0 %v20370_v21  ;;  %v6471_v15 = vld [vmem:[#allocation3 + $0x250] sm:$0xff] }
 0x61a   : > { %v8836_v26 = vpop.f32.mrb[212].mxu1  ;;  %v8400_v41 = vpop.f32.mrb[160].mxu0 }
 0x61b   : > { %v9633_v11 = vadd.f32 %v8836_v26, %v6459_v28  ;;  %v8838_v34 = vpop.f32.mrb[213].mxu1  ;;  %v9763_v55 = vadd.f32 %v8400_v41, %v6589_v5  ;;  %v8402_v54 = vpop.f32.mrb[161].mxu0  ;;  %v6472_v28 = vld [vmem:[#allocation3 + $0x258] sm:$0xff]  ;;  %v6477_v5 = vld [vmem:[#allocation3 + $0x280] sm:$0xff]  ;;  %v6478_v26 = vld [vmem:[#allocation3 + $0x288] sm:$0xff] }
 0x61c   : > { %v9634_v60 = vadd.f32 %v8838_v34, %v6460_v12  ;;  %v8840_v19 = vpop.f32.mrb[214].mxu1  ;;  %v9764_v16 = vadd.f32 %v8402_v54, %v6590_v4  ;;  %v8404_v31 = vpop.f32.mrb[162].mxu0  ;;  %v6607_v54 = vld [vmem:[#allocation3 + $0x690] sm:$0xff] }
 0x61d   : > { %9921 = vst [vmem:[#allocation3 + $0x1f0] sm:$0xff] %v9633_v11  ;;  %v9639_v46 = vadd.f32 %v8840_v19, %v6465_v45  ;;  %v8842_v43 = vpop.f32.mrb[215].mxu1  ;;  %10051 = vst [vmem:[#allocation3 + $0x600] sm:$0xff] %v9763_v55  ;;  %v9769_v49 = vadd.f32 %v8404_v31, %v6595_v63  ;;  %v8406_v37 = vpop.f32.mrb[163].mxu0  ;;  %v6601_v45 = vld [vmem:[#allocation3 + $0x660] sm:$0xff]  ;;  %v6602_v11 = vld [vmem:[#allocation3 + $0x668] sm:$0xff] }
 0x61e   : > { %9922 = vst [vmem:[#allocation3 + $0x1f8] sm:$0xff] %v9634_v60  ;;  %v9640_v25 = vadd.f32 %v8842_v43, %v6466_v10  ;;  %10052 = vst [vmem:[#allocation3 + $0x608] sm:$0xff] %v9764_v16  ;;  %v9770_v32 = vadd.f32 %v8406_v37, %v6596_v30  ;;  %v6608_v16 = vld [vmem:[#allocation3 + $0x698] sm:$0xff]  ;;  %v20373_v31 = vld [vmem:[#allocation30_spill] sm:$0xff] }
 0x61f   : > { %9927 = vst [vmem:[#allocation3 + $0x220] sm:$0xff] %v9639_v46  ;;  %9238 = vmatmul.mubr.bf16.gmra.mrb[8].mxu0 %v20371_v2  ;;  %10057 = vst [vmem:[#allocation3 + $0x630] sm:$0xff] %v9769_v49  ;;  %v6483_v49 = vld [vmem:[#allocation3 + $0x2b0] sm:$0xff]  ;;  %v20374_v37 = vld [vmem:[#allocation31_spill] sm:$0xff] }
 0x620   : > { %9928 = vst [vmem:[#allocation3 + $0x228] sm:$0xff] %v9640_v25  ;;  %9247 = vmatprep.mubr.bf16.mxu0 %v20372_v44  ;;  %10058 = vst [vmem:[#allocation3 + $0x638] sm:$0xff] %v9770_v32  ;;  %v6484_v2 = vld [vmem:[#allocation3 + $0x2b8] sm:$0xff] }
 0x622   : > { %v8846_v21 = vpop.f32.mrb[216].mxu1 }
 0x623   : > { %v9645_v12 = vadd.f32 %v8846_v21, %v6471_v15  ;;  %v8848_v4 = vpop.f32.mrb[217].mxu1 }
 0x624   : > { %v9646_v41 = vadd.f32 %v8848_v4, %v6472_v28  ;;  %v8850_v63 = vpop.f32.mrb[218].mxu1  ;;  %v6489_v28 = vld [vmem:[#allocation3 + $0x2e0] sm:$0xff] }
 0x625   : > { %9933 = vst [vmem:[#allocation3 + $0x250] sm:$0xff] %v9645_v12  ;;  %v9651_v34 = vadd.f32 %v8850_v63, %v6477_v5  ;;  %v8852_v10 = vpop.f32.mrb[219].mxu1  ;;  %v8410_v55 = vpop.f32.mrb[164].mxu0  ;;  %v6490_v12 = vld [vmem:[#allocation3 + $0x2e8] sm:$0xff]  ;;  %v6613_v63 = vld [vmem:[#allocation3 + $0x6c0] sm:$0xff] }
 0x626   : > { %9934 = vst [vmem:[#allocation3 + $0x258] sm:$0xff] %v9646_v41  ;;  %v9652_v30 = vadd.f32 %v8852_v10, %v6478_v26  ;;  %v9775_v60 = vadd.f32 %v8410_v55, %v6601_v45  ;;  %v8412_v19 = vpop.f32.mrb[165].mxu0  ;;  %v20375_v10 = vld [vmem:[#allocation32_spill] sm:$0xff] }
 0x627   : > { %9939 = vst [vmem:[#allocation3 + $0x280] sm:$0xff] %v9651_v34  ;;  %9248 = vmatmul.mubr.bf16.gmra.mrb[12].mxu0 %v20373_v31  ;;  %v9776_v46 = vadd.f32 %v8412_v19, %v6602_v11  ;;  %v8414_v43 = vpop.f32.mrb[166].mxu0  ;;  %v6614_v34 = vld [vmem:[#allocation3 + $0x6c8] sm:$0xff]  ;;  %v6620_v31 = vld [vmem:[#allocation3 + $0x6f8] sm:$0xff] }
 0x628   : > { %9940 = vst [vmem:[#allocation3 + $0x288] sm:$0xff] %v9652_v30  ;;  %9257 = vmatprep.mubr.bf16.mxu0 %v20374_v37  ;;  %10063 = vst [vmem:[#allocation3 + $0x660] sm:$0xff] %v9775_v60  ;;  %v9781_v25 = vadd.f32 %v8414_v43, %v6607_v54  ;;  %v8416_v32 = vpop.f32.mrb[167].mxu0  ;;  %v6619_v54 = vld [vmem:[#allocation3 + $0x6f0] sm:$0xff]  ;;  %v20376_v60 = vld [vmem:[#allocation33_spill] sm:$0xff] }
 0x629   : > { %10064 = vst [vmem:[#allocation3 + $0x668] sm:$0xff] %v9776_v46  ;;  %v9782_v15 = vadd.f32 %v8416_v32, %v6608_v16  ;;  %v6495_v30 = vld [vmem:[#allocation3 + $0x310] sm:$0xff]  ;;  %v6496_v46 = vld [vmem:[#allocation3 + $0x318] sm:$0xff] }
 0x62a   : > { %v8856_v44 = vpop.f32.mrb[220].mxu1  ;;  %10069 = vst [vmem:[#allocation3 + $0x690] sm:$0xff] %v9781_v25  ;;  %v6501_v25 = vld [vmem:[#allocation3 + $0x340] sm:$0xff] }
 0x62b   : > { %v9657_v21 = vadd.f32 %v8856_v44, %v6483_v49  ;;  %v8858_v5 = vpop.f32.mrb[221].mxu1  ;;  %10070 = vst [vmem:[#allocation3 + $0x698] sm:$0xff] %v9782_v15 }
 0x62c   : > { %v9658_v4 = vadd.f32 %v8858_v5, %v6484_v2  ;;  %v8860_v26 = vpop.f32.mrb[222].mxu1 }
 0x62d   : > { %9945 = vst [vmem:[#allocation3 + $0x2b0] sm:$0xff] %v9657_v21  ;;  %v9663_v45 = vadd.f32 %v8860_v26, %v6489_v28  ;;  %v8862_v41 = vpop.f32.mrb[223].mxu1  ;;  %v6502_v28 = vld [vmem:[#allocation3 + $0x348] sm:$0xff] }
 0x62e   : > { %9946 = vst [vmem:[#allocation3 + $0x2b8] sm:$0xff] %v9658_v4  ;;  %v9664_v11 = vadd.f32 %v8862_v41, %v6490_v12  ;;  %v20377_v41 = vld [vmem:[#allocation34_spill] sm:$0xff] }
 0x62f   : > { %9951 = vst [vmem:[#allocation3 + $0x2e0] sm:$0xff] %v9663_v45  ;;  %9258 = vmatmul.mubr.bf16.gmra.mrb[16].mxu0 %v20375_v10  ;;  %v8420_v55 = vpop.f32.mrb[168].mxu0  ;;  %v6508_v10 = vld [vmem:[#allocation3 + $0x378] sm:$0xff] }
 0x630   : > { %9952 = vst [vmem:[#allocation3 + $0x2e8] sm:$0xff] %v9664_v11  ;;  %9267 = vmatprep.mubr.bf16.mxu0 %v20376_v60  ;;  %v9787_v19 = vadd.f32 %v8420_v55, %v6613_v63  ;;  %v8422_v16 = vpop.f32.mrb[169].mxu0  ;;  %v6507_v63 = vld [vmem:[#allocation3 + $0x370] sm:$0xff]  ;;  %v20378_v11 = vld [vmem:[#allocation35_spill] sm:$0xff] }
 0x631   : > { %v9788_v43 = vadd.f32 %v8422_v16, %v6614_v34  ;;  %v8424_v49 = vpop.f32.mrb[170].mxu0  ;;  %v6625_v34 = vld [vmem:[#allocation3 + $0x720] sm:$0xff]  ;;  %v6626_v55 = vld [vmem:[#allocation3 + $0x728] sm:$0xff] }
 0x632   : > { %v8866_v37 = vpop.f32.mrb[224].mxu1  ;;  %10075 = vst [vmem:[#allocation3 + $0x6c0] sm:$0xff] %v9787_v19  ;;  %v9793_v32 = vadd.f32 %v8424_v49, %v6619_v54  ;;  %v8426_v2 = vpop.f32.mrb[171].mxu0  ;;  %v6631_v19 = vld [vmem:[#allocation3 + $0x750] sm:$0xff] }
 0x633   : > { %v9669_v15 = vadd.f32 %v8866_v37, %v6495_v30  ;;  %v8868_v44 = vpop.f32.mrb[225].mxu1  ;;  %10076 = vst [vmem:[#allocation3 + $0x6c8] sm:$0xff] %v9788_v43  ;;  %v9794_v21 = vadd.f32 %v8426_v2, %v6620_v31  ;;  %v6513_v30 = vld [vmem:[#allocation3 + $0x3a0] sm:$0xff]  ;;  %v6632_v37 = vld [vmem:[#allocation3 + $0x758] sm:$0xff] }
 0x634   : > { %v9670_v5 = vadd.f32 %v8868_v44, %v6496_v46  ;;  %v8870_v12 = vpop.f32.mrb[226].mxu1  ;;  %10081 = vst [vmem:[#allocation3 + $0x6f0] sm:$0xff] %v9793_v32  ;;  %v6514_v46 = vld [vmem:[#allocation3 + $0x3a8] sm:$0xff] }
 0x635   : > { %9957 = vst [vmem:[#allocation3 + $0x310] sm:$0xff] %v9669_v15  ;;  %v9675_v4 = vadd.f32 %v8870_v12, %v6501_v25  ;;  %v8872_v26 = vpop.f32.mrb[227].mxu1  ;;  %10082 = vst [vmem:[#allocation3 + $0x6f8] sm:$0xff] %v9794_v21 }
 0x636   : > { %9958 = vst [vmem:[#allocation3 + $0x318] sm:$0xff] %v9670_v5  ;;  %v9676_v45 = vadd.f32 %v8872_v26, %v6502_v28  ;;  %v20379_v26 = vld [vmem:[#allocation37_spill] sm:$0xff] }
 0x637   : > { %9963 = vst [vmem:[#allocation3 + $0x340] sm:$0xff] %v9675_v4  ;;  %9268 = vmatmul.mubr.bf16.gmra.mrb[20].mxu0 %v20377_v41  ;;  %v20380_v41 = vld [vmem:[#allocation13_spill] sm:$0xff] }
 0x638   : > { %9964 = vst [vmem:[#allocation3 + $0x348] sm:$0xff] %v9676_v45  ;;  %9277 = vmatprep.mubr.bf16.mxu0 %v20378_v11  ;;  %v6519_v45 = vld [vmem:[#allocation3 + $0x3d0] sm:$0xff]  ;;  %v6520_v11 = vld [vmem:[#allocation3 + $0x3d8] sm:$0xff] }
 0x63a   : > { %v8876_v54 = vpop.f32.mrb[228].mxu1  ;;  %v8430_v60 = vpop.f32.mrb[172].mxu0 }
 0x63b   : > { %v9681_v16 = vadd.f32 %v8876_v54, %v6507_v63  ;;  %v8878_v31 = vpop.f32.mrb[229].mxu1  ;;  %v9799_v43 = vadd.f32 %v8430_v60, %v6625_v34  ;;  %v8432_v49 = vpop.f32.mrb[173].mxu0  ;;  %v6637_v63 = vld [vmem:[#allocation3 + $0x780] sm:$0xff]  ;;  %v6638_v34 = vld [vmem:[#allocation3 + $0x788] sm:$0xff] }
 0x63c   : > { %v9682_v25 = vadd.f32 %v8878_v31, %v6508_v10  ;;  %v8880_v32 = vpop.f32.mrb[230].mxu1  ;;  %v9800_v2 = vadd.f32 %v8432_v49, %v6626_v55  ;;  %v8434_v15 = vpop.f32.mrb[174].mxu0  ;;  %v6525_v55 = vld [vmem:[#allocation3 + $0x400] sm:$0xff] }
 0x63d   : > { %9969 = vst [vmem:[#allocation3 + $0x370] sm:$0xff] %v9681_v16  ;;  %v9687_v44 = vadd.f32 %v8880_v32, %v6513_v30  ;;  %v8882_v28 = vpop.f32.mrb[231].mxu1  ;;  %10087 = vst [vmem:[#allocation3 + $0x720] sm:$0xff] %v9799_v43  ;;  %v9805_v21 = vadd.f32 %v8434_v15, %v6631_v19  ;;  %v8436_v5 = vpop.f32.mrb[175].mxu0  ;;  %v6643_v30 = vld [vmem:[#allocation3 + $0x7b0] sm:$0xff]  ;;  %v6526_v16 = vld [vmem:[#allocation3 + $0x408] sm:$0xff] }
 0x63e   : > { %9970 = vst [vmem:[#allocation3 + $0x378] sm:$0xff] %v9682_v25  ;;  %v9688_v12 = vadd.f32 %v8882_v28, %v6514_v46  ;;  %10088 = vst [vmem:[#allocation3 + $0x728] sm:$0xff] %v9800_v2  ;;  %v9806_v4 = vadd.f32 %v8436_v5, %v6632_v37  ;;  %v6644_v43 = vld [vmem:[#allocation3 + $0x7b8] sm:$0xff] }
 0x63f   : > { %9975 = vst [vmem:[#allocation3 + $0x3a0] sm:$0xff] %v9687_v44  ;;  %10093 = vst [vmem:[#allocation3 + $0x750] sm:$0xff] %v9805_v21  ;;  %9278 = vmatmul.mubr.bf16.gmra.mrb[24].mxu0 %v20379_v26  ;;  %v20382_v26 = vld [vmem:[#allocation57_spill] sm:$0xff] }
 0x640   : > { %9976 = vst [vmem:[#allocation3 + $0x3a8] sm:$0xff] %v9688_v12  ;;  %10094 = vst [vmem:[#allocation3 + $0x758] sm:$0xff] %v9806_v4  ;;  %9287 = vmatprep.mubr.bf16.mxu0 %v20380_v41  ;;  %v20381_v12 = vld [vmem:[#allocation38_spill] sm:$0xff]  ;;  %v6531_v4 = vld [vmem:[#allocation3 + $0x430] sm:$0xff] }
 0x641   : > { %v6532_v41 = vld [vmem:[#allocation3 + $0x438] sm:$0xff] }
 0x642   : > { %v8886_v10 = vpop.f32.mrb[232].mxu1  ;;  %v8440_v54 = vpop.f32.mrb[176].mxu0 }
 0x643   : > { %v9693_v60 = vadd.f32 %v8886_v10, %v6519_v45  ;;  %v8888_v19 = vpop.f32.mrb[233].mxu1  ;;  %v9811_v31 = vadd.f32 %v8440_v54, %v6637_v63  ;;  %v8442_v46 = vpop.f32.mrb[177].mxu0  ;;  %v6649_v45 = vld [vmem:[#allocation3 + $0x7e0] sm:$0xff]  ;;  %v6650_v63 = vld [vmem:[#allocation3 + $0x7e8] sm:$0xff] }
 0x644   : > { %v9694_v49 = vadd.f32 %v8888_v19, %v6520_v11  ;;  %v8890_v37 = vpop.f32.mrb[234].mxu1  ;;  %v9812_v25 = vadd.f32 %v8442_v46, %v6638_v34  ;;  %v8444_v32 = vpop.f32.mrb[178].mxu0  ;;  %v6537_v34 = vld [vmem:[#allocation3 + $0x460] sm:$0xff] }
 0x645   : > { %9981 = vst [vmem:[#allocation3 + $0x3d0] sm:$0xff] %v9693_v60  ;;  %v9699_v2 = vadd.f32 %v8890_v37, %v6525_v55  ;;  %v8892_v15 = vpop.f32.mrb[235].mxu1  ;;  %10099 = vst [vmem:[#allocation3 + $0x780] sm:$0xff] %v9811_v31  ;;  %v9817_v44 = vadd.f32 %v8444_v32, %v6643_v30  ;;  %v8446_v28 = vpop.f32.mrb[179].mxu0  ;;  %v6655_v55 = vld [vmem:[#allocation3 + $0x810] sm:$0xff]  ;;  %v6538_v60 = vld [vmem:[#allocation3 + $0x468] sm:$0xff] }
 0x646   : > { %9982 = vst [vmem:[#allocation3 + $0x3d8] sm:$0xff] %v9694_v49  ;;  %v9700_v21 = vadd.f32 %v8892_v15, %v6526_v16  ;;  %10100 = vst [vmem:[#allocation3 + $0x788] sm:$0xff] %v9812_v25  ;;  %v9818_v5 = vadd.f32 %v8446_v28, %v6644_v43  ;;  %v6656_v31 = vld [vmem:[#allocation3 + $0x818] sm:$0xff] }
 0x647   : > { %9987 = vst [vmem:[#allocation3 + $0x400] sm:$0xff] %v9699_v2  ;;  %10105 = vst [vmem:[#allocation3 + $0x7b0] sm:$0xff] %v9817_v44  ;;  %9288 = vmatmul.mubr.bf16.gmra.mrb[28].mxu0 %v20381_v12  ;;  %v20384_v12 = vld [vmem:[#allocation18_spill] sm:$0xff] }
 0x648   : > { %9988 = vst [vmem:[#allocation3 + $0x408] sm:$0xff] %v9700_v21  ;;  %10106 = vst [vmem:[#allocation3 + $0x7b8] sm:$0xff] %v9818_v5  ;;  %9330 = vmatprep.mubr.bf16.mxu0 %v20382_v26  ;;  %v20383_v21 = vld [vmem:[#allocation39_spill] sm:$0xff]  ;;  %v6543_v5 = vld [vmem:[#allocation3 + $0x490] sm:$0xff] }
 0x649   : > { %v6544_v26 = vld [vmem:[#allocation3 + $0x498] sm:$0xff] }
 0x64a   : > { %v8896_v11 = vpop.f32.mrb[236].mxu1  ;;  %v8450_v10 = vpop.f32.mrb[180].mxu0 }
 0x64b   : > { %v9705_v54 = vadd.f32 %v8896_v11, %v6531_v4  ;;  %v8898_v30 = vpop.f32.mrb[237].mxu1  ;;  %v9823_v19 = vadd.f32 %v8450_v10, %v6649_v45  ;;  %v8452_v16 = vpop.f32.mrb[181].mxu0  ;;  %v6661_v4 = vld [vmem:[#allocation3 + $0x840] sm:$0xff]  ;;  %v6662_v45 = vld [vmem:[#allocation3 + $0x848] sm:$0xff] }
 0x64c   : > { %v9706_v46 = vadd.f32 %v8898_v30, %v6532_v41  ;;  %v8900_v43 = vpop.f32.mrb[238].mxu1  ;;  %v9824_v49 = vadd.f32 %v8452_v16, %v6650_v63  ;;  %v8454_v37 = vpop.f32.mrb[182].mxu0  ;;  %v6549_v63 = vld [vmem:[#allocation3 + $0x4c0] sm:$0xff] }
 0x64d   : > { %9993 = vst [vmem:[#allocation3 + $0x430] sm:$0xff] %v9705_v54  ;;  %v9711_v25 = vadd.f32 %v8900_v43, %v6537_v34  ;;  %v8902_v32 = vpop.f32.mrb[239].mxu1  ;;  %10111 = vst [vmem:[#allocation3 + $0x7e0] sm:$0xff] %v9823_v19  ;;  %v9829_v2 = vadd.f32 %v8454_v37, %v6655_v55  ;;  %v8456_v15 = vpop.f32.mrb[183].mxu0  ;;  %v6667_v34 = vld [vmem:[#allocation3 + $0x870] sm:$0xff]  ;;  %v6550_v54 = vld [vmem:[#allocation3 + $0x4c8] sm:$0xff] }
 0x64e   : > { %9994 = vst [vmem:[#allocation3 + $0x438] sm:$0xff] %v9706_v46  ;;  %v9712_v44 = vadd.f32 %v8902_v32, %v6538_v60  ;;  %10112 = vst [vmem:[#allocation3 + $0x7e8] sm:$0xff] %v9824_v49  ;;  %v9830_v28 = vadd.f32 %v8456_v15, %v6656_v31  ;;  %v6668_v19 = vld [vmem:[#allocation3 + $0x878] sm:$0xff] }
 0x64f   : > { %9999 = vst [vmem:[#allocation3 + $0x460] sm:$0xff] %v9711_v25  ;;  %10117 = vst [vmem:[#allocation3 + $0x810] sm:$0xff] %v9829_v2  ;;  %9331 = vmatmul.mubr.bf16.vlgmr.msra.gmra.mrb[192].mxu0 %v20383_v21  ;;  %v20386_v21 = vld [vmem:[#allocation40_spill] sm:$0xff] }
 0x650   : > { %10000 = vst [vmem:[#allocation3 + $0x468] sm:$0xff] %v9712_v44  ;;  %10118 = vst [vmem:[#allocation3 + $0x818] sm:$0xff] %v9830_v28  ;;  %9340 = vmatprep.mubr.bf16.mxu0 %v20384_v12  ;;  %v20385_v44 = vld [vmem:[#allocation58_spill] sm:$0xff]  ;;  %v6555_v28 = vld [vmem:[#allocation3 + $0x4f0] sm:$0xff] }
 0x651   : > { %v6556_v12 = vld [vmem:[#allocation3 + $0x4f8] sm:$0xff] }
 0x652   : > { %v8906_v41 = vpop.f32.mrb[240].mxu1  ;;  %v8460_v11 = vpop.f32.mrb[184].mxu0 }
 0x653   : > { %v9717_v10 = vadd.f32 %v8906_v41, %v6543_v5  ;;  %v8908_v55 = vpop.f32.mrb[241].mxu1  ;;  %v9835_v30 = vadd.f32 %v8460_v11, %v6661_v4  ;;  %v8462_v60 = vpop.f32.mrb[185].mxu0  ;;  %v6673_v5 = vld [vmem:[#allocation3 + $0x8a0] sm:$0xff]  ;;  %v6674_v4 = vld [vmem:[#allocation3 + $0x8a8] sm:$0xff] }
 0x654   : > { %v9718_v16 = vadd.f32 %v8908_v55, %v6544_v26  ;;  %v8910_v31 = vpop.f32.mrb[242].mxu1  ;;  %v9836_v46 = vadd.f32 %v8462_v60, %v6662_v45  ;;  %v8464_v43 = vpop.f32.mrb[186].mxu0  ;;  %v6561_v45 = vld [vmem:[#allocation3 + $0x520] sm:$0xff] }
 0x655   : > { %10005 = vst [vmem:[#allocation3 + $0x490] sm:$0xff] %v9717_v10  ;;  %v9723_v49 = vadd.f32 %v8910_v31, %v6549_v63  ;;  %v8912_v37 = vpop.f32.mrb[243].mxu1  ;;  %10123 = vst [vmem:[#allocation3 + $0x840] sm:$0xff] %v9835_v30  ;;  %v9841_v25 = vadd.f32 %v8464_v43, %v6667_v34  ;;  %v8466_v32 = vpop.f32.mrb[187].mxu0  ;;  %v6679_v63 = vld [vmem:[#allocation3 + $0x8d0] sm:$0xff]  ;;  %v6562_v10 = vld [vmem:[#allocation3 + $0x528] sm:$0xff] }
 0x656   : > { %10006 = vst [vmem:[#allocation3 + $0x498] sm:$0xff] %v9718_v16  ;;  %v9724_v2 = vadd.f32 %v8912_v37, %v6550_v54  ;;  %10124 = vst [vmem:[#allocation3 + $0x848] sm:$0xff] %v9836_v46  ;;  %v9842_v15 = vadd.f32 %v8466_v32, %v6668_v19  ;;  %v6680_v30 = vld [vmem:[#allocation3 + $0x8d8] sm:$0xff] }
 0x657   : > { %10011 = vst [vmem:[#allocation3 + $0x4c0] sm:$0xff] %v9723_v49  ;;  %10129 = vst [vmem:[#allocation3 + $0x870] sm:$0xff] %v9841_v25  ;;  %9341 = vmatmul.mubr.bf16.gmra.mrb[196].mxu0 %v20385_v44  ;;  %v20388_v44 = vld [vmem:[#allocation59_spill] sm:$0xff] }
 0x658   : > { %10012 = vst [vmem:[#allocation3 + $0x4c8] sm:$0xff] %v9724_v2  ;;  %10130 = vst [vmem:[#allocation3 + $0x878] sm:$0xff] %v9842_v15  ;;  %9350 = vmatprep.mubr.bf16.mxu0 %v20386_v21  ;;  %v20387_v2 = vld [vmem:[#allocation21_spill] sm:$0xff]  ;;  %v6567_v15 = vld [vmem:[#allocation3 + $0x550] sm:$0xff] }
 0x65a   : > { %v8916_v26 = vpop.f32.mrb[244].mxu1  ;;  %v8470_v41 = vpop.f32.mrb[188].mxu0 }
 0x65b   : > { %v9729_v11 = vadd.f32 %v8916_v26, %v6555_v28  ;;  %v8918_v34 = vpop.f32.mrb[245].mxu1  ;;  %v9847_v55 = vadd.f32 %v8470_v41, %v6673_v5  ;;  %v8472_v54 = vpop.f32.mrb[189].mxu0  ;;  %v6568_v28 = vld [vmem:[#allocation3 + $0x558] sm:$0xff]  ;;  %v6573_v5 = vld [vmem:[#allocation3 + $0x580] sm:$0xff]  ;;  %v6574_v26 = vld [vmem:[#allocation3 + $0x588] sm:$0xff] }
 0x65c   : > { %v9730_v60 = vadd.f32 %v8918_v34, %v6556_v12  ;;  %v8920_v19 = vpop.f32.mrb[246].mxu1  ;;  %v9848_v16 = vadd.f32 %v8472_v54, %v6674_v4  ;;  %v8474_v31 = vpop.f32.mrb[190].mxu0  ;;  %v20390_v54 = vld [vmem:[#allocation16_spill] sm:$0xff] }
 0x65d   : > { %10017 = vst [vmem:[#allocation3 + $0x4f0] sm:$0xff] %v9729_v11  ;;  %v9735_v46 = vadd.f32 %v8920_v19, %v6561_v45  ;;  %v8922_v43 = vpop.f32.mrb[247].mxu1  ;;  %10135 = vst [vmem:[#allocation3 + $0x8a0] sm:$0xff] %v9847_v55  ;;  %v9853_v49 = vadd.f32 %v8474_v31, %v6679_v63  ;;  %v8476_v37 = vpop.f32.mrb[191].mxu0  ;;  %v6579_v55 = vld [vmem:[#allocation3 + $0x5b0] sm:$0xff]  ;;  %v6585_v19 = vld [vmem:[#allocation3 + $0x5e0] sm:$0xff] }
 0x65e   : > { %10018 = vst [vmem:[#allocation3 + $0x4f8] sm:$0xff] %v9730_v60  ;;  %v9736_v25 = vadd.f32 %v8922_v43, %v6562_v10  ;;  %10136 = vst [vmem:[#allocation3 + $0x8a8] sm:$0xff] %v9848_v16  ;;  %v9854_v32 = vadd.f32 %v8476_v37, %v6680_v30  ;;  %v20389_v10 = vld [vmem:[#allocation47_spill] sm:$0xff]  ;;  %v6580_v30 = vld [vmem:[#allocation3 + $0x5b8] sm:$0xff] }
 0x65f   : > { %10023 = vst [vmem:[#allocation3 + $0x520] sm:$0xff] %v9735_v46  ;;  %10141 = vst [vmem:[#allocation3 + $0x8d0] sm:$0xff] %v9853_v49  ;;  %9351 = vmatmul.mubr.bf16.gmra.mrb[200].mxu0 %v20387_v2  ;;  %v6586_v46 = vld [vmem:[#allocation3 + $0x5e8] sm:$0xff]  ;;  %v20391_v2 = vld [vmem:[#allocation60_spill] sm:$0xff] }
 0x660   : > { %10024 = vst [vmem:[#allocation3 + $0x528] sm:$0xff] %v9736_v25  ;;  %10142 = vst [vmem:[#allocation3 + $0x8d8] sm:$0xff] %v9854_v32  ;;  %9360 = vmatprep.mubr.bf16.mxu0 %v20388_v44  ;;  %v6592_v44 = vld [vmem:[#allocation3 + $0x618] sm:$0xff] }
 0x662   : > { %v8926_v21 = vpop.f32.mrb[248].mxu1 }
 0x663   : > { %v9741_v12 = vadd.f32 %v8926_v21, %v6567_v15  ;;  %v8928_v4 = vpop.f32.mrb[249].mxu1  ;;  %v6591_v15 = vld [vmem:[#allocation3 + $0x610] sm:$0xff]  ;;  %v6597_v21 = vld [vmem:[#allocation3 + $0x640] sm:$0xff] }
 0x664   : > { %v9742_v45 = vadd.f32 %v8928_v4, %v6568_v28  ;;  %v8930_v41 = vpop.f32.mrb[250].mxu1  ;;  %v6598_v4 = vld [vmem:[#allocation3 + $0x648] sm:$0xff] }
 0x665   : > { %10029 = vst [vmem:[#allocation3 + $0x550] sm:$0xff] %v9741_v12  ;;  %v9747_v63 = vadd.f32 %v8930_v41, %v6573_v5  ;;  %v8932_v11 = vpop.f32.mrb[251].mxu1 }
 0x666   : > { %10030 = vst [vmem:[#allocation3 + $0x558] sm:$0xff] %v9742_v45  ;;  %v9748_v34 = vadd.f32 %v8932_v11, %v6574_v26 }
 0x667   : > { %10035 = vst [vmem:[#allocation3 + $0x580] sm:$0xff] %v9747_v63  ;;  %9361 = vmatmul.mubr.bf16.gmra.mrb[204].mxu0 %v20389_v10  ;;  %v20392_v10 = vld [vmem:[#allocation63_spill] sm:$0xff] }
 0x668   : > { %10036 = vst [vmem:[#allocation3 + $0x588] sm:$0xff] %v9748_v34  ;;  %9370 = vmatprep.mubr.bf16.mxu0 %v20390_v54  ;;  %v6603_v34 = vld [vmem:[#allocation3 + $0x670] sm:$0xff]  ;;  %v6609_v54 = vld [vmem:[#allocation3 + $0x6a0] sm:$0xff] }
 0x66a   : > { %v8936_v60 = vpop.f32.mrb[252].mxu1 }
 0x66b   : > { %v9753_v16 = vadd.f32 %v8936_v60, %v6579_v55  ;;  %v8938_v31 = vpop.f32.mrb[253].mxu1 }
 0x66c   : > { %v9754_v43 = vadd.f32 %v8938_v31, %v6580_v30  ;;  %v8940_v49 = vpop.f32.mrb[254].mxu1 }
 0x66d   : > { %10041 = vst [vmem:[#allocation3 + $0x5b0] sm:$0xff] %v9753_v16  ;;  %v9759_v37 = vadd.f32 %v8940_v49, %v6585_v19  ;;  %v8942_v25 = vpop.f32.mrb[255].mxu1  ;;  %v6610_v19 = vld [vmem:[#allocation3 + $0x6a8] sm:$0xff] }
 0x66e   : > { %10042 = vst [vmem:[#allocation3 + $0x5b8] sm:$0xff] %v9754_v43  ;;  %v9760_v32 = vadd.f32 %v8942_v25, %v6586_v46  ;;  %v6616_v25 = vld [vmem:[#allocation3 + $0x6d8] sm:$0xff] }
 0x66f   : > { %10047 = vst [vmem:[#allocation3 + $0x5e0] sm:$0xff] %v9759_v37  ;;  %9371 = vmatmul.mubr.bf16.gmra.mrb[208].mxu0 %v20391_v2  ;;  %v20393_v37 = vld [vmem:[#allocation65_spill] sm:$0xff]  ;;  %v6621_v2 = vld [vmem:[#allocation3 + $0x700] sm:$0xff] }
 0x670   : > { %10048 = vst [vmem:[#allocation3 + $0x5e8] sm:$0xff] %v9760_v32  ;;  %9380 = vmatprep.mubr.bf16.mxu0 %v20312_v17  ;;  %v6604_v17 = vld [vmem:[#allocation3 + $0x678] sm:$0xff] }
 0x672   : > { %v8946_v28 = vpop.f32.mrb[0].mxu1 }
 0x673   : > { %v9765_v5 = vadd.f32 %v8946_v28, %v6591_v15  ;;  %v8948_v12 = vpop.f32.mrb[1].mxu1  ;;  %v6622_v28 = vld [vmem:[#allocation3 + $0x708] sm:$0xff] }
 0x674   : > { %v9766_v26 = vadd.f32 %v8948_v12, %v6592_v44  ;;  %v8950_v45 = vpop.f32.mrb[2].mxu1 }
 0x675   : > { %10053 = vst [vmem:[#allocation3 + $0x610] sm:$0xff] %v9765_v5  ;;  %v9771_v41 = vadd.f32 %v8950_v45, %v6597_v21  ;;  %v8952_v63 = vpop.f32.mrb[3].mxu1  ;;  %v6628_v45 = vld [vmem:[#allocation3 + $0x738] sm:$0xff] }
 0x676   : > { %10054 = vst [vmem:[#allocation3 + $0x618] sm:$0xff] %v9766_v26  ;;  %v9772_v11 = vadd.f32 %v8952_v63, %v6598_v4  ;;  %v6633_v63 = vld [vmem:[#allocation3 + $0x760] sm:$0xff] }
 0x677   : > { %10059 = vst [vmem:[#allocation3 + $0x640] sm:$0xff] %v9771_v41  ;;  %9381 = vmatmul.mubr.bf16.gmra.mrb[212].mxu0 %v20313_v62  ;;  %v6615_v62 = vld [vmem:[#allocation3 + $0x6d0] sm:$0xff] }
 0x678   : > { %10060 = vst [vmem:[#allocation3 + $0x648] sm:$0xff] %v9772_v11  ;;  %9390 = vmatprep.mubr.bf16.mxu0 %v20392_v10  ;;  %v6634_v10 = vld [vmem:[#allocation3 + $0x768] sm:$0xff] }
 0x67a   : > { %v8956_v55 = vpop.f32.mrb[4].mxu1 }
 0x67b   : > { %v9777_v30 = vadd.f32 %v8956_v55, %v6603_v34  ;;  %v8958_v60 = vpop.f32.mrb[5].mxu1 }
 0x67c   : > { %v9778_v16 = vadd.f32 %v8958_v60, %v6604_v17  ;;  %v8960_v31 = vpop.f32.mrb[6].mxu1 }
 0x67d   : > { %10065 = vst [vmem:[#allocation3 + $0x670] sm:$0xff] %v9777_v30  ;;  %v9783_v46 = vadd.f32 %v8960_v31, %v6609_v54  ;;  %v8962_v43 = vpop.f32.mrb[7].mxu1 }
 0x67e   : > { %10066 = vst [vmem:[#allocation3 + $0x678] sm:$0xff] %v9778_v16  ;;  %v9784_v49 = vadd.f32 %v8962_v43, %v6610_v19  ;;  %v6645_v16 = vld [vmem:[#allocation3 + $0x7c0] sm:$0xff]  ;;  %v6646_v43 = vld [vmem:[#allocation3 + $0x7c8] sm:$0xff] }
 0x67f   : > { %10071 = vst [vmem:[#allocation3 + $0x6a0] sm:$0xff] %v9783_v46  ;;  %9391 = vmatmul.mubr.bf16.gmra.mrb[216].mxu0 %v20315_v13  ;;  %v6627_v13 = vld [vmem:[#allocation3 + $0x730] sm:$0xff] }
 0x680   : > { %10072 = vst [vmem:[#allocation3 + $0x6a8] sm:$0xff] %v9784_v49  ;;  %9400 = vmatprep.mubr.bf16.mxu0 %v20393_v37 }
 0x682   : > { %v8966_v32 = vpop.f32.mrb[8].mxu1 }
 0x683   : > { %v9789_v15 = vadd.f32 %v8966_v32, %v6615_v62  ;;  %v8968_v44 = vpop.f32.mrb[9].mxu1 }
 0x684   : > { %v9790_v21 = vadd.f32 %v8968_v44, %v6616_v25  ;;  %v8970_v5 = vpop.f32.mrb[10].mxu1 }
 0x685   : > { %10077 = vst [vmem:[#allocation3 + $0x6d0] sm:$0xff] %v9789_v15  ;;  %v9795_v12 = vadd.f32 %v8970_v5, %v6621_v2  ;;  %v8972_v4 = vpop.f32.mrb[11].mxu1  ;;  %v6657_v15 = vld [vmem:[#allocation3 + $0x820] sm:$0xff] }
 0x686   : > { %10078 = vst [vmem:[#allocation3 + $0x6d8] sm:$0xff] %v9790_v21  ;;  %v9796_v26 = vadd.f32 %v8972_v4, %v6622_v28  ;;  %v6658_v21 = vld [vmem:[#allocation3 + $0x828] sm:$0xff] }
 0x687   : > { %10083 = vst [vmem:[#allocation3 + $0x700] sm:$0xff] %v9795_v12  ;;  %9401 = vmatmul.mubr.bf16.gmra.mrb[220].mxu0 %v20318_v22  ;;  %v6639_v22 = vld [vmem:[#allocation3 + $0x790] sm:$0xff] }
 0x688   : > { %10084 = vst [vmem:[#allocation3 + $0x708] sm:$0xff] %v9796_v26  ;;  %9410 = vmatprep.mubr.bf16.mxu0 %v20320_v35  ;;  %v6640_v35 = vld [vmem:[#allocation3 + $0x798] sm:$0xff] }
 0x68a   : > { %v8976_v41 = vpop.f32.mrb[12].mxu1 }
 0x68b   : > { %v9801_v11 = vadd.f32 %v8976_v41, %v6627_v13  ;;  %v8978_v34 = vpop.f32.mrb[13].mxu1  ;;  %v6669_v41 = vld [vmem:[#allocation3 + $0x880] sm:$0xff] }
 0x68c   : > { %v9802_v17 = vadd.f32 %v8978_v34, %v6628_v45  ;;  %v8980_v55 = vpop.f32.mrb[14].mxu1  ;;  %v6670_v34 = vld [vmem:[#allocation3 + $0x888] sm:$0xff] }
 0x68d   : > { %10089 = vst [vmem:[#allocation3 + $0x730] sm:$0xff] %v9801_v11  ;;  %v9807_v54 = vadd.f32 %v8980_v55, %v6633_v63  ;;  %v8982_v30 = vpop.f32.mrb[15].mxu1 }
 0x68e   : > { %10090 = vst [vmem:[#allocation3 + $0x738] sm:$0xff] %v9802_v17  ;;  %v9808_v60 = vadd.f32 %v8982_v30, %v6634_v10 }
 0x68f   : > { %10095 = vst [vmem:[#allocation3 + $0x760] sm:$0xff] %v9807_v54  ;;  %9411 = vmatmul.mubr.bf16.gmra.mrb[224].mxu0 %v20321_v40  ;;  %v6651_v40 = vld [vmem:[#allocation3 + $0x7f0] sm:$0xff] }
 0x690   : > { %10096 = vst [vmem:[#allocation3 + $0x768] sm:$0xff] %v9808_v60  ;;  %9420 = vmatprep.mubr.bf16.mxu0 %v20322_v39  ;;  %v6652_v39 = vld [vmem:[#allocation3 + $0x7f8] sm:$0xff] }
 0x692   : > { %v8986_v19 = vpop.f32.mrb[16].mxu1 }
 0x693   : > { %v9813_v31 = vadd.f32 %v8986_v19, %v6639_v22  ;;  %v8988_v46 = vpop.f32.mrb[17].mxu1  ;;  %v6681_v22 = vld [vmem:[#allocation3 + $0x8e0] sm:$0xff] }
 0x694   : > { %v9814_v49 = vadd.f32 %v8988_v46, %v6640_v35  ;;  %v8990_v62 = vpop.f32.mrb[18].mxu1 }
 0x695   : > { %10101 = vst [vmem:[#allocation3 + $0x790] sm:$0xff] %v9813_v31  ;;  %v9819_v37 = vadd.f32 %v8990_v62, %v6645_v16  ;;  %v8992_v25 = vpop.f32.mrb[19].mxu1  ;;  %v6682_v16 = vld [vmem:[#allocation3 + $0x8e8] sm:$0xff] }
 0x696   : > { %10102 = vst [vmem:[#allocation3 + $0x798] sm:$0xff] %v9814_v49  ;;  %v9820_v32 = vadd.f32 %v8992_v25, %v6646_v43 }
 0x697   : > { %10107 = vst [vmem:[#allocation3 + $0x7c0] sm:$0xff] %v9819_v37  ;;  %9421 = vmatmul.mubr.bf16.gmra.mrb[228].mxu0 %v20323_v3  ;;  %v6663_v3 = vld [vmem:[#allocation3 + $0x850] sm:$0xff]  ;;  %v6426_v37 = vld [vmem:[#allocation3 + $0xe8] sm:$0xff] }
 0x698   : > { %10108 = vst [vmem:[#allocation3 + $0x7c8] sm:$0xff] %v9820_v32  ;;  %9430 = vmatprep.mubr.bf16.mxu0 %v20324_v59  ;;  %v6664_v59 = vld [vmem:[#allocation3 + $0x858] sm:$0xff]  ;;  %v6431_v32 = vld [vmem:[#allocation3 + $0x110] sm:$0xff] }
 0x69a   : > { %v8996_v2 = vpop.f32.mrb[20].mxu1 }
 0x69b   : > { %v9825_v44 = vadd.f32 %v8996_v2, %v6651_v40  ;;  %v8998_v28 = vpop.f32.mrb[21].mxu1  ;;  %v6432_v2 = vld [vmem:[#allocation3 + $0x118] sm:$0xff] }
 0x69c   : > { %v9826_v5 = vadd.f32 %v8998_v28, %v6652_v39  ;;  %v9000_v12 = vpop.f32.mrb[22].mxu1 }
 0x69d   : > { %10113 = vst [vmem:[#allocation3 + $0x7f0] sm:$0xff] %v9825_v44  ;;  %v9831_v4 = vadd.f32 %v9000_v12, %v6657_v15  ;;  %v9002_v26 = vpop.f32.mrb[23].mxu1  ;;  %v6437_v12 = vld [vmem:[#allocation3 + $0x140] sm:$0xff] }
 0x69e   : > { %10114 = vst [vmem:[#allocation3 + $0x7f8] sm:$0xff] %v9826_v5  ;;  %v9832_v13 = vadd.f32 %v9002_v26, %v6658_v21 }
 0x69f   : > { %10119 = vst [vmem:[#allocation3 + $0x820] sm:$0xff] %v9831_v4  ;;  %9431 = vmatmul.mubr.bf16.gmra.mrb[232].mxu0 %v20325_v38  ;;  %v6675_v38 = vld [vmem:[#allocation3 + $0x8b0] sm:$0xff]  ;;  %v6438_v4 = vld [vmem:[#allocation3 + $0x148] sm:$0xff] }
 0x6a0   : > { %10120 = vst [vmem:[#allocation3 + $0x828] sm:$0xff] %v9832_v13  ;;  %9440 = vmatprep.mubr.bf16.mxu0 %v20326_v48  ;;  %v6676_v48 = vld [vmem:[#allocation3 + $0x8b8] sm:$0xff]  ;;  %v6443_v13 = vld [vmem:[#allocation3 + $0x170] sm:$0xff] }
 0x6a2   : > { %v9006_v45 = vpop.f32.mrb[24].mxu1 }
 0x6a3   : > { %v9837_v63 = vadd.f32 %v9006_v45, %v6663_v3  ;;  %v9008_v11 = vpop.f32.mrb[25].mxu1  ;;  %v6444_v45 = vld [vmem:[#allocation3 + $0x178] sm:$0xff] }
 0x6a4   : > { %v9838_v10 = vadd.f32 %v9008_v11, %v6664_v59  ;;  %v9010_v17 = vpop.f32.mrb[26].mxu1 }
 0x6a5   : > { %10125 = vst [vmem:[#allocation3 + $0x850] sm:$0xff] %v9837_v63  ;;  %v9843_v55 = vadd.f32 %v9010_v17, %v6669_v41  ;;  %v9012_v54 = vpop.f32.mrb[27].mxu1  ;;  %v6449_v17 = vld [vmem:[#allocation3 + $0x1a0] sm:$0xff] }
 0x6a6   : > { %10126 = vst [vmem:[#allocation3 + $0x858] sm:$0xff] %v9838_v10  ;;  %v9844_v30 = vadd.f32 %v9012_v54, %v6670_v34 }
 0x6a7   : > { %10131 = vst [vmem:[#allocation3 + $0x880] sm:$0xff] %v9843_v55  ;;  %9441 = vmatmul.mubr.bf16.gmra.mrb[236].mxu0 %v20327_v9  ;;  %v6450_v55 = vld [vmem:[#allocation3 + $0x1a8] sm:$0xff] }
 0x6a8   : > { %10132 = vst [vmem:[#allocation3 + $0x888] sm:$0xff] %v9844_v30  ;;  %9450 = vmatprep.mubr.bf16.mxu0 %v20328_v0  ;;  %v6420_v0 = vld [vmem:[#allocation3 + $0xb8] sm:$0xff]  ;;  %v6455_v30 = vld [vmem:[#allocation3 + $0x1d0] sm:$0xff] }
 0x6aa   : > { %v9016_v60 = vpop.f32.mrb[28].mxu1 }
 0x6ab   : > { %v9849_v35 = vadd.f32 %v9016_v60, %v6675_v38  ;;  %v9018_v19 = vpop.f32.mrb[29].mxu1  ;;  %v6456_v60 = vld [vmem:[#allocation3 + $0x1d8] sm:$0xff] }
 0x6ac   : > { %v9850_v31 = vadd.f32 %v9018_v19, %v6676_v48  ;;  %v9020_v46 = vpop.f32.mrb[30].mxu1 }
 0x6ad   : > { %10137 = vst [vmem:[#allocation3 + $0x8b0] sm:$0xff] %v9849_v35  ;;  %v9855_v43 = vadd.f32 %v9020_v46, %v6681_v22  ;;  %v9022_v49 = vpop.f32.mrb[31].mxu1  ;;  %v6461_v46 = vld [vmem:[#allocation3 + $0x200] sm:$0xff] }
 0x6ae   : > { %10138 = vst [vmem:[#allocation3 + $0x8b8] sm:$0xff] %v9850_v31  ;;  %v9856_v62 = vadd.f32 %v9022_v49, %v6682_v16 }
 0x6af   : > { %10143 = vst [vmem:[#allocation3 + $0x8e0] sm:$0xff] %v9855_v43  ;;  %9451 = vmatmul.mubr.bf16.gmra.mrb[240].mxu0 %v20329_v27  ;;  %v6462_v43 = vld [vmem:[#allocation3 + $0x208] sm:$0xff] }
 0x6b0   : > { %10144 = vst [vmem:[#allocation3 + $0x8e8] sm:$0xff] %v9856_v62  ;;  %9460 = vmatprep.mubr.bf16.mxu0 %v20330_v14  ;;  %v6467_v62 = vld [vmem:[#allocation3 + $0x230] sm:$0xff] }
 0x6b7   : > { %9461 = vmatmul.mubr.bf16.gmra.mrb[244].mxu0 %v20331_v53 }
 0x6b8   : > { %9470 = vmatprep.mubr.bf16.mxu0 %v18946_v8  ;;  %v6401_v8 = vld [vmem:[#allocation3 + $0x20] sm:$0xff] }
 0x6bf   : > { %9471 = vmatmul.mubr.bf16.gmra.mrb[248].mxu0 %v18962_v29  ;;  %v6402_v29 = vld [vmem:[#allocation3 + $0x28] sm:$0xff] }
 0x6c0   : > { %9480 = vmatprep.mubr.bf16.mxu0 %v20334_v47 }
 0x6c7   : > { %9481 = vmatmul.mubr.bf16.gmra.mrb[252].mxu0 %v20336_v6  ;;  %v6425_v6 = vld [vmem:[#allocation3 + $0xe0] sm:$0xff] }
 0x6c8   : > { %9490 = vmatprep.mubr.bf16.mxu0 %v19057_v61 }
 0x6cf   : > { %9491 = vmatmul.mubr.bf16.gmra.mrb[0].mxu0 %v19074_v57  ;;  %v6407_v57 = vld [vmem:[#allocation3 + $0x50] sm:$0xff] }
 0x6d0   : > { %9500 = vmatprep.mubr.bf16.mxu0 %v19120_v52 }
 0x6d7   : > { %9501 = vmatmul.mubr.bf16.gmra.mrb[4].mxu0 %v19134_v20 }
 0x6d8   : > { %9510 = vmatprep.mubr.bf16.mxu0 %v19175_v36  ;;  %v6408_v36 = vld [vmem:[#allocation3 + $0x58] sm:$0xff] }
 0x6df   : > { %9511 = vmatmul.mubr.bf16.gmra.mrb[8].mxu0 %v19188_v33 }
 0x6e0   : > { %9520 = vmatprep.mubr.bf16.mxu0 %v19225_v42 }
 0x6e7   : > { %9521 = vmatmul.mubr.bf16.gmra.mrb[12].mxu0 %v19230_v58 }
 0x6e8   : > { %9530 = vmatprep.mubr.bf16.mxu0 %v19243_v18 }
 0x6ef   : > { %9531 = vmatmul.mubr.bf16.gmra.mrb[16].mxu0 %v19246_v1 }
 0x6f0   : > { %9540 = vmatprep.mubr.bf16.mxu0 %v19252_v24  ;;  %v6413_v24 = vld [vmem:[#allocation3 + $0x80] sm:$0xff] }
 0x6f7   : > { %9541 = vmatmul.mubr.bf16.gmra.mrb[20].mxu0 %v19254_v7  ;;  %v6414_v7 = vld [vmem:[#allocation3 + $0x88] sm:$0xff] }
 0x6f8   : > { %9550 = vmatprep.mubr.bf16.mxu0 %v19264_v51 }
 0x6ff   : > { %9551 = vmatmul.mubr.bf16.gmra.mrb[24].mxu0 %v19266_v23  ;;  %v6419_v23 = vld [vmem:[#allocation3 + $0xb0] sm:$0xff] }
 0x700   : > { %9560 = vmatprep.mubr.bf16.mxu0 %v19278_v56 }
 0x707   : > { %9561 = vmatmul.mubr.bf16.gmra.mrb[28].mxu0 %v19274_v50 }
 0x722   : > { %v9332_v61 = vpop.f32.mrb[192].mxu0 }
 0x723   : > { %v9575_v52 = vadd.f32 %v9332_v61, %v6401_v8  ;;  %v9334_v20 = vpop.f32.mrb[193].mxu0  ;;  %v6468_v61 = vld [vmem:[#allocation3 + $0x238] sm:$0xff] }
 0x724   : > { %v9576_v33 = vadd.f32 %v9334_v20, %v6402_v29  ;;  %v9336_v42 = vpop.f32.mrb[194].mxu0 }
 0x725   : > { %9863 = vst [vmem:[#allocation3 + $0x20] sm:$0xff] %v9575_v52  ;;  %v9581_v58 = vadd.f32 %v9336_v42, %v6407_v57  ;;  %v9338_v18 = vpop.f32.mrb[195].mxu0  ;;  %v6473_v42 = vld [vmem:[#allocation3 + $0x260] sm:$0xff] }
 0x726   : > { %9864 = vst [vmem:[#allocation3 + $0x28] sm:$0xff] %v9576_v33  ;;  %v9582_v1 = vadd.f32 %v9338_v18, %v6408_v36 }
 0x727   : > { %9869 = vst [vmem:[#allocation3 + $0x50] sm:$0xff] %v9581_v58  ;;  %v6474_v58 = vld [vmem:[#allocation3 + $0x268] sm:$0xff] }
 0x728   : > { %9870 = vst [vmem:[#allocation3 + $0x58] sm:$0xff] %v9582_v1  ;;  %v6479_v1 = vld [vmem:[#allocation3 + $0x290] sm:$0xff] }
 0x72a   : > { %v9342_v51 = vpop.f32.mrb[196].mxu0 }
 0x72b   : > { %v9587_v9 = vadd.f32 %v9342_v51, %v6413_v24  ;;  %v9344_v50 = vpop.f32.mrb[197].mxu0  ;;  %v6480_v51 = vld [vmem:[#allocation3 + $0x298] sm:$0xff] }
 0x72c   : > { %v9588_v56 = vadd.f32 %v9344_v50, %v6414_v7  ;;  %v9346_v27 = vpop.f32.mrb[198].mxu0 }
 0x72d   : > { %9875 = vst [vmem:[#allocation3 + $0x80] sm:$0xff] %v9587_v9  ;;  %v9593_v14 = vadd.f32 %v9346_v27, %v6419_v23  ;;  %v9348_v53 = vpop.f32.mrb[199].mxu0  ;;  %v6485_v27 = vld [vmem:[#allocation3 + $0x2c0] sm:$0xff] }
 0x72e   : > { %9876 = vst [vmem:[#allocation3 + $0x88] sm:$0xff] %v9588_v56  ;;  %v9594_v47 = vadd.f32 %v9348_v53, %v6420_v0 }
 0x72f   : > { %9881 = vst [vmem:[#allocation3 + $0xb0] sm:$0xff] %v9593_v14  ;;  %v6486_v14 = vld [vmem:[#allocation3 + $0x2c8] sm:$0xff] }
 0x730   : > { %9882 = vst [vmem:[#allocation3 + $0xb8] sm:$0xff] %v9594_v47  ;;  %v6491_v47 = vld [vmem:[#allocation3 + $0x2f0] sm:$0xff] }
 0x732   : > { %v9352_v25 = vpop.f32.mrb[200].mxu0 }
 0x733   : > { %v9599_v40 = vadd.f32 %v9352_v25, %v6425_v6  ;;  %v9354_v39 = vpop.f32.mrb[201].mxu0  ;;  %v6492_v25 = vld [vmem:[#allocation3 + $0x2f8] sm:$0xff] }
 0x734   : > { %v9600_v15 = vadd.f32 %v9354_v39, %v6426_v37  ;;  %v9356_v44 = vpop.f32.mrb[202].mxu0 }
 0x735   : > { %9887 = vst [vmem:[#allocation3 + $0xe0] sm:$0xff] %v9599_v40  ;;  %v9605_v28 = vadd.f32 %v9356_v44, %v6431_v32  ;;  %v9358_v21 = vpop.f32.mrb[203].mxu0  ;;  %v6497_v44 = vld [vmem:[#allocation3 + $0x320] sm:$0xff] }
 0x736   : > { %9888 = vst [vmem:[#allocation3 + $0xe8] sm:$0xff] %v9600_v15  ;;  %v9606_v5 = vadd.f32 %v9358_v21, %v6432_v2 }
 0x737   : > { %9893 = vst [vmem:[#allocation3 + $0x110] sm:$0xff] %v9605_v28  ;;  %v6498_v28 = vld [vmem:[#allocation3 + $0x328] sm:$0xff] }
 0x738   : > { %9894 = vst [vmem:[#allocation3 + $0x118] sm:$0xff] %v9606_v5  ;;  %v6503_v5 = vld [vmem:[#allocation3 + $0x350] sm:$0xff] }
 0x73a   : > { %v9362_v26 = vpop.f32.mrb[204].mxu0 }
 0x73b   : > { %v9611_v3 = vadd.f32 %v9362_v26, %v6437_v12  ;;  %v9364_v59 = vpop.f32.mrb[205].mxu0  ;;  %v6504_v26 = vld [vmem:[#allocation3 + $0x358] sm:$0xff] }
 0x73c   : > { %v9612_v41 = vadd.f32 %v9364_v59, %v6438_v4  ;;  %v9366_v63 = vpop.f32.mrb[206].mxu0 }
 0x73d   : > { %9899 = vst [vmem:[#allocation3 + $0x140] sm:$0xff] %v9611_v3  ;;  %v9617_v11 = vadd.f32 %v9366_v63, %v6443_v13  ;;  %v9368_v34 = vpop.f32.mrb[207].mxu0  ;;  %v6509_v63 = vld [vmem:[#allocation3 + $0x380] sm:$0xff] }
 0x73e   : > { %9900 = vst [vmem:[#allocation3 + $0x148] sm:$0xff] %v9612_v41  ;;  %v9618_v10 = vadd.f32 %v9368_v34, %v6444_v45 }
 0x73f   : > { %9905 = vst [vmem:[#allocation3 + $0x170] sm:$0xff] %v9617_v11  ;;  %v6510_v11 = vld [vmem:[#allocation3 + $0x388] sm:$0xff] }
 0x740   : > { %9906 = vst [vmem:[#allocation3 + $0x178] sm:$0xff] %v9618_v10  ;;  %v6515_v10 = vld [vmem:[#allocation3 + $0x3b0] sm:$0xff] }
 0x742   : > { %v9372_v54 = vpop.f32.mrb[208].mxu0 }
 0x743   : > { %v9623_v38 = vadd.f32 %v9372_v54, %v6449_v17  ;;  %v9374_v48 = vpop.f32.mrb[209].mxu0  ;;  %v6516_v54 = vld [vmem:[#allocation3 + $0x3b8] sm:$0xff] }
 0x744   : > { %v9624_v22 = vadd.f32 %v9374_v48, %v6450_v55  ;;  %v9376_v35 = vpop.f32.mrb[210].mxu0 }
 0x745   : > { %9911 = vst [vmem:[#allocation3 + $0x1a0] sm:$0xff] %v9623_v38  ;;  %v9629_v19 = vadd.f32 %v9376_v35, %v6455_v30  ;;  %v9378_v16 = vpop.f32.mrb[211].mxu0  ;;  %v6521_v35 = vld [vmem:[#allocation3 + $0x3e0] sm:$0xff] }
 0x746   : > { %9912 = vst [vmem:[#allocation3 + $0x1a8] sm:$0xff] %v9624_v22  ;;  %v9630_v31 = vadd.f32 %v9378_v16, %v6456_v60 }
 0x747   : > { %9917 = vst [vmem:[#allocation3 + $0x1d0] sm:$0xff] %v9629_v19  ;;  %v6522_v19 = vld [vmem:[#allocation3 + $0x3e8] sm:$0xff] }
 0x748   : > { %9918 = vst [vmem:[#allocation3 + $0x1d8] sm:$0xff] %v9630_v31  ;;  %v6527_v31 = vld [vmem:[#allocation3 + $0x410] sm:$0xff] }
 0x74a   : > { %v9382_v49 = vpop.f32.mrb[212].mxu0 }
 0x74b   : > { %v9635_v8 = vadd.f32 %v9382_v49, %v6461_v46  ;;  %v9384_v29 = vpop.f32.mrb[213].mxu0  ;;  %v6528_v49 = vld [vmem:[#allocation3 + $0x418] sm:$0xff] }
 0x74c   : > { %v9636_v57 = vadd.f32 %v9384_v29, %v6462_v43  ;;  %v9386_v52 = vpop.f32.mrb[214].mxu0 }
 0x74d   : > { %9923 = vst [vmem:[#allocation3 + $0x200] sm:$0xff] %v9635_v8  ;;  %v9641_v20 = vadd.f32 %v9386_v52, %v6467_v62  ;;  %v9388_v36 = vpop.f32.mrb[215].mxu0  ;;  %v6533_v52 = vld [vmem:[#allocation3 + $0x440] sm:$0xff] }
 0x74e   : > { %9924 = vst [vmem:[#allocation3 + $0x208] sm:$0xff] %v9636_v57  ;;  %v9642_v33 = vadd.f32 %v9388_v36, %v6468_v61 }
 0x74f   : > { %9929 = vst [vmem:[#allocation3 + $0x230] sm:$0xff] %v9641_v20  ;;  %v6534_v20 = vld [vmem:[#allocation3 + $0x448] sm:$0xff] }
 0x750   : > { %9930 = vst [vmem:[#allocation3 + $0x238] sm:$0xff] %v9642_v33  ;;  %v6539_v33 = vld [vmem:[#allocation3 + $0x470] sm:$0xff] }
 0x752   : > { %v9392_v18 = vpop.f32.mrb[216].mxu0 }
 0x753   : > { %v9647_v24 = vadd.f32 %v9392_v18, %v6473_v42  ;;  %v9394_v7 = vpop.f32.mrb[217].mxu0  ;;  %v6540_v18 = vld [vmem:[#allocation3 + $0x478] sm:$0xff] }
 0x754   : > { %v9648_v23 = vadd.f32 %v9394_v7, %v6474_v58  ;;  %v9396_v9 = vpop.f32.mrb[218].mxu0 }
 0x755   : > { %9935 = vst [vmem:[#allocation3 + $0x260] sm:$0xff] %v9647_v24  ;;  %v9653_v50 = vadd.f32 %v9396_v9, %v6479_v1  ;;  %v9398_v0 = vpop.f32.mrb[219].mxu0  ;;  %v6545_v9 = vld [vmem:[#allocation3 + $0x4a0] sm:$0xff] }
 0x756   : > { %9936 = vst [vmem:[#allocation3 + $0x268] sm:$0xff] %v9648_v23  ;;  %v9654_v56 = vadd.f32 %v9398_v0, %v6480_v51 }
 0x757   : > { %9941 = vst [vmem:[#allocation3 + $0x290] sm:$0xff] %v9653_v50  ;;  %v6546_v50 = vld [vmem:[#allocation3 + $0x4a8] sm:$0xff] }
 0x758   : > { %9942 = vst [vmem:[#allocation3 + $0x298] sm:$0xff] %v9654_v56  ;;  %v6551_v56 = vld [vmem:[#allocation3 + $0x4d0] sm:$0xff] }
 0x75a   : > { %v9402_v53 = vpop.f32.mrb[220].mxu0 }
 0x75b   : > { %v9659_v6 = vadd.f32 %v9402_v53, %v6485_v27  ;;  %v9404_v37 = vpop.f32.mrb[221].mxu0  ;;  %v6552_v53 = vld [vmem:[#allocation3 + $0x4d8] sm:$0xff] }
 0x75c   : > { %v9660_v32 = vadd.f32 %v9404_v37, %v6486_v14  ;;  %v9406_v40 = vpop.f32.mrb[222].mxu0 }
 0x75d   : > { %9947 = vst [vmem:[#allocation3 + $0x2c0] sm:$0xff] %v9659_v6  ;;  %v9665_v39 = vadd.f32 %v9406_v40, %v6491_v47  ;;  %v9408_v2 = vpop.f32.mrb[223].mxu0  ;;  %v6557_v40 = vld [vmem:[#allocation3 + $0x500] sm:$0xff] }
 0x75e   : > { %9948 = vst [vmem:[#allocation3 + $0x2c8] sm:$0xff] %v9660_v32  ;;  %v9666_v15 = vadd.f32 %v9408_v2, %v6492_v25 }
 0x75f   : > { %9953 = vst [vmem:[#allocation3 + $0x2f0] sm:$0xff] %v9665_v39  ;;  %v6558_v39 = vld [vmem:[#allocation3 + $0x508] sm:$0xff] }
 0x760   : > { %9954 = vst [vmem:[#allocation3 + $0x2f8] sm:$0xff] %v9666_v15  ;;  %v6563_v15 = vld [vmem:[#allocation3 + $0x530] sm:$0xff] }
 0x762   : > { %v9412_v21 = vpop.f32.mrb[224].mxu0 }
 0x763   : > { %v9671_v12 = vadd.f32 %v9412_v21, %v6497_v44  ;;  %v9414_v4 = vpop.f32.mrb[225].mxu0  ;;  %v6564_v21 = vld [vmem:[#allocation3 + $0x538] sm:$0xff] }
 0x764   : > { %v9672_v13 = vadd.f32 %v9414_v4, %v6498_v28  ;;  %v9416_v3 = vpop.f32.mrb[226].mxu0 }
 0x765   : > { %9959 = vst [vmem:[#allocation3 + $0x320] sm:$0xff] %v9671_v12  ;;  %v9677_v59 = vadd.f32 %v9416_v3, %v6503_v5  ;;  %v9418_v45 = vpop.f32.mrb[227].mxu0  ;;  %v6569_v3 = vld [vmem:[#allocation3 + $0x560] sm:$0xff] }
 0x766   : > { %9960 = vst [vmem:[#allocation3 + $0x328] sm:$0xff] %v9672_v13  ;;  %v9678_v41 = vadd.f32 %v9418_v45, %v6504_v26 }
 0x767   : > { %9965 = vst [vmem:[#allocation3 + $0x350] sm:$0xff] %v9677_v59  ;;  %v6570_v59 = vld [vmem:[#allocation3 + $0x568] sm:$0xff] }
 0x768   : > { %9966 = vst [vmem:[#allocation3 + $0x358] sm:$0xff] %v9678_v41  ;;  %v6575_v41 = vld [vmem:[#allocation3 + $0x590] sm:$0xff] }
 0x76a   : > { %v9422_v34 = vpop.f32.mrb[228].mxu0 }
 0x76b   : > { %v9683_v17 = vadd.f32 %v9422_v34, %v6509_v63  ;;  %v9424_v55 = vpop.f32.mrb[229].mxu0  ;;  %v6576_v34 = vld [vmem:[#allocation3 + $0x598] sm:$0xff] }
 0x76c   : > { %v9684_v30 = vadd.f32 %v9424_v55, %v6510_v11  ;;  %v9426_v38 = vpop.f32.mrb[230].mxu0 }
 0x76d   : > { %9971 = vst [vmem:[#allocation3 + $0x380] sm:$0xff] %v9683_v17  ;;  %v9689_v48 = vadd.f32 %v9426_v38, %v6515_v10  ;;  %v9428_v60 = vpop.f32.mrb[231].mxu0  ;;  %v6581_v38 = vld [vmem:[#allocation3 + $0x5c0] sm:$0xff] }
 0x76e   : > { %9972 = vst [vmem:[#allocation3 + $0x388] sm:$0xff] %v9684_v30  ;;  %v9690_v22 = vadd.f32 %v9428_v60, %v6516_v54 }
 0x76f   : > { %9977 = vst [vmem:[#allocation3 + $0x3b0] sm:$0xff] %v9689_v48  ;;  %v6582_v48 = vld [vmem:[#allocation3 + $0x5c8] sm:$0xff] }
 0x770   : > { %9978 = vst [vmem:[#allocation3 + $0x3b8] sm:$0xff] %v9690_v22  ;;  %v6587_v22 = vld [vmem:[#allocation3 + $0x5f0] sm:$0xff] }
 0x772   : > { %v9432_v16 = vpop.f32.mrb[232].mxu0 }
 0x773   : > { %v9695_v46 = vadd.f32 %v9432_v16, %v6521_v35  ;;  %v9434_v43 = vpop.f32.mrb[233].mxu0  ;;  %v6588_v16 = vld [vmem:[#allocation3 + $0x5f8] sm:$0xff] }
 0x774   : > { %v9696_v62 = vadd.f32 %v9434_v43, %v6522_v19  ;;  %v9436_v8 = vpop.f32.mrb[234].mxu0 }
 0x775   : > { %9983 = vst [vmem:[#allocation3 + $0x3e0] sm:$0xff] %v9695_v46  ;;  %v9701_v29 = vadd.f32 %v9436_v8, %v6527_v31  ;;  %v9438_v61 = vpop.f32.mrb[235].mxu0  ;;  %v6593_v8 = vld [vmem:[#allocation3 + $0x620] sm:$0xff] }
 0x776   : > { %9984 = vst [vmem:[#allocation3 + $0x3e8] sm:$0xff] %v9696_v62  ;;  %v9702_v57 = vadd.f32 %v9438_v61, %v6528_v49 }
 0x777   : > { %9989 = vst [vmem:[#allocation3 + $0x410] sm:$0xff] %v9701_v29  ;;  %v6594_v29 = vld [vmem:[#allocation3 + $0x628] sm:$0xff] }
 0x778   : > { %9990 = vst [vmem:[#allocation3 + $0x418] sm:$0xff] %v9702_v57  ;;  %v6599_v57 = vld [vmem:[#allocation3 + $0x650] sm:$0xff] }
 0x77a   : > { %v9442_v36 = vpop.f32.mrb[236].mxu0 }
 0x77b   : > { %v9707_v42 = vadd.f32 %v9442_v36, %v6533_v52  ;;  %v9444_v58 = vpop.f32.mrb[237].mxu0  ;;  %v6600_v36 = vld [vmem:[#allocation3 + $0x658] sm:$0xff] }
 0x77c   : > { %v9708_v1 = vadd.f32 %v9444_v58, %v6534_v20  ;;  %v9446_v24 = vpop.f32.mrb[238].mxu0 }
 0x77d   : > { %9995 = vst [vmem:[#allocation3 + $0x440] sm:$0xff] %v9707_v42  ;;  %v9713_v7 = vadd.f32 %v9446_v24, %v6539_v33  ;;  %v9448_v51 = vpop.f32.mrb[239].mxu0  ;;  %v6605_v24 = vld [vmem:[#allocation3 + $0x680] sm:$0xff] }
 0x77e   : > { %9996 = vst [vmem:[#allocation3 + $0x448] sm:$0xff] %v9708_v1  ;;  %v9714_v23 = vadd.f32 %v9448_v51, %v6540_v18 }
 0x77f   : > { %10001 = vst [vmem:[#allocation3 + $0x470] sm:$0xff] %v9713_v7  ;;  %v6606_v7 = vld [vmem:[#allocation3 + $0x688] sm:$0xff] }
 0x780   : > { %10002 = vst [vmem:[#allocation3 + $0x478] sm:$0xff] %v9714_v23  ;;  %v6611_v23 = vld [vmem:[#allocation3 + $0x6b0] sm:$0xff] }
 0x782   : > { %v9452_v0 = vpop.f32.mrb[240].mxu0 }
 0x783   : > { %v9719_v27 = vadd.f32 %v9452_v0, %v6545_v9  ;;  %v9454_v14 = vpop.f32.mrb[241].mxu0  ;;  %v6612_v0 = vld [vmem:[#allocation3 + $0x6b8] sm:$0xff] }
 0x784   : > { %v9720_v47 = vadd.f32 %v9454_v14, %v6546_v50  ;;  %v9456_v6 = vpop.f32.mrb[242].mxu0 }
 0x785   : > { %10007 = vst [vmem:[#allocation3 + $0x4a0] sm:$0xff] %v9719_v27  ;;  %v9725_v37 = vadd.f32 %v9456_v6, %v6551_v56  ;;  %v9458_v25 = vpop.f32.mrb[243].mxu0  ;;  %v6617_v6 = vld [vmem:[#allocation3 + $0x6e0] sm:$0xff] }
 0x786   : > { %10008 = vst [vmem:[#allocation3 + $0x4a8] sm:$0xff] %v9720_v47  ;;  %v9726_v32 = vadd.f32 %v9458_v25, %v6552_v53 }
 0x787   : > { %10013 = vst [vmem:[#allocation3 + $0x4d0] sm:$0xff] %v9725_v37  ;;  %v6618_v37 = vld [vmem:[#allocation3 + $0x6e8] sm:$0xff] }
 0x788   : > { %10014 = vst [vmem:[#allocation3 + $0x4d8] sm:$0xff] %v9726_v32  ;;  %v6623_v32 = vld [vmem:[#allocation3 + $0x710] sm:$0xff] }
 0x78a   : > { %v9462_v2 = vpop.f32.mrb[244].mxu0 }
 0x78b   : > { %v9731_v44 = vadd.f32 %v9462_v2, %v6557_v40  ;;  %v9464_v28 = vpop.f32.mrb[245].mxu0  ;;  %v6624_v2 = vld [vmem:[#allocation3 + $0x718] sm:$0xff] }
 0x78c   : > { %v9732_v5 = vadd.f32 %v9464_v28, %v6558_v39  ;;  %v9466_v12 = vpop.f32.mrb[246].mxu0 }
 0x78d   : > { %10019 = vst [vmem:[#allocation3 + $0x500] sm:$0xff] %v9731_v44  ;;  %v9737_v4 = vadd.f32 %v9466_v12, %v6563_v15  ;;  %v9468_v26 = vpop.f32.mrb[247].mxu0  ;;  %v6629_v12 = vld [vmem:[#allocation3 + $0x740] sm:$0xff] }
 0x78e   : > { %10020 = vst [vmem:[#allocation3 + $0x508] sm:$0xff] %v9732_v5  ;;  %v9738_v13 = vadd.f32 %v9468_v26, %v6564_v21 }
 0x78f   : > { %10025 = vst [vmem:[#allocation3 + $0x530] sm:$0xff] %v9737_v4  ;;  %v6630_v4 = vld [vmem:[#allocation3 + $0x748] sm:$0xff] }
 0x790   : > { %10026 = vst [vmem:[#allocation3 + $0x538] sm:$0xff] %v9738_v13  ;;  %v6635_v13 = vld [vmem:[#allocation3 + $0x770] sm:$0xff] }
 0x792   : > { %v9472_v45 = vpop.f32.mrb[248].mxu0 }
 0x793   : > { %v9743_v63 = vadd.f32 %v9472_v45, %v6569_v3  ;;  %v9474_v11 = vpop.f32.mrb[249].mxu0  ;;  %v6636_v45 = vld [vmem:[#allocation3 + $0x778] sm:$0xff] }
 0x794   : > { %v9744_v10 = vadd.f32 %v9474_v11, %v6570_v59  ;;  %v9476_v17 = vpop.f32.mrb[250].mxu0 }
 0x795   : > { %10031 = vst [vmem:[#allocation3 + $0x560] sm:$0xff] %v9743_v63  ;;  %v9749_v55 = vadd.f32 %v9476_v17, %v6575_v41  ;;  %v9478_v54 = vpop.f32.mrb[251].mxu0  ;;  %v6641_v17 = vld [vmem:[#allocation3 + $0x7a0] sm:$0xff] }
 0x796   : > { %10032 = vst [vmem:[#allocation3 + $0x568] sm:$0xff] %v9744_v10  ;;  %v9750_v30 = vadd.f32 %v9478_v54, %v6576_v34 }
 0x797   : > { %10037 = vst [vmem:[#allocation3 + $0x590] sm:$0xff] %v9749_v55  ;;  %v6642_v55 = vld [vmem:[#allocation3 + $0x7a8] sm:$0xff] }
 0x798   : > { %10038 = vst [vmem:[#allocation3 + $0x598] sm:$0xff] %v9750_v30  ;;  %v6647_v30 = vld [vmem:[#allocation3 + $0x7d0] sm:$0xff] }
 0x79a   : > { %v9482_v60 = vpop.f32.mrb[252].mxu0 }
 0x79b   : > { %v9755_v35 = vadd.f32 %v9482_v60, %v6581_v38  ;;  %v9484_v19 = vpop.f32.mrb[253].mxu0  ;;  %v6648_v60 = vld [vmem:[#allocation3 + $0x7d8] sm:$0xff] }
 0x79c   : > { %v9756_v31 = vadd.f32 %v9484_v19, %v6582_v48  ;;  %v9486_v46 = vpop.f32.mrb[254].mxu0 }
 0x79d   : > { %10043 = vst [vmem:[#allocation3 + $0x5c0] sm:$0xff] %v9755_v35  ;;  %v9761_v43 = vadd.f32 %v9486_v46, %v6587_v22  ;;  %v9488_v49 = vpop.f32.mrb[255].mxu0  ;;  %v6653_v46 = vld [vmem:[#allocation3 + $0x800] sm:$0xff] }
 0x79e   : > { %10044 = vst [vmem:[#allocation3 + $0x5c8] sm:$0xff] %v9756_v31  ;;  %v9762_v62 = vadd.f32 %v9488_v49, %v6588_v16 }
 0x79f   : > { %10049 = vst [vmem:[#allocation3 + $0x5f0] sm:$0xff] %v9761_v43  ;;  %v6654_v43 = vld [vmem:[#allocation3 + $0x808] sm:$0xff] }
 0x7a0   : > { %10050 = vst [vmem:[#allocation3 + $0x5f8] sm:$0xff] %v9762_v62  ;;  %v6659_v62 = vld [vmem:[#allocation3 + $0x830] sm:$0xff] }
 0x7a2   : > { %v9492_v61 = vpop.f32.mrb[0].mxu0 }
 0x7a3   : > { %v9767_v52 = vadd.f32 %v9492_v61, %v6593_v8  ;;  %v9494_v20 = vpop.f32.mrb[1].mxu0  ;;  %v6660_v61 = vld [vmem:[#allocation3 + $0x838] sm:$0xff] }
 0x7a4   : > { %v9768_v33 = vadd.f32 %v9494_v20, %v6594_v29  ;;  %v9496_v42 = vpop.f32.mrb[2].mxu0 }
 0x7a5   : > { %10055 = vst [vmem:[#allocation3 + $0x620] sm:$0xff] %v9767_v52  ;;  %v9773_v58 = vadd.f32 %v9496_v42, %v6599_v57  ;;  %v9498_v18 = vpop.f32.mrb[3].mxu0  ;;  %v6665_v42 = vld [vmem:[#allocation3 + $0x860] sm:$0xff] }
 0x7a6   : > { %10056 = vst [vmem:[#allocation3 + $0x628] sm:$0xff] %v9768_v33  ;;  %v9774_v1 = vadd.f32 %v9498_v18, %v6600_v36 }
 0x7a7   : > { %10061 = vst [vmem:[#allocation3 + $0x650] sm:$0xff] %v9773_v58  ;;  %v6666_v58 = vld [vmem:[#allocation3 + $0x868] sm:$0xff] }
 0x7a8   : > { %10062 = vst [vmem:[#allocation3 + $0x658] sm:$0xff] %v9774_v1  ;;  %v6671_v1 = vld [vmem:[#allocation3 + $0x890] sm:$0xff] }
 0x7aa   : > { %v9502_v51 = vpop.f32.mrb[4].mxu0 }
 0x7ab   : > { %v9779_v9 = vadd.f32 %v9502_v51, %v6605_v24  ;;  %v9504_v50 = vpop.f32.mrb[5].mxu0  ;;  %v6672_v51 = vld [vmem:[#allocation3 + $0x898] sm:$0xff] }
 0x7ac   : > { %v9780_v56 = vadd.f32 %v9504_v50, %v6606_v7  ;;  %v9506_v27 = vpop.f32.mrb[6].mxu0 }
 0x7ad   : > { %10067 = vst [vmem:[#allocation3 + $0x680] sm:$0xff] %v9779_v9  ;;  %v9785_v14 = vadd.f32 %v9506_v27, %v6611_v23  ;;  %v9508_v53 = vpop.f32.mrb[7].mxu0  ;;  %v6677_v27 = vld [vmem:[#allocation3 + $0x8c0] sm:$0xff] }
 0x7ae   : > { %10068 = vst [vmem:[#allocation3 + $0x688] sm:$0xff] %v9780_v56  ;;  %v9786_v47 = vadd.f32 %v9508_v53, %v6612_v0 }
 0x7af   : > { %10073 = vst [vmem:[#allocation3 + $0x6b0] sm:$0xff] %v9785_v14  ;;  %v6678_v14 = vld [vmem:[#allocation3 + $0x8c8] sm:$0xff] }
 0x7b0   : > { %10074 = vst [vmem:[#allocation3 + $0x6b8] sm:$0xff] %v9786_v47  ;;  %v6683_v47 = vld [vmem:[#allocation3 + $0x8f0] sm:$0xff] }
 0x7b2   : > { %v9512_v25 = vpop.f32.mrb[8].mxu0 }
 0x7b3   : > { %v9791_v40 = vadd.f32 %v9512_v25, %v6617_v6  ;;  %v9514_v39 = vpop.f32.mrb[9].mxu0  ;;  %v6684_v25 = vld [vmem:[#allocation3 + $0x8f8] sm:$0xff] }
 0x7b4   : > { %v9792_v15 = vadd.f32 %v9514_v39, %v6618_v37  ;;  %v9516_v44 = vpop.f32.mrb[10].mxu0 }
 0x7b5   : > { %10079 = vst [vmem:[#allocation3 + $0x6e0] sm:$0xff] %v9791_v40  ;;  %v9797_v28 = vadd.f32 %v9516_v44, %v6623_v32  ;;  %v9518_v21 = vpop.f32.mrb[11].mxu0  ;;  %v10151_v44 = vld [vmem:[#allocation3] sm:$0xff] (!%p11691_p12) }
 0x7b6   : > { %10080 = vst [vmem:[#allocation3 + $0x6e8] sm:$0xff] %v9792_v15  ;;  %v9798_v5 = vadd.f32 %v9518_v21, %v6624_v2  ;;  %v10152_v21 = vld [vmem:[#allocation3 + $0x8] sm:$0xff] (!%p11691_p12) }
 0x7b7   : > { %10085 = vst [vmem:[#allocation3 + $0x710] sm:$0xff] %v9797_v28  ;;  %v10439_v28 = vld [vmem:[%s19794_s4] sm:$0x3f] (!%p11691_p12) }
 0x7b8   : > { %10086 = vst [vmem:[#allocation3 + $0x718] sm:$0xff] %v9798_v5  ;;  %v20394_v5 = vld [vmem:[#allocation36_spill] sm:$0xff] (!%p11691_p12) }
 0x7ba   : > { %v9522_v26 = vpop.f32.mrb[12].mxu0 }
 0x7bb   : > { %v9803_v3 = vadd.f32 %v9522_v26, %v6629_v12  ;;  %v9524_v59 = vpop.f32.mrb[13].mxu0  ;;  %v10459_v12 = vsub.s32 (!%p11691_p12), 4, %v20394_v5  ;;  %v20395_v26 = vsub.s32 (!%p11691_p12), 0, %v20394_v5 }
 0x7bc   : > { %v9804_v41 = vadd.f32 %v9524_v59, %v6630_v4  ;;  %v9526_v63 = vpop.f32.mrb[14].mxu0  ;;  %v10463_v4 = vsub.s32 (!%p11691_p12), 5, %v20394_v5 }
 0x7bd   : > { %10091 = vst [vmem:[#allocation3 + $0x740] sm:$0xff] %v9803_v3  ;;  %v9809_v11 = vadd.f32 %v9526_v63, %v6635_v13  ;;  %v9528_v34 = vpop.f32.mrb[15].mxu0  ;;  %v19441_v13 = vrot.slane (!%p11691_p12), %v10439_v28, %v20395_v26  ;;  %v20396_v3 = vsub.s32 (!%p11691_p12), 1, %v20394_v5 }
 0x7be   : > { %10092 = vst [vmem:[#allocation3 + $0x748] sm:$0xff] %v9804_v41  ;;  %v9810_v10 = vadd.f32 %v9528_v34, %v6636_v45  ;;  %v10153_v45 = vld [vmem:[#allocation3 + $0x10] sm:$0xff] (!%p11691_p12)  ;;  %v20397_v41 = vsub.s32 (!%p11691_p12), 2, %v20394_v5  ;;  %v20398_v34 = vsub.s32 (!%p11691_p12), 3, %v20394_v5  ;;  %v10178_v5 = vld [vmem:[#allocation3 + $0xd8] sm:$0xff] (!%p11691_p12) }
 0x7bf   : > { %10097 = vst [vmem:[#allocation3 + $0x770] sm:$0xff] %v9809_v11  ;;  %v19445_v59 = vrot.slane (!%p11691_p12), %v10439_v28, %v20396_v3  ;;  %v10154_v11 = vld [vmem:[#allocation3 + $0x18] sm:$0xff] (!%p11691_p12) }
 0x7c0   : > { %10098 = vst [vmem:[#allocation3 + $0x778] sm:$0xff] %v9810_v10  ;;  %v19449_v63 = vrot.slane (!%p11691_p12), %v10439_v28, %v20397_v41  ;;  %v19453_v10 = vrot.slane (!%p11691_p12), %v10439_v28, %v20398_v34  ;;  %v10181_v41 = vld [vmem:[#allocation3 + $0xf0] sm:$0xff] (!%p11691_p12) }
 0x7c2   : > { %v9532_v54 = vpop.f32.mrb[16].mxu0  ;;  %v10498_v26 = vadd.f32 (!%p11691_p12), %v19453_v10, %v10178_v5 }
 0x7c3   : > { %v9815_v38 = vadd.f32 %v9532_v54, %v6641_v17  ;;  %v9534_v48 = vpop.f32.mrb[17].mxu0  ;;  %v10155_v17 = vld [vmem:[#allocation3 + $0x20] sm:$0xff] (!%p11691_p12)  ;;  %v10156_v54 = vld [vmem:[#allocation3 + $0x28] sm:$0xff] (!%p11691_p12) }
 0x7c4   : > { %v9816_v22 = vadd.f32 %v9534_v48, %v6642_v55  ;;  %v9536_v35 = vpop.f32.mrb[18].mxu0  ;;  %v19455_v55 = vrot.slane (!%p11691_p12), %v10439_v28, %v10459_v12  ;;  %v10158_v48 = vld [vmem:[#allocation3 + $0x38] sm:$0xff] (!%p11691_p12)  ;;  %v10179_v12 = vld [vmem:[#allocation3 + $0xe0] sm:$0xff] (!%p11691_p12)  ;;  %10786 = vst [vmem:[#allocation3 + $0xd8] sm:$0xff] (!%p11691_p12), %v10498_v26  ;;  %v10209_v26 = vld [vmem:[#allocation3 + $0x1d0] sm:$0xff] (!%p11691_p12) }
 0x7c5   : > { %10103 = vst [vmem:[#allocation3 + $0x7a0] sm:$0xff] %v9815_v38  ;;  %v9821_v19 = vadd.f32 %v9536_v35, %v6647_v30  ;;  %v9538_v16 = vpop.f32.mrb[19].mxu0  ;;  %v19457_v30 = vrot.slane (!%p11691_p12), %v10439_v28, %v10463_v4  ;;  %v10157_v38 = vld [vmem:[#allocation3 + $0x30] sm:$0xff] (!%p11691_p12)  ;;  %v10473_v35 = vadd.f32 (!%p11691_p12), %v19449_v63, %v10153_v45  ;;  %v10180_v45 = vld [vmem:[#allocation3 + $0xe8] sm:$0xff] (!%p11691_p12) }
 0x7c6   : > { %10104 = vst [vmem:[#allocation3 + $0x7a8] sm:$0xff] %v9816_v22  ;;  %v9822_v31 = vadd.f32 %v9538_v16, %v6648_v60  ;;  %v10471_v60 = vadd.f32 (!%p11691_p12), %v19441_v13, %v10151_v44  ;;  %v10472_v22 = vadd.f32 (!%p11691_p12), %v19445_v59, %v10152_v21  ;;  %v10159_v16 = vld [vmem:[#allocation3 + $0x40] sm:$0xff] (!%p11691_p12)  ;;  %v10177_v21 = vld [vmem:[#allocation3 + $0xd0] sm:$0xff] (!%p11691_p12)  ;;  %v10499_v3 = vadd.f32 (!%p11691_p12), %v19455_v55, %v10179_v12 }
 0x7c7   : > { %10109 = vst [vmem:[#allocation3 + $0x7d0] sm:$0xff] %v9821_v19  ;;  %v10474_v19 = vadd.f32 (!%p11691_p12), %v19453_v10, %v10154_v11  ;;  %10761 = vst [vmem:[#allocation3 + $0x10] sm:$0xff] (!%p11691_p12), %v10473_v35  ;;  %v10497_v4 = vadd.f32 (!%p11691_p12), %v19449_v63, %v10177_v21  ;;  %v10182_v11 = vld [vmem:[#allocation3 + $0xf8] sm:$0xff] (!%p11691_p12)  ;;  %v10500_v34 = vadd.f32 (!%p11691_p12), %v19457_v30, %v10180_v45  ;;  %v10207_v12 = vld [vmem:[#allocation3 + $0x1c0] sm:$0xff] (!%p11691_p12) }
 0x7c8   : > { %10110 = vst [vmem:[#allocation3 + $0x7d8] sm:$0xff] %v9822_v31  ;;  %v10160_v31 = vld [vmem:[#allocation3 + $0x48] sm:$0xff] (!%p11691_p12)  ;;  %10759 = vst [vmem:[#allocation3] sm:$0xff] (!%p11691_p12), %v10471_v60  ;;  %v10185_v60 = vld [vmem:[#allocation3 + $0x110] sm:$0xff] (!%p11691_p12) }
 0x7c9   : > { %10760 = vst [vmem:[#allocation3 + $0x8] sm:$0xff] (!%p11691_p12), %v10472_v22  ;;  %10762 = vst [vmem:[#allocation3 + $0x18] sm:$0xff] (!%p11691_p12), %v10474_v19  ;;  %v10505_v19 = vadd.f32 (!%p11691_p12), %v19455_v55, %v10185_v60  ;;  %v10213_v60 = vld [vmem:[#allocation3 + $0x1f0] sm:$0xff] (!%p11691_p12) }
 0x7ca   : > { %v9542_v49 = vpop.f32.mrb[20].mxu0  ;;  %10785 = vst [vmem:[#allocation3 + $0xd0] sm:$0xff] (!%p11691_p12), %v10497_v4  ;;  %10787 = vst [vmem:[#allocation3 + $0xe0] sm:$0xff] (!%p11691_p12), %v10499_v3  ;;  %v10208_v4 = vld [vmem:[#allocation3 + $0x1c8] sm:$0xff] (!%p11691_p12)  ;;  %v10527_v3 = vadd.f32 (!%p11691_p12), %v19449_v63, %v10207_v12 }
 0x7cb   : > { %v9827_v8 = vadd.f32 %v9542_v49, %v6653_v46  ;;  %v9544_v29 = vpop.f32.mrb[21].mxu0  ;;  %v10161_v46 = vld [vmem:[#allocation3 + $0x50] sm:$0xff] (!%p11691_p12)  ;;  %v10476_v49 = vadd.f32 (!%p11691_p12), %v19457_v30, %v10156_v54  ;;  %v10502_v54 = vadd.f32 (!%p11691_p12), %v19445_v59, %v10182_v11  ;;  %10788 = vst [vmem:[#allocation3 + $0xe8] sm:$0xff] (!%p11691_p12), %v10500_v34  ;;  %10793 = vst [vmem:[#allocation3 + $0x110] sm:$0xff] (!%p11691_p12), %v10505_v19  ;;  %v10210_v11 = vld [vmem:[#allocation3 + $0x1d8] sm:$0xff] (!%p11691_p12) }
 0x7cc   : > { %v9828_v57 = vadd.f32 %v9544_v29, %v6654_v43  ;;  %v9546_v52 = vpop.f32.mrb[22].mxu0  ;;  %v10475_v43 = vadd.f32 (!%p11691_p12), %v19455_v55, %v10155_v17  ;;  %v10162_v29 = vld [vmem:[#allocation3 + $0x58] sm:$0xff] (!%p11691_p12)  ;;  %v10501_v17 = vadd.f32 (!%p11691_p12), %v19441_v13, %v10181_v41  ;;  %v10528_v45 = vadd.f32 (!%p11691_p12), %v19453_v10, %v10208_v4  ;;  %v10211_v34 = vld [vmem:[#allocation3 + $0x1e0] sm:$0xff] (!%p11691_p12)  ;;  %10815 = vst [vmem:[#allocation3 + $0x1c0] sm:$0xff] (!%p11691_p12), %v10527_v3 }
 0x7cd   : > { %10115 = vst [vmem:[#allocation3 + $0x800] sm:$0xff] %v9827_v8  ;;  %v9833_v20 = vadd.f32 %v9546_v52, %v6659_v62  ;;  %v9548_v36 = vpop.f32.mrb[23].mxu0  ;;  %v10477_v62 = vadd.f32 (!%p11691_p12), %v19441_v13, %v10157_v38  ;;  %v10478_v8 = vadd.f32 (!%p11691_p12), %v19445_v59, %v10158_v48  ;;  %v10479_v52 = vadd.f32 (!%p11691_p12), %v19449_v63, %v10159_v16  ;;  %v10183_v38 = vld [vmem:[#allocation3 + $0x100] sm:$0xff] (!%p11691_p12)  ;;  %v10184_v48 = vld [vmem:[#allocation3 + $0x108] sm:$0xff] (!%p11691_p12)  ;;  %v10186_v16 = vld [vmem:[#allocation3 + $0x118] sm:$0xff] (!%p11691_p12) }
 0x7ce   : > { %10116 = vst [vmem:[#allocation3 + $0x808] sm:$0xff] %v9828_v57  ;;  %v9834_v33 = vadd.f32 %v9548_v36, %v6660_v61  ;;  %v10163_v61 = vld [vmem:[#allocation3 + $0x60] sm:$0xff] (!%p11691_p12)  ;;  %v10164_v57 = vld [vmem:[#allocation3 + $0x68] sm:$0xff] (!%p11691_p12)  ;;  %v10481_v36 = vadd.f32 (!%p11691_p12), %v19455_v55, %v10161_v46  ;;  %10763 = vst [vmem:[#allocation3 + $0x20] sm:$0xff] (!%p11691_p12), %v10475_v43  ;;  %v10503_v22 = vadd.f32 (!%p11691_p12), %v19449_v63, %v10183_v38 }
 0x7cf   : > { %10121 = vst [vmem:[#allocation3 + $0x830] sm:$0xff] %v9833_v20  ;;  %v10480_v20 = vadd.f32 (!%p11691_p12), %v19453_v10, %v10160_v31  ;;  %10764 = vst [vmem:[#allocation3 + $0x28] sm:$0xff] (!%p11691_p12), %v10476_v49  ;;  %v10504_v35 = vadd.f32 (!%p11691_p12), %v19453_v10, %v10184_v48  ;;  %v10187_v31 = vld [vmem:[#allocation3 + $0x120] sm:$0xff] (!%p11691_p12)  ;;  %v10188_v46 = vld [vmem:[#allocation3 + $0x128] sm:$0xff] (!%p11691_p12)  ;;  %v10506_v43 = vadd.f32 (!%p11691_p12), %v19457_v30, %v10186_v16 }
 0x7d0   : > { %10122 = vst [vmem:[#allocation3 + $0x838] sm:$0xff] %v9834_v33  ;;  %v10482_v33 = vadd.f32 (!%p11691_p12), %v19457_v30, %v10162_v29  ;;  %10765 = vst [vmem:[#allocation3 + $0x30] sm:$0xff] (!%p11691_p12), %v10477_v62  ;;  %v10507_v49 = vadd.f32 (!%p11691_p12), %v19441_v13, %v10187_v31  ;;  %v10508_v62 = vadd.f32 (!%p11691_p12), %v19445_v59, %v10188_v46  ;;  %v10190_v29 = vld [vmem:[#allocation3 + $0x138] sm:$0xff] (!%p11691_p12)  ;;  %v10216_v46 = vld [vmem:[#allocation3 + $0x208] sm:$0xff] (!%p11691_p12) }
 0x7d1   : > { %10766 = vst [vmem:[#allocation3 + $0x38] sm:$0xff] (!%p11691_p12), %v10478_v8  ;;  %10767 = vst [vmem:[#allocation3 + $0x40] sm:$0xff] (!%p11691_p12), %v10479_v52  ;;  %v10189_v8 = vld [vmem:[#allocation3 + $0x130] sm:$0xff] (!%p11691_p12)  ;;  %v10510_v52 = vadd.f32 (!%p11691_p12), %v19453_v10, %v10190_v29  ;;  %v10529_v41 = vadd.f32 (!%p11691_p12), %v19455_v55, %v10209_v26  ;;  %v10531_v38 = vadd.f32 (!%p11691_p12), %v19441_v13, %v10211_v34  ;;  %v10238_v3 = vld [vmem:[#allocation3 + $0x2b8] sm:$0xff] (!%p11691_p12) }
 0x7d2   : > { %v9552_v18 = vpop.f32.mrb[24].mxu0  ;;  %10768 = vst [vmem:[#allocation3 + $0x48] sm:$0xff] (!%p11691_p12), %v10480_v20  ;;  %10769 = vst [vmem:[#allocation3 + $0x50] sm:$0xff] (!%p11691_p12), %v10481_v36  ;;  %v10192_v36 = vld [vmem:[#allocation3 + $0x148] sm:$0xff] (!%p11691_p12)  ;;  %v10533_v19 = vadd.f32 (!%p11691_p12), %v19449_v63, %v10213_v60  ;;  %v10237_v26 = vld [vmem:[#allocation3 + $0x2b0] sm:$0xff] (!%p11691_p12) }
 0x7d3   : > { %v9839_v24 = vadd.f32 %v9552_v18, %v6665_v42  ;;  %v9554_v7 = vpop.f32.mrb[25].mxu0  ;;  %v10165_v42 = vld [vmem:[#allocation3 + $0x70] sm:$0xff] (!%p11691_p12)  ;;  %v10167_v18 = vld [vmem:[#allocation3 + $0x80] sm:$0xff] (!%p11691_p12)  ;;  %10770 = vst [vmem:[#allocation3 + $0x58] sm:$0xff] (!%p11691_p12), %v10482_v33  ;;  %10789 = vst [vmem:[#allocation3 + $0xf0] sm:$0xff] (!%p11691_p12), %v10501_v17 }
 0x7d4   : > { %v9840_v23 = vadd.f32 %v9554_v7, %v6666_v58  ;;  %v9556_v9 = vpop.f32.mrb[26].mxu0  ;;  %v10166_v58 = vld [vmem:[#allocation3 + $0x78] sm:$0xff] (!%p11691_p12)  ;;  %v10485_v7 = vadd.f32 (!%p11691_p12), %v19449_v63, %v10165_v42  ;;  %10790 = vst [vmem:[#allocation3 + $0xf8] sm:$0xff] (!%p11691_p12), %v10502_v54  ;;  %10791 = vst [vmem:[#allocation3 + $0x100] sm:$0xff] (!%p11691_p12), %v10503_v22  ;;  %v10193_v33 = vld [vmem:[#allocation3 + $0x150] sm:$0xff] (!%p11691_p12)  ;;  %v10530_v54 = vadd.f32 (!%p11691_p12), %v19457_v30, %v10210_v11 }
 0x7d5   : > { %10127 = vst [vmem:[#allocation3 + $0x860] sm:$0xff] %v9839_v24  ;;  %v9845_v50 = vadd.f32 %v9556_v9, %v6671_v1  ;;  %v9558_v0 = vpop.f32.mrb[27].mxu0  ;;  %v10483_v1 = vadd.f32 (!%p11691_p12), %v19441_v13, %v10163_v61  ;;  %v10484_v24 = vadd.f32 (!%p11691_p12), %v19445_v59, %v10164_v57  ;;  %v10169_v9 = vld [vmem:[#allocation3 + $0x90] sm:$0xff] (!%p11691_p12)  ;;  %v10191_v61 = vld [vmem:[#allocation3 + $0x140] sm:$0xff] (!%p11691_p12)  ;;  %10792 = vst [vmem:[#allocation3 + $0x108] sm:$0xff] (!%p11691_p12), %v10504_v35 }
 0x7d6   : > { %10128 = vst [vmem:[#allocation3 + $0x868] sm:$0xff] %v9840_v23  ;;  %v9846_v56 = vadd.f32 %v9558_v0, %v6672_v51  ;;  %v10486_v51 = vadd.f32 (!%p11691_p12), %v19453_v10, %v10166_v58  ;;  %v10168_v23 = vld [vmem:[#allocation3 + $0x88] sm:$0xff] (!%p11691_p12)  ;;  %v10487_v0 = vadd.f32 (!%p11691_p12), %v19455_v55, %v10167_v18  ;;  %10773 = vst [vmem:[#allocation3 + $0x70] sm:$0xff] (!%p11691_p12), %v10485_v7  ;;  %v10194_v42 = vld [vmem:[#allocation3 + $0x158] sm:$0xff] (!%p11691_p12) }
 0x7d7   : > { %10133 = vst [vmem:[#allocation3 + $0x890] sm:$0xff] %v9845_v50  ;;  %v10170_v50 = vld [vmem:[#allocation3 + $0x98] sm:$0xff] (!%p11691_p12)  ;;  %10771 = vst [vmem:[#allocation3 + $0x60] sm:$0xff] (!%p11691_p12), %v10483_v1  ;;  %v10509_v57 = vadd.f32 (!%p11691_p12), %v19449_v63, %v10189_v8  ;;  %v10511_v20 = vadd.f32 (!%p11691_p12), %v19455_v55, %v10191_v61  ;;  %v10512_v58 = vadd.f32 (!%p11691_p12), %v19457_v30, %v10192_v36  ;;  %v10196_v7 = vld [vmem:[#allocation3 + $0x168] sm:$0xff] (!%p11691_p12) }
 0x7d8   : > { %10134 = vst [vmem:[#allocation3 + $0x898] sm:$0xff] %v9846_v56  ;;  %v10488_v56 = vadd.f32 (!%p11691_p12), %v19457_v30, %v10168_v23  ;;  %10772 = vst [vmem:[#allocation3 + $0x68] sm:$0xff] (!%p11691_p12), %v10484_v24  ;;  %v10513_v18 = vadd.f32 (!%p11691_p12), %v19441_v13, %v10193_v33  ;;  %v10514_v1 = vadd.f32 (!%p11691_p12), %v19445_v59, %v10194_v42  ;;  %v10195_v24 = vld [vmem:[#allocation3 + $0x160] sm:$0xff] (!%p11691_p12)  ;;  %v10212_v17 = vld [vmem:[#allocation3 + $0x1e8] sm:$0xff] (!%p11691_p12) }
 0x7d9   : > { %10774 = vst [vmem:[#allocation3 + $0x78] sm:$0xff] (!%p11691_p12), %v10486_v51  ;;  %10775 = vst [vmem:[#allocation3 + $0x80] sm:$0xff] (!%p11691_p12), %v10487_v0  ;;  %v10197_v51 = vld [vmem:[#allocation3 + $0x170] sm:$0xff] (!%p11691_p12)  ;;  %v10515_v23 = vadd.f32 (!%p11691_p12), %v19449_v63, %v10195_v24  ;;  %v10198_v0 = vld [vmem:[#allocation3 + $0x178] sm:$0xff] (!%p11691_p12)  ;;  %v10532_v48 = vadd.f32 (!%p11691_p12), %v19445_v59, %v10212_v17  ;;  %v10558_v11 = vadd.f32 (!%p11691_p12), %v19453_v10, %v10238_v3 }
 0x7da   : > { %v9562_v53 = vpop.f32.mrb[28].mxu0  ;;  %10150 = sbr.rel (%p11691_p12) target bundleno = 2143 (0x85f), region = 71  ;;  %10776 = vst [vmem:[#allocation3 + $0x88] sm:$0xff] (!%p11691_p12), %v10488_v56  ;;  %10794 = vst [vmem:[#allocation3 + $0x118] sm:$0xff] (!%p11691_p12), %v10506_v43  ;;  %v10199_v56 = vld [vmem:[#allocation3 + $0x180] sm:$0xff] (!%p11691_p12)  ;;  %v10214_v22 = vld [vmem:[#allocation3 + $0x1f8] sm:$0xff] (!%p11691_p12) }
 0x7db   : > { %v9851_v6 = vadd.f32 %v9562_v53, %v6677_v27  ;;  %v9564_v37 = vpop.f32.mrb[29].mxu0  ;;  %v10489_v27 = vadd.f32 (!%p11691_p12), %v19441_v13, %v10169_v9  ;;  %v10171_v53 = vld [vmem:[#allocation3 + $0xa0] sm:$0xff] (!%p11691_p12)  ;;  %10795 = vst [vmem:[#allocation3 + $0x120] sm:$0xff] (!%p11691_p12), %v10507_v49  ;;  %10796 = vst [vmem:[#allocation3 + $0x128] sm:$0xff] (!%p11691_p12), %v10508_v62  ;;  %v10516_v9 = vadd.f32 (!%p11691_p12), %v19453_v10, %v10196_v7  ;;  %v10217_v43 = vld [vmem:[#allocation3 + $0x210] sm:$0xff] (!%p11691_p12) }
 0x7dc   : > { %v9852_v32 = vadd.f32 %v9564_v37, %v6678_v14  ;;  %v9566_v40 = vpop.f32.mrb[30].mxu0  ;;  %v10490_v14 = vadd.f32 (!%p11691_p12), %v19445_v59, %v10170_v50  ;;  %v10491_v37 = vadd.f32 (!%p11691_p12), %v19449_v63, %v10171_v53  ;;  %10797 = vst [vmem:[#allocation3 + $0x130] sm:$0xff] (!%p11691_p12), %v10509_v57  ;;  %10798 = vst [vmem:[#allocation3 + $0x138] sm:$0xff] (!%p11691_p12), %v10510_v52  ;;  %v10215_v35 = vld [vmem:[#allocation3 + $0x200] sm:$0xff] (!%p11691_p12)  ;;  %v10218_v49 = vld [vmem:[#allocation3 + $0x218] sm:$0xff] (!%p11691_p12) }
 0x7dd   : > { %10139 = vst [vmem:[#allocation3 + $0x8c0] sm:$0xff] %v9851_v6  ;;  %v9857_v39 = vadd.f32 %v9566_v40, %v6683_v47  ;;  %v9568_v2 = vpop.f32.mrb[31].mxu0  ;;  %v10172_v47 = vld [vmem:[#allocation3 + $0xa8] sm:$0xff] (!%p11691_p12)  ;;  %v10173_v6 = vld [vmem:[#allocation3 + $0xb0] sm:$0xff] (!%p11691_p12)  ;;  %v10174_v40 = vld [vmem:[#allocation3 + $0xb8] sm:$0xff] (!%p11691_p12)  ;;  %v10517_v50 = vadd.f32 (!%p11691_p12), %v19455_v55, %v10197_v51  ;;  %v10519_v53 = vadd.f32 (!%p11691_p12), %v19441_v13, %v10199_v56  ;;  %v10534_v16 = vadd.f32 (!%p11691_p12), %v19453_v10, %v10214_v22 }
 0x7de   : > { %10140 = vst [vmem:[#allocation3 + $0x8c8] sm:$0xff] %v9852_v32  ;;  %v9858_v15 = vadd.f32 %v9568_v2, %v6684_v25  ;;  %v10492_v25 = vadd.f32 (!%p11691_p12), %v19453_v10, %v10172_v47  ;;  %v10493_v32 = vadd.f32 (!%p11691_p12), %v19455_v55, %v10173_v6  ;;  %v10176_v2 = vld [vmem:[#allocation3 + $0xc8] sm:$0xff] (!%p11691_p12)  ;;  %10777 = vst [vmem:[#allocation3 + $0x90] sm:$0xff] (!%p11691_p12), %v10489_v27  ;;  %v10201_v6 = vld [vmem:[#allocation3 + $0x190] sm:$0xff] (!%p11691_p12) }
 0x7df   : > { %10145 = vst [vmem:[#allocation3 + $0x8f0] sm:$0xff] %v9857_v39  ;;  %v10175_v39 = vld [vmem:[#allocation3 + $0xc0] sm:$0xff] (!%p11691_p12)  ;;  %10778 = vst [vmem:[#allocation3 + $0x98] sm:$0xff] (!%p11691_p12), %v10490_v14  ;;  %v10496_v28 = vadd.f32 (!%p11691_p12), %v19445_v59, %v10176_v2  ;;  %v10200_v27 = vld [vmem:[#allocation3 + $0x188] sm:$0xff] (!%p11691_p12)  ;;  %v10518_v14 = vadd.f32 (!%p11691_p12), %v19457_v30, %v10198_v0  ;;  %v10535_v31 = vadd.f32 (!%p11691_p12), %v19455_v55, %v10215_v35 }
 0x7e0   : > { %10146 = vst [vmem:[#allocation3 + $0x8f8] sm:$0xff] %v9858_v15  ;;  %v10494_v15 = vadd.f32 (!%p11691_p12), %v19457_v30, %v10174_v40  ;;  %v10495_v44 = vadd.f32 (!%p11691_p12), %v19441_v13, %v10175_v39  ;;  %10779 = vst [vmem:[#allocation3 + $0xa0] sm:$0xff] (!%p11691_p12), %v10491_v37  ;;  %v10520_v47 = vadd.f32 (!%p11691_p12), %v19445_v59, %v10200_v27  ;;  %v10202_v37 = vld [vmem:[#allocation3 + $0x198] sm:$0xff] (!%p11691_p12)  ;;  %v10204_v2 = vld [vmem:[#allocation3 + $0x1a8] sm:$0xff] (!%p11691_p12) }
 0x7e1   : > { %10780 = vst [vmem:[#allocation3 + $0xa8] sm:$0xff] %v10492_v25  ;;  %10781 = vst [vmem:[#allocation3 + $0xb0] sm:$0xff] %v10493_v32  ;;  %v10203_v25 = vld [vmem:[#allocation3 + $0x1a0] sm:$0xff]  ;;  %v10521_v32 = vadd.f32 %v19449_v63, %v10201_v6  ;;  %v10522_v40 = vadd.f32 %v19453_v10, %v10202_v37  ;;  %v10536_v62 = vadd.f32 %v19457_v30, %v10216_v46  ;;  %v10220_v57 = vld [vmem:[#allocation3 + $0x228] sm:$0xff] }
 0x7e2   : > { %10782 = vst [vmem:[#allocation3 + $0xb8] sm:$0xff] %v10494_v15  ;;  %10783 = vst [vmem:[#allocation3 + $0xc0] sm:$0xff] %v10495_v44  ;;  %v10523_v39 = vadd.f32 %v19455_v55, %v10203_v25  ;;  %v10205_v15 = vld [vmem:[#allocation3 + $0x1b0] sm:$0xff]  ;;  %v10206_v44 = vld [vmem:[#allocation3 + $0x1b8] sm:$0xff]  ;;  %v10537_v8 = vadd.f32 %v19441_v13, %v10217_v43  ;;  %v10538_v29 = vadd.f32 %v19445_v59, %v10218_v49 }
 0x7e3   : > { %10784 = vst [vmem:[#allocation3 + $0xc8] sm:$0xff] %v10496_v28  ;;  %10799 = vst [vmem:[#allocation3 + $0x140] sm:$0xff] %v10511_v20  ;;  %v10524_v28 = vadd.f32 %v19457_v30, %v10204_v2  ;;  %v10525_v21 = vadd.f32 %v19441_v13, %v10205_v15  ;;  %v10526_v5 = vadd.f32 %v19445_v59, %v10206_v44  ;;  %v10219_v61 = vld [vmem:[#allocation3 + $0x220] sm:$0xff]  ;;  %v10221_v52 = vld [vmem:[#allocation3 + $0x230] sm:$0xff] }
 0x7e4   : > { %10800 = vst [vmem:[#allocation3 + $0x148] sm:$0xff] %v10512_v58  ;;  %10801 = vst [vmem:[#allocation3 + $0x150] sm:$0xff] %v10513_v18  ;;  %v10539_v20 = vadd.f32 %v19449_v63, %v10219_v61  ;;  %v10540_v36 = vadd.f32 %v19453_v10, %v10220_v57  ;;  %v10541_v33 = vadd.f32 %v19455_v55, %v10221_v52  ;;  %v10222_v42 = vld [vmem:[#allocation3 + $0x238] sm:$0xff]  ;;  %v10223_v58 = vld [vmem:[#allocation3 + $0x240] sm:$0xff] }
 0x7e5   : > { %10802 = vst [vmem:[#allocation3 + $0x158] sm:$0xff] %v10514_v1  ;;  %10803 = vst [vmem:[#allocation3 + $0x160] sm:$0xff] %v10515_v23  ;;  %v10224_v18 = vld [vmem:[#allocation3 + $0x248] sm:$0xff]  ;;  %v10542_v1 = vadd.f32 %v19457_v30, %v10222_v42  ;;  %v10543_v24 = vadd.f32 %v19441_v13, %v10223_v58  ;;  %v10225_v51 = vld [vmem:[#allocation3 + $0x250] sm:$0xff] }
 0x7e6   : > { %10804 = vst [vmem:[#allocation3 + $0x168] sm:$0xff] %v10516_v9  ;;  %10805 = vst [vmem:[#allocation3 + $0x170] sm:$0xff] %v10517_v50  ;;  %v10544_v7 = vadd.f32 %v19445_v59, %v10224_v18  ;;  %v10226_v23 = vld [vmem:[#allocation3 + $0x258] sm:$0xff]  ;;  %v10227_v9 = vld [vmem:[#allocation3 + $0x260] sm:$0xff]  ;;  %v10545_v50 = vadd.f32 %v19449_v63, %v10225_v51 }
 0x7e7   : > { %10806 = vst [vmem:[#allocation3 + $0x178] sm:$0xff] %v10518_v14  ;;  %10807 = vst [vmem:[#allocation3 + $0x180] sm:$0xff] %v10519_v53  ;;  %v10546_v0 = vadd.f32 %v19453_v10, %v10226_v23  ;;  %v10547_v56 = vadd.f32 %v19455_v55, %v10227_v9  ;;  %v10228_v27 = vld [vmem:[#allocation3 + $0x268] sm:$0xff]  ;;  %v10229_v14 = vld [vmem:[#allocation3 + $0x270] sm:$0xff] }
 0x7e8   : > { %10808 = vst [vmem:[#allocation3 + $0x188] sm:$0xff] %v10520_v47  ;;  %10809 = vst [vmem:[#allocation3 + $0x190] sm:$0xff] %v10521_v32  ;;  %v10230_v53 = vld [vmem:[#allocation3 + $0x278] sm:$0xff]  ;;  %v10548_v47 = vadd.f32 %v19457_v30, %v10228_v27  ;;  %v10549_v6 = vadd.f32 %v19441_v13, %v10229_v14  ;;  %v10231_v25 = vld [vmem:[#allocation3 + $0x280] sm:$0xff] }
 0x7e9   : > { %10810 = vst [vmem:[#allocation3 + $0x198] sm:$0xff] %v10522_v40  ;;  %10811 = vst [vmem:[#allocation3 + $0x1a0] sm:$0xff] %v10523_v39  ;;  %v10550_v37 = vadd.f32 %v19445_v59, %v10230_v53  ;;  %v10232_v32 = vld [vmem:[#allocation3 + $0x288] sm:$0xff]  ;;  %v10233_v40 = vld [vmem:[#allocation3 + $0x290] sm:$0xff]  ;;  %v10551_v39 = vadd.f32 %v19449_v63, %v10231_v25 }
 0x7ea   : > { %10812 = vst [vmem:[#allocation3 + $0x1a8] sm:$0xff] %v10524_v28  ;;  %10813 = vst [vmem:[#allocation3 + $0x1b0] sm:$0xff] %v10525_v21  ;;  %v10552_v2 = vadd.f32 %v19453_v10, %v10232_v32  ;;  %v10553_v15 = vadd.f32 %v19455_v55, %v10233_v40  ;;  %v10234_v44 = vld [vmem:[#allocation3 + $0x298] sm:$0xff]  ;;  %v10235_v28 = vld [vmem:[#allocation3 + $0x2a0] sm:$0xff] }
 0x7eb   : > { %10814 = vst [vmem:[#allocation3 + $0x1b8] sm:$0xff] %v10526_v5  ;;  %10816 = vst [vmem:[#allocation3 + $0x1c8] sm:$0xff] %v10528_v45  ;;  %v10236_v21 = vld [vmem:[#allocation3 + $0x2a8] sm:$0xff]  ;;  %v10554_v5 = vadd.f32 %v19457_v30, %v10234_v44  ;;  %v10555_v12 = vadd.f32 %v19441_v13, %v10235_v28  ;;  %v10239_v45 = vld [vmem:[#allocation3 + $0x2c0] sm:$0xff] }
 0x7ec   : > { %10817 = vst [vmem:[#allocation3 + $0x1d0] sm:$0xff] %v10529_v41  ;;  %10818 = vst [vmem:[#allocation3 + $0x1d8] sm:$0xff] %v10530_v54  ;;  %v10556_v4 = vadd.f32 %v19445_v59, %v10236_v21  ;;  %v10557_v41 = vadd.f32 %v19449_v63, %v10237_v26  ;;  %v10559_v34 = vadd.f32 %v19455_v55, %v10239_v45  ;;  %v10240_v17 = vld [vmem:[#allocation3 + $0x2c8] sm:$0xff]  ;;  %v10241_v54 = vld [vmem:[#allocation3 + $0x2d0] sm:$0xff] }
 0x7ed   : > { %10819 = vst [vmem:[#allocation3 + $0x1e0] sm:$0xff] %v10531_v38  ;;  %10820 = vst [vmem:[#allocation3 + $0x1e8] sm:$0xff] %v10532_v48  ;;  %v10242_v38 = vld [vmem:[#allocation3 + $0x2d8] sm:$0xff]  ;;  %v10560_v48 = vadd.f32 %v19457_v30, %v10240_v17  ;;  %v10561_v60 = vadd.f32 %v19441_v13, %v10241_v54  ;;  %v10243_v35 = vld [vmem:[#allocation3 + $0x2e0] sm:$0xff] }
 0x7ee   : > { %10821 = vst [vmem:[#allocation3 + $0x1f0] sm:$0xff] %v10533_v19  ;;  %10822 = vst [vmem:[#allocation3 + $0x1f8] sm:$0xff] %v10534_v16  ;;  %v10562_v22 = vadd.f32 %v19445_v59, %v10242_v38  ;;  %v10244_v19 = vld [vmem:[#allocation3 + $0x2e8] sm:$0xff]  ;;  %v10245_v16 = vld [vmem:[#allocation3 + $0x2f0] sm:$0xff] }
 0x7ef   : > { %10823 = vst [vmem:[#allocation3 + $0x200] sm:$0xff] %v10535_v31  ;;  %10824 = vst [vmem:[#allocation3 + $0x208] sm:$0xff] %v10536_v62  ;;  %v10563_v31 = vadd.f32 %v19449_v63, %v10243_v35  ;;  %v10564_v46 = vadd.f32 %v19453_v10, %v10244_v19  ;;  %v10565_v43 = vadd.f32 %v19455_v55, %v10245_v16  ;;  %v10246_v49 = vld [vmem:[#allocation3 + $0x2f8] sm:$0xff]  ;;  %v10247_v62 = vld [vmem:[#allocation3 + $0x300] sm:$0xff] }
 0x7f0   : > { %10825 = vst [vmem:[#allocation3 + $0x210] sm:$0xff] %v10537_v8  ;;  %10826 = vst [vmem:[#allocation3 + $0x218] sm:$0xff] %v10538_v29  ;;  %v10248_v8 = vld [vmem:[#allocation3 + $0x308] sm:$0xff]  ;;  %v10566_v29 = vadd.f32 %v19457_v30, %v10246_v49  ;;  %v10567_v61 = vadd.f32 %v19441_v13, %v10247_v62  ;;  %v10249_v52 = vld [vmem:[#allocation3 + $0x310] sm:$0xff] }
 0x7f1   : > { %10827 = vst [vmem:[#allocation3 + $0x220] sm:$0xff] %v10539_v20  ;;  %10828 = vst [vmem:[#allocation3 + $0x228] sm:$0xff] %v10540_v36  ;;  %v10568_v57 = vadd.f32 %v19445_v59, %v10248_v8  ;;  %v10250_v20 = vld [vmem:[#allocation3 + $0x318] sm:$0xff]  ;;  %v10251_v36 = vld [vmem:[#allocation3 + $0x320] sm:$0xff] }
 0x7f2   : > { %10829 = vst [vmem:[#allocation3 + $0x230] sm:$0xff] %v10541_v33  ;;  %10830 = vst [vmem:[#allocation3 + $0x238] sm:$0xff] %v10542_v1  ;;  %v10569_v33 = vadd.f32 %v19449_v63, %v10249_v52  ;;  %v10570_v42 = vadd.f32 %v19453_v10, %v10250_v20  ;;  %v10571_v58 = vadd.f32 %v19455_v55, %v10251_v36  ;;  %v10252_v18 = vld [vmem:[#allocation3 + $0x328] sm:$0xff]  ;;  %v10253_v1 = vld [vmem:[#allocation3 + $0x330] sm:$0xff] }
 0x7f3   : > { %10831 = vst [vmem:[#allocation3 + $0x240] sm:$0xff] %v10543_v24  ;;  %10832 = vst [vmem:[#allocation3 + $0x248] sm:$0xff] %v10544_v7  ;;  %v10254_v24 = vld [vmem:[#allocation3 + $0x338] sm:$0xff]  ;;  %v10572_v7 = vadd.f32 %v19457_v30, %v10252_v18  ;;  %v10573_v51 = vadd.f32 %v19441_v13, %v10253_v1  ;;  %v10255_v9 = vld [vmem:[#allocation3 + $0x340] sm:$0xff] }
 0x7f4   : > { %10833 = vst [vmem:[#allocation3 + $0x250] sm:$0xff] %v10545_v50  ;;  %10834 = vst [vmem:[#allocation3 + $0x258] sm:$0xff] %v10546_v0  ;;  %v10574_v23 = vadd.f32 %v19445_v59, %v10254_v24  ;;  %v10256_v50 = vld [vmem:[#allocation3 + $0x348] sm:$0xff]  ;;  %v10257_v0 = vld [vmem:[#allocation3 + $0x350] sm:$0xff] }
 0x7f5   : > { %10835 = vst [vmem:[#allocation3 + $0x260] sm:$0xff] %v10547_v56  ;;  %10836 = vst [vmem:[#allocation3 + $0x268] sm:$0xff] %v10548_v47  ;;  %v10575_v56 = vadd.f32 %v19449_v63, %v10255_v9  ;;  %v10576_v27 = vadd.f32 %v19453_v10, %v10256_v50  ;;  %v10577_v14 = vadd.f32 %v19455_v55, %v10257_v0  ;;  %v10258_v53 = vld [vmem:[#allocation3 + $0x358] sm:$0xff]  ;;  %v10259_v47 = vld [vmem:[#allocation3 + $0x360] sm:$0xff] }
 0x7f6   : > { %10837 = vst [vmem:[#allocation3 + $0x270] sm:$0xff] %v10549_v6  ;;  %10838 = vst [vmem:[#allocation3 + $0x278] sm:$0xff] %v10550_v37  ;;  %v10260_v6 = vld [vmem:[#allocation3 + $0x368] sm:$0xff]  ;;  %v10578_v37 = vadd.f32 %v19457_v30, %v10258_v53  ;;  %v10579_v25 = vadd.f32 %v19441_v13, %v10259_v47  ;;  %v10261_v40 = vld [vmem:[#allocation3 + $0x370] sm:$0xff] }
 0x7f7   : > { %10839 = vst [vmem:[#allocation3 + $0x280] sm:$0xff] %v10551_v39  ;;  %10840 = vst [vmem:[#allocation3 + $0x288] sm:$0xff] %v10552_v2  ;;  %v10580_v32 = vadd.f32 %v19445_v59, %v10260_v6  ;;  %v10262_v39 = vld [vmem:[#allocation3 + $0x378] sm:$0xff]  ;;  %v10263_v2 = vld [vmem:[#allocation3 + $0x380] sm:$0xff] }
 0x7f8   : > { %10841 = vst [vmem:[#allocation3 + $0x290] sm:$0xff] %v10553_v15  ;;  %10842 = vst [vmem:[#allocation3 + $0x298] sm:$0xff] %v10554_v5  ;;  %v10581_v15 = vadd.f32 %v19449_v63, %v10261_v40  ;;  %v10582_v44 = vadd.f32 %v19453_v10, %v10262_v39  ;;  %v10583_v28 = vadd.f32 %v19455_v55, %v10263_v2  ;;  %v10264_v21 = vld [vmem:[#allocation3 + $0x388] sm:$0xff]  ;;  %v10265_v5 = vld [vmem:[#allocation3 + $0x390] sm:$0xff] }
 0x7f9   : > { %10843 = vst [vmem:[#allocation3 + $0x2a0] sm:$0xff] %v10555_v12  ;;  %10844 = vst [vmem:[#allocation3 + $0x2a8] sm:$0xff] %v10556_v4  ;;  %v10266_v12 = vld [vmem:[#allocation3 + $0x398] sm:$0xff]  ;;  %v10584_v4 = vadd.f32 %v19457_v30, %v10264_v21  ;;  %v10585_v26 = vadd.f32 %v19441_v13, %v10265_v5  ;;  %v10267_v45 = vld [vmem:[#allocation3 + $0x3a0] sm:$0xff] }
 0x7fa   : > { %10845 = vst [vmem:[#allocation3 + $0x2b0] sm:$0xff] %v10557_v41  ;;  %10846 = vst [vmem:[#allocation3 + $0x2b8] sm:$0xff] %v10558_v11  ;;  %v10586_v3 = vadd.f32 %v19445_v59, %v10266_v12  ;;  %v10268_v41 = vld [vmem:[#allocation3 + $0x3a8] sm:$0xff]  ;;  %v10269_v11 = vld [vmem:[#allocation3 + $0x3b0] sm:$0xff] }
 0x7fb   : > { %10847 = vst [vmem:[#allocation3 + $0x2c0] sm:$0xff] %v10559_v34  ;;  %10848 = vst [vmem:[#allocation3 + $0x2c8] sm:$0xff] %v10560_v48  ;;  %v10587_v34 = vadd.f32 %v19449_v63, %v10267_v45  ;;  %v10588_v17 = vadd.f32 %v19453_v10, %v10268_v41  ;;  %v10589_v54 = vadd.f32 %v19455_v55, %v10269_v11  ;;  %v10270_v38 = vld [vmem:[#allocation3 + $0x3b8] sm:$0xff]  ;;  %v10271_v48 = vld [vmem:[#allocation3 + $0x3c0] sm:$0xff] }
 0x7fc   : > { %10849 = vst [vmem:[#allocation3 + $0x2d0] sm:$0xff] %v10561_v60  ;;  %10850 = vst [vmem:[#allocation3 + $0x2d8] sm:$0xff] %v10562_v22  ;;  %v10272_v60 = vld [vmem:[#allocation3 + $0x3c8] sm:$0xff]  ;;  %v10590_v22 = vadd.f32 %v19457_v30, %v10270_v38  ;;  %v10591_v35 = vadd.f32 %v19441_v13, %v10271_v48  ;;  %v10273_v16 = vld [vmem:[#allocation3 + $0x3d0] sm:$0xff] }
 0x7fd   : > { %10851 = vst [vmem:[#allocation3 + $0x2e0] sm:$0xff] %v10563_v31  ;;  %10852 = vst [vmem:[#allocation3 + $0x2e8] sm:$0xff] %v10564_v46  ;;  %v10592_v19 = vadd.f32 %v19445_v59, %v10272_v60  ;;  %v10274_v31 = vld [vmem:[#allocation3 + $0x3d8] sm:$0xff]  ;;  %v10275_v46 = vld [vmem:[#allocation3 + $0x3e0] sm:$0xff] }
 0x7fe   : > { %10853 = vst [vmem:[#allocation3 + $0x2f0] sm:$0xff] %v10565_v43  ;;  %10854 = vst [vmem:[#allocation3 + $0x2f8] sm:$0xff] %v10566_v29  ;;  %v10593_v43 = vadd.f32 %v19449_v63, %v10273_v16  ;;  %v10594_v49 = vadd.f32 %v19453_v10, %v10274_v31  ;;  %v10595_v62 = vadd.f32 %v19455_v55, %v10275_v46  ;;  %v10276_v8 = vld [vmem:[#allocation3 + $0x3e8] sm:$0xff]  ;;  %v10277_v29 = vld [vmem:[#allocation3 + $0x3f0] sm:$0xff] }
 0x7ff   : > { %10855 = vst [vmem:[#allocation3 + $0x300] sm:$0xff] %v10567_v61  ;;  %10856 = vst [vmem:[#allocation3 + $0x308] sm:$0xff] %v10568_v57  ;;  %v10278_v61 = vld [vmem:[#allocation3 + $0x3f8] sm:$0xff]  ;;  %v10596_v57 = vadd.f32 %v19457_v30, %v10276_v8  ;;  %v10597_v52 = vadd.f32 %v19441_v13, %v10277_v29  ;;  %v10279_v36 = vld [vmem:[#allocation3 + $0x400] sm:$0xff] }
 0x800   : > { %10857 = vst [vmem:[#allocation3 + $0x310] sm:$0xff] %v10569_v33  ;;  %10858 = vst [vmem:[#allocation3 + $0x318] sm:$0xff] %v10570_v42  ;;  %v10598_v20 = vadd.f32 %v19445_v59, %v10278_v61  ;;  %v10280_v33 = vld [vmem:[#allocation3 + $0x408] sm:$0xff]  ;;  %v10281_v42 = vld [vmem:[#allocation3 + $0x410] sm:$0xff] }
 0x801   : > { %10859 = vst [vmem:[#allocation3 + $0x320] sm:$0xff] %v10571_v58  ;;  %10860 = vst [vmem:[#allocation3 + $0x328] sm:$0xff] %v10572_v7  ;;  %v10599_v58 = vadd.f32 %v19449_v63, %v10279_v36  ;;  %v10600_v18 = vadd.f32 %v19453_v10, %v10280_v33  ;;  %v10601_v1 = vadd.f32 %v19455_v55, %v10281_v42  ;;  %v10282_v24 = vld [vmem:[#allocation3 + $0x418] sm:$0xff]  ;;  %v10283_v7 = vld [vmem:[#allocation3 + $0x420] sm:$0xff] }
 0x802   : > { %10861 = vst [vmem:[#allocation3 + $0x330] sm:$0xff] %v10573_v51  ;;  %10862 = vst [vmem:[#allocation3 + $0x338] sm:$0xff] %v10574_v23  ;;  %v10284_v51 = vld [vmem:[#allocation3 + $0x428] sm:$0xff]  ;;  %v10602_v23 = vadd.f32 %v19457_v30, %v10282_v24  ;;  %v10603_v9 = vadd.f32 %v19441_v13, %v10283_v7  ;;  %v10285_v0 = vld [vmem:[#allocation3 + $0x430] sm:$0xff] }
 0x803   : > { %10863 = vst [vmem:[#allocation3 + $0x340] sm:$0xff] %v10575_v56  ;;  %10864 = vst [vmem:[#allocation3 + $0x348] sm:$0xff] %v10576_v27  ;;  %v10604_v50 = vadd.f32 %v19445_v59, %v10284_v51  ;;  %v10286_v56 = vld [vmem:[#allocation3 + $0x438] sm:$0xff]  ;;  %v10287_v27 = vld [vmem:[#allocation3 + $0x440] sm:$0xff] }
 0x804   : > { %10865 = vst [vmem:[#allocation3 + $0x350] sm:$0xff] %v10577_v14  ;;  %10866 = vst [vmem:[#allocation3 + $0x358] sm:$0xff] %v10578_v37  ;;  %v10605_v14 = vadd.f32 %v19449_v63, %v10285_v0  ;;  %v10606_v53 = vadd.f32 %v19453_v10, %v10286_v56  ;;  %v10607_v47 = vadd.f32 %v19455_v55, %v10287_v27  ;;  %v10288_v6 = vld [vmem:[#allocation3 + $0x448] sm:$0xff]  ;;  %v10289_v37 = vld [vmem:[#allocation3 + $0x450] sm:$0xff] }
 0x805   : > { %10867 = vst [vmem:[#allocation3 + $0x360] sm:$0xff] %v10579_v25  ;;  %10868 = vst [vmem:[#allocation3 + $0x368] sm:$0xff] %v10580_v32  ;;  %v10290_v25 = vld [vmem:[#allocation3 + $0x458] sm:$0xff]  ;;  %v10608_v32 = vadd.f32 %v19457_v30, %v10288_v6  ;;  %v10609_v40 = vadd.f32 %v19441_v13, %v10289_v37  ;;  %v10291_v2 = vld [vmem:[#allocation3 + $0x460] sm:$0xff] }
 0x806   : > { %10869 = vst [vmem:[#allocation3 + $0x370] sm:$0xff] %v10581_v15  ;;  %10870 = vst [vmem:[#allocation3 + $0x378] sm:$0xff] %v10582_v44  ;;  %v10610_v39 = vadd.f32 %v19445_v59, %v10290_v25  ;;  %v10292_v15 = vld [vmem:[#allocation3 + $0x468] sm:$0xff]  ;;  %v10293_v44 = vld [vmem:[#allocation3 + $0x470] sm:$0xff] }
 0x807   : > { %10871 = vst [vmem:[#allocation3 + $0x380] sm:$0xff] %v10583_v28  ;;  %10872 = vst [vmem:[#allocation3 + $0x388] sm:$0xff] %v10584_v4  ;;  %v10611_v28 = vadd.f32 %v19449_v63, %v10291_v2  ;;  %v10612_v21 = vadd.f32 %v19453_v10, %v10292_v15  ;;  %v10613_v5 = vadd.f32 %v19455_v55, %v10293_v44  ;;  %v10294_v12 = vld [vmem:[#allocation3 + $0x478] sm:$0xff]  ;;  %v10295_v4 = vld [vmem:[#allocation3 + $0x480] sm:$0xff] }
 0x808   : > { %10873 = vst [vmem:[#allocation3 + $0x390] sm:$0xff] %v10585_v26  ;;  %10874 = vst [vmem:[#allocation3 + $0x398] sm:$0xff] %v10586_v3  ;;  %v10296_v26 = vld [vmem:[#allocation3 + $0x488] sm:$0xff]  ;;  %v10614_v3 = vadd.f32 %v19457_v30, %v10294_v12  ;;  %v10615_v45 = vadd.f32 %v19441_v13, %v10295_v4  ;;  %v10297_v11 = vld [vmem:[#allocation3 + $0x490] sm:$0xff] }
 0x809   : > { %10875 = vst [vmem:[#allocation3 + $0x3a0] sm:$0xff] %v10587_v34  ;;  %10876 = vst [vmem:[#allocation3 + $0x3a8] sm:$0xff] %v10588_v17  ;;  %v10616_v41 = vadd.f32 %v19445_v59, %v10296_v26  ;;  %v10298_v34 = vld [vmem:[#allocation3 + $0x498] sm:$0xff]  ;;  %v10299_v17 = vld [vmem:[#allocation3 + $0x4a0] sm:$0xff] }
 0x80a   : > { %10877 = vst [vmem:[#allocation3 + $0x3b0] sm:$0xff] %v10589_v54  ;;  %10878 = vst [vmem:[#allocation3 + $0x3b8] sm:$0xff] %v10590_v22  ;;  %v10617_v54 = vadd.f32 %v19449_v63, %v10297_v11  ;;  %v10618_v38 = vadd.f32 %v19453_v10, %v10298_v34  ;;  %v10619_v48 = vadd.f32 %v19455_v55, %v10299_v17  ;;  %v10300_v60 = vld [vmem:[#allocation3 + $0x4a8] sm:$0xff]  ;;  %v10301_v22 = vld [vmem:[#allocation3 + $0x4b0] sm:$0xff] }
 0x80b   : > { %10879 = vst [vmem:[#allocation3 + $0x3c0] sm:$0xff] %v10591_v35  ;;  %10880 = vst [vmem:[#allocation3 + $0x3c8] sm:$0xff] %v10592_v19  ;;  %v10302_v35 = vld [vmem:[#allocation3 + $0x4b8] sm:$0xff]  ;;  %v10620_v19 = vadd.f32 %v19457_v30, %v10300_v60  ;;  %v10621_v16 = vadd.f32 %v19441_v13, %v10301_v22  ;;  %v10303_v46 = vld [vmem:[#allocation3 + $0x4c0] sm:$0xff] }
 0x80c   : > { %10881 = vst [vmem:[#allocation3 + $0x3d0] sm:$0xff] %v10593_v43  ;;  %10882 = vst [vmem:[#allocation3 + $0x3d8] sm:$0xff] %v10594_v49  ;;  %v10622_v31 = vadd.f32 %v19445_v59, %v10302_v35  ;;  %v10304_v43 = vld [vmem:[#allocation3 + $0x4c8] sm:$0xff]  ;;  %v10305_v49 = vld [vmem:[#allocation3 + $0x4d0] sm:$0xff] }
 0x80d   : > { %10883 = vst [vmem:[#allocation3 + $0x3e0] sm:$0xff] %v10595_v62  ;;  %10884 = vst [vmem:[#allocation3 + $0x3e8] sm:$0xff] %v10596_v57  ;;  %v10623_v62 = vadd.f32 %v19449_v63, %v10303_v46  ;;  %v10624_v8 = vadd.f32 %v19453_v10, %v10304_v43  ;;  %v10625_v29 = vadd.f32 %v19455_v55, %v10305_v49  ;;  %v10306_v61 = vld [vmem:[#allocation3 + $0x4d8] sm:$0xff]  ;;  %v10307_v57 = vld [vmem:[#allocation3 + $0x4e0] sm:$0xff] }
 0x80e   : > { %10885 = vst [vmem:[#allocation3 + $0x3f0] sm:$0xff] %v10597_v52  ;;  %10886 = vst [vmem:[#allocation3 + $0x3f8] sm:$0xff] %v10598_v20  ;;  %v10308_v52 = vld [vmem:[#allocation3 + $0x4e8] sm:$0xff]  ;;  %v10626_v20 = vadd.f32 %v19457_v30, %v10306_v61  ;;  %v10627_v36 = vadd.f32 %v19441_v13, %v10307_v57  ;;  %v10309_v42 = vld [vmem:[#allocation3 + $0x4f0] sm:$0xff] }
 0x80f   : > { %10887 = vst [vmem:[#allocation3 + $0x400] sm:$0xff] %v10599_v58  ;;  %10888 = vst [vmem:[#allocation3 + $0x408] sm:$0xff] %v10600_v18  ;;  %v10628_v33 = vadd.f32 %v19445_v59, %v10308_v52  ;;  %v10310_v58 = vld [vmem:[#allocation3 + $0x4f8] sm:$0xff]  ;;  %v10311_v18 = vld [vmem:[#allocation3 + $0x500] sm:$0xff] }
 0x810   : > { %10889 = vst [vmem:[#allocation3 + $0x410] sm:$0xff] %v10601_v1  ;;  %10890 = vst [vmem:[#allocation3 + $0x418] sm:$0xff] %v10602_v23  ;;  %v10629_v1 = vadd.f32 %v19449_v63, %v10309_v42  ;;  %v10630_v24 = vadd.f32 %v19453_v10, %v10310_v58  ;;  %v10631_v7 = vadd.f32 %v19455_v55, %v10311_v18  ;;  %v10312_v51 = vld [vmem:[#allocation3 + $0x508] sm:$0xff]  ;;  %v10313_v23 = vld [vmem:[#allocation3 + $0x510] sm:$0xff] }
 0x811   : > { %10891 = vst [vmem:[#allocation3 + $0x420] sm:$0xff] %v10603_v9  ;;  %10892 = vst [vmem:[#allocation3 + $0x428] sm:$0xff] %v10604_v50  ;;  %v10314_v9 = vld [vmem:[#allocation3 + $0x518] sm:$0xff]  ;;  %v10632_v50 = vadd.f32 %v19457_v30, %v10312_v51  ;;  %v10633_v0 = vadd.f32 %v19441_v13, %v10313_v23  ;;  %v10315_v27 = vld [vmem:[#allocation3 + $0x520] sm:$0xff] }
 0x812   : > { %10893 = vst [vmem:[#allocation3 + $0x430] sm:$0xff] %v10605_v14  ;;  %10894 = vst [vmem:[#allocation3 + $0x438] sm:$0xff] %v10606_v53  ;;  %v10634_v56 = vadd.f32 %v19445_v59, %v10314_v9  ;;  %v10316_v14 = vld [vmem:[#allocation3 + $0x528] sm:$0xff]  ;;  %v10317_v53 = vld [vmem:[#allocation3 + $0x530] sm:$0xff] }
 0x813   : > { %10895 = vst [vmem:[#allocation3 + $0x440] sm:$0xff] %v10607_v47  ;;  %10896 = vst [vmem:[#allocation3 + $0x448] sm:$0xff] %v10608_v32  ;;  %v10635_v47 = vadd.f32 %v19449_v63, %v10315_v27  ;;  %v10636_v6 = vadd.f32 %v19453_v10, %v10316_v14  ;;  %v10637_v37 = vadd.f32 %v19455_v55, %v10317_v53  ;;  %v10318_v25 = vld [vmem:[#allocation3 + $0x538] sm:$0xff]  ;;  %v10319_v32 = vld [vmem:[#allocation3 + $0x540] sm:$0xff] }
 0x814   : > { %10897 = vst [vmem:[#allocation3 + $0x450] sm:$0xff] %v10609_v40  ;;  %10898 = vst [vmem:[#allocation3 + $0x458] sm:$0xff] %v10610_v39  ;;  %v10320_v40 = vld [vmem:[#allocation3 + $0x548] sm:$0xff]  ;;  %v10638_v39 = vadd.f32 %v19457_v30, %v10318_v25  ;;  %v10639_v2 = vadd.f32 %v19441_v13, %v10319_v32  ;;  %v10321_v44 = vld [vmem:[#allocation3 + $0x550] sm:$0xff] }
 0x815   : > { %10899 = vst [vmem:[#allocation3 + $0x460] sm:$0xff] %v10611_v28  ;;  %10900 = vst [vmem:[#allocation3 + $0x468] sm:$0xff] %v10612_v21  ;;  %v10640_v15 = vadd.f32 %v19445_v59, %v10320_v40  ;;  %v10322_v28 = vld [vmem:[#allocation3 + $0x558] sm:$0xff]  ;;  %v10323_v21 = vld [vmem:[#allocation3 + $0x560] sm:$0xff] }
 0x816   : > { %10901 = vst [vmem:[#allocation3 + $0x470] sm:$0xff] %v10613_v5  ;;  %10902 = vst [vmem:[#allocation3 + $0x478] sm:$0xff] %v10614_v3  ;;  %v10641_v5 = vadd.f32 %v19449_v63, %v10321_v44  ;;  %v10642_v12 = vadd.f32 %v19453_v10, %v10322_v28  ;;  %v10643_v4 = vadd.f32 %v19455_v55, %v10323_v21  ;;  %v10324_v26 = vld [vmem:[#allocation3 + $0x568] sm:$0xff]  ;;  %v10325_v3 = vld [vmem:[#allocation3 + $0x570] sm:$0xff] }
 0x817   : > { %10903 = vst [vmem:[#allocation3 + $0x480] sm:$0xff] %v10615_v45  ;;  %10904 = vst [vmem:[#allocation3 + $0x488] sm:$0xff] %v10616_v41  ;;  %v10326_v45 = vld [vmem:[#allocation3 + $0x578] sm:$0xff]  ;;  %v10644_v41 = vadd.f32 %v19457_v30, %v10324_v26  ;;  %v10645_v11 = vadd.f32 %v19441_v13, %v10325_v3  ;;  %v10327_v17 = vld [vmem:[#allocation3 + $0x580] sm:$0xff] }
 0x818   : > { %10905 = vst [vmem:[#allocation3 + $0x490] sm:$0xff] %v10617_v54  ;;  %10906 = vst [vmem:[#allocation3 + $0x498] sm:$0xff] %v10618_v38  ;;  %v10646_v34 = vadd.f32 %v19445_v59, %v10326_v45  ;;  %v10328_v54 = vld [vmem:[#allocation3 + $0x588] sm:$0xff]  ;;  %v10329_v38 = vld [vmem:[#allocation3 + $0x590] sm:$0xff] }
 0x819   : > { %10907 = vst [vmem:[#allocation3 + $0x4a0] sm:$0xff] %v10619_v48  ;;  %10908 = vst [vmem:[#allocation3 + $0x4a8] sm:$0xff] %v10620_v19  ;;  %v10647_v48 = vadd.f32 %v19449_v63, %v10327_v17  ;;  %v10648_v60 = vadd.f32 %v19453_v10, %v10328_v54  ;;  %v10649_v22 = vadd.f32 %v19455_v55, %v10329_v38  ;;  %v10330_v35 = vld [vmem:[#allocation3 + $0x598] sm:$0xff]  ;;  %v10331_v19 = vld [vmem:[#allocation3 + $0x5a0] sm:$0xff] }
 0x81a   : > { %10909 = vst [vmem:[#allocation3 + $0x4b0] sm:$0xff] %v10621_v16  ;;  %10910 = vst [vmem:[#allocation3 + $0x4b8] sm:$0xff] %v10622_v31  ;;  %v10332_v16 = vld [vmem:[#allocation3 + $0x5a8] sm:$0xff]  ;;  %v10650_v31 = vadd.f32 %v19457_v30, %v10330_v35  ;;  %v10651_v46 = vadd.f32 %v19441_v13, %v10331_v19  ;;  %v10333_v49 = vld [vmem:[#allocation3 + $0x5b0] sm:$0xff] }
 0x81b   : > { %10911 = vst [vmem:[#allocation3 + $0x4c0] sm:$0xff] %v10623_v62  ;;  %10912 = vst [vmem:[#allocation3 + $0x4c8] sm:$0xff] %v10624_v8  ;;  %v10652_v43 = vadd.f32 %v19445_v59, %v10332_v16  ;;  %v10334_v62 = vld [vmem:[#allocation3 + $0x5b8] sm:$0xff]  ;;  %v10335_v8 = vld [vmem:[#allocation3 + $0x5c0] sm:$0xff] }
 0x81c   : > { %10913 = vst [vmem:[#allocation3 + $0x4d0] sm:$0xff] %v10625_v29  ;;  %10914 = vst [vmem:[#allocation3 + $0x4d8] sm:$0xff] %v10626_v20  ;;  %v10653_v29 = vadd.f32 %v19449_v63, %v10333_v49  ;;  %v10654_v61 = vadd.f32 %v19453_v10, %v10334_v62  ;;  %v10655_v57 = vadd.f32 %v19455_v55, %v10335_v8  ;;  %v10336_v52 = vld [vmem:[#allocation3 + $0x5c8] sm:$0xff]  ;;  %v10337_v20 = vld [vmem:[#allocation3 + $0x5d0] sm:$0xff] }
 0x81d   : > { %10915 = vst [vmem:[#allocation3 + $0x4e0] sm:$0xff] %v10627_v36  ;;  %10916 = vst [vmem:[#allocation3 + $0x4e8] sm:$0xff] %v10628_v33  ;;  %v10338_v36 = vld [vmem:[#allocation3 + $0x5d8] sm:$0xff]  ;;  %v10656_v33 = vadd.f32 %v19457_v30, %v10336_v52  ;;  %v10657_v42 = vadd.f32 %v19441_v13, %v10337_v20  ;;  %v10339_v18 = vld [vmem:[#allocation3 + $0x5e0] sm:$0xff] }
 0x81e   : > { %10917 = vst [vmem:[#allocation3 + $0x4f0] sm:$0xff] %v10629_v1  ;;  %10918 = vst [vmem:[#allocation3 + $0x4f8] sm:$0xff] %v10630_v24  ;;  %v10658_v58 = vadd.f32 %v19445_v59, %v10338_v36  ;;  %v10340_v1 = vld [vmem:[#allocation3 + $0x5e8] sm:$0xff]  ;;  %v10341_v24 = vld [vmem:[#allocation3 + $0x5f0] sm:$0xff] }
 0x81f   : > { %10919 = vst [vmem:[#allocation3 + $0x500] sm:$0xff] %v10631_v7  ;;  %10920 = vst [vmem:[#allocation3 + $0x508] sm:$0xff] %v10632_v50  ;;  %v10659_v7 = vadd.f32 %v19449_v63, %v10339_v18  ;;  %v10660_v51 = vadd.f32 %v19453_v10, %v10340_v1  ;;  %v10661_v23 = vadd.f32 %v19455_v55, %v10341_v24  ;;  %v10342_v9 = vld [vmem:[#allocation3 + $0x5f8] sm:$0xff]  ;;  %v10343_v50 = vld [vmem:[#allocation3 + $0x600] sm:$0xff] }
 0x820   : > { %10921 = vst [vmem:[#allocation3 + $0x510] sm:$0xff] %v10633_v0  ;;  %10922 = vst [vmem:[#allocation3 + $0x518] sm:$0xff] %v10634_v56  ;;  %v10344_v0 = vld [vmem:[#allocation3 + $0x608] sm:$0xff]  ;;  %v10662_v56 = vadd.f32 %v19457_v30, %v10342_v9  ;;  %v10663_v27 = vadd.f32 %v19441_v13, %v10343_v50  ;;  %v10345_v53 = vld [vmem:[#allocation3 + $0x610] sm:$0xff] }
 0x821   : > { %10923 = vst [vmem:[#allocation3 + $0x520] sm:$0xff] %v10635_v47  ;;  %10924 = vst [vmem:[#allocation3 + $0x528] sm:$0xff] %v10636_v6  ;;  %v10664_v14 = vadd.f32 %v19445_v59, %v10344_v0  ;;  %v10346_v47 = vld [vmem:[#allocation3 + $0x618] sm:$0xff]  ;;  %v10347_v6 = vld [vmem:[#allocation3 + $0x620] sm:$0xff] }
 0x822   : > { %10925 = vst [vmem:[#allocation3 + $0x530] sm:$0xff] %v10637_v37  ;;  %10926 = vst [vmem:[#allocation3 + $0x538] sm:$0xff] %v10638_v39  ;;  %v10665_v37 = vadd.f32 %v19449_v63, %v10345_v53  ;;  %v10666_v25 = vadd.f32 %v19453_v10, %v10346_v47  ;;  %v10667_v32 = vadd.f32 %v19455_v55, %v10347_v6  ;;  %v10348_v40 = vld [vmem:[#allocation3 + $0x628] sm:$0xff]  ;;  %v10349_v39 = vld [vmem:[#allocation3 + $0x630] sm:$0xff] }
 0x823   : > { %10927 = vst [vmem:[#allocation3 + $0x540] sm:$0xff] %v10639_v2  ;;  %10928 = vst [vmem:[#allocation3 + $0x548] sm:$0xff] %v10640_v15  ;;  %v10350_v2 = vld [vmem:[#allocation3 + $0x638] sm:$0xff]  ;;  %v10668_v15 = vadd.f32 %v19457_v30, %v10348_v40  ;;  %v10669_v44 = vadd.f32 %v19441_v13, %v10349_v39  ;;  %v10351_v21 = vld [vmem:[#allocation3 + $0x640] sm:$0xff] }
 0x824   : > { %10929 = vst [vmem:[#allocation3 + $0x550] sm:$0xff] %v10641_v5  ;;  %10930 = vst [vmem:[#allocation3 + $0x558] sm:$0xff] %v10642_v12  ;;  %v10670_v28 = vadd.f32 %v19445_v59, %v10350_v2  ;;  %v10352_v5 = vld [vmem:[#allocation3 + $0x648] sm:$0xff]  ;;  %v10353_v12 = vld [vmem:[#allocation3 + $0x650] sm:$0xff] }
 0x825   : > { %10931 = vst [vmem:[#allocation3 + $0x560] sm:$0xff] %v10643_v4  ;;  %10932 = vst [vmem:[#allocation3 + $0x568] sm:$0xff] %v10644_v41  ;;  %v10671_v4 = vadd.f32 %v19449_v63, %v10351_v21  ;;  %v10672_v26 = vadd.f32 %v19453_v10, %v10352_v5  ;;  %v10673_v3 = vadd.f32 %v19455_v55, %v10353_v12  ;;  %v10354_v45 = vld [vmem:[#allocation3 + $0x658] sm:$0xff]  ;;  %v10355_v41 = vld [vmem:[#allocation3 + $0x660] sm:$0xff] }
 0x826   : > { %10933 = vst [vmem:[#allocation3 + $0x570] sm:$0xff] %v10645_v11  ;;  %10934 = vst [vmem:[#allocation3 + $0x578] sm:$0xff] %v10646_v34  ;;  %v10356_v11 = vld [vmem:[#allocation3 + $0x668] sm:$0xff]  ;;  %v10674_v34 = vadd.f32 %v19457_v30, %v10354_v45  ;;  %v10675_v17 = vadd.f32 %v19441_v13, %v10355_v41  ;;  %v10357_v38 = vld [vmem:[#allocation3 + $0x670] sm:$0xff] }
 0x827   : > { %10935 = vst [vmem:[#allocation3 + $0x580] sm:$0xff] %v10647_v48  ;;  %10936 = vst [vmem:[#allocation3 + $0x588] sm:$0xff] %v10648_v60  ;;  %v10676_v54 = vadd.f32 %v19445_v59, %v10356_v11  ;;  %v10358_v48 = vld [vmem:[#allocation3 + $0x678] sm:$0xff]  ;;  %v10359_v60 = vld [vmem:[#allocation3 + $0x680] sm:$0xff] }
 0x828   : > { %10937 = vst [vmem:[#allocation3 + $0x590] sm:$0xff] %v10649_v22  ;;  %10938 = vst [vmem:[#allocation3 + $0x598] sm:$0xff] %v10650_v31  ;;  %v10677_v22 = vadd.f32 %v19449_v63, %v10357_v38  ;;  %v10678_v35 = vadd.f32 %v19453_v10, %v10358_v48  ;;  %v10679_v19 = vadd.f32 %v19455_v55, %v10359_v60  ;;  %v10360_v16 = vld [vmem:[#allocation3 + $0x688] sm:$0xff]  ;;  %v10361_v31 = vld [vmem:[#allocation3 + $0x690] sm:$0xff] }
 0x829   : > { %10939 = vst [vmem:[#allocation3 + $0x5a0] sm:$0xff] %v10651_v46  ;;  %10940 = vst [vmem:[#allocation3 + $0x5a8] sm:$0xff] %v10652_v43  ;;  %v10362_v46 = vld [vmem:[#allocation3 + $0x698] sm:$0xff]  ;;  %v10680_v43 = vadd.f32 %v19457_v30, %v10360_v16  ;;  %v10681_v49 = vadd.f32 %v19441_v13, %v10361_v31  ;;  %v10363_v8 = vld [vmem:[#allocation3 + $0x6a0] sm:$0xff] }
 0x82a   : > { %10941 = vst [vmem:[#allocation3 + $0x5b0] sm:$0xff] %v10653_v29  ;;  %10942 = vst [vmem:[#allocation3 + $0x5b8] sm:$0xff] %v10654_v61  ;;  %v10682_v62 = vadd.f32 %v19445_v59, %v10362_v46  ;;  %v10364_v29 = vld [vmem:[#allocation3 + $0x6a8] sm:$0xff]  ;;  %v10365_v61 = vld [vmem:[#allocation3 + $0x6b0] sm:$0xff] }
 0x82b   : > { %10943 = vst [vmem:[#allocation3 + $0x5c0] sm:$0xff] %v10655_v57  ;;  %10944 = vst [vmem:[#allocation3 + $0x5c8] sm:$0xff] %v10656_v33  ;;  %v10683_v57 = vadd.f32 %v19449_v63, %v10363_v8  ;;  %v10684_v52 = vadd.f32 %v19453_v10, %v10364_v29  ;;  %v10685_v20 = vadd.f32 %v19455_v55, %v10365_v61  ;;  %v10366_v36 = vld [vmem:[#allocation3 + $0x6b8] sm:$0xff]  ;;  %v10367_v33 = vld [vmem:[#allocation3 + $0x6c0] sm:$0xff] }
 0x82c   : > { %10945 = vst [vmem:[#allocation3 + $0x5d0] sm:$0xff] %v10657_v42  ;;  %10946 = vst [vmem:[#allocation3 + $0x5d8] sm:$0xff] %v10658_v58  ;;  %v10368_v42 = vld [vmem:[#allocation3 + $0x6c8] sm:$0xff]  ;;  %v10686_v58 = vadd.f32 %v19457_v30, %v10366_v36  ;;  %v10687_v18 = vadd.f32 %v19441_v13, %v10367_v33  ;;  %v10369_v24 = vld [vmem:[#allocation3 + $0x6d0] sm:$0xff] }
 0x82d   : > { %10947 = vst [vmem:[#allocation3 + $0x5e0] sm:$0xff] %v10659_v7  ;;  %10948 = vst [vmem:[#allocation3 + $0x5e8] sm:$0xff] %v10660_v51  ;;  %v10688_v1 = vadd.f32 %v19445_v59, %v10368_v42  ;;  %v10370_v7 = vld [vmem:[#allocation3 + $0x6d8] sm:$0xff]  ;;  %v10371_v51 = vld [vmem:[#allocation3 + $0x6e0] sm:$0xff] }
 0x82e   : > { %10949 = vst [vmem:[#allocation3 + $0x5f0] sm:$0xff] %v10661_v23  ;;  %10950 = vst [vmem:[#allocation3 + $0x5f8] sm:$0xff] %v10662_v56  ;;  %v10689_v23 = vadd.f32 %v19449_v63, %v10369_v24  ;;  %v10690_v9 = vadd.f32 %v19453_v10, %v10370_v7  ;;  %v10691_v50 = vadd.f32 %v19455_v55, %v10371_v51  ;;  %v10372_v0 = vld [vmem:[#allocation3 + $0x6e8] sm:$0xff]  ;;  %v10373_v56 = vld [vmem:[#allocation3 + $0x6f0] sm:$0xff] }
 0x82f   : > { %10951 = vst [vmem:[#allocation3 + $0x600] sm:$0xff] %v10663_v27  ;;  %10952 = vst [vmem:[#allocation3 + $0x608] sm:$0xff] %v10664_v14  ;;  %v10374_v27 = vld [vmem:[#allocation3 + $0x6f8] sm:$0xff]  ;;  %v10692_v14 = vadd.f32 %v19457_v30, %v10372_v0  ;;  %v10693_v53 = vadd.f32 %v19441_v13, %v10373_v56  ;;  %v10375_v6 = vld [vmem:[#allocation3 + $0x700] sm:$0xff] }
 0x830   : > { %10953 = vst [vmem:[#allocation3 + $0x610] sm:$0xff] %v10665_v37  ;;  %10954 = vst [vmem:[#allocation3 + $0x618] sm:$0xff] %v10666_v25  ;;  %v10694_v47 = vadd.f32 %v19445_v59, %v10374_v27  ;;  %v10376_v37 = vld [vmem:[#allocation3 + $0x708] sm:$0xff]  ;;  %v10377_v25 = vld [vmem:[#allocation3 + $0x710] sm:$0xff] }
 0x831   : > { %10955 = vst [vmem:[#allocation3 + $0x620] sm:$0xff] %v10667_v32  ;;  %10956 = vst [vmem:[#allocation3 + $0x628] sm:$0xff] %v10668_v15  ;;  %v10695_v32 = vadd.f32 %v19449_v63, %v10375_v6  ;;  %v10696_v40 = vadd.f32 %v19453_v10, %v10376_v37  ;;  %v10697_v39 = vadd.f32 %v19455_v55, %v10377_v25  ;;  %v10378_v2 = vld [vmem:[#allocation3 + $0x718] sm:$0xff]  ;;  %v10379_v15 = vld [vmem:[#allocation3 + $0x720] sm:$0xff] }
 0x832   : > { %10957 = vst [vmem:[#allocation3 + $0x630] sm:$0xff] %v10669_v44  ;;  %10958 = vst [vmem:[#allocation3 + $0x638] sm:$0xff] %v10670_v28  ;;  %v10380_v44 = vld [vmem:[#allocation3 + $0x728] sm:$0xff]  ;;  %v10698_v28 = vadd.f32 %v19457_v30, %v10378_v2  ;;  %v10699_v21 = vadd.f32 %v19441_v13, %v10379_v15  ;;  %v10381_v12 = vld [vmem:[#allocation3 + $0x730] sm:$0xff] }
 0x833   : > { %10959 = vst [vmem:[#allocation3 + $0x640] sm:$0xff] %v10671_v4  ;;  %10960 = vst [vmem:[#allocation3 + $0x648] sm:$0xff] %v10672_v26  ;;  %v10700_v5 = vadd.f32 %v19445_v59, %v10380_v44  ;;  %v10382_v4 = vld [vmem:[#allocation3 + $0x738] sm:$0xff]  ;;  %v10383_v26 = vld [vmem:[#allocation3 + $0x740] sm:$0xff] }
 0x834   : > { %10961 = vst [vmem:[#allocation3 + $0x650] sm:$0xff] %v10673_v3  ;;  %10962 = vst [vmem:[#allocation3 + $0x658] sm:$0xff] %v10674_v34  ;;  %v10701_v3 = vadd.f32 %v19449_v63, %v10381_v12  ;;  %v10702_v45 = vadd.f32 %v19453_v10, %v10382_v4  ;;  %v10703_v41 = vadd.f32 %v19455_v55, %v10383_v26  ;;  %v10384_v11 = vld [vmem:[#allocation3 + $0x748] sm:$0xff]  ;;  %v10385_v34 = vld [vmem:[#allocation3 + $0x750] sm:$0xff] }
 0x835   : > { %10963 = vst [vmem:[#allocation3 + $0x660] sm:$0xff] %v10675_v17  ;;  %10964 = vst [vmem:[#allocation3 + $0x668] sm:$0xff] %v10676_v54  ;;  %v10386_v17 = vld [vmem:[#allocation3 + $0x758] sm:$0xff]  ;;  %v10704_v54 = vadd.f32 %v19457_v30, %v10384_v11  ;;  %v10705_v38 = vadd.f32 %v19441_v13, %v10385_v34  ;;  %v10387_v60 = vld [vmem:[#allocation3 + $0x760] sm:$0xff] }
 0x836   : > { %10965 = vst [vmem:[#allocation3 + $0x670] sm:$0xff] %v10677_v22  ;;  %10966 = vst [vmem:[#allocation3 + $0x678] sm:$0xff] %v10678_v35  ;;  %v10706_v48 = vadd.f32 %v19445_v59, %v10386_v17  ;;  %v10388_v22 = vld [vmem:[#allocation3 + $0x768] sm:$0xff]  ;;  %v10389_v35 = vld [vmem:[#allocation3 + $0x770] sm:$0xff] }
 0x837   : > { %10967 = vst [vmem:[#allocation3 + $0x680] sm:$0xff] %v10679_v19  ;;  %10968 = vst [vmem:[#allocation3 + $0x688] sm:$0xff] %v10680_v43  ;;  %v10707_v19 = vadd.f32 %v19449_v63, %v10387_v60  ;;  %v10708_v16 = vadd.f32 %v19453_v10, %v10388_v22  ;;  %v10709_v31 = vadd.f32 %v19455_v55, %v10389_v35  ;;  %v10390_v46 = vld [vmem:[#allocation3 + $0x778] sm:$0xff]  ;;  %v10391_v43 = vld [vmem:[#allocation3 + $0x780] sm:$0xff] }
 0x838   : > { %10969 = vst [vmem:[#allocation3 + $0x690] sm:$0xff] %v10681_v49  ;;  %10970 = vst [vmem:[#allocation3 + $0x698] sm:$0xff] %v10682_v62  ;;  %v10392_v49 = vld [vmem:[#allocation3 + $0x788] sm:$0xff]  ;;  %v10710_v62 = vadd.f32 %v19457_v30, %v10390_v46  ;;  %v10711_v8 = vadd.f32 %v19441_v13, %v10391_v43  ;;  %v10393_v61 = vld [vmem:[#allocation3 + $0x790] sm:$0xff] }
 0x839   : > { %10971 = vst [vmem:[#allocation3 + $0x6a0] sm:$0xff] %v10683_v57  ;;  %10972 = vst [vmem:[#allocation3 + $0x6a8] sm:$0xff] %v10684_v52  ;;  %v10712_v29 = vadd.f32 %v19445_v59, %v10392_v49  ;;  %v10394_v57 = vld [vmem:[#allocation3 + $0x798] sm:$0xff]  ;;  %v10395_v52 = vld [vmem:[#allocation3 + $0x7a0] sm:$0xff] }
 0x83a   : > { %10973 = vst [vmem:[#allocation3 + $0x6b0] sm:$0xff] %v10685_v20  ;;  %10974 = vst [vmem:[#allocation3 + $0x6b8] sm:$0xff] %v10686_v58  ;;  %v10713_v20 = vadd.f32 %v19449_v63, %v10393_v61  ;;  %v10714_v36 = vadd.f32 %v19453_v10, %v10394_v57  ;;  %v10715_v33 = vadd.f32 %v19455_v55, %v10395_v52  ;;  %v10396_v42 = vld [vmem:[#allocation3 + $0x7a8] sm:$0xff]  ;;  %v10397_v58 = vld [vmem:[#allocation3 + $0x7b0] sm:$0xff] }
 0x83b   : > { %10975 = vst [vmem:[#allocation3 + $0x6c0] sm:$0xff] %v10687_v18  ;;  %10976 = vst [vmem:[#allocation3 + $0x6c8] sm:$0xff] %v10688_v1  ;;  %v10398_v18 = vld [vmem:[#allocation3 + $0x7b8] sm:$0xff]  ;;  %v10716_v1 = vadd.f32 %v19457_v30, %v10396_v42  ;;  %v10717_v24 = vadd.f32 %v19441_v13, %v10397_v58  ;;  %v10399_v51 = vld [vmem:[#allocation3 + $0x7c0] sm:$0xff] }
 0x83c   : > { %10977 = vst [vmem:[#allocation3 + $0x6d0] sm:$0xff] %v10689_v23  ;;  %10978 = vst [vmem:[#allocation3 + $0x6d8] sm:$0xff] %v10690_v9  ;;  %v10718_v7 = vadd.f32 %v19445_v59, %v10398_v18  ;;  %v10400_v23 = vld [vmem:[#allocation3 + $0x7c8] sm:$0xff]  ;;  %v10401_v9 = vld [vmem:[#allocation3 + $0x7d0] sm:$0xff] }
 0x83d   : > { %10979 = vst [vmem:[#allocation3 + $0x6e0] sm:$0xff] %v10691_v50  ;;  %10980 = vst [vmem:[#allocation3 + $0x6e8] sm:$0xff] %v10692_v14  ;;  %v10719_v50 = vadd.f32 %v19449_v63, %v10399_v51  ;;  %v10720_v0 = vadd.f32 %v19453_v10, %v10400_v23  ;;  %v10721_v56 = vadd.f32 %v19455_v55, %v10401_v9  ;;  %v10402_v27 = vld [vmem:[#allocation3 + $0x7d8] sm:$0xff]  ;;  %v10403_v14 = vld [vmem:[#allocation3 + $0x7e0] sm:$0xff] }
 0x83e   : > { %10981 = vst [vmem:[#allocation3 + $0x6f0] sm:$0xff] %v10693_v53  ;;  %10982 = vst [vmem:[#allocation3 + $0x6f8] sm:$0xff] %v10694_v47  ;;  %v10404_v53 = vld [vmem:[#allocation3 + $0x7e8] sm:$0xff]  ;;  %v10722_v47 = vadd.f32 %v19457_v30, %v10402_v27  ;;  %v10723_v6 = vadd.f32 %v19441_v13, %v10403_v14  ;;  %v10405_v25 = vld [vmem:[#allocation3 + $0x7f0] sm:$0xff] }
 0x83f   : > { %10983 = vst [vmem:[#allocation3 + $0x700] sm:$0xff] %v10695_v32  ;;  %10984 = vst [vmem:[#allocation3 + $0x708] sm:$0xff] %v10696_v40  ;;  %v10724_v37 = vadd.f32 %v19445_v59, %v10404_v53  ;;  %v10406_v32 = vld [vmem:[#allocation3 + $0x7f8] sm:$0xff]  ;;  %v10407_v40 = vld [vmem:[#allocation3 + $0x800] sm:$0xff] }
 0x840   : > { %10985 = vst [vmem:[#allocation3 + $0x710] sm:$0xff] %v10697_v39  ;;  %10986 = vst [vmem:[#allocation3 + $0x718] sm:$0xff] %v10698_v28  ;;  %v10725_v39 = vadd.f32 %v19449_v63, %v10405_v25  ;;  %v10726_v2 = vadd.f32 %v19453_v10, %v10406_v32  ;;  %v10727_v15 = vadd.f32 %v19455_v55, %v10407_v40  ;;  %v10408_v44 = vld [vmem:[#allocation3 + $0x808] sm:$0xff]  ;;  %v10409_v28 = vld [vmem:[#allocation3 + $0x810] sm:$0xff] }
 0x841   : > { %10987 = vst [vmem:[#allocation3 + $0x720] sm:$0xff] %v10699_v21  ;;  %10988 = vst [vmem:[#allocation3 + $0x728] sm:$0xff] %v10700_v5  ;;  %v10410_v21 = vld [vmem:[#allocation3 + $0x818] sm:$0xff]  ;;  %v10728_v5 = vadd.f32 %v19457_v30, %v10408_v44  ;;  %v10729_v12 = vadd.f32 %v19441_v13, %v10409_v28  ;;  %v10411_v26 = vld [vmem:[#allocation3 + $0x820] sm:$0xff] }
 0x842   : > { %10989 = vst [vmem:[#allocation3 + $0x730] sm:$0xff] %v10701_v3  ;;  %10990 = vst [vmem:[#allocation3 + $0x738] sm:$0xff] %v10702_v45  ;;  %v10730_v4 = vadd.f32 %v19445_v59, %v10410_v21  ;;  %v10412_v3 = vld [vmem:[#allocation3 + $0x828] sm:$0xff]  ;;  %v10413_v45 = vld [vmem:[#allocation3 + $0x830] sm:$0xff] }
 0x843   : > { %10991 = vst [vmem:[#allocation3 + $0x740] sm:$0xff] %v10703_v41  ;;  %10992 = vst [vmem:[#allocation3 + $0x748] sm:$0xff] %v10704_v54  ;;  %v10731_v41 = vadd.f32 %v19449_v63, %v10411_v26  ;;  %v10732_v11 = vadd.f32 %v19453_v10, %v10412_v3  ;;  %v10733_v34 = vadd.f32 %v19455_v55, %v10413_v45  ;;  %v10414_v17 = vld [vmem:[#allocation3 + $0x838] sm:$0xff]  ;;  %v10415_v54 = vld [vmem:[#allocation3 + $0x840] sm:$0xff] }
 0x844   : > { %10993 = vst [vmem:[#allocation3 + $0x750] sm:$0xff] %v10705_v38  ;;  %10994 = vst [vmem:[#allocation3 + $0x758] sm:$0xff] %v10706_v48  ;;  %v10416_v38 = vld [vmem:[#allocation3 + $0x848] sm:$0xff]  ;;  %v10734_v48 = vadd.f32 %v19457_v30, %v10414_v17  ;;  %v10735_v60 = vadd.f32 %v19441_v13, %v10415_v54  ;;  %v10417_v35 = vld [vmem:[#allocation3 + $0x850] sm:$0xff] }
 0x845   : > { %10995 = vst [vmem:[#allocation3 + $0x760] sm:$0xff] %v10707_v19  ;;  %10996 = vst [vmem:[#allocation3 + $0x768] sm:$0xff] %v10708_v16  ;;  %v10736_v22 = vadd.f32 %v19445_v59, %v10416_v38  ;;  %v10418_v19 = vld [vmem:[#allocation3 + $0x858] sm:$0xff]  ;;  %v10419_v16 = vld [vmem:[#allocation3 + $0x860] sm:$0xff] }
 0x846   : > { %10997 = vst [vmem:[#allocation3 + $0x770] sm:$0xff] %v10709_v31  ;;  %10998 = vst [vmem:[#allocation3 + $0x778] sm:$0xff] %v10710_v62  ;;  %v10737_v31 = vadd.f32 %v19449_v63, %v10417_v35  ;;  %v10738_v46 = vadd.f32 %v19453_v10, %v10418_v19  ;;  %v10739_v43 = vadd.f32 %v19455_v55, %v10419_v16  ;;  %v10420_v49 = vld [vmem:[#allocation3 + $0x868] sm:$0xff]  ;;  %v10421_v62 = vld [vmem:[#allocation3 + $0x870] sm:$0xff] }
 0x847   : > { %10999 = vst [vmem:[#allocation3 + $0x780] sm:$0xff] %v10711_v8  ;;  %11000 = vst [vmem:[#allocation3 + $0x788] sm:$0xff] %v10712_v29  ;;  %v10422_v8 = vld [vmem:[#allocation3 + $0x878] sm:$0xff]  ;;  %v10740_v29 = vadd.f32 %v19457_v30, %v10420_v49  ;;  %v10741_v61 = vadd.f32 %v19441_v13, %v10421_v62  ;;  %v10423_v52 = vld [vmem:[#allocation3 + $0x880] sm:$0xff] }
 0x848   : > { %11001 = vst [vmem:[#allocation3 + $0x790] sm:$0xff] %v10713_v20  ;;  %11002 = vst [vmem:[#allocation3 + $0x798] sm:$0xff] %v10714_v36  ;;  %v10742_v57 = vadd.f32 %v19445_v59, %v10422_v8  ;;  %v10424_v20 = vld [vmem:[#allocation3 + $0x888] sm:$0xff]  ;;  %v10425_v36 = vld [vmem:[#allocation3 + $0x890] sm:$0xff] }
 0x849   : > { %11003 = vst [vmem:[#allocation3 + $0x7a0] sm:$0xff] %v10715_v33  ;;  %11004 = vst [vmem:[#allocation3 + $0x7a8] sm:$0xff] %v10716_v1  ;;  %v10743_v33 = vadd.f32 %v19449_v63, %v10423_v52  ;;  %v10744_v42 = vadd.f32 %v19453_v10, %v10424_v20  ;;  %v10745_v58 = vadd.f32 %v19455_v55, %v10425_v36  ;;  %v10426_v18 = vld [vmem:[#allocation3 + $0x898] sm:$0xff]  ;;  %v10427_v1 = vld [vmem:[#allocation3 + $0x8a0] sm:$0xff] }
 0x84a   : > { %11005 = vst [vmem:[#allocation3 + $0x7b0] sm:$0xff] %v10717_v24  ;;  %11006 = vst [vmem:[#allocation3 + $0x7b8] sm:$0xff] %v10718_v7  ;;  %v10428_v24 = vld [vmem:[#allocation3 + $0x8a8] sm:$0xff]  ;;  %v10746_v7 = vadd.f32 %v19457_v30, %v10426_v18  ;;  %v10747_v51 = vadd.f32 %v19441_v13, %v10427_v1  ;;  %v10429_v9 = vld [vmem:[#allocation3 + $0x8b0] sm:$0xff] }
 0x84b   : > { %11007 = vst [vmem:[#allocation3 + $0x7c0] sm:$0xff] %v10719_v50  ;;  %11008 = vst [vmem:[#allocation3 + $0x7c8] sm:$0xff] %v10720_v0  ;;  %v10748_v23 = vadd.f32 %v19445_v59, %v10428_v24  ;;  %v10430_v50 = vld [vmem:[#allocation3 + $0x8b8] sm:$0xff]  ;;  %v10431_v0 = vld [vmem:[#allocation3 + $0x8c0] sm:$0xff] }
 0x84c   : > { %11009 = vst [vmem:[#allocation3 + $0x7d0] sm:$0xff] %v10721_v56  ;;  %11010 = vst [vmem:[#allocation3 + $0x7d8] sm:$0xff] %v10722_v47  ;;  %v10749_v56 = vadd.f32 %v19449_v63, %v10429_v9  ;;  %v10750_v27 = vadd.f32 %v19453_v10, %v10430_v50  ;;  %v10751_v14 = vadd.f32 %v19455_v55, %v10431_v0  ;;  %v10432_v53 = vld [vmem:[#allocation3 + $0x8c8] sm:$0xff]  ;;  %v10433_v47 = vld [vmem:[#allocation3 + $0x8d0] sm:$0xff] }
 0x84d   : > { %11011 = vst [vmem:[#allocation3 + $0x7e0] sm:$0xff] %v10723_v6  ;;  %11012 = vst [vmem:[#allocation3 + $0x7e8] sm:$0xff] %v10724_v37  ;;  %v10434_v6 = vld [vmem:[#allocation3 + $0x8d8] sm:$0xff]  ;;  %v10752_v37 = vadd.f32 %v19457_v30, %v10432_v53  ;;  %v10753_v25 = vadd.f32 %v19441_v13, %v10433_v47  ;;  %v10435_v40 = vld [vmem:[#allocation3 + $0x8e0] sm:$0xff] }
 0x84e   : > { %11013 = vst [vmem:[#allocation3 + $0x7f0] sm:$0xff] %v10725_v39  ;;  %11014 = vst [vmem:[#allocation3 + $0x7f8] sm:$0xff] %v10726_v2  ;;  %v10754_v32 = vadd.f32 %v19445_v59, %v10434_v6  ;;  %v10436_v39 = vld [vmem:[#allocation3 + $0x8e8] sm:$0xff]  ;;  %v10437_v2 = vld [vmem:[#allocation3 + $0x8f0] sm:$0xff] }
 0x84f   : > { %11015 = vst [vmem:[#allocation3 + $0x800] sm:$0xff] %v10727_v15  ;;  %11016 = vst [vmem:[#allocation3 + $0x808] sm:$0xff] %v10728_v5  ;;  %v10755_v15 = vadd.f32 %v19449_v63, %v10435_v40  ;;  %v10756_v44 = vadd.f32 %v19453_v10, %v10436_v39  ;;  %v10757_v28 = vadd.f32 %v19455_v55, %v10437_v2  ;;  %v10438_v21 = vld [vmem:[#allocation3 + $0x8f8] sm:$0xff] }
 0x850   : > { %11017 = vst [vmem:[#allocation3 + $0x810] sm:$0xff] %v10729_v12  ;;  %11018 = vst [vmem:[#allocation3 + $0x818] sm:$0xff] %v10730_v4  ;;  %v10758_v13 = vadd.f32 %v19457_v30, %v10438_v21 }
 0x851   : > { %11019 = vst [vmem:[#allocation3 + $0x820] sm:$0xff] %v10731_v41  ;;  %11020 = vst [vmem:[#allocation3 + $0x828] sm:$0xff] %v10732_v11 }
 0x852   : > { %11021 = vst [vmem:[#allocation3 + $0x830] sm:$0xff] %v10733_v34  ;;  %11022 = vst [vmem:[#allocation3 + $0x838] sm:$0xff] %v10734_v48 }
 0x853   : > { %11023 = vst [vmem:[#allocation3 + $0x840] sm:$0xff] %v10735_v60  ;;  %11024 = vst [vmem:[#allocation3 + $0x848] sm:$0xff] %v10736_v22 }
 0x854   : > { %11025 = vst [vmem:[#allocation3 + $0x850] sm:$0xff] %v10737_v31  ;;  %11026 = vst [vmem:[#allocation3 + $0x858] sm:$0xff] %v10738_v46 }
 0x855   : > { %11027 = vst [vmem:[#allocation3 + $0x860] sm:$0xff] %v10739_v43  ;;  %11028 = vst [vmem:[#allocation3 + $0x868] sm:$0xff] %v10740_v29 }
 0x856   : > { %11029 = vst [vmem:[#allocation3 + $0x870] sm:$0xff] %v10741_v61  ;;  %11030 = vst [vmem:[#allocation3 + $0x878] sm:$0xff] %v10742_v57 }
 0x857   : > { %11031 = vst [vmem:[#allocation3 + $0x880] sm:$0xff] %v10743_v33  ;;  %11032 = vst [vmem:[#allocation3 + $0x888] sm:$0xff] %v10744_v42 }
 0x858   : > { %11033 = vst [vmem:[#allocation3 + $0x890] sm:$0xff] %v10745_v58  ;;  %11034 = vst [vmem:[#allocation3 + $0x898] sm:$0xff] %v10746_v7 }
 0x859   : > { %11035 = vst [vmem:[#allocation3 + $0x8a0] sm:$0xff] %v10747_v51  ;;  %11036 = vst [vmem:[#allocation3 + $0x8a8] sm:$0xff] %v10748_v23 }
 0x85a   : > { %11037 = vst [vmem:[#allocation3 + $0x8b0] sm:$0xff] %v10749_v56  ;;  %11038 = vst [vmem:[#allocation3 + $0x8b8] sm:$0xff] %v10750_v27 }
 0x85b   : > { %11039 = vst [vmem:[#allocation3 + $0x8c0] sm:$0xff] %v10751_v14  ;;  %11040 = vst [vmem:[#allocation3 + $0x8c8] sm:$0xff] %v10752_v37 }
 0x85c   : > { %11041 = vst [vmem:[#allocation3 + $0x8d0] sm:$0xff] %v10753_v25  ;;  %11042 = vst [vmem:[#allocation3 + $0x8d8] sm:$0xff] %v10754_v32 }
 0x85d   : > { %11043 = vst [vmem:[#allocation3 + $0x8e0] sm:$0xff] %v10755_v15  ;;  %11044 = vst [vmem:[#allocation3 + $0x8e8] sm:$0xff] %v10756_v44 }
 0x85e   : > { %11045 = vst [vmem:[#allocation3 + $0x8f0] sm:$0xff] %v10757_v28  ;;  %11046 = vst [vmem:[#allocation3 + $0x8f8] sm:$0xff] %v10758_v13 }
 0x85f PF: > { %p19749_p13 = scmp.eq.s32.totalorder %s11152_s23, 5  ;;  %s13997_s13 = smov [#allocation3]  }
 0x860   : > { %s11057_s14 = sshll.u32 %s13997_s13, 4  ;;  %s11058_s14 = int_to_ptr.vmem [resolvable:$true] %s11057_s14 }
 0x861   : > { %s13926_s15 = scalar_lea.vmem %s11058_s14, 36864  ;;  %p13933_p3 = scmp.lt.s32.totalorder %s11058_s14, %s11058_s14 }
 0x862   : > { %p13927_p0 = scmp.ne.s32.totalorder %s11058_s14, %s13926_s15  ;;  %p13934_p4 = scmp.lt.s32.totalorder %s13926_s15, %s13926_s15 }
 0x864   : > { %p13928_p1 = pnand %p13927_p0, %p19749_p13  ;;  %p13935_p5 = por %p13934_p4, %p13933_p3 }
 0x866   : > { %p13929_p2 = pneg %p13928_p1 }
 0x868   : > { %p13936_p6 = pnand %p13935_p5, %p13929_p2 }
 0x86a   : > { %13939 = shalt.err (!%p13936_p6)
}
 0x86b   : > { %s13940_s23 = scalar_lea.hbm %s19795_s5, 36864 }
 0x86c   : > { %p13941_p7 = scmp.ne.s32.totalorder %s19795_s5, %s13940_s23  ;;  %p13946_p10 = scmp.lt.u32.totalorder %s13940_s23, %s19795_s5 }
 0x86e   : > { %p13942_p8 = pnand %p13941_p7, %p19749_p13 }
 0x870   : > { %p13943_p9 = pneg %p13942_p8 }
 0x872   : > { %p13948_p11 = pnand %p13946_p10, %p13943_p9 }
 0x874   : > { %13951 = shalt.err (!%p13948_p11)
}
 0x875   : > { %s13998_s7 = smov 768   ;;  %s13999_s29 = smov 48  }
 0x876   : > { %12565 = dma.vmem_to_hbm [thread:$0]  (%p19749_p13), %s11058_s14, 36864, %s19795_s5, [#allocation4], %s13998_s7, %s13998_s7, %s13999_s29  }
 0x877   : > { %13973 = dma.done.wait (%p19749_p13), [#allocation4], 36864  }
 0x878   : > { %13975 = vsyncadd (%p19749_p13), [#allocation4], 4294930432 }
 0x879 PF: > { %s16_s22 = sadd.s32 1, %s13994_s22   ;;  %s20400_s18 = smov %s13982_s19 }
 0x87a   : > { %p13_p12 = scmp.ge.s32.totalorder %s16_s22, 8   ;;  %s20401_s19 = smov %s14066_s27 }
 0x87b   : > { %s20402_s20 = smov %s13990_s21  ;;  %s20403_s21 = smov %s20405_s24 }
 0x87c   :  { %15 = sbr.rel (!%p13_p12) target bundleno = 3 (0x3), region = 113 }
 0x883   :  { %11073 = vsyncpa [#allocation4], 1 }
 0x884   :  { %11075 = vsyncpa [#allocation4 + $0x1], 1 }

</bundles_post_ra>
